<compile_context>
chip_gen: v7x
topology: tpu7x:2x2x1
jax: 0.10.0
libtpu: 0.0.40
codegen_flags: <defaults>
</compile_context>

<pallas_src>
import functools

import jax
import jax.numpy as jnp
from jax.experimental import pallas as pl
from jax.experimental.pallas import tpu as pltpu

GUARD = 128   # lane-aligned zero guard around each flattened batch block
NB_MAX = 8    # images per grid step (whole step resident in VMEM)


# ----------------------------------------------------------------------------
# In-kernel helpers
# ----------------------------------------------------------------------------
def _conv3x3_taps(src_ref, w_ref, *, wp, core):
    """3x3 'same' conv on a zero-guarded, padded-flat activation.

    src_ref: (Cin, GUARD + core + GUARD) ref; core = nb * Hp * Wp (Hp=H+2, Wp=W+2).
    w_ref:   (9, Cout, Cin) ref, tap t = dy*3 + dx (PyTorch cross-correlation).
    Returns a (Cout, core) f32 accumulator.  Border (padding-ring) lanes hold
    garbage and must be masked by the caller before being reused as conv input.
    """
    cin = src_ref.shape[0]
    cout = w_ref.shape[1]
    acc = jnp.zeros((cout, core), jnp.float32)
    for t in range(9):
        dy, dx = divmod(t, 3)
        off = (dy - 1) * wp + (dx - 1)
        start = GUARD + off                       # static, in-bounds slice start
        xs = src_ref[:, start:start + core]       # (Cin, core) shifted view
        wt = w_ref[t]                             # (Cout, Cin)
        if cin == 1:
            acc = acc + wt * xs                   # tiny-K: VPU outer product (f32)
        else:
            acc = acc + jnp.dot(wt.astype(jnp.bfloat16),
                                xs.astype(jnp.bfloat16),
                                preferred_element_type=jnp.float32)
    return acc


def _fused_conv_pair_kernel(x_ref, mask_ref, w1_ref, b1_ref, w2_ref, b2_ref,
                            o_ref, h_ref, *, wp, core, relu1, relu2):
    # conv #1 (+ optional ReLU), then zero the padding ring so it acts as
    # conv #2's zero padding.
    h = _conv3x3_taps(x_ref, w1_ref, wp=wp, core=core) + b1_ref[...]
    if relu1:
        h = jnp.maximum(h, 0.0)
    h = h * mask_ref[...]
    # Stage the intermediate into a zero-guarded VMEM scratch so conv #2 can
    # take shifted slices (never leaves VMEM).
    h_ref[...] = jnp.zeros_like(h_ref)
    h_ref[:, GUARD:GUARD + core] = h
    # conv #2 (+ optional ReLU).  Border lanes of the output are garbage; the
    # consumer only reads the interior.
    y = _conv3x3_taps(h_ref, w2_ref, wp=wp, core=core) + b2_ref[...]
    if relu2:
        y = jnp.maximum(y, 0.0)
    o_ref[...] = y


# ----------------------------------------------------------------------------
# Pallas wrapper: one fused (conv -> conv) pair per pallas_call
# ----------------------------------------------------------------------------
def fused_conv_pair(x_flat, mask, w1, b1, w2, b2, *, wp, relu1, relu2):
    """x_flat: (nblk, Cin0, GUARD + core + GUARD) -> (nblk, Cout2, core)."""
    nblk, cin0, mtot = x_flat.shape
    core = mtot - 2 * GUARD
    c1 = w1.shape[1]
    c2 = w2.shape[1]
    kernel = functools.partial(_fused_conv_pair_kernel, wp=wp, core=core,
                               relu1=relu1, relu2=relu2)
    return pl.pallas_call(
        kernel,
        out_shape=jax.ShapeDtypeStruct((nblk, c2, core), jnp.float32),
        grid_spec=pltpu.PrefetchScalarGridSpec(
            num_scalar_prefetch=0,
            grid=(nblk,),
            in_specs=[
                pl.BlockSpec((None, cin0, mtot), lambda i: (i, 0, 0)),
                pl.BlockSpec((1, core), lambda i: (0, 0)),
                pl.BlockSpec(w1.shape, lambda i: (0, 0, 0)),
                pl.BlockSpec(b1.shape, lambda i: (0, 0)),
                pl.BlockSpec(w2.shape, lambda i: (0, 0, 0)),
                pl.BlockSpec(b2.shape, lambda i: (0, 0)),
            ],
            out_specs=pl.BlockSpec((None, c2, core), lambda i: (i, 0, 0)),
            scratch_shapes=[pltpu.VMEM((c1, mtot), jnp.float32)],
        ),
        # Working set per step is < ~8 MiB even at NB_MAX, so the default
        # scoped-VMEM limit is ample on v5e/v6e/v7x; no vmem_limit override.
        compiler_params=pltpu.CompilerParams(
            dimension_semantics=("parallel",),
        ),
    )(x_flat, mask, w1, b1, w2, b2)


# ----------------------------------------------------------------------------
# Layout / data-movement glue (pure JAX, small tensors)
# ----------------------------------------------------------------------------
def _to_blocks(x_nchw, nb):
    n, c, h, w = x_nchw.shape
    nblk = -(-n // nb)
    npad = nblk * nb
    if npad != n:
        x_nchw = jnp.pad(x_nchw, ((0, npad - n), (0, 0), (0, 0), (0, 0)))
    return x_nchw.reshape(nblk, nb, c, h, w).transpose(0, 2, 1, 3, 4)


def _blocks_to_flat(xb):
    # (nblk, C, nb, H, W) -> (nblk, C, GUARD + nb*(H+2)*(W+2) + GUARD), zero-padded
    nblk, c, nb, h, w = xb.shape
    xp = jnp.pad(xb, ((0, 0), (0, 0), (0, 0), (1, 1), (1, 1)))
    flat = xp.reshape(nblk, c, nb * (h + 2) * (w + 2))
    return jnp.pad(flat, ((0, 0), (0, 0), (GUARD, GUARD)))


def _flat_core_to_blocks(y_flat, nb, h, w):
    nblk, c, _ = y_flat.shape
    y = y_flat.reshape(nblk, c, nb, h + 2, w + 2)
    return y[:, :, :, 1:h + 1, 1:w + 1]


def _interior_mask(nb, h, w):
    # 1.0 on interior pixels of the padded (H+2, W+2) grid, 0.0 on the ring.
    hp, wp = h + 2, w + 2
    r = jnp.arange(hp)
    cix = jnp.arange(wp)
    m = ((r[:, None] >= 1) & (r[:, None] <= h)
         & (cix[None, :] >= 1) & (cix[None, :] <= w)).astype(jnp.float32)
    return jnp.tile(m.reshape(1, hp * wp), (1, nb))   # (1, nb*hp*wp)


def _maxpool2x2(xb):
    nblk, c, nb, h, w = xb.shape
    return jnp.max(xb.reshape(nblk, c, nb, h // 2, 2, w // 2, 2), axis=(4, 6))


def _upsample2(xb):
    nblk, c, nb, h, w = xb.shape
    y = jnp.broadcast_to(xb[:, :, :, :, None, :, None], (nblk, c, nb, h, 2, w, 2))
    return y.reshape(nblk, c, nb, 2 * h, 2 * w)


# ----------------------------------------------------------------------------
# Parameters (deterministic, PyTorch-default-style uniform init)
# ----------------------------------------------------------------------------
def _init_conv(key, cin, cout):
    kw, kb = jax.random.split(key)
    fan_in = cin * 9
    bound = 1.0 / float(fan_in) ** 0.5
    w = jax.random.uniform(kw, (cout, cin, 3, 3), jnp.float32, -bound, bound)
    b = jax.random.uniform(kb, (cout,), jnp.float32, -bound, bound)
    # kernel layout: tap-major (9 = dy*3+dx, cout, cin) and (cout, 1)
    wk = jnp.transpose(w, (2, 3, 0, 1)).reshape(9, cout, cin)
    return wk, b.reshape(cout, 1)


def init_params(seed: int = 0):
    keys = jax.random.split(jax.random.PRNGKey(seed), 6)
    return {
        "enc1": _init_conv(keys[0], 1, 16),
        "enc2": _init_conv(keys[1], 16, 16),
        "enc3": _init_conv(keys[2], 16, 1),
        "dec1": _init_conv(keys[3], 1, 16),
        "dec2": _init_conv(keys[4], 16, 16),
        "dec3": _init_conv(keys[5], 16, 1),
    }


# ----------------------------------------------------------------------------
# Forward pass (matches _MnistAllClassesAE.forward)
# ----------------------------------------------------------------------------
def mnist_ae_forward(params, x):
    x = x.reshape(-1, 1, 28, 28).astype(jnp.float32)   # x.view(-1, 1, 28, 28)
    n = x.shape[0]
    nb = min(n, NB_MAX)
    xb = _to_blocks(x, nb)                              # (nblk, 1, nb, 28, 28)
    mask28 = _interior_mask(nb, 28, 28)                 # constant-folded under jit
    mask14 = _interior_mask(nb, 14, 14)

    # Encoder: conv1+ReLU, conv2+ReLU fused; then 2x2 maxpool (glue).
    h = fused_conv_pair(_blocks_to_flat(xb), mask28,
                        *params["enc1"], *params["enc2"],
                        wp=30, relu1=True, relu2=True)
    hb = _maxpool2x2(_flat_core_to_blocks(h, nb, 28, 28))     # (nblk,16,nb,14,14)

    # Bottleneck: enc conv3 (no ReLU) + dec conv1 + ReLU fused.
    h = fused_conv_pair(_blocks_to_flat(hb), mask14,
                        *params["enc3"], *params["dec1"],
                        wp=16, relu1=False, relu2=True)
    hb = _upsample2(_flat_core_to_blocks(h, nb, 14, 14))      # (nblk,16,nb,28,28)

    # Decoder tail: conv2+ReLU, conv3 (no ReLU) fused.
    h = fused_conv_pair(_blocks_to_flat(hb), mask28,
                        *params["dec2"], *params["dec3"],
                        wp=30, relu1=True, relu2=False)
    yb = _flat_core_to_blocks(h, nb, 28, 28)                  # (nblk, 1, nb, 28, 28)
    y = yb.transpose(0, 2, 1, 3, 4).reshape(-1, 1, 28, 28)
    return y[:n]


# ----------------------------------------------------------------------------
# Pure-XLA reference (f32) for numerical validation
# ----------------------------------------------------------------------------
def _reference_forward(params, x):
    def conv(h, wk, b, relu):
        cout, cin = wk.shape[1], wk.shape[2]
        w = wk.reshape(3, 3, cout, cin).transpose(2, 3, 0, 1)   # OIHW
        y = jax.lax.conv_general_dilated(
            h, w, window_strides=(1, 1), padding="SAME",
            dimension_numbers=("NCHW", "OIHW", "NCHW"))
        y = y + b.reshape(1, cout, 1, 1)
        return jnp.maximum(y, 0.0) if relu else y

    h = x.reshape(-1, 1, 28, 28).astype(jnp.float32)
    h = conv(h, *params["enc1"], True)
    h = conv(h, *params["enc2"], True)
    h = jax.lax.reduce_window(h, -jnp.inf, jax.lax.max,
                              (1, 1, 2, 2), (1, 1, 2, 2), "VALID")
    h = conv(h, *params["enc3"], False)
    h = conv(h, *params["dec1"], True)
    h = jnp.repeat(jnp.repeat(h, 2, axis=2), 2, axis=3)
    h = conv(h, *params["dec2"], True)
    h = conv(h, *params["dec3"], False)
    return h


# ----------------------------------------------------------------------------
if __name__ == "__main__":
    params = init_params(0)
    x = jax.random.normal(jax.random.PRNGKey(0), (2, 1, 28, 28), jnp.float32)

    fwd = jax.jit(mnist_ae_forward)
    y = fwd(params, x)
    jax.block_until_ready(y)

    assert y.shape == (2, 1, 28, 28), y.shape
    assert y.dtype == jnp.float32

    # Correctness check vs pure-XLA reference (bf16 MXU operands -> loose tol).
    y_ref = _reference_forward(params, x)
    err = float(jnp.max(jnp.abs(y - y_ref)))
    assert err < 5e-2, f"max abs error vs reference: {err}"

    print("KERNEL_OK")
</pallas_src>

<mosaic_0001>
module attributes {stable_mosaic.version = 11 : i64} {
  func.func @_fused_conv_pair_kernel(%arg0: i32, %arg1: memref<1x1x2056xf32, #tpu.memory_space<vmem>>, %arg2: memref<1x1800xf32, #tpu.memory_space<vmem>>, %arg3: memref<9x16x1xf32, #tpu.memory_space<vmem>>, %arg4: memref<16x1xf32, #tpu.memory_space<vmem>>, %arg5: memref<9x16x16xf32, #tpu.memory_space<vmem>>, %arg6: memref<16x1xf32, #tpu.memory_space<vmem>>, %arg7: memref<1x16x1800xf32, #tpu.memory_space<vmem>>, %arg8: memref<16x2056xf32, #tpu.memory_space<vmem>>) attributes {dimension_semantics = [#tpu.dimension_semantics<parallel>], iteration_bounds = array<i64: 1>, scalar_prefetch = 0 : i64, scratch_operands = 1 : i64, tpu.core_type = #tpu.core_type<tc>, window_params = [{transform_indices = @transform_0, window_bounds = array<i64: 1, 1, 2056>}, {pipeline_mode = #tpu.pipeline_mode<synchronous>, transform_indices = @transform_1, window_bounds = array<i64: 1, 1800>}, {pipeline_mode = #tpu.pipeline_mode<synchronous>, transform_indices = @transform_2, window_bounds = array<i64: 9, 16, 1>}, {pipeline_mode = #tpu.pipeline_mode<synchronous>, transform_indices = @transform_3, window_bounds = array<i64: 16, 1>}, {pipeline_mode = #tpu.pipeline_mode<synchronous>, transform_indices = @transform_4, window_bounds = array<i64: 9, 16, 16>}, {pipeline_mode = #tpu.pipeline_mode<synchronous>, transform_indices = @transform_5, window_bounds = array<i64: 16, 1>}, {transform_indices = @transform_6, window_bounds = array<i64: 1, 16, 1800>}]} {
    %cst = arith.constant 0.000000e+00 : f32
    %0 = vector.broadcast %cst : f32 to vector<16x1800xf32>
    %c0 = arith.constant 0 : index
    %c0_0 = arith.constant 0 : index
    %c97 = arith.constant 97 : index
    %1 = vector.load %arg1[%c0, %c0_0, %c97] : memref<1x1x2056xf32, #tpu.memory_space<vmem>>, vector<1x1x1800xf32>
    %2 = vector.shape_cast %1 : vector<1x1x1800xf32> to vector<1x1800xf32>
    %c0_1 = arith.constant 0 : index
    %c0_2 = arith.constant 0 : index
    %c0_3 = arith.constant 0 : index
    %3 = vector.load %arg3[%c0_1, %c0_2, %c0_3] : memref<9x16x1xf32, #tpu.memory_space<vmem>>, vector<1x16x1xf32>
    %4 = vector.shape_cast %3 : vector<1x16x1xf32> to vector<16x1xf32>
    %5 = vector.broadcast %4 : vector<16x1xf32> to vector<16x1800xf32>
    %6 = vector.broadcast %2 : vector<1x1800xf32> to vector<16x1800xf32>
    %7 = arith.mulf %5, %6 : vector<16x1800xf32>
    %8 = arith.addf %0, %7 : vector<16x1800xf32>
    %c0_4 = arith.constant 0 : index
    %c0_5 = arith.constant 0 : index
    %c98 = arith.constant 98 : index
    %9 = vector.load %arg1[%c0_4, %c0_5, %c98] : memref<1x1x2056xf32, #tpu.memory_space<vmem>>, vector<1x1x1800xf32>
    %10 = vector.shape_cast %9 : vector<1x1x1800xf32> to vector<1x1800xf32>
    %c1 = arith.constant 1 : index
    %c0_6 = arith.constant 0 : index
    %c0_7 = arith.constant 0 : index
    %11 = vector.load %arg3[%c1, %c0_6, %c0_7] : memref<9x16x1xf32, #tpu.memory_space<vmem>>, vector<1x16x1xf32>
    %12 = vector.shape_cast %11 : vector<1x16x1xf32> to vector<16x1xf32>
    %13 = vector.broadcast %12 : vector<16x1xf32> to vector<16x1800xf32>
    %14 = vector.broadcast %10 : vector<1x1800xf32> to vector<16x1800xf32>
    %15 = arith.mulf %13, %14 : vector<16x1800xf32>
    %16 = arith.addf %8, %15 : vector<16x1800xf32>
    %c0_8 = arith.constant 0 : index
    %c0_9 = arith.constant 0 : index
    %c99 = arith.constant 99 : index
    %17 = vector.load %arg1[%c0_8, %c0_9, %c99] : memref<1x1x2056xf32, #tpu.memory_space<vmem>>, vector<1x1x1800xf32>
    %18 = vector.shape_cast %17 : vector<1x1x1800xf32> to vector<1x1800xf32>
    %c2 = arith.constant 2 : index
    %c0_10 = arith.constant 0 : index
    %c0_11 = arith.constant 0 : index
    %19 = vector.load %arg3[%c2, %c0_10, %c0_11] : memref<9x16x1xf32, #tpu.memory_space<vmem>>, vector<1x16x1xf32>
    %20 = vector.shape_cast %19 : vector<1x16x1xf32> to vector<16x1xf32>
    %21 = vector.broadcast %20 : vector<16x1xf32> to vector<16x1800xf32>
    %22 = vector.broadcast %18 : vector<1x1800xf32> to vector<16x1800xf32>
    %23 = arith.mulf %21, %22 : vector<16x1800xf32>
    %24 = arith.addf %16, %23 : vector<16x1800xf32>
    %c0_12 = arith.constant 0 : index
    %c0_13 = arith.constant 0 : index
    %c127 = arith.constant 127 : index
    %25 = vector.load %arg1[%c0_12, %c0_13, %c127] : memref<1x1x2056xf32, #tpu.memory_space<vmem>>, vector<1x1x1800xf32>
    %26 = vector.shape_cast %25 : vector<1x1x1800xf32> to vector<1x1800xf32>
    %c3 = arith.constant 3 : index
    %c0_14 = arith.constant 0 : index
    %c0_15 = arith.constant 0 : index
    %27 = vector.load %arg3[%c3, %c0_14, %c0_15] : memref<9x16x1xf32, #tpu.memory_space<vmem>>, vector<1x16x1xf32>
    %28 = vector.shape_cast %27 : vector<1x16x1xf32> to vector<16x1xf32>
    %29 = vector.broadcast %28 : vector<16x1xf32> to vector<16x1800xf32>
    %30 = vector.broadcast %26 : vector<1x1800xf32> to vector<16x1800xf32>
    %31 = arith.mulf %29, %30 : vector<16x1800xf32>
    %32 = arith.addf %24, %31 : vector<16x1800xf32>
    %c0_16 = arith.constant 0 : index
    %c0_17 = arith.constant 0 : index
    %c128 = arith.constant 128 : index
    %33 = vector.load %arg1[%c0_16, %c0_17, %c128] : memref<1x1x2056xf32, #tpu.memory_space<vmem>>, vector<1x1x1800xf32>
    %34 = vector.shape_cast %33 : vector<1x1x1800xf32> to vector<1x1800xf32>
    %c4 = arith.constant 4 : index
    %c0_18 = arith.constant 0 : index
    %c0_19 = arith.constant 0 : index
    %35 = vector.load %arg3[%c4, %c0_18, %c0_19] : memref<9x16x1xf32, #tpu.memory_space<vmem>>, vector<1x16x1xf32>
    %36 = vector.shape_cast %35 : vector<1x16x1xf32> to vector<16x1xf32>
    %37 = vector.broadcast %36 : vector<16x1xf32> to vector<16x1800xf32>
    %38 = vector.broadcast %34 : vector<1x1800xf32> to vector<16x1800xf32>
    %39 = arith.mulf %37, %38 : vector<16x1800xf32>
    %40 = arith.addf %32, %39 : vector<16x1800xf32>
    %c0_20 = arith.constant 0 : index
    %c0_21 = arith.constant 0 : index
    %c129 = arith.constant 129 : index
    %41 = vector.load %arg1[%c0_20, %c0_21, %c129] : memref<1x1x2056xf32, #tpu.memory_space<vmem>>, vector<1x1x1800xf32>
    %42 = vector.shape_cast %41 : vector<1x1x1800xf32> to vector<1x1800xf32>
    %c5 = arith.constant 5 : index
    %c0_22 = arith.constant 0 : index
    %c0_23 = arith.constant 0 : index
    %43 = vector.load %arg3[%c5, %c0_22, %c0_23] : memref<9x16x1xf32, #tpu.memory_space<vmem>>, vector<1x16x1xf32>
    %44 = vector.shape_cast %43 : vector<1x16x1xf32> to vector<16x1xf32>
    %45 = vector.broadcast %44 : vector<16x1xf32> to vector<16x1800xf32>
    %46 = vector.broadcast %42 : vector<1x1800xf32> to vector<16x1800xf32>
    %47 = arith.mulf %45, %46 : vector<16x1800xf32>
    %48 = arith.addf %40, %47 : vector<16x1800xf32>
    %c0_24 = arith.constant 0 : index
    %c0_25 = arith.constant 0 : index
    %c157 = arith.constant 157 : index
    %49 = vector.load %arg1[%c0_24, %c0_25, %c157] : memref<1x1x2056xf32, #tpu.memory_space<vmem>>, vector<1x1x1800xf32>
    %50 = vector.shape_cast %49 : vector<1x1x1800xf32> to vector<1x1800xf32>
    %c6 = arith.constant 6 : index
    %c0_26 = arith.constant 0 : index
    %c0_27 = arith.constant 0 : index
    %51 = vector.load %arg3[%c6, %c0_26, %c0_27] : memref<9x16x1xf32, #tpu.memory_space<vmem>>, vector<1x16x1xf32>
    %52 = vector.shape_cast %51 : vector<1x16x1xf32> to vector<16x1xf32>
    %53 = vector.broadcast %52 : vector<16x1xf32> to vector<16x1800xf32>
    %54 = vector.broadcast %50 : vector<1x1800xf32> to vector<16x1800xf32>
    %55 = arith.mulf %53, %54 : vector<16x1800xf32>
    %56 = arith.addf %48, %55 : vector<16x1800xf32>
    %c0_28 = arith.constant 0 : index
    %c0_29 = arith.constant 0 : index
    %c158 = arith.constant 158 : index
    %57 = vector.load %arg1[%c0_28, %c0_29, %c158] : memref<1x1x2056xf32, #tpu.memory_space<vmem>>, vector<1x1x1800xf32>
    %58 = vector.shape_cast %57 : vector<1x1x1800xf32> to vector<1x1800xf32>
    %c7 = arith.constant 7 : index
    %c0_30 = arith.constant 0 : index
    %c0_31 = arith.constant 0 : index
    %59 = vector.load %arg3[%c7, %c0_30, %c0_31] : memref<9x16x1xf32, #tpu.memory_space<vmem>>, vector<1x16x1xf32>
    %60 = vector.shape_cast %59 : vector<1x16x1xf32> to vector<16x1xf32>
    %61 = vector.broadcast %60 : vector<16x1xf32> to vector<16x1800xf32>
    %62 = vector.broadcast %58 : vector<1x1800xf32> to vector<16x1800xf32>
    %63 = arith.mulf %61, %62 : vector<16x1800xf32>
    %64 = arith.addf %56, %63 : vector<16x1800xf32>
    %c0_32 = arith.constant 0 : index
    %c0_33 = arith.constant 0 : index
    %c159 = arith.constant 159 : index
    %65 = vector.load %arg1[%c0_32, %c0_33, %c159] : memref<1x1x2056xf32, #tpu.memory_space<vmem>>, vector<1x1x1800xf32>
    %66 = vector.shape_cast %65 : vector<1x1x1800xf32> to vector<1x1800xf32>
    %c8 = arith.constant 8 : index
    %c0_34 = arith.constant 0 : index
    %c0_35 = arith.constant 0 : index
    %67 = vector.load %arg3[%c8, %c0_34, %c0_35] : memref<9x16x1xf32, #tpu.memory_space<vmem>>, vector<1x16x1xf32>
    %68 = vector.shape_cast %67 : vector<1x16x1xf32> to vector<16x1xf32>
    %69 = vector.broadcast %68 : vector<16x1xf32> to vector<16x1800xf32>
    %70 = vector.broadcast %66 : vector<1x1800xf32> to vector<16x1800xf32>
    %71 = arith.mulf %69, %70 : vector<16x1800xf32>
    %72 = arith.addf %64, %71 : vector<16x1800xf32>
    %c0_36 = arith.constant 0 : index
    %c0_37 = arith.constant 0 : index
    %73 = vector.load %arg4[%c0_36, %c0_37] : memref<16x1xf32, #tpu.memory_space<vmem>>, vector<16x1xf32>
    %74 = vector.broadcast %73 : vector<16x1xf32> to vector<16x1800xf32>
    %75 = arith.addf %72, %74 : vector<16x1800xf32>
    %cst_38 = arith.constant 0.000000e+00 : f32
    %76 = vector.broadcast %cst_38 : f32 to vector<16x1800xf32>
    %77 = arith.maximumf %75, %76 : vector<16x1800xf32>
    %c0_39 = arith.constant 0 : index
    %c0_40 = arith.constant 0 : index
    %78 = vector.load %arg2[%c0_39, %c0_40] : memref<1x1800xf32, #tpu.memory_space<vmem>>, vector<1x1800xf32>
    %79 = vector.broadcast %78 : vector<1x1800xf32> to vector<16x1800xf32>
    %80 = arith.mulf %77, %79 : vector<16x1800xf32>
    %cst_41 = arith.constant 0.000000e+00 : f32
    %81 = vector.broadcast %cst_41 : f32 to vector<16x2056xf32>
    %c0_42 = arith.constant 0 : index
    %c0_43 = arith.constant 0 : index
    %82 = vector.load %arg8[%c0_42, %c0_43] : memref<16x2056xf32, #tpu.memory_space<vmem>>, vector<16x2056xf32>
    tpu.vector_store %arg8[%c0_42, %c0_43], %81 {strides = array<i32>} : memref<16x2056xf32, #tpu.memory_space<vmem>>, vector<16x2056xf32>,
    %c0_44 = arith.constant 0 : index
    %c128_45 = arith.constant 128 : index
    %83 = vector.load %arg8[%c0_44, %c128_45] : memref<16x2056xf32, #tpu.memory_space<vmem>>, vector<16x1800xf32>
    tpu.vector_store %arg8[%c0_44, %c128_45], %80 {strides = array<i32>} : memref<16x2056xf32, #tpu.memory_space<vmem>>, vector<16x1800xf32>,
    %cst_46 = arith.constant 0.000000e+00 : f32
    %84 = vector.broadcast %cst_46 : f32 to vector<16x1800xf32>
    %c0_47 = arith.constant 0 : index
    %c97_48 = arith.constant 97 : index
    %85 = vector.load %arg8[%c0_47, %c97_48] : memref<16x2056xf32, #tpu.memory_space<vmem>>, vector<16x1800xf32>
    %c0_49 = arith.constant 0 : index
    %c0_50 = arith.constant 0 : index
    %c0_51 = arith.constant 0 : index
    %86 = vector.load %arg5[%c0_49, %c0_50, %c0_51] : memref<9x16x16xf32, #tpu.memory_space<vmem>>, vector<1x16x16xf32>
    %87 = vector.shape_cast %86 : vector<1x16x16xf32> to vector<16x16xf32>
    %88 = arith.truncf %87 : vector<16x16xf32> to vector<16x16xbf16>
    %89 = arith.truncf %85 : vector<16x1800xf32> to vector<16x1800xbf16>
    %cst_52 = arith.constant dense<0.000000e+00> : vector<16x1800xf32>
    %90 = tpu.matmul %88, %89, %cst_52 {dimension_numbers = #tpu.dot_dimension_numbers<[1], [0], [0], [1], [0, 0, 1, 1], [], []>} : vector<16x16xbf16>, vector<16x1800xbf16>, vector<16x1800xf32> -> vector<16x1800xf32>
    %91 = arith.addf %84, %90 : vector<16x1800xf32>
    %c0_53 = arith.constant 0 : index
    %c98_54 = arith.constant 98 : index
    %92 = vector.load %arg8[%c0_53, %c98_54] : memref<16x2056xf32, #tpu.memory_space<vmem>>, vector<16x1800xf32>
    %c1_55 = arith.constant 1 : index
    %c0_56 = arith.constant 0 : index
    %c0_57 = arith.constant 0 : index
    %93 = vector.load %arg5[%c1_55, %c0_56, %c0_57] : memref<9x16x16xf32, #tpu.memory_space<vmem>>, vector<1x16x16xf32>
    %94 = vector.shape_cast %93 : vector<1x16x16xf32> to vector<16x16xf32>
    %95 = arith.truncf %94 : vector<16x16xf32> to vector<16x16xbf16>
    %96 = arith.truncf %92 : vector<16x1800xf32> to vector<16x1800xbf16>
    %cst_58 = arith.constant dense<0.000000e+00> : vector<16x1800xf32>
    %97 = tpu.matmul %95, %96, %cst_58 {dimension_numbers = #tpu.dot_dimension_numbers<[1], [0], [0], [1], [0, 0, 1, 1], [], []>} : vector<16x16xbf16>, vector<16x1800xbf16>, vector<16x1800xf32> -> vector<16x1800xf32>
    %98 = arith.addf %91, %97 : vector<16x1800xf32>
    %c0_59 = arith.constant 0 : index
    %c99_60 = arith.constant 99 : index
    %99 = vector.load %arg8[%c0_59, %c99_60] : memref<16x2056xf32, #tpu.memory_space<vmem>>, vector<16x1800xf32>
    %c2_61 = arith.constant 2 : index
    %c0_62 = arith.constant 0 : index
    %c0_63 = arith.constant 0 : index
    %100 = vector.load %arg5[%c2_61, %c0_62, %c0_63] : memref<9x16x16xf32, #tpu.memory_space<vmem>>, vector<1x16x16xf32>
    %101 = vector.shape_cast %100 : vector<1x16x16xf32> to vector<16x16xf32>
    %102 = arith.truncf %101 : vector<16x16xf32> to vector<16x16xbf16>
    %103 = arith.truncf %99 : vector<16x1800xf32> to vector<16x1800xbf16>
    %cst_64 = arith.constant dense<0.000000e+00> : vector<16x1800xf32>
    %104 = tpu.matmul %102, %103, %cst_64 {dimension_numbers = #tpu.dot_dimension_numbers<[1], [0], [0], [1], [0, 0, 1, 1], [], []>} : vector<16x16xbf16>, vector<16x1800xbf16>, vector<16x1800xf32> -> vector<16x1800xf32>
    %105 = arith.addf %98, %104 : vector<16x1800xf32>
    %c0_65 = arith.constant 0 : index
    %c127_66 = arith.constant 127 : index
    %106 = vector.load %arg8[%c0_65, %c127_66] : memref<16x2056xf32, #tpu.memory_space<vmem>>, vector<16x1800xf32>
    %c3_67 = arith.constant 3 : index
    %c0_68 = arith.constant 0 : index
    %c0_69 = arith.constant 0 : index
    %107 = vector.load %arg5[%c3_67, %c0_68, %c0_69] : memref<9x16x16xf32, #tpu.memory_space<vmem>>, vector<1x16x16xf32>
    %108 = vector.shape_cast %107 : vector<1x16x16xf32> to vector<16x16xf32>
    %109 = arith.truncf %108 : vector<16x16xf32> to vector<16x16xbf16>
    %110 = arith.truncf %106 : vector<16x1800xf32> to vector<16x1800xbf16>
    %cst_70 = arith.constant dense<0.000000e+00> : vector<16x1800xf32>
    %111 = tpu.matmul %109, %110, %cst_70 {dimension_numbers = #tpu.dot_dimension_numbers<[1], [0], [0], [1], [0, 0, 1, 1], [], []>} : vector<16x16xbf16>, vector<16x1800xbf16>, vector<16x1800xf32> -> vector<16x1800xf32>
    %112 = arith.addf %105, %111 : vector<16x1800xf32>
    %c0_71 = arith.constant 0 : index
    %c128_72 = arith.constant 128 : index
    %113 = vector.load %arg8[%c0_71, %c128_72] : memref<16x2056xf32, #tpu.memory_space<vmem>>, vector<16x1800xf32>
    %c4_73 = arith.constant 4 : index
    %c0_74 = arith.constant 0 : index
    %c0_75 = arith.constant 0 : index
    %114 = vector.load %arg5[%c4_73, %c0_74, %c0_75] : memref<9x16x16xf32, #tpu.memory_space<vmem>>, vector<1x16x16xf32>
    %115 = vector.shape_cast %114 : vector<1x16x16xf32> to vector<16x16xf32>
    %116 = arith.truncf %115 : vector<16x16xf32> to vector<16x16xbf16>
    %117 = arith.truncf %113 : vector<16x1800xf32> to vector<16x1800xbf16>
    %cst_76 = arith.constant dense<0.000000e+00> : vector<16x1800xf32>
    %118 = tpu.matmul %116, %117, %cst_76 {dimension_numbers = #tpu.dot_dimension_numbers<[1], [0], [0], [1], [0, 0, 1, 1], [], []>} : vector<16x16xbf16>, vector<16x1800xbf16>, vector<16x1800xf32> -> vector<16x1800xf32>
    %119 = arith.addf %112, %118 : vector<16x1800xf32>
    %c0_77 = arith.constant 0 : index
    %c129_78 = arith.constant 129 : index
    %120 = vector.load %arg8[%c0_77, %c129_78] : memref<16x2056xf32, #tpu.memory_space<vmem>>, vector<16x1800xf32>
    %c5_79 = arith.constant 5 : index
    %c0_80 = arith.constant 0 : index
    %c0_81 = arith.constant 0 : index
    %121 = vector.load %arg5[%c5_79, %c0_80, %c0_81] : memref<9x16x16xf32, #tpu.memory_space<vmem>>, vector<1x16x16xf32>
    %122 = vector.shape_cast %121 : vector<1x16x16xf32> to vector<16x16xf32>
    %123 = arith.truncf %122 : vector<16x16xf32> to vector<16x16xbf16>
    %124 = arith.truncf %120 : vector<16x1800xf32> to vector<16x1800xbf16>
    %cst_82 = arith.constant dense<0.000000e+00> : vector<16x1800xf32>
    %125 = tpu.matmul %123, %124, %cst_82 {dimension_numbers = #tpu.dot_dimension_numbers<[1], [0], [0], [1], [0, 0, 1, 1], [], []>} : vector<16x16xbf16>, vector<16x1800xbf16>, vector<16x1800xf32> -> vector<16x1800xf32>
    %126 = arith.addf %119, %125 : vector<16x1800xf32>
    %c0_83 = arith.constant 0 : index
    %c157_84 = arith.constant 157 : index
    %127 = vector.load %arg8[%c0_83, %c157_84] : memref<16x2056xf32, #tpu.memory_space<vmem>>, vector<16x1800xf32>
    %c6_85 = arith.constant 6 : index
    %c0_86 = arith.constant 0 : index
    %c0_87 = arith.constant 0 : index
    %128 = vector.load %arg5[%c6_85, %c0_86, %c0_87] : memref<9x16x16xf32, #tpu.memory_space<vmem>>, vector<1x16x16xf32>
    %129 = vector.shape_cast %128 : vector<1x16x16xf32> to vector<16x16xf32>
    %130 = arith.truncf %129 : vector<16x16xf32> to vector<16x16xbf16>
    %131 = arith.truncf %127 : vector<16x1800xf32> to vector<16x1800xbf16>
    %cst_88 = arith.constant dense<0.000000e+00> : vector<16x1800xf32>
    %132 = tpu.matmul %130, %131, %cst_88 {dimension_numbers = #tpu.dot_dimension_numbers<[1], [0], [0], [1], [0, 0, 1, 1], [], []>} : vector<16x16xbf16>, vector<16x1800xbf16>, vector<16x1800xf32> -> vector<16x1800xf32>
    %133 = arith.addf %126, %132 : vector<16x1800xf32>
    %c0_89 = arith.constant 0 : index
    %c158_90 = arith.constant 158 : index
    %134 = vector.load %arg8[%c0_89, %c158_90] : memref<16x2056xf32, #tpu.memory_space<vmem>>, vector<16x1800xf32>
    %c7_91 = arith.constant 7 : index
    %c0_92 = arith.constant 0 : index
    %c0_93 = arith.constant 0 : index
    %135 = vector.load %arg5[%c7_91, %c0_92, %c0_93] : memref<9x16x16xf32, #tpu.memory_space<vmem>>, vector<1x16x16xf32>
    %136 = vector.shape_cast %135 : vector<1x16x16xf32> to vector<16x16xf32>
    %137 = arith.truncf %136 : vector<16x16xf32> to vector<16x16xbf16>
    %138 = arith.truncf %134 : vector<16x1800xf32> to vector<16x1800xbf16>
    %cst_94 = arith.constant dense<0.000000e+00> : vector<16x1800xf32>
    %139 = tpu.matmul %137, %138, %cst_94 {dimension_numbers = #tpu.dot_dimension_numbers<[1], [0], [0], [1], [0, 0, 1, 1], [], []>} : vector<16x16xbf16>, vector<16x1800xbf16>, vector<16x1800xf32> -> vector<16x1800xf32>
    %140 = arith.addf %133, %139 : vector<16x1800xf32>
    %c0_95 = arith.constant 0 : index
    %c159_96 = arith.constant 159 : index
    %141 = vector.load %arg8[%c0_95, %c159_96] : memref<16x2056xf32, #tpu.memory_space<vmem>>, vector<16x1800xf32>
    %c8_97 = arith.constant 8 : index
    %c0_98 = arith.constant 0 : index
    %c0_99 = arith.constant 0 : index
    %142 = vector.load %arg5[%c8_97, %c0_98, %c0_99] : memref<9x16x16xf32, #tpu.memory_space<vmem>>, vector<1x16x16xf32>
    %143 = vector.shape_cast %142 : vector<1x16x16xf32> to vector<16x16xf32>
    %144 = arith.truncf %143 : vector<16x16xf32> to vector<16x16xbf16>
    %145 = arith.truncf %141 : vector<16x1800xf32> to vector<16x1800xbf16>
    %cst_100 = arith.constant dense<0.000000e+00> : vector<16x1800xf32>
    %146 = tpu.matmul %144, %145, %cst_100 {dimension_numbers = #tpu.dot_dimension_numbers<[1], [0], [0], [1], [0, 0, 1, 1], [], []>} : vector<16x16xbf16>, vector<16x1800xbf16>, vector<16x1800xf32> -> vector<16x1800xf32>
    %147 = arith.addf %140, %146 : vector<16x1800xf32>
    %c0_101 = arith.constant 0 : index
    %c0_102 = arith.constant 0 : index
    %148 = vector.load %arg6[%c0_101, %c0_102] : memref<16x1xf32, #tpu.memory_space<vmem>>, vector<16x1xf32>
    %149 = vector.broadcast %148 : vector<16x1xf32> to vector<16x1800xf32>
    %150 = arith.addf %147, %149 : vector<16x1800xf32>
    %cst_103 = arith.constant 0.000000e+00 : f32
    %151 = vector.broadcast %cst_103 : f32 to vector<16x1800xf32>
    %152 = arith.maximumf %150, %151 : vector<16x1800xf32>
    %c0_104 = arith.constant 0 : index
    %c0_105 = arith.constant 0 : index
    %c0_106 = arith.constant 0 : index
    %153 = vector.load %arg7[%c0_104, %c0_105, %c0_106] : memref<1x16x1800xf32, #tpu.memory_space<vmem>>, vector<1x16x1800xf32>
    %154 = vector.shape_cast %153 : vector<1x16x1800xf32> to vector<16x1800xf32>
    %155 = vector.shape_cast %152 : vector<16x1800xf32> to vector<1x16x1800xf32>
    tpu.vector_store %arg7[%c0_104, %c0_105, %c0_106], %155 {strides = array<i32>} : memref<1x16x1800xf32, #tpu.memory_space<vmem>>, vector<1x16x1800xf32>,
    return
  }
  func.func @transform_0(%arg0: i32) -> (i32, i32, i32) {
    %c0_i32 = arith.constant 0 : i32
    %c0_i32_0 = arith.constant 0 : i32
    %c0_i32_1 = arith.constant 0 : i32
    return %arg0, %c0_i32, %c0_i32_0 : i32, i32, i32
  }
  func.func @transform_1(%arg0: i32) -> (i32, i32) {
    %c0_i32 = arith.constant 0 : i32
    %c0_i32_0 = arith.constant 0 : i32
    %c0_i32_1 = arith.constant 0 : i32
    return %c0_i32, %c0_i32_0 : i32, i32
  }
  func.func @transform_2(%arg0: i32) -> (i32, i32, i32) {
    %c0_i32 = arith.constant 0 : i32
    %c0_i32_0 = arith.constant 0 : i32
    %c0_i32_1 = arith.constant 0 : i32
    %c0_i32_2 = arith.constant 0 : i32
    return %c0_i32, %c0_i32_0, %c0_i32_1 : i32, i32, i32
  }
  func.func @transform_3(%arg0: i32) -> (i32, i32) {
    %c0_i32 = arith.constant 0 : i32
    %c0_i32_0 = arith.constant 0 : i32
    %c0_i32_1 = arith.constant 0 : i32
    return %c0_i32, %c0_i32_0 : i32, i32
  }
  func.func @transform_4(%arg0: i32) -> (i32, i32, i32) {
    %c0_i32 = arith.constant 0 : i32
    %c0_i32_0 = arith.constant 0 : i32
    %c0_i32_1 = arith.constant 0 : i32
    %c0_i32_2 = arith.constant 0 : i32
    return %c0_i32, %c0_i32_0, %c0_i32_1 : i32, i32, i32
  }
  func.func @transform_5(%arg0: i32) -> (i32, i32) {
    %c0_i32 = arith.constant 0 : i32
    %c0_i32_0 = arith.constant 0 : i32
    %c0_i32_1 = arith.constant 0 : i32
    return %c0_i32, %c0_i32_0 : i32, i32
  }
  func.func @transform_6(%arg0: i32) -> (i32, i32, i32) {
    %c0_i32 = arith.constant 0 : i32
    %c0_i32_0 = arith.constant 0 : i32
    %c0_i32_1 = arith.constant 0 : i32
    return %arg0, %c0_i32, %c0_i32_0 : i32, i32, i32
  }
}

module attributes {stable_mosaic.version = 11 : i64} {
  func.func @_fused_conv_pair_kernel(%arg0: i32, %arg1: memref<1x16x768xf32, #tpu.memory_space<vmem>>, %arg2: memref<1x512xf32, #tpu.memory_space<vmem>>, %arg3: memref<9x1x16xf32, #tpu.memory_space<vmem>>, %arg4: memref<1x1xf32, #tpu.memory_space<vmem>>, %arg5: memref<9x16x1xf32, #tpu.memory_space<vmem>>, %arg6: memref<16x1xf32, #tpu.memory_space<vmem>>, %arg7: memref<1x16x512xf32, #tpu.memory_space<vmem>>, %arg8: memref<1x768xf32, #tpu.memory_space<vmem>>) attributes {dimension_semantics = [#tpu.dimension_semantics<parallel>], iteration_bounds = array<i64: 1>, scalar_prefetch = 0 : i64, scratch_operands = 1 : i64, tpu.core_type = #tpu.core_type<tc>, window_params = [{transform_indices = @transform_0, window_bounds = array<i64: 1, 16, 768>}, {pipeline_mode = #tpu.pipeline_mode<synchronous>, transform_indices = @transform_1, window_bounds = array<i64: 1, 512>}, {pipeline_mode = #tpu.pipeline_mode<synchronous>, transform_indices = @transform_2, window_bounds = array<i64: 9, 1, 16>}, {pipeline_mode = #tpu.pipeline_mode<synchronous>, transform_indices = @transform_3, window_bounds = array<i64: 1, 1>}, {pipeline_mode = #tpu.pipeline_mode<synchronous>, transform_indices = @transform_4, window_bounds = array<i64: 9, 16, 1>}, {pipeline_mode = #tpu.pipeline_mode<synchronous>, transform_indices = @transform_5, window_bounds = array<i64: 16, 1>}, {transform_indices = @transform_6, window_bounds = array<i64: 1, 16, 512>}]} {
    %cst = arith.constant 0.000000e+00 : f32
    %0 = vector.broadcast %cst : f32 to vector<1x512xf32>
    %c0 = arith.constant 0 : index
    %c0_0 = arith.constant 0 : index
    %c111 = arith.constant 111 : index
    %1 = vector.load %arg1[%c0, %c0_0, %c111] : memref<1x16x768xf32, #tpu.memory_space<vmem>>, vector<1x16x512xf32>
    %2 = vector.shape_cast %1 : vector<1x16x512xf32> to vector<16x512xf32>
    %c0_1 = arith.constant 0 : index
    %c0_2 = arith.constant 0 : index
    %c0_3 = arith.constant 0 : index
    %3 = vector.load %arg3[%c0_1, %c0_2, %c0_3] : memref<9x1x16xf32, #tpu.memory_space<vmem>>, vector<1x1x16xf32>
    %4 = vector.shape_cast %3 : vector<1x1x16xf32> to vector<1x16xf32>
    %5 = arith.truncf %4 : vector<1x16xf32> to vector<1x16xbf16>
    %6 = arith.truncf %2 : vector<16x512xf32> to vector<16x512xbf16>
    %cst_4 = arith.constant dense<0.000000e+00> : vector<1x512xf32>
    %7 = tpu.matmul %5, %6, %cst_4 {dimension_numbers = #tpu.dot_dimension_numbers<[1], [0], [0], [1], [0, 0, 1, 1], [], []>} : vector<1x16xbf16>, vector<16x512xbf16>, vector<1x512xf32> -> vector<1x512xf32>
    %8 = arith.addf %0, %7 : vector<1x512xf32>
    %c0_5 = arith.constant 0 : index
    %c0_6 = arith.constant 0 : index
    %c112 = arith.constant 112 : index
    %9 = vector.load %arg1[%c0_5, %c0_6, %c112] : memref<1x16x768xf32, #tpu.memory_space<vmem>>, vector<1x16x512xf32>
    %10 = vector.shape_cast %9 : vector<1x16x512xf32> to vector<16x512xf32>
    %c1 = arith.constant 1 : index
    %c0_7 = arith.constant 0 : index
    %c0_8 = arith.constant 0 : index
    %11 = vector.load %arg3[%c1, %c0_7, %c0_8] : memref<9x1x16xf32, #tpu.memory_space<vmem>>, vector<1x1x16xf32>
    %12 = vector.shape_cast %11 : vector<1x1x16xf32> to vector<1x16xf32>
    %13 = arith.truncf %12 : vector<1x16xf32> to vector<1x16xbf16>
    %14 = arith.truncf %10 : vector<16x512xf32> to vector<16x512xbf16>
    %cst_9 = arith.constant dense<0.000000e+00> : vector<1x512xf32>
    %15 = tpu.matmul %13, %14, %cst_9 {dimension_numbers = #tpu.dot_dimension_numbers<[1], [0], [0], [1], [0, 0, 1, 1], [], []>} : vector<1x16xbf16>, vector<16x512xbf16>, vector<1x512xf32> -> vector<1x512xf32>
    %16 = arith.addf %8, %15 : vector<1x512xf32>
    %c0_10 = arith.constant 0 : index
    %c0_11 = arith.constant 0 : index
    %c113 = arith.constant 113 : index
    %17 = vector.load %arg1[%c0_10, %c0_11, %c113] : memref<1x16x768xf32, #tpu.memory_space<vmem>>, vector<1x16x512xf32>
    %18 = vector.shape_cast %17 : vector<1x16x512xf32> to vector<16x512xf32>
    %c2 = arith.constant 2 : index
    %c0_12 = arith.constant 0 : index
    %c0_13 = arith.constant 0 : index
    %19 = vector.load %arg3[%c2, %c0_12, %c0_13] : memref<9x1x16xf32, #tpu.memory_space<vmem>>, vector<1x1x16xf32>
    %20 = vector.shape_cast %19 : vector<1x1x16xf32> to vector<1x16xf32>
    %21 = arith.truncf %20 : vector<1x16xf32> to vector<1x16xbf16>
    %22 = arith.truncf %18 : vector<16x512xf32> to vector<16x512xbf16>
    %cst_14 = arith.constant dense<0.000000e+00> : vector<1x512xf32>
    %23 = tpu.matmul %21, %22, %cst_14 {dimension_numbers = #tpu.dot_dimension_numbers<[1], [0], [0], [1], [0, 0, 1, 1], [], []>} : vector<1x16xbf16>, vector<16x512xbf16>, vector<1x512xf32> -> vector<1x512xf32>
    %24 = arith.addf %16, %23 : vector<1x512xf32>
    %c0_15 = arith.constant 0 : index
    %c0_16 = arith.constant 0 : index
    %c127 = arith.constant 127 : index
    %25 = vector.load %arg1[%c0_15, %c0_16, %c127] : memref<1x16x768xf32, #tpu.memory_space<vmem>>, vector<1x16x512xf32>
    %26 = vector.shape_cast %25 : vector<1x16x512xf32> to vector<16x512xf32>
    %c3 = arith.constant 3 : index
    %c0_17 = arith.constant 0 : index
    %c0_18 = arith.constant 0 : index
    %27 = vector.load %arg3[%c3, %c0_17, %c0_18] : memref<9x1x16xf32, #tpu.memory_space<vmem>>, vector<1x1x16xf32>
    %28 = vector.shape_cast %27 : vector<1x1x16xf32> to vector<1x16xf32>
    %29 = arith.truncf %28 : vector<1x16xf32> to vector<1x16xbf16>
    %30 = arith.truncf %26 : vector<16x512xf32> to vector<16x512xbf16>
    %cst_19 = arith.constant dense<0.000000e+00> : vector<1x512xf32>
    %31 = tpu.matmul %29, %30, %cst_19 {dimension_numbers = #tpu.dot_dimension_numbers<[1], [0], [0], [1], [0, 0, 1, 1], [], []>} : vector<1x16xbf16>, vector<16x512xbf16>, vector<1x512xf32> -> vector<1x512xf32>
    %32 = arith.addf %24, %31 : vector<1x512xf32>
    %c0_20 = arith.constant 0 : index
    %c0_21 = arith.constant 0 : index
    %c128 = arith.constant 128 : index
    %33 = vector.load %arg1[%c0_20, %c0_21, %c128] : memref<1x16x768xf32, #tpu.memory_space<vmem>>, vector<1x16x512xf32>
    %34 = vector.shape_cast %33 : vector<1x16x512xf32> to vector<16x512xf32>
    %c4 = arith.constant 4 : index
    %c0_22 = arith.constant 0 : index
    %c0_23 = arith.constant 0 : index
    %35 = vector.load %arg3[%c4, %c0_22, %c0_23] : memref<9x1x16xf32, #tpu.memory_space<vmem>>, vector<1x1x16xf32>
    %36 = vector.shape_cast %35 : vector<1x1x16xf32> to vector<1x16xf32>
    %37 = arith.truncf %36 : vector<1x16xf32> to vector<1x16xbf16>
    %38 = arith.truncf %34 : vector<16x512xf32> to vector<16x512xbf16>
    %cst_24 = arith.constant dense<0.000000e+00> : vector<1x512xf32>
    %39 = tpu.matmul %37, %38, %cst_24 {dimension_numbers = #tpu.dot_dimension_numbers<[1], [0], [0], [1], [0, 0, 1, 1], [], []>} : vector<1x16xbf16>, vector<16x512xbf16>, vector<1x512xf32> -> vector<1x512xf32>
    %40 = arith.addf %32, %39 : vector<1x512xf32>
    %c0_25 = arith.constant 0 : index
    %c0_26 = arith.constant 0 : index
    %c129 = arith.constant 129 : index
    %41 = vector.load %arg1[%c0_25, %c0_26, %c129] : memref<1x16x768xf32, #tpu.memory_space<vmem>>, vector<1x16x512xf32>
    %42 = vector.shape_cast %41 : vector<1x16x512xf32> to vector<16x512xf32>
    %c5 = arith.constant 5 : index
    %c0_27 = arith.constant 0 : index
    %c0_28 = arith.constant 0 : index
    %43 = vector.load %arg3[%c5, %c0_27, %c0_28] : memref<9x1x16xf32, #tpu.memory_space<vmem>>, vector<1x1x16xf32>
    %44 = vector.shape_cast %43 : vector<1x1x16xf32> to vector<1x16xf32>
    %45 = arith.truncf %44 : vector<1x16xf32> to vector<1x16xbf16>
    %46 = arith.truncf %42 : vector<16x512xf32> to vector<16x512xbf16>
    %cst_29 = arith.constant dense<0.000000e+00> : vector<1x512xf32>
    %47 = tpu.matmul %45, %46, %cst_29 {dimension_numbers = #tpu.dot_dimension_numbers<[1], [0], [0], [1], [0, 0, 1, 1], [], []>} : vector<1x16xbf16>, vector<16x512xbf16>, vector<1x512xf32> -> vector<1x512xf32>
    %48 = arith.addf %40, %47 : vector<1x512xf32>
    %c0_30 = arith.constant 0 : index
    %c0_31 = arith.constant 0 : index
    %c143 = arith.constant 143 : index
    %49 = vector.load %arg1[%c0_30, %c0_31, %c143] : memref<1x16x768xf32, #tpu.memory_space<vmem>>, vector<1x16x512xf32>
    %50 = vector.shape_cast %49 : vector<1x16x512xf32> to vector<16x512xf32>
    %c6 = arith.constant 6 : index
    %c0_32 = arith.constant 0 : index
    %c0_33 = arith.constant 0 : index
    %51 = vector.load %arg3[%c6, %c0_32, %c0_33] : memref<9x1x16xf32, #tpu.memory_space<vmem>>, vector<1x1x16xf32>
    %52 = vector.shape_cast %51 : vector<1x1x16xf32> to vector<1x16xf32>
    %53 = arith.truncf %52 : vector<1x16xf32> to vector<1x16xbf16>
    %54 = arith.truncf %50 : vector<16x512xf32> to vector<16x512xbf16>
    %cst_34 = arith.constant dense<0.000000e+00> : vector<1x512xf32>
    %55 = tpu.matmul %53, %54, %cst_34 {dimension_numbers = #tpu.dot_dimension_numbers<[1], [0], [0], [1], [0, 0, 1, 1], [], []>} : vector<1x16xbf16>, vector<16x512xbf16>, vector<1x512xf32> -> vector<1x512xf32>
    %56 = arith.addf %48, %55 : vector<1x512xf32>
    %c0_35 = arith.constant 0 : index
    %c0_36 = arith.constant 0 : index
    %c144 = arith.constant 144 : index
    %57 = vector.load %arg1[%c0_35, %c0_36, %c144] : memref<1x16x768xf32, #tpu.memory_space<vmem>>, vector<1x16x512xf32>
    %58 = vector.shape_cast %57 : vector<1x16x512xf32> to vector<16x512xf32>
    %c7 = arith.constant 7 : index
    %c0_37 = arith.constant 0 : index
    %c0_38 = arith.constant 0 : index
    %59 = vector.load %arg3[%c7, %c0_37, %c0_38] : memref<9x1x16xf32, #tpu.memory_space<vmem>>, vector<1x1x16xf32>
    %60 = vector.shape_cast %59 : vector<1x1x16xf32> to vector<1x16xf32>
    %61 = arith.truncf %60 : vector<1x16xf32> to vector<1x16xbf16>
    %62 = arith.truncf %58 : vector<16x512xf32> to vector<16x512xbf16>
    %cst_39 = arith.constant dense<0.000000e+00> : vector<1x512xf32>
    %63 = tpu.matmul %61, %62, %cst_39 {dimension_numbers = #tpu.dot_dimension_numbers<[1], [0], [0], [1], [0, 0, 1, 1], [], []>} : vector<1x16xbf16>, vector<16x512xbf16>, vector<1x512xf32> -> vector<1x512xf32>
    %64 = arith.addf %56, %63 : vector<1x512xf32>
    %c0_40 = arith.constant 0 : index
    %c0_41 = arith.constant 0 : index
    %c145 = arith.constant 145 : index
    %65 = vector.load %arg1[%c0_40, %c0_41, %c145] : memref<1x16x768xf32, #tpu.memory_space<vmem>>, vector<1x16x512xf32>
    %66 = vector.shape_cast %65 : vector<1x16x512xf32> to vector<16x512xf32>
    %c8 = arith.constant 8 : index
    %c0_42 = arith.constant 0 : index
    %c0_43 = arith.constant 0 : index
    %67 = vector.load %arg3[%c8, %c0_42, %c0_43] : memref<9x1x16xf32, #tpu.memory_space<vmem>>, vector<1x1x16xf32>
    %68 = vector.shape_cast %67 : vector<1x1x16xf32> to vector<1x16xf32>
    %69 = arith.truncf %68 : vector<1x16xf32> to vector<1x16xbf16>
    %70 = arith.truncf %66 : vector<16x512xf32> to vector<16x512xbf16>
    %cst_44 = arith.constant dense<0.000000e+00> : vector<1x512xf32>
    %71 = tpu.matmul %69, %70, %cst_44 {dimension_numbers = #tpu.dot_dimension_numbers<[1], [0], [0], [1], [0, 0, 1, 1], [], []>} : vector<1x16xbf16>, vector<16x512xbf16>, vector<1x512xf32> -> vector<1x512xf32>
    %72 = arith.addf %64, %71 : vector<1x512xf32>
    %c0_45 = arith.constant 0 : index
    %c0_46 = arith.constant 0 : index
    %73 = vector.load %arg4[%c0_45, %c0_46] : memref<1x1xf32, #tpu.memory_space<vmem>>, vector<1x1xf32>
    %74 = vector.broadcast %73 : vector<1x1xf32> to vector<1x512xf32>
    %75 = arith.addf %72, %74 : vector<1x512xf32>
    %c0_47 = arith.constant 0 : index
    %c0_48 = arith.constant 0 : index
    %76 = vector.load %arg2[%c0_47, %c0_48] : memref<1x512xf32, #tpu.memory_space<vmem>>, vector<1x512xf32>
    %77 = arith.mulf %75, %76 : vector<1x512xf32>
    %cst_49 = arith.constant 0.000000e+00 : f32
    %78 = vector.broadcast %cst_49 : f32 to vector<1x768xf32>
    %c0_50 = arith.constant 0 : index
    %c0_51 = arith.constant 0 : index
    %79 = vector.load %arg8[%c0_50, %c0_51] : memref<1x768xf32, #tpu.memory_space<vmem>>, vector<1x768xf32>
    tpu.vector_store %arg8[%c0_50, %c0_51], %78 {strides = array<i32>} : memref<1x768xf32, #tpu.memory_space<vmem>>, vector<1x768xf32>,
    %c0_52 = arith.constant 0 : index
    %c128_53 = arith.constant 128 : index
    %80 = vector.load %arg8[%c0_52, %c128_53] : memref<1x768xf32, #tpu.memory_space<vmem>>, vector<1x512xf32>
    tpu.vector_store %arg8[%c0_52, %c128_53], %77 {strides = array<i32>} : memref<1x768xf32, #tpu.memory_space<vmem>>, vector<1x512xf32>,
    %cst_54 = arith.constant 0.000000e+00 : f32
    %81 = vector.broadcast %cst_54 : f32 to vector<16x512xf32>
    %c0_55 = arith.constant 0 : index
    %c111_56 = arith.constant 111 : index
    %82 = vector.load %arg8[%c0_55, %c111_56] : memref<1x768xf32, #tpu.memory_space<vmem>>, vector<1x512xf32>
    %c0_57 = arith.constant 0 : index
    %c0_58 = arith.constant 0 : index
    %c0_59 = arith.constant 0 : index
    %83 = vector.load %arg5[%c0_57, %c0_58, %c0_59] : memref<9x16x1xf32, #tpu.memory_space<vmem>>, vector<1x16x1xf32>
    %84 = vector.shape_cast %83 : vector<1x16x1xf32> to vector<16x1xf32>
    %85 = vector.broadcast %84 : vector<16x1xf32> to vector<16x512xf32>
    %86 = vector.broadcast %82 : vector<1x512xf32> to vector<16x512xf32>
    %87 = arith.mulf %85, %86 : vector<16x512xf32>
    %88 = arith.addf %81, %87 : vector<16x512xf32>
    %c0_60 = arith.constant 0 : index
    %c112_61 = arith.constant 112 : index
    %89 = vector.load %arg8[%c0_60, %c112_61] : memref<1x768xf32, #tpu.memory_space<vmem>>, vector<1x512xf32>
    %c1_62 = arith.constant 1 : index
    %c0_63 = arith.constant 0 : index
    %c0_64 = arith.constant 0 : index
    %90 = vector.load %arg5[%c1_62, %c0_63, %c0_64] : memref<9x16x1xf32, #tpu.memory_space<vmem>>, vector<1x16x1xf32>
    %91 = vector.shape_cast %90 : vector<1x16x1xf32> to vector<16x1xf32>
    %92 = vector.broadcast %91 : vector<16x1xf32> to vector<16x512xf32>
    %93 = vector.broadcast %89 : vector<1x512xf32> to vector<16x512xf32>
    %94 = arith.mulf %92, %93 : vector<16x512xf32>
    %95 = arith.addf %88, %94 : vector<16x512xf32>
    %c0_65 = arith.constant 0 : index
    %c113_66 = arith.constant 113 : index
    %96 = vector.load %arg8[%c0_65, %c113_66] : memref<1x768xf32, #tpu.memory_space<vmem>>, vector<1x512xf32>
    %c2_67 = arith.constant 2 : index
    %c0_68 = arith.constant 0 : index
    %c0_69 = arith.constant 0 : index
    %97 = vector.load %arg5[%c2_67, %c0_68, %c0_69] : memref<9x16x1xf32, #tpu.memory_space<vmem>>, vector<1x16x1xf32>
    %98 = vector.shape_cast %97 : vector<1x16x1xf32> to vector<16x1xf32>
    %99 = vector.broadcast %98 : vector<16x1xf32> to vector<16x512xf32>
    %100 = vector.broadcast %96 : vector<1x512xf32> to vector<16x512xf32>
    %101 = arith.mulf %99, %100 : vector<16x512xf32>
    %102 = arith.addf %95, %101 : vector<16x512xf32>
    %c0_70 = arith.constant 0 : index
    %c127_71 = arith.constant 127 : index
    %103 = vector.load %arg8[%c0_70, %c127_71] : memref<1x768xf32, #tpu.memory_space<vmem>>, vector<1x512xf32>
    %c3_72 = arith.constant 3 : index
    %c0_73 = arith.constant 0 : index
    %c0_74 = arith.constant 0 : index
    %104 = vector.load %arg5[%c3_72, %c0_73, %c0_74] : memref<9x16x1xf32, #tpu.memory_space<vmem>>, vector<1x16x1xf32>
    %105 = vector.shape_cast %104 : vector<1x16x1xf32> to vector<16x1xf32>
    %106 = vector.broadcast %105 : vector<16x1xf32> to vector<16x512xf32>
    %107 = vector.broadcast %103 : vector<1x512xf32> to vector<16x512xf32>
    %108 = arith.mulf %106, %107 : vector<16x512xf32>
    %109 = arith.addf %102, %108 : vector<16x512xf32>
    %c0_75 = arith.constant 0 : index
    %c128_76 = arith.constant 128 : index
    %110 = vector.load %arg8[%c0_75, %c128_76] : memref<1x768xf32, #tpu.memory_space<vmem>>, vector<1x512xf32>
    %c4_77 = arith.constant 4 : index
    %c0_78 = arith.constant 0 : index
    %c0_79 = arith.constant 0 : index
    %111 = vector.load %arg5[%c4_77, %c0_78, %c0_79] : memref<9x16x1xf32, #tpu.memory_space<vmem>>, vector<1x16x1xf32>
    %112 = vector.shape_cast %111 : vector<1x16x1xf32> to vector<16x1xf32>
    %113 = vector.broadcast %112 : vector<16x1xf32> to vector<16x512xf32>
    %114 = vector.broadcast %110 : vector<1x512xf32> to vector<16x512xf32>
    %115 = arith.mulf %113, %114 : vector<16x512xf32>
    %116 = arith.addf %109, %115 : vector<16x512xf32>
    %c0_80 = arith.constant 0 : index
    %c129_81 = arith.constant 129 : index
    %117 = vector.load %arg8[%c0_80, %c129_81] : memref<1x768xf32, #tpu.memory_space<vmem>>, vector<1x512xf32>
    %c5_82 = arith.constant 5 : index
    %c0_83 = arith.constant 0 : index
    %c0_84 = arith.constant 0 : index
    %118 = vector.load %arg5[%c5_82, %c0_83, %c0_84] : memref<9x16x1xf32, #tpu.memory_space<vmem>>, vector<1x16x1xf32>
    %119 = vector.shape_cast %118 : vector<1x16x1xf32> to vector<16x1xf32>
    %120 = vector.broadcast %119 : vector<16x1xf32> to vector<16x512xf32>
    %121 = vector.broadcast %117 : vector<1x512xf32> to vector<16x512xf32>
    %122 = arith.mulf %120, %121 : vector<16x512xf32>
    %123 = arith.addf %116, %122 : vector<16x512xf32>
    %c0_85 = arith.constant 0 : index
    %c143_86 = arith.constant 143 : index
    %124 = vector.load %arg8[%c0_85, %c143_86] : memref<1x768xf32, #tpu.memory_space<vmem>>, vector<1x512xf32>
    %c6_87 = arith.constant 6 : index
    %c0_88 = arith.constant 0 : index
    %c0_89 = arith.constant 0 : index
    %125 = vector.load %arg5[%c6_87, %c0_88, %c0_89] : memref<9x16x1xf32, #tpu.memory_space<vmem>>, vector<1x16x1xf32>
    %126 = vector.shape_cast %125 : vector<1x16x1xf32> to vector<16x1xf32>
    %127 = vector.broadcast %126 : vector<16x1xf32> to vector<16x512xf32>
    %128 = vector.broadcast %124 : vector<1x512xf32> to vector<16x512xf32>
    %129 = arith.mulf %127, %128 : vector<16x512xf32>
    %130 = arith.addf %123, %129 : vector<16x512xf32>
    %c0_90 = arith.constant 0 : index
    %c144_91 = arith.constant 144 : index
    %131 = vector.load %arg8[%c0_90, %c144_91] : memref<1x768xf32, #tpu.memory_space<vmem>>, vector<1x512xf32>
    %c7_92 = arith.constant 7 : index
    %c0_93 = arith.constant 0 : index
    %c0_94 = arith.constant 0 : index
    %132 = vector.load %arg5[%c7_92, %c0_93, %c0_94] : memref<9x16x1xf32, #tpu.memory_space<vmem>>, vector<1x16x1xf32>
    %133 = vector.shape_cast %132 : vector<1x16x1xf32> to vector<16x1xf32>
    %134 = vector.broadcast %133 : vector<16x1xf32> to vector<16x512xf32>
    %135 = vector.broadcast %131 : vector<1x512xf32> to vector<16x512xf32>
    %136 = arith.mulf %134, %135 : vector<16x512xf32>
    %137 = arith.addf %130, %136 : vector<16x512xf32>
    %c0_95 = arith.constant 0 : index
    %c145_96 = arith.constant 145 : index
    %138 = vector.load %arg8[%c0_95, %c145_96] : memref<1x768xf32, #tpu.memory_space<vmem>>, vector<1x512xf32>
    %c8_97 = arith.constant 8 : index
    %c0_98 = arith.constant 0 : index
    %c0_99 = arith.constant 0 : index
    %139 = vector.load %arg5[%c8_97, %c0_98, %c0_99] : memref<9x16x1xf32, #tpu.memory_space<vmem>>, vector<1x16x1xf32>
    %140 = vector.shape_cast %139 : vector<1x16x1xf32> to vector<16x1xf32>
    %141 = vector.broadcast %140 : vector<16x1xf32> to vector<16x512xf32>
    %142 = vector.broadcast %138 : vector<1x512xf32> to vector<16x512xf32>
    %143 = arith.mulf %141, %142 : vector<16x512xf32>
    %144 = arith.addf %137, %143 : vector<16x512xf32>
    %c0_100 = arith.constant 0 : index
    %c0_101 = arith.constant 0 : index
    %145 = vector.load %arg6[%c0_100, %c0_101] : memref<16x1xf32, #tpu.memory_space<vmem>>, vector<16x1xf32>
    %146 = vector.broadcast %145 : vector<16x1xf32> to vector<16x512xf32>
    %147 = arith.addf %144, %146 : vector<16x512xf32>
    %cst_102 = arith.constant 0.000000e+00 : f32
    %148 = vector.broadcast %cst_102 : f32 to vector<16x512xf32>
    %149 = arith.maximumf %147, %148 : vector<16x512xf32>
    %c0_103 = arith.constant 0 : index
    %c0_104 = arith.constant 0 : index
    %c0_105 = arith.constant 0 : index
    %150 = vector.load %arg7[%c0_103, %c0_104, %c0_105] : memref<1x16x512xf32, #tpu.memory_space<vmem>>, vector<1x16x512xf32>
    %151 = vector.shape_cast %150 : vector<1x16x512xf32> to vector<16x512xf32>
    %152 = vector.shape_cast %149 : vector<16x512xf32> to vector<1x16x512xf32>
    tpu.vector_store %arg7[%c0_103, %c0_104, %c0_105], %152 {strides = array<i32>} : memref<1x16x512xf32, #tpu.memory_space<vmem>>, vector<1x16x512xf32>,
    return
  }
  func.func @transform_0(%arg0: i32) -> (i32, i32, i32) {
    %c0_i32 = arith.constant 0 : i32
    %c0_i32_0 = arith.constant 0 : i32
    %c0_i32_1 = arith.constant 0 : i32
    return %arg0, %c0_i32, %c0_i32_0 : i32, i32, i32
  }
  func.func @transform_1(%arg0: i32) -> (i32, i32) {
    %c0_i32 = arith.constant 0 : i32
    %c0_i32_0 = arith.constant 0 : i32
    %c0_i32_1 = arith.constant 0 : i32
    return %c0_i32, %c0_i32_0 : i32, i32
  }
  func.func @transform_2(%arg0: i32) -> (i32, i32, i32) {
    %c0_i32 = arith.constant 0 : i32
    %c0_i32_0 = arith.constant 0 : i32
    %c0_i32_1 = arith.constant 0 : i32
    %c0_i32_2 = arith.constant 0 : i32
    return %c0_i32, %c0_i32_0, %c0_i32_1 : i32, i32, i32
  }
  func.func @transform_3(%arg0: i32) -> (i32, i32) {
    %c0_i32 = arith.constant 0 : i32
    %c0_i32_0 = arith.constant 0 : i32
    %c0_i32_1 = arith.constant 0 : i32
    return %c0_i32, %c0_i32_0 : i32, i32
  }
  func.func @transform_4(%arg0: i32) -> (i32, i32, i32) {
    %c0_i32 = arith.constant 0 : i32
    %c0_i32_0 = arith.constant 0 : i32
    %c0_i32_1 = arith.constant 0 : i32
    %c0_i32_2 = arith.constant 0 : i32
    return %c0_i32, %c0_i32_0, %c0_i32_1 : i32, i32, i32
  }
  func.func @transform_5(%arg0: i32) -> (i32, i32) {
    %c0_i32 = arith.constant 0 : i32
    %c0_i32_0 = arith.constant 0 : i32
    %c0_i32_1 = arith.constant 0 : i32
    return %c0_i32, %c0_i32_0 : i32, i32
  }
  func.func @transform_6(%arg0: i32) -> (i32, i32, i32) {
    %c0_i32 = arith.constant 0 : i32
    %c0_i32_0 = arith.constant 0 : i32
    %c0_i32_1 = arith.constant 0 : i32
    return %arg0, %c0_i32, %c0_i32_0 : i32, i32, i32
  }
}

module attributes {stable_mosaic.version = 11 : i64} {
  func.func @_fused_conv_pair_kernel(%arg0: i32, %arg1: memref<1x16x2056xf32, #tpu.memory_space<vmem>>, %arg2: memref<1x1800xf32, #tpu.memory_space<vmem>>, %arg3: memref<9x16x16xf32, #tpu.memory_space<vmem>>, %arg4: memref<16x1xf32, #tpu.memory_space<vmem>>, %arg5: memref<9x1x16xf32, #tpu.memory_space<vmem>>, %arg6: memref<1x1xf32, #tpu.memory_space<vmem>>, %arg7: memref<1x1x1800xf32, #tpu.memory_space<vmem>>, %arg8: memref<16x2056xf32, #tpu.memory_space<vmem>>) attributes {dimension_semantics = [#tpu.dimension_semantics<parallel>], iteration_bounds = array<i64: 1>, scalar_prefetch = 0 : i64, scratch_operands = 1 : i64, tpu.core_type = #tpu.core_type<tc>, window_params = [{transform_indices = @transform_0, window_bounds = array<i64: 1, 16, 2056>}, {pipeline_mode = #tpu.pipeline_mode<synchronous>, transform_indices = @transform_1, window_bounds = array<i64: 1, 1800>}, {pipeline_mode = #tpu.pipeline_mode<synchronous>, transform_indices = @transform_2, window_bounds = array<i64: 9, 16, 16>}, {pipeline_mode = #tpu.pipeline_mode<synchronous>, transform_indices = @transform_3, window_bounds = array<i64: 16, 1>}, {pipeline_mode = #tpu.pipeline_mode<synchronous>, transform_indices = @transform_4, window_bounds = array<i64: 9, 1, 16>}, {pipeline_mode = #tpu.pipeline_mode<synchronous>, transform_indices = @transform_5, window_bounds = array<i64: 1, 1>}, {transform_indices = @transform_6, window_bounds = array<i64: 1, 1, 1800>}]} {
    %cst = arith.constant 0.000000e+00 : f32
    %0 = vector.broadcast %cst : f32 to vector<16x1800xf32>
    %c0 = arith.constant 0 : index
    %c0_0 = arith.constant 0 : index
    %c97 = arith.constant 97 : index
    %1 = vector.load %arg1[%c0, %c0_0, %c97] : memref<1x16x2056xf32, #tpu.memory_space<vmem>>, vector<1x16x1800xf32>
    %2 = vector.shape_cast %1 : vector<1x16x1800xf32> to vector<16x1800xf32>
    %c0_1 = arith.constant 0 : index
    %c0_2 = arith.constant 0 : index
    %c0_3 = arith.constant 0 : index
    %3 = vector.load %arg3[%c0_1, %c0_2, %c0_3] : memref<9x16x16xf32, #tpu.memory_space<vmem>>, vector<1x16x16xf32>
    %4 = vector.shape_cast %3 : vector<1x16x16xf32> to vector<16x16xf32>
    %5 = arith.truncf %4 : vector<16x16xf32> to vector<16x16xbf16>
    %6 = arith.truncf %2 : vector<16x1800xf32> to vector<16x1800xbf16>
    %cst_4 = arith.constant dense<0.000000e+00> : vector<16x1800xf32>
    %7 = tpu.matmul %5, %6, %cst_4 {dimension_numbers = #tpu.dot_dimension_numbers<[1], [0], [0], [1], [0, 0, 1, 1], [], []>} : vector<16x16xbf16>, vector<16x1800xbf16>, vector<16x1800xf32> -> vector<16x1800xf32>
    %8 = arith.addf %0, %7 : vector<16x1800xf32>
    %c0_5 = arith.constant 0 : index
    %c0_6 = arith.constant 0 : index
    %c98 = arith.constant 98 : index
    %9 = vector.load %arg1[%c0_5, %c0_6, %c98] : memref<1x16x2056xf32, #tpu.memory_space<vmem>>, vector<1x16x1800xf32>
    %10 = vector.shape_cast %9 : vector<1x16x1800xf32> to vector<16x1800xf32>
    %c1 = arith.constant 1 : index
    %c0_7 = arith.constant 0 : index
    %c0_8 = arith.constant 0 : index
    %11 = vector.load %arg3[%c1, %c0_7, %c0_8] : memref<9x16x16xf32, #tpu.memory_space<vmem>>, vector<1x16x16xf32>
    %12 = vector.shape_cast %11 : vector<1x16x16xf32> to vector<16x16xf32>
    %13 = arith.truncf %12 : vector<16x16xf32> to vector<16x16xbf16>
    %14 = arith.truncf %10 : vector<16x1800xf32> to vector<16x1800xbf16>
    %cst_9 = arith.constant dense<0.000000e+00> : vector<16x1800xf32>
    %15 = tpu.matmul %13, %14, %cst_9 {dimension_numbers = #tpu.dot_dimension_numbers<[1], [0], [0], [1], [0, 0, 1, 1], [], []>} : vector<16x16xbf16>, vector<16x1800xbf16>, vector<16x1800xf32> -> vector<16x1800xf32>
    %16 = arith.addf %8, %15 : vector<16x1800xf32>
    %c0_10 = arith.constant 0 : index
    %c0_11 = arith.constant 0 : index
    %c99 = arith.constant 99 : index
    %17 = vector.load %arg1[%c0_10, %c0_11, %c99] : memref<1x16x2056xf32, #tpu.memory_space<vmem>>, vector<1x16x1800xf32>
    %18 = vector.shape_cast %17 : vector<1x16x1800xf32> to vector<16x1800xf32>
    %c2 = arith.constant 2 : index
    %c0_12 = arith.constant 0 : index
    %c0_13 = arith.constant 0 : index
    %19 = vector.load %arg3[%c2, %c0_12, %c0_13] : memref<9x16x16xf32, #tpu.memory_space<vmem>>, vector<1x16x16xf32>
    %20 = vector.shape_cast %19 : vector<1x16x16xf32> to vector<16x16xf32>
    %21 = arith.truncf %20 : vector<16x16xf32> to vector<16x16xbf16>
    %22 = arith.truncf %18 : vector<16x1800xf32> to vector<16x1800xbf16>
    %cst_14 = arith.constant dense<0.000000e+00> : vector<16x1800xf32>
    %23 = tpu.matmul %21, %22, %cst_14 {dimension_numbers = #tpu.dot_dimension_numbers<[1], [0], [0], [1], [0, 0, 1, 1], [], []>} : vector<16x16xbf16>, vector<16x1800xbf16>, vector<16x1800xf32> -> vector<16x1800xf32>
    %24 = arith.addf %16, %23 : vector<16x1800xf32>
    %c0_15 = arith.constant 0 : index
    %c0_16 = arith.constant 0 : index
    %c127 = arith.constant 127 : index
    %25 = vector.load %arg1[%c0_15, %c0_16, %c127] : memref<1x16x2056xf32, #tpu.memory_space<vmem>>, vector<1x16x1800xf32>
    %26 = vector.shape_cast %25 : vector<1x16x1800xf32> to vector<16x1800xf32>
    %c3 = arith.constant 3 : index
    %c0_17 = arith.constant 0 : index
    %c0_18 = arith.constant 0 : index
    %27 = vector.load %arg3[%c3, %c0_17, %c0_18] : memref<9x16x16xf32, #tpu.memory_space<vmem>>, vector<1x16x16xf32>
    %28 = vector.shape_cast %27 : vector<1x16x16xf32> to vector<16x16xf32>
    %29 = arith.truncf %28 : vector<16x16xf32> to vector<16x16xbf16>
    %30 = arith.truncf %26 : vector<16x1800xf32> to vector<16x1800xbf16>
    %cst_19 = arith.constant dense<0.000000e+00> : vector<16x1800xf32>
    %31 = tpu.matmul %29, %30, %cst_19 {dimension_numbers = #tpu.dot_dimension_numbers<[1], [0], [0], [1], [0, 0, 1, 1], [], []>} : vector<16x16xbf16>, vector<16x1800xbf16>, vector<16x1800xf32> -> vector<16x1800xf32>
    %32 = arith.addf %24, %31 : vector<16x1800xf32>
    %c0_20 = arith.constant 0 : index
    %c0_21 = arith.constant 0 : index
    %c128 = arith.constant 128 : index
    %33 = vector.load %arg1[%c0_20, %c0_21, %c128] : memref<1x16x2056xf32, #tpu.memory_space<vmem>>, vector<1x16x1800xf32>
    %34 = vector.shape_cast %33 : vector<1x16x1800xf32> to vector<16x1800xf32>
    %c4 = arith.constant 4 : index
    %c0_22 = arith.constant 0 : index
    %c0_23 = arith.constant 0 : index
    %35 = vector.load %arg3[%c4, %c0_22, %c0_23] : memref<9x16x16xf32, #tpu.memory_space<vmem>>, vector<1x16x16xf32>
    %36 = vector.shape_cast %35 : vector<1x16x16xf32> to vector<16x16xf32>
    %37 = arith.truncf %36 : vector<16x16xf32> to vector<16x16xbf16>
    %38 = arith.truncf %34 : vector<16x1800xf32> to vector<16x1800xbf16>
    %cst_24 = arith.constant dense<0.000000e+00> : vector<16x1800xf32>
    %39 = tpu.matmul %37, %38, %cst_24 {dimension_numbers = #tpu.dot_dimension_numbers<[1], [0], [0], [1], [0, 0, 1, 1], [], []>} : vector<16x16xbf16>, vector<16x1800xbf16>, vector<16x1800xf32> -> vector<16x1800xf32>
    %40 = arith.addf %32, %39 : vector<16x1800xf32>
    %c0_25 = arith.constant 0 : index
    %c0_26 = arith.constant 0 : index
    %c129 = arith.constant 129 : index
    %41 = vector.load %arg1[%c0_25, %c0_26, %c129] : memref<1x16x2056xf32, #tpu.memory_space<vmem>>, vector<1x16x1800xf32>
    %42 = vector.shape_cast %41 : vector<1x16x1800xf32> to vector<16x1800xf32>
    %c5 = arith.constant 5 : index
    %c0_27 = arith.constant 0 : index
    %c0_28 = arith.constant 0 : index
    %43 = vector.load %arg3[%c5, %c0_27, %c0_28] : memref<9x16x16xf32, #tpu.memory_space<vmem>>, vector<1x16x16xf32>
    %44 = vector.shape_cast %43 : vector<1x16x16xf32> to vector<16x16xf32>
    %45 = arith.truncf %44 : vector<16x16xf32> to vector<16x16xbf16>
    %46 = arith.truncf %42 : vector<16x1800xf32> to vector<16x1800xbf16>
    %cst_29 = arith.constant dense<0.000000e+00> : vector<16x1800xf32>
    %47 = tpu.matmul %45, %46, %cst_29 {dimension_numbers = #tpu.dot_dimension_numbers<[1], [0], [0], [1], [0, 0, 1, 1], [], []>} : vector<16x16xbf16>, vector<16x1800xbf16>, vector<16x1800xf32> -> vector<16x1800xf32>
    %48 = arith.addf %40, %47 : vector<16x1800xf32>
    %c0_30 = arith.constant 0 : index
    %c0_31 = arith.constant 0 : index
    %c157 = arith.constant 157 : index
    %49 = vector.load %arg1[%c0_30, %c0_31, %c157] : memref<1x16x2056xf32, #tpu.memory_space<vmem>>, vector<1x16x1800xf32>
    %50 = vector.shape_cast %49 : vector<1x16x1800xf32> to vector<16x1800xf32>
    %c6 = arith.constant 6 : index
    %c0_32 = arith.constant 0 : index
    %c0_33 = arith.constant 0 : index
    %51 = vector.load %arg3[%c6, %c0_32, %c0_33] : memref<9x16x16xf32, #tpu.memory_space<vmem>>, vector<1x16x16xf32>
    %52 = vector.shape_cast %51 : vector<1x16x16xf32> to vector<16x16xf32>
    %53 = arith.truncf %52 : vector<16x16xf32> to vector<16x16xbf16>
    %54 = arith.truncf %50 : vector<16x1800xf32> to vector<16x1800xbf16>
    %cst_34 = arith.constant dense<0.000000e+00> : vector<16x1800xf32>
    %55 = tpu.matmul %53, %54, %cst_34 {dimension_numbers = #tpu.dot_dimension_numbers<[1], [0], [0], [1], [0, 0, 1, 1], [], []>} : vector<16x16xbf16>, vector<16x1800xbf16>, vector<16x1800xf32> -> vector<16x1800xf32>
    %56 = arith.addf %48, %55 : vector<16x1800xf32>
    %c0_35 = arith.constant 0 : index
    %c0_36 = arith.constant 0 : index
    %c158 = arith.constant 158 : index
    %57 = vector.load %arg1[%c0_35, %c0_36, %c158] : memref<1x16x2056xf32, #tpu.memory_space<vmem>>, vector<1x16x1800xf32>
    %58 = vector.shape_cast %57 : vector<1x16x1800xf32> to vector<16x1800xf32>
    %c7 = arith.constant 7 : index
    %c0_37 = arith.constant 0 : index
    %c0_38 = arith.constant 0 : index
    %59 = vector.load %arg3[%c7, %c0_37, %c0_38] : memref<9x16x16xf32, #tpu.memory_space<vmem>>, vector<1x16x16xf32>
    %60 = vector.shape_cast %59 : vector<1x16x16xf32> to vector<16x16xf32>
    %61 = arith.truncf %60 : vector<16x16xf32> to vector<16x16xbf16>
    %62 = arith.truncf %58 : vector<16x1800xf32> to vector<16x1800xbf16>
    %cst_39 = arith.constant dense<0.000000e+00> : vector<16x1800xf32>
    %63 = tpu.matmul %61, %62, %cst_39 {dimension_numbers = #tpu.dot_dimension_numbers<[1], [0], [0], [1], [0, 0, 1, 1], [], []>} : vector<16x16xbf16>, vector<16x1800xbf16>, vector<16x1800xf32> -> vector<16x1800xf32>
    %64 = arith.addf %56, %63 : vector<16x1800xf32>
    %c0_40 = arith.constant 0 : index
    %c0_41 = arith.constant 0 : index
    %c159 = arith.constant 159 : index
    %65 = vector.load %arg1[%c0_40, %c0_41, %c159] : memref<1x16x2056xf32, #tpu.memory_space<vmem>>, vector<1x16x1800xf32>
    %66 = vector.shape_cast %65 : vector<1x16x1800xf32> to vector<16x1800xf32>
    %c8 = arith.constant 8 : index
    %c0_42 = arith.constant 0 : index
    %c0_43 = arith.constant 0 : index
    %67 = vector.load %arg3[%c8, %c0_42, %c0_43] : memref<9x16x16xf32, #tpu.memory_space<vmem>>, vector<1x16x16xf32>
    %68 = vector.shape_cast %67 : vector<1x16x16xf32> to vector<16x16xf32>
    %69 = arith.truncf %68 : vector<16x16xf32> to vector<16x16xbf16>
    %70 = arith.truncf %66 : vector<16x1800xf32> to vector<16x1800xbf16>
    %cst_44 = arith.constant dense<0.000000e+00> : vector<16x1800xf32>
    %71 = tpu.matmul %69, %70, %cst_44 {dimension_numbers = #tpu.dot_dimension_numbers<[1], [0], [0], [1], [0, 0, 1, 1], [], []>} : vector<16x16xbf16>, vector<16x1800xbf16>, vector<16x1800xf32> -> vector<16x1800xf32>
    %72 = arith.addf %64, %71 : vector<16x1800xf32>
    %c0_45 = arith.constant 0 : index
    %c0_46 = arith.constant 0 : index
    %73 = vector.load %arg4[%c0_45, %c0_46] : memref<16x1xf32, #tpu.memory_space<vmem>>, vector<16x1xf32>
    %74 = vector.broadcast %73 : vector<16x1xf32> to vector<16x1800xf32>
    %75 = arith.addf %72, %74 : vector<16x1800xf32>
    %cst_47 = arith.constant 0.000000e+00 : f32
    %76 = vector.broadcast %cst_47 : f32 to vector<16x1800xf32>
    %77 = arith.maximumf %75, %76 : vector<16x1800xf32>
    %c0_48 = arith.constant 0 : index
    %c0_49 = arith.constant 0 : index
    %78 = vector.load %arg2[%c0_48, %c0_49] : memref<1x1800xf32, #tpu.memory_space<vmem>>, vector<1x1800xf32>
    %79 = vector.broadcast %78 : vector<1x1800xf32> to vector<16x1800xf32>
    %80 = arith.mulf %77, %79 : vector<16x1800xf32>
    %cst_50 = arith.constant 0.000000e+00 : f32
    %81 = vector.broadcast %cst_50 : f32 to vector<16x2056xf32>
    %c0_51 = arith.constant 0 : index
    %c0_52 = arith.constant 0 : index
    %82 = vector.load %arg8[%c0_51, %c0_52] : memref<16x2056xf32, #tpu.memory_space<vmem>>, vector<16x2056xf32>
    tpu.vector_store %arg8[%c0_51, %c0_52], %81 {strides = array<i32>} : memref<16x2056xf32, #tpu.memory_space<vmem>>, vector<16x2056xf32>,
    %c0_53 = arith.constant 0 : index
    %c128_54 = arith.constant 128 : index
    %83 = vector.load %arg8[%c0_53, %c128_54] : memref<16x2056xf32, #tpu.memory_space<vmem>>, vector<16x1800xf32>
    tpu.vector_store %arg8[%c0_53, %c128_54], %80 {strides = array<i32>} : memref<16x2056xf32, #tpu.memory_space<vmem>>, vector<16x1800xf32>,
    %cst_55 = arith.constant 0.000000e+00 : f32
    %84 = vector.broadcast %cst_55 : f32 to vector<1x1800xf32>
    %c0_56 = arith.constant 0 : index
    %c97_57 = arith.constant 97 : index
    %85 = vector.load %arg8[%c0_56, %c97_57] : memref<16x2056xf32, #tpu.memory_space<vmem>>, vector<16x1800xf32>
    %c0_58 = arith.constant 0 : index
    %c0_59 = arith.constant 0 : index
    %c0_60 = arith.constant 0 : index
    %86 = vector.load %arg5[%c0_58, %c0_59, %c0_60] : memref<9x1x16xf32, #tpu.memory_space<vmem>>, vector<1x1x16xf32>
    %87 = vector.shape_cast %86 : vector<1x1x16xf32> to vector<1x16xf32>
    %88 = arith.truncf %87 : vector<1x16xf32> to vector<1x16xbf16>
    %89 = arith.truncf %85 : vector<16x1800xf32> to vector<16x1800xbf16>
    %cst_61 = arith.constant dense<0.000000e+00> : vector<1x1800xf32>
    %90 = tpu.matmul %88, %89, %cst_61 {dimension_numbers = #tpu.dot_dimension_numbers<[1], [0], [0], [1], [0, 0, 1, 1], [], []>} : vector<1x16xbf16>, vector<16x1800xbf16>, vector<1x1800xf32> -> vector<1x1800xf32>
    %91 = arith.addf %84, %90 : vector<1x1800xf32>
    %c0_62 = arith.constant 0 : index
    %c98_63 = arith.constant 98 : index
    %92 = vector.load %arg8[%c0_62, %c98_63] : memref<16x2056xf32, #tpu.memory_space<vmem>>, vector<16x1800xf32>
    %c1_64 = arith.constant 1 : index
    %c0_65 = arith.constant 0 : index
    %c0_66 = arith.constant 0 : index
    %93 = vector.load %arg5[%c1_64, %c0_65, %c0_66] : memref<9x1x16xf32, #tpu.memory_space<vmem>>, vector<1x1x16xf32>
    %94 = vector.shape_cast %93 : vector<1x1x16xf32> to vector<1x16xf32>
    %95 = arith.truncf %94 : vector<1x16xf32> to vector<1x16xbf16>
    %96 = arith.truncf %92 : vector<16x1800xf32> to vector<16x1800xbf16>
    %cst_67 = arith.constant dense<0.000000e+00> : vector<1x1800xf32>
    %97 = tpu.matmul %95, %96, %cst_67 {dimension_numbers = #tpu.dot_dimension_numbers<[1], [0], [0], [1], [0, 0, 1, 1], [], []>} : vector<1x16xbf16>, vector<16x1800xbf16>, vector<1x1800xf32> -> vector<1x1800xf32>
    %98 = arith.addf %91, %97 : vector<1x1800xf32>
    %c0_68 = arith.constant 0 : index
    %c99_69 = arith.constant 99 : index
    %99 = vector.load %arg8[%c0_68, %c99_69] : memref<16x2056xf32, #tpu.memory_space<vmem>>, vector<16x1800xf32>
    %c2_70 = arith.constant 2 : index
    %c0_71 = arith.constant 0 : index
    %c0_72 = arith.constant 0 : index
    %100 = vector.load %arg5[%c2_70, %c0_71, %c0_72] : memref<9x1x16xf32, #tpu.memory_space<vmem>>, vector<1x1x16xf32>
    %101 = vector.shape_cast %100 : vector<1x1x16xf32> to vector<1x16xf32>
    %102 = arith.truncf %101 : vector<1x16xf32> to vector<1x16xbf16>
    %103 = arith.truncf %99 : vector<16x1800xf32> to vector<16x1800xbf16>
    %cst_73 = arith.constant dense<0.000000e+00> : vector<1x1800xf32>
    %104 = tpu.matmul %102, %103, %cst_73 {dimension_numbers = #tpu.dot_dimension_numbers<[1], [0], [0], [1], [0, 0, 1, 1], [], []>} : vector<1x16xbf16>, vector<16x1800xbf16>, vector<1x1800xf32> -> vector<1x1800xf32>
    %105 = arith.addf %98, %104 : vector<1x1800xf32>
    %c0_74 = arith.constant 0 : index
    %c127_75 = arith.constant 127 : index
    %106 = vector.load %arg8[%c0_74, %c127_75] : memref<16x2056xf32, #tpu.memory_space<vmem>>, vector<16x1800xf32>
    %c3_76 = arith.constant 3 : index
    %c0_77 = arith.constant 0 : index
    %c0_78 = arith.constant 0 : index
    %107 = vector.load %arg5[%c3_76, %c0_77, %c0_78] : memref<9x1x16xf32, #tpu.memory_space<vmem>>, vector<1x1x16xf32>
    %108 = vector.shape_cast %107 : vector<1x1x16xf32> to vector<1x16xf32>
    %109 = arith.truncf %108 : vector<1x16xf32> to vector<1x16xbf16>
    %110 = arith.truncf %106 : vector<16x1800xf32> to vector<16x1800xbf16>
    %cst_79 = arith.constant dense<0.000000e+00> : vector<1x1800xf32>
    %111 = tpu.matmul %109, %110, %cst_79 {dimension_numbers = #tpu.dot_dimension_numbers<[1], [0], [0], [1], [0, 0, 1, 1], [], []>} : vector<1x16xbf16>, vector<16x1800xbf16>, vector<1x1800xf32> -> vector<1x1800xf32>
    %112 = arith.addf %105, %111 : vector<1x1800xf32>
    %c0_80 = arith.constant 0 : index
    %c128_81 = arith.constant 128 : index
    %113 = vector.load %arg8[%c0_80, %c128_81] : memref<16x2056xf32, #tpu.memory_space<vmem>>, vector<16x1800xf32>
    %c4_82 = arith.constant 4 : index
    %c0_83 = arith.constant 0 : index
    %c0_84 = arith.constant 0 : index
    %114 = vector.load %arg5[%c4_82, %c0_83, %c0_84] : memref<9x1x16xf32, #tpu.memory_space<vmem>>, vector<1x1x16xf32>
    %115 = vector.shape_cast %114 : vector<1x1x16xf32> to vector<1x16xf32>
    %116 = arith.truncf %115 : vector<1x16xf32> to vector<1x16xbf16>
    %117 = arith.truncf %113 : vector<16x1800xf32> to vector<16x1800xbf16>
    %cst_85 = arith.constant dense<0.000000e+00> : vector<1x1800xf32>
    %118 = tpu.matmul %116, %117, %cst_85 {dimension_numbers = #tpu.dot_dimension_numbers<[1], [0], [0], [1], [0, 0, 1, 1], [], []>} : vector<1x16xbf16>, vector<16x1800xbf16>, vector<1x1800xf32> -> vector<1x1800xf32>
    %119 = arith.addf %112, %118 : vector<1x1800xf32>
    %c0_86 = arith.constant 0 : index
    %c129_87 = arith.constant 129 : index
    %120 = vector.load %arg8[%c0_86, %c129_87] : memref<16x2056xf32, #tpu.memory_space<vmem>>, vector<16x1800xf32>
    %c5_88 = arith.constant 5 : index
    %c0_89 = arith.constant 0 : index
    %c0_90 = arith.constant 0 : index
    %121 = vector.load %arg5[%c5_88, %c0_89, %c0_90] : memref<9x1x16xf32, #tpu.memory_space<vmem>>, vector<1x1x16xf32>
    %122 = vector.shape_cast %121 : vector<1x1x16xf32> to vector<1x16xf32>
    %123 = arith.truncf %122 : vector<1x16xf32> to vector<1x16xbf16>
    %124 = arith.truncf %120 : vector<16x1800xf32> to vector<16x1800xbf16>
    %cst_91 = arith.constant dense<0.000000e+00> : vector<1x1800xf32>
    %125 = tpu.matmul %123, %124, %cst_91 {dimension_numbers = #tpu.dot_dimension_numbers<[1], [0], [0], [1], [0, 0, 1, 1], [], []>} : vector<1x16xbf16>, vector<16x1800xbf16>, vector<1x1800xf32> -> vector<1x1800xf32>
    %126 = arith.addf %119, %125 : vector<1x1800xf32>
    %c0_92 = arith.constant 0 : index
    %c157_93 = arith.constant 157 : index
    %127 = vector.load %arg8[%c0_92, %c157_93] : memref<16x2056xf32, #tpu.memory_space<vmem>>, vector<16x1800xf32>
    %c6_94 = arith.constant 6 : index
    %c0_95 = arith.constant 0 : index
    %c0_96 = arith.constant 0 : index
    %128 = vector.load %arg5[%c6_94, %c0_95, %c0_96] : memref<9x1x16xf32, #tpu.memory_space<vmem>>, vector<1x1x16xf32>
    %129 = vector.shape_cast %128 : vector<1x1x16xf32> to vector<1x16xf32>
    %130 = arith.truncf %129 : vector<1x16xf32> to vector<1x16xbf16>
    %131 = arith.truncf %127 : vector<16x1800xf32> to vector<16x1800xbf16>
    %cst_97 = arith.constant dense<0.000000e+00> : vector<1x1800xf32>
    %132 = tpu.matmul %130, %131, %cst_97 {dimension_numbers = #tpu.dot_dimension_numbers<[1], [0], [0], [1], [0, 0, 1, 1], [], []>} : vector<1x16xbf16>, vector<16x1800xbf16>, vector<1x1800xf32> -> vector<1x1800xf32>
    %133 = arith.addf %126, %132 : vector<1x1800xf32>
    %c0_98 = arith.constant 0 : index
    %c158_99 = arith.constant 158 : index
    %134 = vector.load %arg8[%c0_98, %c158_99] : memref<16x2056xf32, #tpu.memory_space<vmem>>, vector<16x1800xf32>
    %c7_100 = arith.constant 7 : index
    %c0_101 = arith.constant 0 : index
    %c0_102 = arith.constant 0 : index
    %135 = vector.load %arg5[%c7_100, %c0_101, %c0_102] : memref<9x1x16xf32, #tpu.memory_space<vmem>>, vector<1x1x16xf32>
    %136 = vector.shape_cast %135 : vector<1x1x16xf32> to vector<1x16xf32>
    %137 = arith.truncf %136 : vector<1x16xf32> to vector<1x16xbf16>
    %138 = arith.truncf %134 : vector<16x1800xf32> to vector<16x1800xbf16>
    %cst_103 = arith.constant dense<0.000000e+00> : vector<1x1800xf32>
    %139 = tpu.matmul %137, %138, %cst_103 {dimension_numbers = #tpu.dot_dimension_numbers<[1], [0], [0], [1], [0, 0, 1, 1], [], []>} : vector<1x16xbf16>, vector<16x1800xbf16>, vector<1x1800xf32> -> vector<1x1800xf32>
    %140 = arith.addf %133, %139 : vector<1x1800xf32>
    %c0_104 = arith.constant 0 : index
    %c159_105 = arith.constant 159 : index
    %141 = vector.load %arg8[%c0_104, %c159_105] : memref<16x2056xf32, #tpu.memory_space<vmem>>, vector<16x1800xf32>
    %c8_106 = arith.constant 8 : index
    %c0_107 = arith.constant 0 : index
    %c0_108 = arith.constant 0 : index
    %142 = vector.load %arg5[%c8_106, %c0_107, %c0_108] : memref<9x1x16xf32, #tpu.memory_space<vmem>>, vector<1x1x16xf32>
    %143 = vector.shape_cast %142 : vector<1x1x16xf32> to vector<1x16xf32>
    %144 = arith.truncf %143 : vector<1x16xf32> to vector<1x16xbf16>
    %145 = arith.truncf %141 : vector<16x1800xf32> to vector<16x1800xbf16>
    %cst_109 = arith.constant dense<0.000000e+00> : vector<1x1800xf32>
    %146 = tpu.matmul %144, %145, %cst_109 {dimension_numbers = #tpu.dot_dimension_numbers<[1], [0], [0], [1], [0, 0, 1, 1], [], []>} : vector<1x16xbf16>, vector<16x1800xbf16>, vector<1x1800xf32> -> vector<1x1800xf32>
    %147 = arith.addf %140, %146 : vector<1x1800xf32>
    %c0_110 = arith.constant 0 : index
    %c0_111 = arith.constant 0 : index
    %148 = vector.load %arg6[%c0_110, %c0_111] : memref<1x1xf32, #tpu.memory_space<vmem>>, vector<1x1xf32>
    %149 = vector.broadcast %148 : vector<1x1xf32> to vector<1x1800xf32>
    %150 = arith.addf %147, %149 : vector<1x1800xf32>
    %c0_112 = arith.constant 0 : index
    %c0_113 = arith.constant 0 : index
    %c0_114 = arith.constant 0 : index
    %151 = vector.load %arg7[%c0_112, %c0_113, %c0_114] : memref<1x1x1800xf32, #tpu.memory_space<vmem>>, vector<1x1x1800xf32>
    %152 = vector.shape_cast %151 : vector<1x1x1800xf32> to vector<1x1800xf32>
    %153 = vector.shape_cast %150 : vector<1x1800xf32> to vector<1x1x1800xf32>
    tpu.vector_store %arg7[%c0_112, %c0_113, %c0_114], %153 {strides = array<i32>} : memref<1x1x1800xf32, #tpu.memory_space<vmem>>, vector<1x1x1800xf32>,
    return
  }
  func.func @transform_0(%arg0: i32) -> (i32, i32, i32) {
    %c0_i32 = arith.constant 0 : i32
    %c0_i32_0 = arith.constant 0 : i32
    %c0_i32_1 = arith.constant 0 : i32
    return %arg0, %c0_i32, %c0_i32_0 : i32, i32, i32
  }
  func.func @transform_1(%arg0: i32) -> (i32, i32) {
    %c0_i32 = arith.constant 0 : i32
    %c0_i32_0 = arith.constant 0 : i32
    %c0_i32_1 = arith.constant 0 : i32
    return %c0_i32, %c0_i32_0 : i32, i32
  }
  func.func @transform_2(%arg0: i32) -> (i32, i32, i32) {
    %c0_i32 = arith.constant 0 : i32
    %c0_i32_0 = arith.constant 0 : i32
    %c0_i32_1 = arith.constant 0 : i32
    %c0_i32_2 = arith.constant 0 : i32
    return %c0_i32, %c0_i32_0, %c0_i32_1 : i32, i32, i32
  }
  func.func @transform_3(%arg0: i32) -> (i32, i32) {
    %c0_i32 = arith.constant 0 : i32
    %c0_i32_0 = arith.constant 0 : i32
    %c0_i32_1 = arith.constant 0 : i32
    return %c0_i32, %c0_i32_0 : i32, i32
  }
  func.func @transform_4(%arg0: i32) -> (i32, i32, i32) {
    %c0_i32 = arith.constant 0 : i32
    %c0_i32_0 = arith.constant 0 : i32
    %c0_i32_1 = arith.constant 0 : i32
    %c0_i32_2 = arith.constant 0 : i32
    return %c0_i32, %c0_i32_0, %c0_i32_1 : i32, i32, i32
  }
  func.func @transform_5(%arg0: i32) -> (i32, i32) {
    %c0_i32 = arith.constant 0 : i32
    %c0_i32_0 = arith.constant 0 : i32
    %c0_i32_1 = arith.constant 0 : i32
    return %c0_i32, %c0_i32_0 : i32, i32
  }
  func.func @transform_6(%arg0: i32) -> (i32, i32, i32) {
    %c0_i32 = arith.constant 0 : i32
    %c0_i32_0 = arith.constant 0 : i32
    %c0_i32_1 = arith.constant 0 : i32
    return %arg0, %c0_i32, %c0_i32_0 : i32, i32, i32
  }
}

</mosaic_0001>

<bundles_post_ra>
// kernel: mnist_ae_forward.3
= control target key start
LH: loop header
LB: loop body
LE: loop exit
PB: predicated region body
PF: predicated region fallthrough
CT: control target
= control target key end

     0   :  { %v10366_v0 = vmov 0   ;;  %v40_v17 = vlaneseq  ;;  %s7048_s7 = smov 127   ;;  %s7049_s10 = smov 126   ;;  %vm308_vm0 = vcmask 1039360   ;;  %vm530_vm1 = vcmask 1031168   ;;  %s10359_s2 = inlined_call_operand.vmem [shape: f32[9,16,1], index: 2, kind: input, shape index: {}]   ;;  %s10360_s0 = inlined_call_operand.vmem [shape: f32[1,1,2056], index: 0, kind: input, shape index: {}]   ;;  %s10361_s3 = inlined_call_operand.vmem [shape: f32[16,1], index: 3, kind: input, shape index: {}]   ;;  %s10362_s1 = inlined_call_operand.vmem [shape: f32[1,1800], index: 1, kind: input, shape index: {}]   ;;  %s10363_s4 = inlined_call_operand.vmem [shape: f32[9,16,16], index: 4, kind: input, shape index: {}]   ;;  %s10364_s5 = inlined_call_operand.vmem [shape: f32[16,1], index: 5, kind: input, shape index: {}]   ;;  %s10365_s6 = inlined_call_operand.vmem [shape: f32[1,16,1800], index: 6, kind: output, shape index: {}]  }
   0x1   :  { %7044 = vset.pattern.permute.xlu1 %v10366_v0  ;;  %v6627_v1 = vld [vmem:[%s10359_s2 + $0x10] sm:$0xff]  ;;  %7043 = vset.pattern.permute.xlu0 %v10366_v0  ;;  %v6628_v2 = vld [vmem:[%s10359_s2 + $0x18] sm:$0xff]  ;;  %v26_v3 = vld [vmem:[%s10359_s2] sm:$0xff]  ;;  %s7051_s17 = smov 97   ;;  %s7052_s18 = smov 96   ;;  %vm844_vm2 = vcmask 801792  }
   0x2   :  { %180 = vperm.xlu1 %7044, %v6627_v1   ;;  %2769 = vmatprep.mubr.bf16.mxu1 %v10366_v0  ;;  %v27_v4 = vld [vmem:[%s10359_s2 + $0x8] sm:$0xff]  ;;  %v6629_v6 = vld [vmem:[%s10359_s2 + $0x20] sm:$0xff]  ;;  %v6632_v7 = vld [vmem:[%s10359_s2 + $0x38] sm:$0xff]  ;;  %v41_v18 = vshrl.u32 %v40_v17, 7  ;;  %s7053_s19 = smov 68   ;;  %s7054_s25 = smov 67  }
   0x3   :  { %2726 = vmatprep.mubr.bf16.mxu0 %v10366_v0  ;;  %30 = vperm.xlu0 %7043, %v26_v3   ;;  %v6630_v5 = vld [vmem:[%s10359_s2 + $0x28] sm:$0xff]  ;;  %v6631_v8 = vld [vmem:[%s10359_s2 + $0x30] sm:$0xff]  ;;  %v6633_v10 = vld [vmem:[%s10359_s2 + $0x40] sm:$0xff]  ;;  %vm1147_vm3 = vcmask 793600   ;;  %vm1369_vm4 = vcmask 785408   ;;  %vm1591_vm5 = vcmask 556032  }
   0x4   :  { %v6634_v9 = vld [vmem:[%s10359_s2 + $0x48] sm:$0xff]  ;;  %v6636_v11 = vld [vmem:[%s10359_s2 + $0x58] sm:$0xff]  ;;  %v6635_v12 = vld [vmem:[%s10359_s2 + $0x50] sm:$0xff]  ;;  %v7150_v19 = vsub.s32 1, %v41_v18  ;;  %v7152_v20 = vsub.s32 0, %v41_v18  ;;  %v7163_v24 = vsub.s32 3, %v41_v18 }
   0x5   :  { %v6638_v13 = vld [vmem:[%s10359_s2 + $0x68] sm:$0xff]  ;;  %v6637_v14 = vld [vmem:[%s10359_s2 + $0x60] sm:$0xff]  ;;  %v6640_v15 = vld [vmem:[%s10359_s2 + $0x78] sm:$0xff]  ;;  %v7165_v25 = vsub.s32 2, %v41_v18  ;;  %v7167_v27 = vsub.s32 5, %v41_v18  ;;  %v7169_v28 = vsub.s32 4, %v41_v18 }
   0x6   :  { %185 = vperm.xlu1 %7044, %v6628_v2   ;;  %v6639_v16 = vld [vmem:[%s10359_s2 + $0x70] sm:$0xff]  ;;  %v24_v21 = vld [vmem:[%s10360_s0] sm:$0xff]  ;;  %v7181_v33 = vsub.s32 7, %v41_v18  ;;  %v7183_v34 = vsub.s32 6, %v41_v18  ;;  %v25_v43 = vld [vmem:[%s10360_s0 + $0x8] sm:$0x7f] }
   0x7   :  { %35 = vperm.xlu0 %7043, %v27_v4   ;;  %v7158_v22 = vrot.slane %v24_v21, %v7150_v19  ;;  %v7161_v23 = vrot.slane %v24_v21, %v7152_v20  ;;  %v7174_v31 = vrot.slane %v24_v21, %v7163_v24  ;;  %v7177_v32 = vrot.slane %v24_v21, %v7165_v25  ;;  %s7058_s9 = smov 30   ;;  %s7059_s14 = smov 29  }
   0x8   :  { %v7188_v37 = vrot.slane %v24_v21, %v7167_v27  ;;  %v7191_v38 = vrot.slane %v24_v21, %v7169_v28  ;;  %v7198_v41 = vrot.slane %v24_v21, %v7181_v33  ;;  %v7201_v42 = vrot.slane %v24_v21, %v7183_v34  ;;  %s7060_s15 = smov 1  }
   0x9   :  { %v7211_v46 = vrot.slane %v25_v43, %v7150_v19  ;;  %v7214_v47 = vrot.slane %v25_v43, %v7152_v20  ;;  %v7221_v50 = vrot.slane %v25_v43, %v7163_v24  ;;  %v7224_v51 = vrot.slane %v25_v43, %v7165_v25 }
   0xa   :  { %407 = vperm.xlu1 %7044, %v6630_v5   ;;  %10578 = vst [vmem:[#allocation3_spill] sm:$0xff] %v7188_v37  ;;  %10579 = vst [vmem:[#allocation4_spill] sm:$0xff] %v7198_v41  ;;  %v7231_v54 = vrot.slane %v25_v43, %v7167_v27  ;;  %v7234_v55 = vrot.slane %v25_v43, %v7169_v28  ;;  %v7241_v58 = vrot.slane %v25_v43, %v7183_v34  ;;  %vm1813_vm6 = vcmask 547840  }
   0xb   :  { %402 = vperm.xlu0 %7043, %v6629_v6   ;;  %10580 = vst [vmem:[#allocation5_spill] sm:$0xff] %v7201_v42  ;;  %10581 = vst [vmem:[#allocation6_spill] sm:$0xff] %v7211_v46  ;;  %vm2035_vm7 = vcmask 539648   ;;  %vm2365_vm8 = vcmask 64512   ;;  %vm2474_vm9 = vcmask 252928   ;;  %vm2660_vm10 = vcmask 244736  }
   0xc   :  { %10582 = vst [vmem:[#allocation7_spill] sm:$0xff] %v7214_v47  ;;  %10583 = vst [vmem:[#allocation8_spill] sm:$0xff] %v7221_v50  ;;  %vm2690_vm11 = vcmask 130048   ;;  %vm7061_vm12 = vmmov 0   ;;  %vm3475_vm13 = vcmask 236544   ;;  %vm3980_vm14 = vcmask 7168  }
   0xd   :  { %10584 = vst [vmem:[#allocation9_spill] sm:$0xff] %v7224_v51  ;;  %10585 = vst [vmem:[#allocation10_spill] sm:$0xff] %v7231_v54  ;;  %vm5238_vm15 = vcmask 809984  }
   0xe   :  { %631 = vperm.xlu1 %7044, %v6632_v7   ;;  %10586 = vst [vmem:[#allocation11_spill] sm:$0xff] %v7234_v55  ;;  %10587 = vst [vmem:[#allocation12_spill] sm:$0xff] %v7241_v58 }
   0xf   :  { %626 = vperm.xlu0 %7043, %v6631_v8  }
  0x12   :  { %947 = vperm.xlu1 %7044, %v6634_v9  }
  0x13   :  { %942 = vperm.xlu0 %7043, %v6633_v10  }
  0x16   :  { %1246 = vperm.xlu1 %7044, %v6636_v11  }
  0x17   :  { %1241 = vperm.xlu0 %7043, %v6635_v12  }
  0x1a   :  { %1468 = vperm.xlu1 %7044, %v6638_v13  }
  0x1b   :  { %1463 = vperm.xlu0 %7043, %v6637_v14  }
  0x1e   :  { %1690 = vperm.xlu1 %7044, %v6640_v15  }
  0x1f   :  { %1685 = vperm.xlu0 %7043, %v6639_v16  }
  0x81   :  { %v181_v26 = vpop.permute.xlu1 %180 }
  0x82   :  { %v189_v29 = vmul.f32 %v181_v26, %v7158_v22  ;;  %v188_v30 = vmul.f32 %v181_v26, %v7161_v23  ;;  %v191_v35 = vmul.f32 %v181_v26, %v7174_v31  ;;  %v190_v36 = vmul.f32 %v181_v26, %v7177_v32  ;;  %v7265_v7 = vpop.permute.xlu0 %30 }
  0x83   :  { %v193_v39 = vmul.f32 %v181_v26, %v7188_v37  ;;  %v192_v40 = vmul.f32 %v181_v26, %v7191_v38  ;;  %v195_v44 = vmul.f32 %v181_v26, %v7198_v41  ;;  %v194_v45 = vmul.f32 %v181_v26, %v7201_v42  ;;  %10588 = vst [vmem:[#allocation13_spill] sm:$0xff] %v7265_v7 }
  0x84   :  { %250 = vrot.lane.b32.xlu1 %v189_v29, %s7048_s7  ;;  %248 = vrot.lane.b32.xlu0 %v188_v30, %s7048_s7  ;;  %v197_v48 = vmul.f32 %v181_v26, %v7211_v46  ;;  %v196_v49 = vmul.f32 %v181_v26, %v7214_v47  ;;  %v199_v52 = vmul.f32 %v181_v26, %v7221_v50 }
  0x85   :  { %v198_v53 = vmul.f32 %v181_v26, %v7224_v51  ;;  %v201_v56 = vmul.f32 %v181_v26, %v7231_v54  ;;  %v200_v57 = vmul.f32 %v181_v26, %v7234_v55  ;;  %v186_v59 = vpop.permute.xlu1 %185  ;;  %v202_v61 = vmul.f32 %v181_v26, %v7241_v58 }
  0x86   :  { %v203_v60 = vmul.f32 %v186_v59, %v7161_v23  ;;  %v205_v62 = vmul.f32 %v186_v59, %v7177_v32  ;;  %v204_v63 = vmul.f32 %v186_v59, %v7158_v22  ;;  %v207_v1 = vmul.f32 %v186_v59, %v7191_v38  ;;  %v7273_v12 = vpop.permute.xlu0 %35 }
  0x87   :  { %v206_v2 = vmul.f32 %v186_v59, %v7174_v31  ;;  %v209_v3 = vmul.f32 %v186_v59, %v7201_v42  ;;  %v208_v4 = vmul.f32 %v186_v59, %v7188_v37  ;;  %v211_v5 = vmul.f32 %v186_v59, %v7214_v47  ;;  %10589 = vst [vmem:[#allocation14_spill] sm:$0xff] %v7273_v12 }
  0x88   :  { %254 = vrot.lane.b32.xlu1 %v191_v35, %s7048_s7  ;;  %252 = vrot.lane.b32.xlu0 %v190_v36, %s7048_s7  ;;  %v210_v6 = vmul.f32 %v186_v59, %v7198_v41  ;;  %v213_v8 = vmul.f32 %v186_v59, %v7224_v51  ;;  %v212_v9 = vmul.f32 %v186_v59, %v7211_v46 }
  0x89   :  { %v215_v10 = vmul.f32 %v186_v59, %v7234_v55  ;;  %v214_v11 = vmul.f32 %v186_v59, %v7221_v50  ;;  %v217_v13 = vmul.f32 %v186_v59, %v7241_v58  ;;  %v216_v14 = vmul.f32 %v186_v59, %v7231_v54 }
  0x8a   :  { %v403_v15 = vpop.permute.xlu0 %402 }
  0x8b   :  { %v411_v16 = vmul.f32 %v403_v15, %v7158_v22  ;;  %v410_v17 = vmul.f32 %v403_v15, %v7161_v23  ;;  %v413_v18 = vmul.f32 %v403_v15, %v7174_v31  ;;  %v412_v21 = vmul.f32 %v403_v15, %v7177_v32 }
  0x8c   :  { %258 = vrot.lane.b32.xlu1 %v193_v39, %s7048_s7  ;;  %256 = vrot.lane.b32.xlu0 %v192_v40, %s7048_s7  ;;  %v415_v26 = vmul.f32 %v403_v15, %v7188_v37  ;;  %v414_v29 = vmul.f32 %v403_v15, %v7191_v38  ;;  %v417_v30 = vmul.f32 %v403_v15, %v7198_v41 }
  0x8d   :  { %v416_v35 = vmul.f32 %v403_v15, %v7201_v42  ;;  %v419_v36 = vmul.f32 %v403_v15, %v7211_v46  ;;  %v418_v39 = vmul.f32 %v403_v15, %v7214_v47  ;;  %v421_v40 = vmul.f32 %v403_v15, %v7221_v50 }
  0x8e   :  { %v420_v43 = vmul.f32 %v403_v15, %v7224_v51 }
  0x90   :  { %262 = vrot.lane.b32.xlu1 %v195_v44, %s7048_s7  ;;  %260 = vrot.lane.b32.xlu0 %v194_v45, %s7048_s7  ;;  %v408_v44 = vpop.permute.xlu1 %407  ;;  %v423_v45 = vmul.f32 %v403_v15, %v7231_v54 }
  0x91   :  { %v426_v59 = vmul.f32 %v408_v44, %v7158_v22 }
  0x94   :  { %266 = vrot.lane.b32.xlu1 %v197_v48, %s7048_s7  ;;  %264 = vrot.lane.b32.xlu0 %v196_v49, %s7048_s7  ;;  %v422_v48 = vmul.f32 %v403_v15, %v7234_v55  ;;  %v7309_v49 = vpop.permute.xlu1 %631 }
  0x98   :  { %270 = vrot.lane.b32.xlu1 %v199_v52, %s7048_s7  ;;  %268 = vrot.lane.b32.xlu0 %v198_v53, %s7048_s7  ;;  %v7311_v52 = vpop.permute.xlu0 %626  ;;  %v425_v53 = vmul.f32 %v408_v44, %v7161_v23 }
  0x9c   :  { %274 = vrot.lane.b32.xlu1 %v201_v56, %s7048_s7  ;;  %272 = vrot.lane.b32.xlu0 %v200_v57, %s7048_s7  ;;  %v424_v56 = vmul.f32 %v403_v15, %v7241_v58  ;;  %v427_v57 = vmul.f32 %v408_v44, %v7177_v32  ;;  %v435_v15 = vmul.f32 %v408_v44, %v7224_v51 }
  0xa0   :  { %278 = vrot.lane.b32.xlu1 %v203_v60, %s7048_s7  ;;  %276 = vrot.lane.b32.xlu0 %v202_v61, %s7048_s7  ;;  %v7319_v60 = vpop.permute.xlu1 %947  ;;  %v7321_v61 = vpop.permute.xlu0 %942 }
  0xa4   :  { %282 = vrot.lane.b32.xlu1 %v205_v62, %s7048_s7  ;;  %280 = vrot.lane.b32.xlu0 %v204_v63, %s7048_s7  ;;  %v429_v62 = vmul.f32 %v408_v44, %v7191_v38  ;;  %v428_v63 = vmul.f32 %v408_v44, %v7174_v31 }
  0xa8   :  { %286 = vrot.lane.b32.xlu1 %v207_v1, %s7048_s7  ;;  %284 = vrot.lane.b32.xlu0 %v206_v2, %s7048_s7  ;;  %v7329_v1 = vpop.permute.xlu1 %1246  ;;  %v7331_v2 = vpop.permute.xlu0 %1241 }
  0xac   :  { %290 = vrot.lane.b32.xlu1 %v209_v3, %s7048_s7  ;;  %288 = vrot.lane.b32.xlu0 %v208_v4, %s7048_s7  ;;  %v431_v3 = vmul.f32 %v408_v44, %v7201_v42  ;;  %v430_v4 = vmul.f32 %v408_v44, %v7188_v37 }
  0xb0   :  { %294 = vrot.lane.b32.xlu1 %v211_v5, %s7048_s7  ;;  %292 = vrot.lane.b32.xlu0 %v210_v6, %s7048_s7  ;;  %v6642_v5 = vld [vmem:[%s10359_s2 + $0x88] sm:$0xff]  ;;  %v6641_v6 = vld [vmem:[%s10359_s2 + $0x80] sm:$0xff]  ;;  %s7050_s2 = smov 98  }
  0xb4   :  { %298 = vrot.lane.b32.xlu1 %v213_v8, %s7048_s7  ;;  %296 = vrot.lane.b32.xlu0 %v212_v9, %s7048_s7  ;;  %v7343_v8 = vpop.permute.xlu1 %1468  ;;  %v7345_v9 = vpop.permute.xlu0 %1463 }
  0xb8   :  { %302 = vrot.lane.b32.xlu1 %v215_v10, %s7048_s7  ;;  %300 = vrot.lane.b32.xlu0 %v214_v11, %s7048_s7  ;;  %v433_v10 = vmul.f32 %v408_v44, %v7214_v47  ;;  %v432_v11 = vmul.f32 %v408_v44, %v7198_v41 }
  0xbc   :  { %306 = vrot.lane.b32.xlu1 %v217_v13, %s7048_s7  ;;  %304 = vrot.lane.b32.xlu0 %v216_v14, %s7048_s7  ;;  %v7351_v13 = vpop.permute.xlu1 %1690  ;;  %v7353_v14 = vpop.permute.xlu0 %1685 }
  0xc0   :  { %472 = vrot.lane.b32.xlu1 %v411_v16, %s7049_s10  ;;  %470 = vrot.lane.b32.xlu0 %v410_v17, %s7049_s10  ;;  %v434_v16 = vmul.f32 %v408_v44, %v7211_v46 }
  0xc4   :  { %476 = vrot.lane.b32.xlu1 %v413_v18, %s7049_s10  ;;  %474 = vrot.lane.b32.xlu0 %v412_v21, %s7049_s10  ;;  %v437_v21 = vmul.f32 %v408_v44, %v7234_v55 }
  0xc8   :  { %480 = vrot.lane.b32.xlu1 %v415_v26, %s7049_s10  ;;  %478 = vrot.lane.b32.xlu0 %v414_v29, %s7049_s10  ;;  %v436_v26 = vmul.f32 %v408_v44, %v7221_v50 }
  0xcc   :  { %484 = vrot.lane.b32.xlu1 %v417_v30, %s7049_s10  ;;  %482 = vrot.lane.b32.xlu0 %v416_v35, %s7049_s10  ;;  %v439_v35 = vmul.f32 %v408_v44, %v7241_v58 }
  0xd0   :  { %488 = vrot.lane.b32.xlu1 %v419_v36, %s7049_s10  ;;  %486 = vrot.lane.b32.xlu0 %v418_v39, %s7049_s10  ;;  %v438_v36 = vmul.f32 %v408_v44, %v7231_v54 }
  0xd4   :  { %492 = vrot.lane.b32.xlu1 %v421_v40, %s7049_s10  ;;  %490 = vrot.lane.b32.xlu0 %v420_v43, %s7049_s10  ;;  %v717_v43 = vmul.f32 %v7311_v52, %v7158_v22 }
  0xd8   :  { %496 = vrot.lane.b32.xlu1 %v423_v45, %s7049_s10  ;;  %494 = vrot.lane.b32.xlu0 %v422_v48, %s7049_s10  ;;  %v716_v45 = vmul.f32 %v7311_v52, %v7161_v23 }
  0xdc   :  { %500 = vrot.lane.b32.xlu1 %v425_v53, %s7049_s10  ;;  %498 = vrot.lane.b32.xlu0 %v424_v56, %s7049_s10  ;;  %v719_v53 = vmul.f32 %v7311_v52, %v7174_v31  ;;  %v718_v56 = vmul.f32 %v7311_v52, %v7177_v32 }
  0xe0   :  { %504 = vrot.lane.b32.xlu1 %v427_v57, %s7049_s10  ;;  %502 = vrot.lane.b32.xlu0 %v426_v59, %s7049_s10 }
  0xe4   :  { %508 = vrot.lane.b32.xlu1 %v429_v62, %s7049_s10  ;;  %506 = vrot.lane.b32.xlu0 %v428_v63, %s7049_s10  ;;  %v721_v62 = vmul.f32 %v7311_v52, %v7188_v37  ;;  %v720_v63 = vmul.f32 %v7311_v52, %v7191_v38 }
  0xe8   :  { %512 = vrot.lane.b32.xlu1 %v431_v3, %s7049_s10  ;;  %510 = vrot.lane.b32.xlu0 %v430_v4, %s7049_s10 }
  0xec   :  { %1912 = vperm.xlu1 %7044, %v6642_v5   ;;  %1907 = vperm.xlu0 %7043, %v6641_v6   ;;  %v735_v5 = vmul.f32 %v7309_v49, %v7174_v31  ;;  %v734_v6 = vmul.f32 %v7309_v49, %v7177_v32 }
  0xf0   :  { %516 = vrot.lane.b32.xlu1 %v433_v10, %s7049_s10  ;;  %514 = vrot.lane.b32.xlu0 %v432_v11, %s7049_s10 }
  0xf4   :  { %520 = vrot.lane.b32.xlu1 %v435_v15, %s7049_s10  ;;  %518 = vrot.lane.b32.xlu0 %v434_v16, %s7049_s10  ;;  %v737_v15 = vmul.f32 %v7309_v49, %v7188_v37  ;;  %v736_v16 = vmul.f32 %v7309_v49, %v7191_v38 }
  0xf6   :  { %v7359_v17 = vpop.permute.xlu1 %250  ;;  %v7361_v18 = vpop.permute.xlu0 %248 }
  0xf8   :  { %524 = vrot.lane.b32.xlu1 %v437_v21, %s7049_s10  ;;  %522 = vrot.lane.b32.xlu0 %v436_v26, %s7049_s10  ;;  %v7428_v21 = vld [vmem:[%s10360_s0 + $0x1] sm:$0xff] }
  0xf9   :  { %v7496_v58 = vrot.slane %v7428_v21, %v7152_v20 }
  0xfa   :  { %v7367_v29 = vpop.permute.xlu1 %254  ;;  %v7369_v30 = vpop.permute.xlu0 %252 }
  0xfb   :  { %v1042_v54 = vmul.f32 %v7496_v58, %v7319_v60 }
  0xfc   :  { %528 = vrot.lane.b32.xlu1 %v439_v35, %s7049_s10  ;;  %526 = vrot.lane.b32.xlu0 %v438_v36, %s7049_s10  ;;  %v733_v36 = vmul.f32 %v7309_v49, %v7158_v22 }
  0xfe   :  { %v7375_v39 = vpop.permute.xlu1 %258  ;;  %v7377_v40 = vpop.permute.xlu0 %256 }
  0xff   :  { %10590 = vst [vmem:[#allocation15_spill] sm:$0xff] %v7375_v39 }
 0x100   :  { %782 = vrot.lane.b32.xlu1 %v717_v43, %s7050_s2  ;;  %780 = vrot.lane.b32.xlu0 %v716_v45, %s7050_s2  ;;  %v732_v43 = vmul.f32 %v7309_v49, %v7161_v23  ;;  %v7442_v45 = vrot.slane %v7428_v21, %v7165_v25 }
 0x102   :  { %v7385_v44 = vpop.permute.xlu1 %262  ;;  %v7387_v48 = vpop.permute.xlu0 %260 }
 0x103   :  { %10591 = vst [vmem:[#allocation16_spill] sm:$0xff] %v7385_v44  ;;  %10592 = vst [vmem:[#allocation17_spill] sm:$0xff] %v7387_v48 }
 0x104   :  { %786 = vrot.lane.b32.xlu1 %v719_v53, %s7050_s2  ;;  %784 = vrot.lane.b32.xlu0 %v718_v56, %s7050_s2  ;;  %v7446_v53 = vrot.slane %v7428_v21, %v7150_v19 }
 0x106   :  { %v7395_v57 = vpop.permute.xlu1 %266  ;;  %v7397_v59 = vpop.permute.xlu0 %264 }
 0x107   :  { %10593 = vst [vmem:[#allocation18_spill] sm:$0xff] %v7395_v57  ;;  %10594 = vst [vmem:[#allocation19_spill] sm:$0xff] %v7397_v59 }
 0x108   :  { %790 = vrot.lane.b32.xlu1 %v721_v62, %s7050_s2  ;;  %788 = vrot.lane.b32.xlu0 %v720_v63, %s7050_s2  ;;  %v1029_v63 = vmul.f32 %v7442_v45, %v7321_v61 }
 0x10a   :  { %v7405_v3 = vpop.permute.xlu1 %270  ;;  %v7407_v4 = vpop.permute.xlu0 %268 }
 0x10b   :  { %10595 = vst [vmem:[#allocation20_spill] sm:$0xff] %v7405_v3  ;;  %10596 = vst [vmem:[#allocation21_spill] sm:$0xff] %v7407_v4  ;;  %v1027_v4 = vmul.f32 %v7496_v58, %v7321_v61 }
 0x10c   :  { %818 = vrot.lane.b32.xlu1 %v735_v5, %s7050_s2  ;;  %816 = vrot.lane.b32.xlu0 %v734_v6, %s7050_s2  ;;  %v1028_v5 = vmul.f32 %v7446_v53, %v7321_v61  ;;  %v7460_v6 = vrot.slane %v7428_v21, %v7169_v28 }
 0x10e   :  { %v7415_v10 = vpop.permute.xlu1 %274  ;;  %v7417_v11 = vpop.permute.xlu0 %272 }
 0x10f   :  { %10597 = vst [vmem:[#allocation22_spill] sm:$0xff] %v7415_v10  ;;  %10598 = vst [vmem:[#allocation23_spill] sm:$0xff] %v7417_v11  ;;  %v1043_v10 = vmul.f32 %v7446_v53, %v7319_v60 }
 0x110   :  { %822 = vrot.lane.b32.xlu1 %v737_v15, %s7050_s2  ;;  %820 = vrot.lane.b32.xlu0 %v736_v16, %s7050_s2  ;;  %v7464_v15 = vrot.slane %v7428_v21, %v7163_v24 }
 0x112   :  { %v7430_v26 = vpop.permute.xlu1 %278  ;;  %v7432_v35 = vpop.permute.xlu0 %276 }
 0x113   :  { %10599 = vst [vmem:[#allocation24_spill] sm:$0xff] %v7432_v35  ;;  %v1044_v35 = vmul.f32 %v7442_v45, %v7319_v60 }
 0x114   :  { %814 = vrot.lane.b32.xlu1 %v733_v36, %s7050_s2  ;;  %812 = vrot.lane.b32.xlu0 %v732_v43, %s7050_s2  ;;  %v1031_v43 = vmul.f32 %v7460_v6, %v7321_v61 }
 0x116   :  { %v7448_v56 = vpop.permute.xlu1 %282  ;;  %v7450_v62 = vpop.permute.xlu0 %280 }
 0x118   :  { %1091 = vrot.lane.b32.xlu1 %v1029_v63, %s7051_s17  ;;  %1089 = vrot.lane.b32.xlu0 %v1028_v5, %s7051_s17  ;;  %v1030_v63 = vmul.f32 %v7464_v15, %v7321_v61 }
 0x11a   :  { %v7466_v16 = vpop.permute.xlu1 %286  ;;  %v7468_v36 = vpop.permute.xlu0 %284 }
 0x11c   :  { %1095 = vrot.lane.b32.xlu1 %v1031_v43, %s7051_s17  ;;  %1093 = vrot.lane.b32.xlu0 %v1030_v63, %s7051_s17  ;;  %v1046_v43 = vmul.f32 %v7460_v6, %v7319_v60  ;;  %v1045_v63 = vmul.f32 %v7464_v15, %v7319_v60 }
 0x11e   :  { %v7476_v5 = vpop.permute.xlu1 %290  ;;  %v7478_v0 = vpop.permute.xlu0 %288 }
 0x11f   :  { %10600 = vst [vmem:[#allocation25_spill] sm:$0xff] %v7476_v5  ;;  %v1488_v5 = vmul.f32 %v7343_v8, %v7442_v45 }
 0x120   :  { %1121 = vrot.lane.b32.xlu1 %v1044_v35, %s7051_s17  ;;  %1119 = vrot.lane.b32.xlu0 %v1043_v10, %s7051_s17 }
 0x122   :  { %v7486_v11 = vpop.permute.xlu1 %294  ;;  %v7488_v3 = vpop.permute.xlu0 %292 }
 0x123   :  { %10601 = vst [vmem:[#allocation26_spill] sm:$0xff] %v7486_v11  ;;  %10602 = vst [vmem:[#allocation27_spill] sm:$0xff] %v7488_v3 }
 0x124   :  { %1125 = vrot.lane.b32.xlu1 %v1046_v43, %s7051_s17  ;;  %1123 = vrot.lane.b32.xlu0 %v1045_v63, %s7051_s17  ;;  %v1251_v43 = vmul.f32 %v7331_v2, %v7442_v45  ;;  %v1250_v63 = vmul.f32 %v7331_v2, %v7446_v53 }
 0x126   :  { %v7500_v35 = vpop.permute.xlu1 %298  ;;  %v7502_v10 = vpop.permute.xlu0 %296 }
 0x127   :  { %10603 = vst [vmem:[#allocation28_spill] sm:$0xff] %v7500_v35  ;;  %10604 = vst [vmem:[#allocation29_spill] sm:$0xff] %v7502_v10 }
 0x128   :  { %1117 = vrot.lane.b32.xlu1 %v1042_v54, %s7051_s17  ;;  %1087 = vrot.lane.b32.xlu0 %v1027_v4, %s7051_s17  ;;  %v1253_v4 = vmul.f32 %v7331_v2, %v7460_v6 }
 0x12a   :  { %v7510_v55 = vpop.permute.xlu1 %302  ;;  %v7512_v50 = vpop.permute.xlu0 %300 }
 0x12b   :  { %10605 = vst [vmem:[#allocation30_spill] sm:$0xff] %v7510_v55  ;;  %10606 = vst [vmem:[#allocation31_spill] sm:$0xff] %v7512_v50  ;;  %v1252_v55 = vmul.f32 %v7331_v2, %v7464_v15 }
 0x12c   :  { %1313 = vrot.lane.b32.xlu1 %v1251_v43, %s7052_s18  ;;  %1311 = vrot.lane.b32.xlu0 %v1250_v63, %s7052_s18  ;;  %v1266_v43 = vmul.f32 %v7329_v1, %v7442_v45  ;;  %v1265_v63 = vmul.f32 %v7329_v1, %v7446_v53 }
 0x12e   :  { %v7520_v35 = vpop.permute.xlu1 %306  ;;  %v7522_v54 = vpop.permute.xlu0 %304 }
 0x12f   :  { %10607 = vst [vmem:[#allocation32_spill] sm:$0xff] %v7520_v35  ;;  %10608 = vst [vmem:[#allocation33_spill] sm:$0xff] %v7522_v54 }
 0x130   :  { %1317 = vrot.lane.b32.xlu1 %v1253_v4, %s7052_s18  ;;  %1315 = vrot.lane.b32.xlu0 %v1252_v55, %s7052_s18  ;;  %v1268_v55 = vmul.f32 %v7329_v1, %v7460_v6  ;;  %v1267_v4 = vmul.f32 %v7329_v1, %v7464_v15 }
 0x132   :  { %v7530_v50 = vpop.permute.xlu1 %472  ;;  %v7532_v51 = vpop.permute.xlu0 %470 }
 0x134   :  { %1343 = vrot.lane.b32.xlu1 %v1266_v43, %s7052_s18  ;;  %1341 = vrot.lane.b32.xlu0 %v1265_v63, %s7052_s18  ;;  %v1264_v43 = vmul.f32 %v7329_v1, %v7496_v58  ;;  %v1249_v63 = vmul.f32 %v7331_v2, %v7496_v58 }
 0x136   :  { %v7540_v35 = vpop.permute.xlu1 %476  ;;  %v7542_v54 = vpop.permute.xlu0 %474 }
 0x138   :  { %1347 = vrot.lane.b32.xlu1 %v1268_v55, %s7052_s18  ;;  %1345 = vrot.lane.b32.xlu0 %v1267_v4, %s7052_s18  ;;  %v1473_v55 = vmul.f32 %v7345_v9, %v7442_v45  ;;  %v1472_v4 = vmul.f32 %v7345_v9, %v7446_v53 }
 0x13a   :  { %v7550_v46 = vpop.permute.xlu1 %480  ;;  %v7552_v10 = vpop.permute.xlu0 %478 }
 0x13c   :  { %1339 = vrot.lane.b32.xlu1 %v1264_v43, %s7052_s18  ;;  %1309 = vrot.lane.b32.xlu0 %v1249_v63, %s7052_s18  ;;  %v1475_v43 = vmul.f32 %v7345_v9, %v7460_v6  ;;  %v1474_v63 = vmul.f32 %v7345_v9, %v7464_v15 }
 0x13e   :  { %v7560_v11 = vpop.permute.xlu1 %484  ;;  %v7562_v3 = vpop.permute.xlu0 %482 }
 0x13f   :  { %10609 = vst [vmem:[#allocation34_spill] sm:$0xff] %v7560_v11  ;;  %10610 = vst [vmem:[#allocation35_spill] sm:$0xff] %v7562_v3 }
 0x140   :  { %1535 = vrot.lane.b32.xlu1 %v1473_v55, %s7053_s19  ;;  %1533 = vrot.lane.b32.xlu0 %v1472_v4, %s7053_s19  ;;  %v1487_v55 = vmul.f32 %v7343_v8, %v7446_v53 }
 0x142   :  { %v7574_v11 = vpop.permute.xlu1 %488  ;;  %v7576_v3 = vpop.permute.xlu0 %486 }
 0x143   :  { %10611 = vst [vmem:[#allocation36_spill] sm:$0xff] %v7574_v11  ;;  %10612 = vst [vmem:[#allocation37_spill] sm:$0xff] %v7576_v3  ;;  %v1490_v11 = vmul.f32 %v7343_v8, %v7460_v6 }
 0x144   :  { %1539 = vrot.lane.b32.xlu1 %v1475_v43, %s7053_s19  ;;  %1537 = vrot.lane.b32.xlu0 %v1474_v63, %s7053_s19  ;;  %v1489_v43 = vmul.f32 %v7343_v8, %v7464_v15  ;;  %v2124_v63 = vld [vmem:[%s10361_s3] sm:$0xff] }
 0x146   :  { %v7586_v4 = vpop.permute.xlu1 %492  ;;  %v7588_v57 = vpop.permute.xlu0 %490 }
 0x147   :  { %10613 = vst [vmem:[#allocation38_spill] sm:$0xff] %v7586_v4  ;;  %10614 = vst [vmem:[#allocation39_spill] sm:$0xff] %v7588_v57  ;;  %v1486_v57 = vmul.f32 %v7343_v8, %v7496_v58 }
 0x148   :  { %1565 = vrot.lane.b32.xlu1 %v1488_v5, %s7053_s19  ;;  %1563 = vrot.lane.b32.xlu0 %v1487_v55, %s7053_s19  ;;  %v2125_v5 = vld [vmem:[%s10361_s3 + $0x8] sm:$0xff] }
 0x14a   :  { %v7602_v55 = vpop.permute.xlu1 %496  ;;  %v7604_v4 = vpop.permute.xlu0 %494 }
 0x14b   :  { %10615 = vst [vmem:[#allocation40_spill] sm:$0xff] %v7602_v55  ;;  %10616 = vst [vmem:[#allocation41_spill] sm:$0xff] %v7604_v4  ;;  %v7619_v55 = vld [vmem:[%s10360_s0 + $0x8] sm:$0xff] }
 0x14c   :  { %1569 = vrot.lane.b32.xlu1 %v1490_v11, %s7053_s19  ;;  %1567 = vrot.lane.b32.xlu0 %v1489_v43, %s7053_s19  ;;  %v1471_v11 = vmul.f32 %v7345_v9, %v7496_v58 }
 0x14e   :  { %v7612_v43 = vpop.permute.xlu1 %500  ;;  %v7614_v3 = vpop.permute.xlu0 %498 }
 0x14f   :  { %10617 = vst [vmem:[#allocation42_spill] sm:$0xff] %v7612_v43  ;;  %10618 = vst [vmem:[#allocation43_spill] sm:$0xff] %v7614_v3 }
 0x150   :  { %2133 = vperm.xlu1 %7044, %v2125_v5   ;;  %2128 = vperm.xlu0 %7043, %v2124_v63   ;;  %v723_v5 = vmul.f32 %v7311_v52, %v7198_v41  ;;  %v722_v63 = vmul.f32 %v7311_v52, %v7201_v42 }
 0x152   :  { %v7633_v59 = vpop.permute.xlu1 %504  ;;  %v7635_v44 = vpop.permute.xlu0 %502 }
 0x153   :  { %10619 = vst [vmem:[#allocation44_spill] sm:$0xff] %v7633_v59  ;;  %10620 = vst [vmem:[#allocation45_spill] sm:$0xff] %v7635_v44 }
 0x154   :  { %1561 = vrot.lane.b32.xlu1 %v1486_v57, %s7053_s19  ;;  %1531 = vrot.lane.b32.xlu0 %v1471_v11, %s7053_s19  ;;  %v675_v57 = vrot.slane %v7619_v55, %v7150_v19  ;;  %v671_v11 = vrot.slane %v7619_v55, %v7152_v20 }
 0x156   :  { %v725_v3 = vmul.f32 %v675_v57, %v7311_v52  ;;  %v724_v4 = vmul.f32 %v671_v11, %v7311_v52  ;;  %v7645_v48 = vpop.permute.xlu1 %508  ;;  %v7647_v47 = vpop.permute.xlu0 %506  ;;  %v741_v37 = vmul.f32 %v675_v57, %v7309_v49  ;;  %v1696_v57 = vmul.f32 %v7353_v14, %v7464_v15 }
 0x157   :  { %10621 = vst [vmem:[#allocation46_spill] sm:$0xff] %v7645_v48  ;;  %10622 = vst [vmem:[#allocation47_spill] sm:$0xff] %v7647_v47 }
 0x158   :  { %794 = vrot.lane.b32.xlu1 %v723_v5, %s7050_s2  ;;  %792 = vrot.lane.b32.xlu0 %v722_v63, %s7050_s2  ;;  %v739_v5 = vmul.f32 %v7309_v49, %v7198_v41  ;;  %v738_v63 = vmul.f32 %v7309_v49, %v7201_v42 }
 0x15a   :  { %v7657_v41 = vpop.permute.xlu1 %512 }
 0x15b   :  { %10623 = vst [vmem:[#allocation48_spill] sm:$0xff] %v7657_v41  ;;  %v1710_v41 = vmul.f32 %v7351_v13, %v7442_v45 }
 0x15c   :  { %798 = vrot.lane.b32.xlu1 %v725_v3, %s7050_s2  ;;  %796 = vrot.lane.b32.xlu0 %v724_v4, %s7050_s2  ;;  %v740_v3 = vmul.f32 %v671_v11, %v7309_v49  ;;  %v1695_v4 = vmul.f32 %v7353_v14, %v7442_v45 }
 0x160   :  { %826 = vrot.lane.b32.xlu1 %v739_v5, %s7050_s2  ;;  %824 = vrot.lane.b32.xlu0 %v738_v63, %s7050_s2  ;;  %v1694_v5 = vmul.f32 %v7353_v14, %v7446_v53  ;;  %v7659_v63 = vpop.permute.xlu0 %510 }
 0x161   :  { %10624 = vst [vmem:[#allocation49_spill] sm:$0xff] %v7659_v63  ;;  %v1712_v63 = vmul.f32 %v7351_v13, %v7460_v6 }
 0x164   :  { %830 = vrot.lane.b32.xlu1 %v741_v37, %s7050_s2  ;;  %828 = vrot.lane.b32.xlu0 %v740_v3, %s7050_s2  ;;  %v1697_v37 = vmul.f32 %v7353_v14, %v7460_v6 }
 0x168   :  { %1757 = vrot.lane.b32.xlu1 %v1695_v4, %s7054_s25  ;;  %1755 = vrot.lane.b32.xlu0 %v1694_v5, %s7054_s25  ;;  %v1709_v4 = vmul.f32 %v7351_v13, %v7446_v53 }
 0x16b   :  { %v7667_v11 = vpop.permute.xlu1 %1912  ;;  %v7669_v3 = vpop.permute.xlu0 %1907 }
 0x16c   :  { %1761 = vrot.lane.b32.xlu1 %v1697_v37, %s7054_s25  ;;  %1759 = vrot.lane.b32.xlu0 %v1696_v57, %s7054_s25  ;;  %v1711_v37 = vmul.f32 %v7351_v13, %v7464_v15 }
 0x16f   :  { %v7677_v5 = vpop.permute.xlu1 %516  ;;  %v7679_v42 = vpop.permute.xlu0 %514 }
 0x170   :  { %10625 = vst [vmem:[#allocation50_spill] sm:$0xff] %v7677_v5  ;;  %10626 = vst [vmem:[#allocation51_spill] sm:$0xff] %v7679_v42  ;;  %1787 = vrot.lane.b32.xlu1 %v1710_v41, %s7054_s25  ;;  %1785 = vrot.lane.b32.xlu0 %v1709_v4, %s7054_s25  ;;  %v1708_v5 = vmul.f32 %v7351_v13, %v7496_v58  ;;  %v1693_v41 = vmul.f32 %v7353_v14, %v7496_v58 }
 0x173   :  { %v7687_v57 = vpop.permute.xlu1 %520  ;;  %v7689_v48 = vpop.permute.xlu0 %518 }
 0x174   :  { %10627 = vst [vmem:[#allocation52_spill] sm:$0xff] %v7687_v57  ;;  %10628 = vst [vmem:[#allocation53_spill] sm:$0xff] %v7689_v48  ;;  %1791 = vrot.lane.b32.xlu1 %v1712_v63, %s7054_s25  ;;  %1789 = vrot.lane.b32.xlu0 %v1711_v37, %s7054_s25  ;;  %v7705_v57 = vrot.slane %v7428_v21, %v7183_v34  ;;  %v7709_v63 = vrot.slane %v7428_v21, %v7167_v27  ;;  %v7714_v37 = vld [vmem:[%s10360_s0 + $0x9] sm:$0x7f]  ;;  %s7055_s0 = smov 66  }
 0x175   :  { %v7726_v48 = vrot.slane %v7428_v21, %v7181_v33  ;;  %v7732_v47 = vrot.slane %v7714_v37, %v7152_v20 }
 0x176   :  { %v1048_v21 = vmul.f32 %v7705_v57, %v7319_v60 }
 0x177   :  { %v7697_v4 = vpop.permute.xlu1 %524  ;;  %v7699_v42 = vpop.permute.xlu0 %522  ;;  %v1035_v59 = vmul.f32 %v7732_v47, %v7321_v61 }
 0x178   :  { %10629 = vst [vmem:[#allocation54_spill] sm:$0xff] %v7697_v4  ;;  %10630 = vst [vmem:[#allocation55_spill] sm:$0xff] %v7699_v42  ;;  %1783 = vrot.lane.b32.xlu1 %v1708_v5, %s7054_s25  ;;  %1753 = vrot.lane.b32.xlu0 %v1693_v41, %s7054_s25  ;;  %v1033_v4 = vmul.f32 %v7705_v57, %v7321_v61  ;;  %v1032_v5 = vmul.f32 %v7709_v63, %v7321_v61 }
 0x17b   :  { %v7720_v41 = vpop.permute.xlu1 %528  ;;  %v7722_v42 = vpop.permute.xlu0 %526 }
 0x17c   :  { %10631 = vst [vmem:[#allocation56_spill] sm:$0xff] %v7720_v41  ;;  %10632 = vst [vmem:[#allocation57_spill] sm:$0xff] %v7722_v42  ;;  %1099 = vrot.lane.b32.xlu1 %v1033_v4, %s7051_s17  ;;  %1097 = vrot.lane.b32.xlu0 %v1032_v5, %s7051_s17  ;;  %v1034_v41 = vmul.f32 %v7726_v48, %v7321_v61  ;;  %v1047_v4 = vmul.f32 %v7709_v63, %v7319_v60 }
 0x17f   :  { %v7738_v43 = vpop.permute.xlu1 %782  ;;  %v7740_v42 = vpop.permute.xlu0 %780 }
 0x180   :  { %10633 = vst [vmem:[#allocation58_spill] sm:$0xff] %v7738_v43  ;;  %10634 = vst [vmem:[#allocation59_spill] sm:$0xff] %v7740_v42  ;;  %1103 = vrot.lane.b32.xlu1 %v1035_v59, %s7051_s17  ;;  %1101 = vrot.lane.b32.xlu0 %v1034_v41, %s7051_s17  ;;  %v1050_v42 = vmul.f32 %v7732_v47, %v7319_v60  ;;  %v1049_v59 = vmul.f32 %v7726_v48, %v7319_v60 }
 0x183   :  { %v7748_v5 = vpop.permute.xlu1 %786  ;;  %v7750_v44 = vpop.permute.xlu0 %784 }
 0x184   :  { %10635 = vst [vmem:[#allocation60_spill] sm:$0xff] %v7748_v5  ;;  %10636 = vst [vmem:[#allocation61_spill] sm:$0xff] %v7750_v44  ;;  %1129 = vrot.lane.b32.xlu1 %v1048_v21, %s7051_s17  ;;  %1127 = vrot.lane.b32.xlu0 %v1047_v4, %s7051_s17  ;;  %v1917_v5 = vmul.f32 %v7669_v3, %v7442_v45  ;;  %v1916_v21 = vmul.f32 %v7669_v3, %v7446_v53 }
 0x187   :  { %v7758_v41 = vpop.permute.xlu1 %790  ;;  %v7760_v43 = vpop.permute.xlu0 %788 }
 0x188   :  { %10637 = vst [vmem:[#allocation62_spill] sm:$0xff] %v7758_v41  ;;  %10638 = vst [vmem:[#allocation63_spill] sm:$0xff] %v7760_v43  ;;  %1133 = vrot.lane.b32.xlu1 %v1050_v42, %s7051_s17  ;;  %1131 = vrot.lane.b32.xlu0 %v1049_v59, %s7051_s17  ;;  %v1919_v42 = vmul.f32 %v7669_v3, %v7460_v6  ;;  %v1918_v59 = vmul.f32 %v7669_v3, %v7464_v15 }
 0x18b   :  { %v7768_v4 = vpop.permute.xlu1 %818  ;;  %v7770_v44 = vpop.permute.xlu0 %816 }
 0x18c   :  { %10639 = vst [vmem:[#allocation64_spill] sm:$0xff] %v7768_v4  ;;  %10640 = vst [vmem:[#allocation65_spill] sm:$0xff] %v7770_v44  ;;  %1979 = vrot.lane.b32.xlu1 %v1917_v5, %s7055_s0  ;;  %1977 = vrot.lane.b32.xlu0 %v1916_v21, %s7055_s0  ;;  %v1932_v44 = vmul.f32 %v7667_v11, %v7442_v45  ;;  %v1931_v5 = vmul.f32 %v7667_v11, %v7446_v53 }
 0x18d   :  { %v1930_v53 = vmul.f32 %v7667_v11, %v7496_v58 }
 0x18f   :  { %v7778_v41 = vpop.permute.xlu1 %822  ;;  %v7780_v43 = vpop.permute.xlu0 %820 }
 0x190   :  { %10641 = vst [vmem:[#allocation66_spill] sm:$0xff] %v7778_v41  ;;  %10642 = vst [vmem:[#allocation67_spill] sm:$0xff] %v7780_v43  ;;  %1983 = vrot.lane.b32.xlu1 %v1919_v42, %s7055_s0  ;;  %1981 = vrot.lane.b32.xlu0 %v1918_v59, %s7055_s0  ;;  %v1934_v41 = vmul.f32 %v7667_v11, %v7460_v6  ;;  %v1933_v42 = vmul.f32 %v7667_v11, %v7464_v15 }
 0x191   :  { %v1255_v15 = vmul.f32 %v7331_v2, %v7705_v57 }
 0x193   :  { %v7788_v21 = vpop.permute.xlu1 %814  ;;  %v7790_v4 = vpop.permute.xlu0 %812 }
 0x194   :  { %10643 = vst [vmem:[#allocation68_spill] sm:$0xff] %v7788_v21  ;;  %10644 = vst [vmem:[#allocation69_spill] sm:$0xff] %v7790_v4  ;;  %2009 = vrot.lane.b32.xlu1 %v1932_v44, %s7055_s0  ;;  %2007 = vrot.lane.b32.xlu0 %v1931_v5, %s7055_s0  ;;  %v1915_v44 = vmul.f32 %v7669_v3, %v7496_v58  ;;  %v1257_v58 = vmul.f32 %v7331_v2, %v7732_v47 }
 0x197   :  { %v7798_v59 = vpop.permute.xlu1 %1091  ;;  %v7800_v45 = vpop.permute.xlu0 %1089 }
 0x198   :  { %10645 = vst [vmem:[#allocation70_spill] sm:$0xff] %v7798_v59  ;;  %10646 = vst [vmem:[#allocation71_spill] sm:$0xff] %v7800_v45  ;;  %2013 = vrot.lane.b32.xlu1 %v1934_v41, %s7055_s0  ;;  %2011 = vrot.lane.b32.xlu0 %v1933_v42, %s7055_s0  ;;  %v1254_v41 = vmul.f32 %v7331_v2, %v7709_v63 }
 0x19b   :  { %v7808_v5 = vpop.permute.xlu1 %1095  ;;  %v7810_v6 = vpop.permute.xlu0 %1093 }
 0x19c   :  { %10647 = vst [vmem:[#allocation72_spill] sm:$0xff] %v7808_v5  ;;  %10648 = vst [vmem:[#allocation73_spill] sm:$0xff] %v7810_v6  ;;  %2005 = vrot.lane.b32.xlu1 %v1930_v53, %s7055_s0  ;;  %1975 = vrot.lane.b32.xlu0 %v1915_v44, %s7055_s0  ;;  %v1256_v53 = vmul.f32 %v7331_v2, %v7726_v48 }
 0x19f   :  { %v7818_v42 = vpop.permute.xlu1 %1121  ;;  %v7820_v45 = vpop.permute.xlu0 %1119 }
 0x1a0   :  { %10649 = vst [vmem:[#allocation74_spill] sm:$0xff] %v7818_v42  ;;  %10650 = vst [vmem:[#allocation75_spill] sm:$0xff] %v7820_v45  ;;  %1321 = vrot.lane.b32.xlu1 %v1255_v15, %s7052_s18  ;;  %1319 = vrot.lane.b32.xlu0 %v1254_v41, %s7052_s18  ;;  %v1270_v45 = vmul.f32 %v7329_v1, %v7705_v57  ;;  %v1269_v42 = vmul.f32 %v7329_v1, %v7709_v63 }
 0x1a3   :  { %v7828_v44 = vpop.permute.xlu1 %1125  ;;  %v7830_v5 = vpop.permute.xlu0 %1123 }
 0x1a4   :  { %10651 = vst [vmem:[#allocation76_spill] sm:$0xff] %v7828_v44  ;;  %10652 = vst [vmem:[#allocation77_spill] sm:$0xff] %v7830_v5  ;;  %1325 = vrot.lane.b32.xlu1 %v1257_v58, %s7052_s18  ;;  %1323 = vrot.lane.b32.xlu0 %v1256_v53, %s7052_s18  ;;  %v1272_v44 = vmul.f32 %v7329_v1, %v7732_v47  ;;  %v1271_v5 = vmul.f32 %v7329_v1, %v7726_v48 }
 0x1a7   :  { %v7836_v15 = vpop.permute.xlu1 %1117  ;;  %v7838_v41 = vpop.permute.xlu0 %1087 }
 0x1a8   :  { %10653 = vst [vmem:[#allocation78_spill] sm:$0xff] %v7836_v15  ;;  %10654 = vst [vmem:[#allocation79_spill] sm:$0xff] %v7838_v41  ;;  %1351 = vrot.lane.b32.xlu1 %v1270_v45, %s7052_s18  ;;  %1349 = vrot.lane.b32.xlu0 %v1269_v42, %s7052_s18  ;;  %v1477_v41 = vmul.f32 %v7345_v9, %v7705_v57  ;;  %v1476_v15 = vmul.f32 %v7345_v9, %v7709_v63 }
 0x1ab   :  { %v7846_v58 = vpop.permute.xlu1 %1313  ;;  %v7848_v53 = vpop.permute.xlu0 %1311 }
 0x1ac   :  { %10655 = vst [vmem:[#allocation80_spill] sm:$0xff] %v7846_v58  ;;  %10656 = vst [vmem:[#allocation81_spill] sm:$0xff] %v7848_v53  ;;  %1355 = vrot.lane.b32.xlu1 %v1272_v44, %s7052_s18  ;;  %1353 = vrot.lane.b32.xlu0 %v1271_v5, %s7052_s18  ;;  %v1479_v53 = vmul.f32 %v7345_v9, %v7732_v47  ;;  %v1478_v58 = vmul.f32 %v7345_v9, %v7726_v48 }
 0x1af   :  { %v7856_v45 = vpop.permute.xlu1 %1317  ;;  %v7858_v42 = vpop.permute.xlu0 %1315 }
 0x1b0   :  { %10657 = vst [vmem:[#allocation82_spill] sm:$0xff] %v7856_v45  ;;  %10658 = vst [vmem:[#allocation83_spill] sm:$0xff] %v7858_v42  ;;  %1543 = vrot.lane.b32.xlu1 %v1477_v41, %s7053_s19  ;;  %1541 = vrot.lane.b32.xlu0 %v1476_v15, %s7053_s19  ;;  %v1492_v42 = vmul.f32 %v7343_v8, %v7705_v57  ;;  %v1491_v45 = vmul.f32 %v7343_v8, %v7709_v63 }
 0x1b3   :  { %v7866_v44 = vpop.permute.xlu1 %1343  ;;  %v7868_v5 = vpop.permute.xlu0 %1341 }
 0x1b4   :  { %10659 = vst [vmem:[#allocation84_spill] sm:$0xff] %v7866_v44  ;;  %10660 = vst [vmem:[#allocation85_spill] sm:$0xff] %v7868_v5  ;;  %1547 = vrot.lane.b32.xlu1 %v1479_v53, %s7053_s19  ;;  %1545 = vrot.lane.b32.xlu0 %v1478_v58, %s7053_s19  ;;  %v1494_v5 = vmul.f32 %v7343_v8, %v7732_v47  ;;  %v1493_v44 = vmul.f32 %v7343_v8, %v7726_v48 }
 0x1b7   :  { %v7876_v41 = vpop.permute.xlu1 %1347  ;;  %v7878_v15 = vpop.permute.xlu0 %1345 }
 0x1b8   :  { %10661 = vst [vmem:[#allocation86_spill] sm:$0xff] %v7876_v41  ;;  %10662 = vst [vmem:[#allocation87_spill] sm:$0xff] %v7878_v15  ;;  %1573 = vrot.lane.b32.xlu1 %v1492_v42, %s7053_s19  ;;  %1571 = vrot.lane.b32.xlu0 %v1491_v45, %s7053_s19  ;;  %v683_v41 = vrot.slane %v7619_v55, %v7163_v24  ;;  %v679_v45 = vrot.slane %v7619_v55, %v7165_v25 }
 0x1ba   :  { %v727_v42 = vmul.f32 %v683_v41, %v7311_v52  ;;  %v742_v21 = vmul.f32 %v679_v45, %v7309_v49 }
 0x1bb   :  { %v7886_v53 = vpop.permute.xlu1 %1339  ;;  %v7888_v58 = vpop.permute.xlu0 %1309 }
 0x1bc   :  { %10663 = vst [vmem:[#allocation88_spill] sm:$0xff] %v7886_v53  ;;  %10664 = vst [vmem:[#allocation89_spill] sm:$0xff] %v7888_v58  ;;  %1577 = vrot.lane.b32.xlu1 %v1494_v5, %s7053_s19  ;;  %1575 = vrot.lane.b32.xlu0 %v1493_v44, %s7053_s19  ;;  %v726_v58 = vmul.f32 %v679_v45, %v7311_v52  ;;  %v691_v5 = vrot.slane %v7619_v55, %v7167_v27 }
 0x1bd   :  { %v687_v44 = vrot.slane %v7619_v55, %v7169_v28 }
 0x1be   :  { %v729_v6 = vmul.f32 %v691_v5, %v7311_v52 }
 0x1bf   :  { %v7899_v15 = vpop.permute.xlu1 %1535  ;;  %v7901_v53 = vpop.permute.xlu0 %1533 }
 0x1c0   :  { %10665 = vst [vmem:[#allocation90_spill] sm:$0xff] %v7899_v15  ;;  %10666 = vst [vmem:[#allocation91_spill] sm:$0xff] %v7901_v53  ;;  %802 = vrot.lane.b32.xlu1 %v727_v42, %s7050_s2  ;;  %800 = vrot.lane.b32.xlu0 %v726_v58, %s7050_s2  ;;  %v728_v53 = vmul.f32 %v687_v44, %v7311_v52  ;;  %v743_v42 = vmul.f32 %v683_v41, %v7309_v49 }
 0x1c1   :  { %v1699_v41 = vmul.f32 %v7353_v14, %v7705_v57 }
 0x1c3   :  { %v7911_v59 = vpop.permute.xlu1 %1539  ;;  %v7913_v4 = vpop.permute.xlu0 %1537 }
 0x1c4   :  { %10667 = vst [vmem:[#allocation92_spill] sm:$0xff] %v7911_v59  ;;  %10668 = vst [vmem:[#allocation93_spill] sm:$0xff] %v7913_v4  ;;  %806 = vrot.lane.b32.xlu1 %v729_v6, %s7050_s2  ;;  %804 = vrot.lane.b32.xlu0 %v728_v53, %s7050_s2  ;;  %v745_v4 = vmul.f32 %v691_v5, %v7309_v49  ;;  %v744_v6 = vmul.f32 %v687_v44, %v7309_v49 }
 0x1c5   :  { %v1701_v5 = vmul.f32 %v7353_v14, %v7732_v47 }
 0x1c7   :  { %v7919_v15 = vpop.permute.xlu1 %1565  ;;  %v7921_v58 = vpop.permute.xlu0 %1563 }
 0x1c8   :  { %10669 = vst [vmem:[#allocation94_spill] sm:$0xff] %v7919_v15  ;;  %10670 = vst [vmem:[#allocation95_spill] sm:$0xff] %v7921_v58  ;;  %834 = vrot.lane.b32.xlu1 %v743_v42, %s7050_s2  ;;  %832 = vrot.lane.b32.xlu0 %v742_v21, %s7050_s2  ;;  %v1698_v21 = vmul.f32 %v7353_v14, %v7709_v63  ;;  %v1700_v42 = vmul.f32 %v7353_v14, %v7726_v48 }
 0x1cb   :  { %v7927_v59 = vpop.permute.xlu1 %1569  ;;  %v7929_v43 = vpop.permute.xlu0 %1567 }
 0x1cc   :  { %10671 = vst [vmem:[#allocation96_spill] sm:$0xff] %v7927_v59  ;;  %10672 = vst [vmem:[#allocation97_spill] sm:$0xff] %v7929_v43  ;;  %838 = vrot.lane.b32.xlu1 %v745_v4, %s7050_s2  ;;  %836 = vrot.lane.b32.xlu0 %v744_v6, %s7050_s2  ;;  %v1714_v6 = vmul.f32 %v7351_v13, %v7705_v57 }
 0x1cf   :  { %v7936_v53 = vpop.permute.xlu1 %2133  ;;  %v7938_v45 = vpop.permute.xlu0 %2128 }
 0x1d0   :  { %10673 = vst [vmem:[#allocation98_spill] sm:$0xff] %v7936_v53  ;;  %10674 = vst [vmem:[#allocation99_spill] sm:$0xff] %v7938_v45  ;;  %1765 = vrot.lane.b32.xlu1 %v1699_v41, %s7054_s25  ;;  %1763 = vrot.lane.b32.xlu0 %v1698_v21, %s7054_s25  ;;  %v1713_v53 = vmul.f32 %v7351_v13, %v7709_v63 }
 0x1d3   :  { %v7946_v4 = vpop.permute.xlu1 %1561  ;;  %v7948_v44 = vpop.permute.xlu0 %1531 }
 0x1d4   :  { %10675 = vst [vmem:[#allocation100_spill] sm:$0xff] %v7946_v4  ;;  %10676 = vst [vmem:[#allocation101_spill] sm:$0xff] %v7948_v44  ;;  %1769 = vrot.lane.b32.xlu1 %v1701_v5, %s7054_s25  ;;  %1767 = vrot.lane.b32.xlu0 %v1700_v42, %s7054_s25  ;;  %v7967_v5 = vld [vmem:[%s10362_s1] sm:$0xff]  ;;  %v1716_v42 = vmul.f32 %v7351_v13, %v7732_v47 }
 0x1d7   :  { %v7956_v41 = vpop.permute.xlu1 %794  ;;  %v7958_v21 = vpop.permute.xlu0 %792 }
 0x1d8   :  { %10677 = vst [vmem:[#allocation102_spill] sm:$0xff] %v7956_v41  ;;  %10678 = vst [vmem:[#allocation103_spill] sm:$0xff] %v7958_v21  ;;  %1795 = vrot.lane.b32.xlu1 %v1714_v6, %s7054_s25  ;;  %1793 = vrot.lane.b32.xlu0 %v1713_v53, %s7054_s25  ;;  %v1715_v21 = vmul.f32 %v7351_v13, %v7726_v48  ;;  %v2211_v53 = vrot.slane %v7967_v5, %v7165_v25 }
 0x1d9   :  { %v2207_v6 = vrot.slane %v7967_v5, %v7150_v19 }
 0x1db   :  { %v7971_v4 = vpop.permute.xlu1 %798  ;;  %v7973_v41 = vpop.permute.xlu0 %796 }
 0x1dc   :  { %10679 = vst [vmem:[#allocation104_spill] sm:$0xff] %v7971_v4  ;;  %10680 = vst [vmem:[#allocation105_spill] sm:$0xff] %v7973_v41  ;;  %1799 = vrot.lane.b32.xlu1 %v1716_v42, %s7054_s25  ;;  %1797 = vrot.lane.b32.xlu0 %v1715_v21, %s7054_s25  ;;  %v2219_v4 = vrot.slane %v7967_v5, %v7169_v28  ;;  %v2215_v42 = vrot.slane %v7967_v5, %v7163_v24 }
 0x1df   :  { %v7983_v44 = vpop.permute.xlu1 %826  ;;  %v7985_v59 = vpop.permute.xlu0 %824 }
 0x1e0   :  { %10681 = vst [vmem:[#allocation106_spill] sm:$0xff] %v7983_v44  ;;  %10682 = vst [vmem:[#allocation107_spill] sm:$0xff] %v7985_v59  ;;  %2264 = vrot.lane.b32.xlu1 %v2211_v53, %s7051_s17  ;;  %2262 = vrot.lane.b32.xlu0 %v2207_v6, %s7051_s17  ;;  %v8000_v44 = vrot.slane %v7714_v37, %v7150_v19  ;;  %v2203_v53 = vrot.slane %v7967_v5, %v7152_v20 }
 0x1e2   :  { %v1036_v6 = vmul.f32 %v8000_v44, %v7321_v61  ;;  %v1051_v15 = vmul.f32 %v8000_v44, %v7319_v60 }
 0x1e3   :  { %v7993_v41 = vpop.permute.xlu1 %830  ;;  %v7995_v21 = vpop.permute.xlu0 %828 }
 0x1e4   :  { %10683 = vst [vmem:[#allocation108_spill] sm:$0xff] %v7993_v41  ;;  %10684 = vst [vmem:[#allocation109_spill] sm:$0xff] %v7995_v21  ;;  %2268 = vrot.lane.b32.xlu1 %v2219_v4, %s7051_s17  ;;  %2266 = vrot.lane.b32.xlu0 %v2215_v42, %s7051_s17  ;;  %v8014_v4 = vrot.slane %v7714_v37, %v7163_v24  ;;  %v8019_v42 = vrot.slane %v7714_v37, %v7165_v25 }
 0x1e6   :  { %v1038_v41 = vmul.f32 %v8014_v4, %v7321_v61 }
 0x1e7   :  { %v8007_v59 = vpop.permute.xlu1 %1757  ;;  %v8009_v45 = vpop.permute.xlu0 %1755 }
 0x1e8   :  { %10685 = vst [vmem:[#allocation110_spill] sm:$0xff] %v8007_v59  ;;  %10686 = vst [vmem:[#allocation111_spill] sm:$0xff] %v8009_v45  ;;  %1105 = vrot.lane.b32.xlu1 %v1036_v6, %s7051_s17  ;;  %2260 = vrot.lane.b32.xlu0 %v2203_v53, %s7051_s17  ;;  %v1037_v6 = vmul.f32 %v8019_v42, %v7321_v61  ;;  %v8033_v53 = vrot.slane %v7714_v37, %v7169_v28 }
 0x1e9   :  { %v1052_v59 = vmul.f32 %v8019_v42, %v7319_v60 }
 0x1eb   :  { %v8023_v21 = vpop.permute.xlu1 %1761  ;;  %v8025_v58 = vpop.permute.xlu0 %1759 }
 0x1ec   :  { %10687 = vst [vmem:[#allocation112_spill] sm:$0xff] %v8023_v21  ;;  %10688 = vst [vmem:[#allocation113_spill] sm:$0xff] %v8025_v58  ;;  %1109 = vrot.lane.b32.xlu1 %v1038_v41, %s7051_s17  ;;  %1107 = vrot.lane.b32.xlu0 %v1037_v6, %s7051_s17  ;;  %v1039_v58 = vmul.f32 %v8033_v53, %v7321_v61  ;;  %v1053_v41 = vmul.f32 %v8014_v4, %v7319_v60 }
 0x1ef   :  { %v8037_v43 = vpop.permute.xlu1 %1787  ;;  %v8039_v45 = vpop.permute.xlu0 %1785 }
 0x1f0   :  { %10689 = vst [vmem:[#allocation114_spill] sm:$0xff] %v8037_v43  ;;  %10690 = vst [vmem:[#allocation115_spill] sm:$0xff] %v8039_v45  ;;  %1135 = vrot.lane.b32.xlu1 %v1051_v15, %s7051_s17  ;;  %1111 = vrot.lane.b32.xlu0 %v1039_v58, %s7051_s17  ;;  %v1920_v45 = vmul.f32 %v7669_v3, %v7709_v63  ;;  %v1054_v43 = vmul.f32 %v8033_v53, %v7319_v60 }
 0x1f3   :  { %v8047_v6 = vpop.permute.xlu1 %1791  ;;  %v8049_v21 = vpop.permute.xlu0 %1789 }
 0x1f4   :  { %10691 = vst [vmem:[#allocation116_spill] sm:$0xff] %v8047_v6  ;;  %10692 = vst [vmem:[#allocation117_spill] sm:$0xff] %v8049_v21  ;;  %1139 = vrot.lane.b32.xlu1 %v1053_v41, %s7051_s17  ;;  %1137 = vrot.lane.b32.xlu0 %v1052_v59, %s7051_s17  ;;  %v1922_v6 = vmul.f32 %v7669_v3, %v7726_v48  ;;  %v1921_v21 = vmul.f32 %v7669_v3, %v7705_v57 }
 0x1f7   :  { %v8057_v15 = vpop.permute.xlu1 %1783  ;;  %v8059_v58 = vpop.permute.xlu0 %1753 }
 0x1f8   :  { %10693 = vst [vmem:[#allocation118_spill] sm:$0xff] %v8057_v15  ;;  %10694 = vst [vmem:[#allocation119_spill] sm:$0xff] %v8059_v58  ;;  %1985 = vrot.lane.b32.xlu1 %v1920_v45, %s7055_s0  ;;  %1141 = vrot.lane.b32.xlu0 %v1054_v43, %s7051_s17  ;;  %v1935_v15 = vmul.f32 %v7667_v11, %v7709_v63  ;;  %v1923_v58 = vmul.f32 %v7669_v3, %v7732_v47 }
 0x1f9   :  { %v1936_v63 = vmul.f32 %v7667_v11, %v7705_v57  ;;  %v1260_v57 = vmul.f32 %v7331_v2, %v8014_v4 }
 0x1fb   :  { %v8067_v41 = vpop.permute.xlu1 %1099  ;;  %v8069_v59 = vpop.permute.xlu0 %1097 }
 0x1fc   :  { %10695 = vst [vmem:[#allocation120_spill] sm:$0xff] %v8067_v41  ;;  %10696 = vst [vmem:[#allocation121_spill] sm:$0xff] %v8069_v59  ;;  %1989 = vrot.lane.b32.xlu1 %v1922_v6, %s7055_s0  ;;  %1987 = vrot.lane.b32.xlu0 %v1921_v21, %s7055_s0  ;;  %v1937_v41 = vmul.f32 %v7667_v11, %v7726_v48  ;;  %v1938_v48 = vmul.f32 %v7667_v11, %v7732_v47 }
 0x1fd   :  { %v1273_v47 = vmul.f32 %v7329_v1, %v8000_v44  ;;  %v1276_v59 = vmul.f32 %v7329_v1, %v8033_v53 }
 0x1ff   :  { %v8077_v45 = vpop.permute.xlu1 %1103  ;;  %v8079_v43 = vpop.permute.xlu0 %1101 }
 0x200   :  { %10697 = vst [vmem:[#allocation122_spill] sm:$0xff] %v8077_v45  ;;  %10698 = vst [vmem:[#allocation123_spill] sm:$0xff] %v8079_v43  ;;  %2015 = vrot.lane.b32.xlu1 %v1935_v15, %s7055_s0  ;;  %1991 = vrot.lane.b32.xlu0 %v1923_v58, %s7055_s0  ;;  %v1258_v45 = vmul.f32 %v7331_v2, %v8000_v44  ;;  %v1480_v43 = vmul.f32 %v7345_v9, %v8000_v44 }
 0x203   :  { %v8087_v6 = vpop.permute.xlu1 %1129  ;;  %v8089_v21 = vpop.permute.xlu0 %1127 }
 0x204   :  { %10699 = vst [vmem:[#allocation124_spill] sm:$0xff] %v8087_v6  ;;  %10700 = vst [vmem:[#allocation125_spill] sm:$0xff] %v8089_v21  ;;  %2019 = vrot.lane.b32.xlu1 %v1937_v41, %s7055_s0  ;;  %2017 = vrot.lane.b32.xlu0 %v1936_v63, %s7055_s0  ;;  %v1259_v6 = vmul.f32 %v7331_v2, %v8019_v42  ;;  %v1274_v21 = vmul.f32 %v7329_v1, %v8019_v42 }
 0x207   :  { %v8097_v15 = vpop.permute.xlu1 %1133  ;;  %v8099_v58 = vpop.permute.xlu0 %1131 }
 0x208   :  { %10701 = vst [vmem:[#allocation126_spill] sm:$0xff] %v8097_v15  ;;  %10702 = vst [vmem:[#allocation127_spill] sm:$0xff] %v8099_v58  ;;  %1327 = vrot.lane.b32.xlu1 %v1258_v45, %s7052_s18  ;;  %2021 = vrot.lane.b32.xlu0 %v1938_v48, %s7055_s0  ;;  %v1261_v15 = vmul.f32 %v7331_v2, %v8033_v53  ;;  %v1275_v58 = vmul.f32 %v7329_v1, %v8014_v4 }
 0x20b   :  { %v8107_v41 = vpop.permute.xlu1 %1979  ;;  %v8109_v63 = vpop.permute.xlu0 %1977 }
 0x20c   :  { %1331 = vrot.lane.b32.xlu1 %v1260_v57, %s7052_s18  ;;  %1329 = vrot.lane.b32.xlu0 %v1259_v6, %s7052_s18 }
 0x20f   :  { %v8117_v45 = vpop.permute.xlu1 %1983  ;;  %v8119_v48 = vpop.permute.xlu0 %1981 }
 0x210   :  { %10703 = vst [vmem:[#allocation128_spill] sm:$0xff] %v8119_v48  ;;  %1357 = vrot.lane.b32.xlu1 %v1273_v47, %s7052_s18  ;;  %1333 = vrot.lane.b32.xlu0 %v1261_v15, %s7052_s18 }
 0x213   :  { %v8127_v57 = vpop.permute.xlu1 %2009  ;;  %v8129_v6 = vpop.permute.xlu0 %2007 }
 0x214   :  { %10704 = vst [vmem:[#allocation129_spill] sm:$0xff] %v8127_v57  ;;  %10705 = vst [vmem:[#allocation130_spill] sm:$0xff] %v8129_v6  ;;  %1361 = vrot.lane.b32.xlu1 %v1275_v58, %s7052_s18  ;;  %1359 = vrot.lane.b32.xlu0 %v1274_v21, %s7052_s18  ;;  %v1482_v6 = vmul.f32 %v7345_v9, %v8014_v4  ;;  %v1481_v57 = vmul.f32 %v7345_v9, %v8019_v42 }
 0x217   :  { %v8137_v47 = vpop.permute.xlu1 %2013  ;;  %v8139_v15 = vpop.permute.xlu0 %2011 }
 0x218   :  { %10706 = vst [vmem:[#allocation131_spill] sm:$0xff] %v8137_v47  ;;  %10707 = vst [vmem:[#allocation132_spill] sm:$0xff] %v8139_v15  ;;  %1549 = vrot.lane.b32.xlu1 %v1480_v43, %s7053_s19  ;;  %1363 = vrot.lane.b32.xlu0 %v1276_v59, %s7052_s18  ;;  %v1495_v47 = vmul.f32 %v7343_v8, %v8000_v44  ;;  %v1483_v15 = vmul.f32 %v7345_v9, %v8033_v53 }
 0x21b   :  { %v8147_v58 = vpop.permute.xlu1 %2005  ;;  %v8149_v21 = vpop.permute.xlu0 %1975 }
 0x21c   :  { %10708 = vst [vmem:[#allocation133_spill] sm:$0xff] %v8147_v58  ;;  %10709 = vst [vmem:[#allocation134_spill] sm:$0xff] %v8149_v21  ;;  %1553 = vrot.lane.b32.xlu1 %v1482_v6, %s7053_s19  ;;  %1551 = vrot.lane.b32.xlu0 %v1481_v57, %s7053_s19  ;;  %v1497_v58 = vmul.f32 %v7343_v8, %v8014_v4  ;;  %v1496_v21 = vmul.f32 %v7343_v8, %v8019_v42 }
 0x21f   :  { %v8157_v43 = vpop.permute.xlu1 %1321  ;;  %v8159_v59 = vpop.permute.xlu0 %1319 }
 0x220   :  { %10710 = vst [vmem:[#allocation135_spill] sm:$0xff] %v8157_v43  ;;  %10711 = vst [vmem:[#allocation136_spill] sm:$0xff] %v8159_v59  ;;  %1579 = vrot.lane.b32.xlu1 %v1495_v47, %s7053_s19  ;;  %1555 = vrot.lane.b32.xlu0 %v1483_v15, %s7053_s19  ;;  %v1702_v59 = vmul.f32 %v7353_v14, %v8000_v44  ;;  %v1498_v43 = vmul.f32 %v7343_v8, %v8033_v53 }
 0x223   :  { %v8167_v6 = vpop.permute.xlu1 %1325  ;;  %v8169_v57 = vpop.permute.xlu0 %1323 }
 0x224   :  { %10712 = vst [vmem:[#allocation137_spill] sm:$0xff] %v8167_v6  ;;  %10713 = vst [vmem:[#allocation138_spill] sm:$0xff] %v8169_v57  ;;  %1583 = vrot.lane.b32.xlu1 %v1497_v58, %s7053_s19  ;;  %1581 = vrot.lane.b32.xlu0 %v1496_v21, %s7053_s19  ;;  %v1704_v6 = vmul.f32 %v7353_v14, %v8014_v4  ;;  %v1703_v57 = vmul.f32 %v7353_v14, %v8019_v42 }
 0x227   :  { %v8177_v47 = vpop.permute.xlu1 %1351  ;;  %v8179_v15 = vpop.permute.xlu0 %1349 }
 0x228   :  { %10714 = vst [vmem:[#allocation139_spill] sm:$0xff] %v8177_v47  ;;  %10715 = vst [vmem:[#allocation140_spill] sm:$0xff] %v8179_v15  ;;  %1771 = vrot.lane.b32.xlu1 %v1702_v59, %s7054_s25  ;;  %1585 = vrot.lane.b32.xlu0 %v1498_v43, %s7053_s19  ;;  %v1717_v47 = vmul.f32 %v7351_v13, %v8000_v44  ;;  %v1705_v15 = vmul.f32 %v7353_v14, %v8033_v53 }
 0x22b   :  { %v8187_v58 = vpop.permute.xlu1 %1355  ;;  %v8189_v21 = vpop.permute.xlu0 %1353 }
 0x22c   :  { %10716 = vst [vmem:[#allocation141_spill] sm:$0xff] %v8187_v58  ;;  %10717 = vst [vmem:[#allocation142_spill] sm:$0xff] %v8189_v21  ;;  %1775 = vrot.lane.b32.xlu1 %v1704_v6, %s7054_s25  ;;  %1773 = vrot.lane.b32.xlu0 %v1703_v57, %s7054_s25  ;;  %v1719_v58 = vmul.f32 %v7351_v13, %v8014_v4  ;;  %v1718_v21 = vmul.f32 %v7351_v13, %v8019_v42 }
 0x22f   :  { %v8197_v59 = vpop.permute.xlu1 %1543  ;;  %v8199_v43 = vpop.permute.xlu0 %1541 }
 0x230   :  { %10718 = vst [vmem:[#allocation143_spill] sm:$0xff] %v8197_v59  ;;  %10719 = vst [vmem:[#allocation144_spill] sm:$0xff] %v8199_v43  ;;  %1801 = vrot.lane.b32.xlu1 %v1717_v47, %s7054_s25  ;;  %1777 = vrot.lane.b32.xlu0 %v1705_v15, %s7054_s25  ;;  %v2223_v43 = vrot.slane %v7967_v5, %v7167_v27  ;;  %v1720_v59 = vmul.f32 %v7351_v13, %v8033_v53 }
 0x233   :  { %v8207_v6 = vpop.permute.xlu1 %1547  ;;  %v8209_v57 = vpop.permute.xlu0 %1545 }
 0x234   :  { %10720 = vst [vmem:[#allocation145_spill] sm:$0xff] %v8207_v6  ;;  %10721 = vst [vmem:[#allocation146_spill] sm:$0xff] %v8209_v57  ;;  %1805 = vrot.lane.b32.xlu1 %v1719_v58, %s7054_s25  ;;  %1803 = vrot.lane.b32.xlu0 %v1718_v21, %s7054_s25  ;;  %v2231_v6 = vrot.slane %v7967_v5, %v7181_v33  ;;  %v2227_v58 = vrot.slane %v7967_v5, %v7183_v34  ;;  %v8232_v21 = vld [vmem:[%s10362_s1 + $0x8] sm:$0x7f]  ;;  %s7056_s1 = smov 31  }
 0x237   :  { %v8217_v47 = vpop.permute.xlu1 %1573  ;;  %v8219_v15 = vpop.permute.xlu0 %1571 }
 0x238   :  { %10722 = vst [vmem:[#allocation147_spill] sm:$0xff] %v8217_v47  ;;  %10723 = vst [vmem:[#allocation148_spill] sm:$0xff] %v8219_v15  ;;  %2270 = vrot.lane.b32.xlu1 %v2223_v43, %s7051_s17  ;;  %1807 = vrot.lane.b32.xlu0 %v1720_v59, %s7054_s25  ;;  %v695_v43 = vrot.slane %v7619_v55, %v7183_v34  ;;  %v2235_v59 = vrot.slane %v8232_v21, %v7152_v20 }
 0x23a   :  { %v730_v5 = vmul.f32 %v695_v43, %v7311_v52 }
 0x23b   :  { %v8234_v47 = vpop.permute.xlu1 %1577  ;;  %v8236_v15 = vpop.permute.xlu0 %1575 }
 0x23c   :  { %10724 = vst [vmem:[#allocation149_spill] sm:$0xff] %v8234_v47  ;;  %10725 = vst [vmem:[#allocation150_spill] sm:$0xff] %v8236_v15  ;;  %2274 = vrot.lane.b32.xlu1 %v2231_v6, %s7051_s17  ;;  %2272 = vrot.lane.b32.xlu0 %v2227_v58, %s7051_s17  ;;  %v699_v6 = vrot.slane %v7619_v55, %v7181_v33  ;;  %v746_v47 = vmul.f32 %v695_v43, %v7309_v49 }
 0x23d   :  { %v1925_v43 = vmul.f32 %v7669_v3, %v8019_v42 }
 0x23e   :  { %v731_v20 = vmul.f32 %v699_v6, %v7311_v52  ;;  %v747_v33 = vmul.f32 %v699_v6, %v7309_v49  ;;  %v1926_v52 = vmul.f32 %v7669_v3, %v8014_v4  ;;  %v1939_v49 = vmul.f32 %v7667_v11, %v8000_v44 }
 0x23f   :  { %v8245_v57 = vpop.permute.xlu1 %802  ;;  %v8247_v48 = vpop.permute.xlu0 %800 }
 0x240   :  { %10726 = vst [vmem:[#allocation151_spill] sm:$0xff] %v8245_v57  ;;  %10727 = vst [vmem:[#allocation152_spill] sm:$0xff] %v8247_v48  ;;  %808 = vrot.lane.b32.xlu1 %v730_v5, %s7050_s2  ;;  %2276 = vrot.lane.b32.xlu0 %v2235_v59, %s7051_s17  ;;  %v1924_v5 = vmul.f32 %v7669_v3, %v8000_v44  ;;  %v1940_v44 = vmul.f32 %v7667_v11, %v8019_v42 }
 0x241   :  { %v8316_v42 = vrot.slane %v7714_v37, %v7183_v34  ;;  %v131_v48 = vmul.f32 %v7158_v22, %v7273_v12 }
 0x243   :  { %v8254_v15 = vpop.permute.xlu1 %806  ;;  %v8256_v58 = vpop.permute.xlu0 %804 }
 0x244   :  { %10728 = vst [vmem:[#allocation153_spill] sm:$0xff] %v8254_v15  ;;  %10729 = vst [vmem:[#allocation154_spill] sm:$0xff] %v8256_v58  ;;  %840 = vrot.lane.b32.xlu1 %v746_v47, %s7050_s2  ;;  %810 = vrot.lane.b32.xlu0 %v731_v20, %s7050_s2  ;;  %v119_v58 = vmul.f32 %v7191_v38, %v7265_v7 }
 0x247   :  { %v8263_v57 = vpop.permute.xlu1 %834  ;;  %v8265_v59 = vpop.permute.xlu0 %832 }
 0x248   :  { %10730 = vst [vmem:[#allocation155_spill] sm:$0xff] %v8263_v57  ;;  %10731 = vst [vmem:[#allocation156_spill] sm:$0xff] %v8265_v59  ;;  %1993 = vrot.lane.b32.xlu1 %v1924_v5, %s7055_s0  ;;  %842 = vrot.lane.b32.xlu0 %v747_v33, %s7050_s2  ;;  %v1927_v5 = vmul.f32 %v7669_v3, %v8033_v53  ;;  %v1941_v33 = vmul.f32 %v7667_v11, %v8014_v4 }
 0x249   :  { %v1041_v59 = vmul.f32 %v8316_v42, %v7321_v61 }
 0x24b   :  { %v8272_v55 = vpop.permute.xlu1 %838  ;;  %v8274_v47 = vpop.permute.xlu0 %836 }
 0x24c   :  { %10732 = vst [vmem:[#allocation157_spill] sm:$0xff] %v8272_v55  ;;  %10733 = vst [vmem:[#allocation158_spill] sm:$0xff] %v8274_v47  ;;  %1997 = vrot.lane.b32.xlu1 %v1926_v52, %s7055_s0  ;;  %1995 = vrot.lane.b32.xlu0 %v1925_v43, %s7055_s0  ;;  %v8301_v55 = vrot.slane %v7714_v37, %v7167_v27  ;;  %v1942_v47 = vmul.f32 %v7667_v11, %v8033_v53 }
 0x24d   :  { %v115_v37 = vmul.f32 %v7161_v23, %v7265_v7 }
 0x24e   :  { %v1262_v53 = vmul.f32 %v7331_v2, %v8301_v55 }
 0x24f   :  { %v8282_v6 = vpop.permute.xlu1 %1765  ;;  %v8284_v20 = vpop.permute.xlu0 %1763 }
 0x250   :  { %10734 = vst [vmem:[#allocation159_spill] sm:$0xff] %v8282_v6  ;;  %10735 = vst [vmem:[#allocation160_spill] sm:$0xff] %v8284_v20  ;;  %2023 = vrot.lane.b32.xlu1 %v1939_v49, %s7055_s0  ;;  %1999 = vrot.lane.b32.xlu0 %v1927_v5, %s7055_s0  ;;  %v1040_v49 = vmul.f32 %v8301_v55, %v7321_v61  ;;  %v1056_v61 = vmul.f32 %v8316_v42, %v7319_v60 }
 0x253   :  { %v8292_v52 = vpop.permute.xlu1 %1769  ;;  %v8294_v43 = vpop.permute.xlu0 %1767 }
 0x254   :  { %10736 = vst [vmem:[#allocation161_spill] sm:$0xff] %v8292_v52  ;;  %10737 = vst [vmem:[#allocation162_spill] sm:$0xff] %v8294_v43  ;;  %2027 = vrot.lane.b32.xlu1 %v1941_v33, %s7055_s0  ;;  %2025 = vrot.lane.b32.xlu0 %v1940_v44, %s7055_s0  ;;  %v1055_v33 = vmul.f32 %v8301_v55, %v7319_v60  ;;  %v132_v60 = vmul.f32 %v7177_v32, %v7273_v12 }
 0x255   :  { %v8376_v52 = vmul.f32 %v7343_v8, %v8316_v42  ;;  %v310_v43 = vsel %vm308_vm0, %v7359_v17, %v7369_v30 }
 0x257   :  { %v8306_v5 = vpop.permute.xlu1 %1795  ;;  %v8308_v4 = vpop.permute.xlu0 %1793 }
 0x258   :  { %10738 = vst [vmem:[#allocation163_spill] sm:$0xff] %v8306_v5  ;;  %10739 = vst [vmem:[#allocation164_spill] sm:$0xff] %v8308_v4  ;;  %1113 = vrot.lane.b32.xlu1 %v1040_v49, %s7051_s17  ;;  %2029 = vrot.lane.b32.xlu0 %v1942_v47, %s7055_s0  ;;  %v116_v47 = vmul.f32 %v7158_v22, %v7265_v7  ;;  %v134_v4 = vmul.f32 %v7191_v38, %v7273_v12 }
 0x259   :  { %v1277_v22 = vmul.f32 %v7329_v1, %v8301_v55  ;;  %v1499_v38 = vmul.f32 %v7343_v8, %v8301_v55  ;;  %v312_v8 = vsel %vm308_vm0, %v7367_v29, %v7377_v40 }
 0x25a   :  { %v368_v6 = vadd.f32 %v310_v43, %v116_v47 }
 0x25b   :  { %v8320_v44 = vpop.permute.xlu1 %1799  ;;  %v8322_v57 = vpop.permute.xlu0 %1797 }
 0x25c   :  { %10740 = vst [vmem:[#allocation165_spill] sm:$0xff] %v8320_v44  ;;  %10741 = vst [vmem:[#allocation166_spill] sm:$0xff] %v8322_v57  ;;  %1143 = vrot.lane.b32.xlu1 %v1055_v33, %s7051_s17  ;;  %1115 = vrot.lane.b32.xlu0 %v1041_v59, %s7051_s17  ;;  %v117_v59 = vmul.f32 %v7177_v32, %v7265_v7  ;;  %v118_v33 = vmul.f32 %v7174_v31, %v7265_v7 }
 0x25d   :  { %v130_v44 = vmul.f32 %v7161_v23, %v7273_v12  ;;  %v133_v57 = vmul.f32 %v7174_v31, %v7273_v12  ;;  %v1484_v23 = vmul.f32 %v7345_v9, %v8301_v55  ;;  %v1278_v31 = vmul.f32 %v7329_v1, %v8316_v42 }
 0x25e   :  { %v311_v1 = vsel %vm308_vm0, %v7369_v30, %v7367_v29  ;;  %v8405_v30 = vmul.f32 %v7353_v14, %v8316_v42  ;;  %v324_v29 = vsel %vm308_vm0, %v7450_v62, %v7448_v56 }
 0x25f   :  { %v8334_v49 = vpop.permute.xlu1 %2264  ;;  %v8336_v15 = vpop.permute.xlu0 %2262  ;;  %v383_v43 = vadd.f32 %v324_v29, %v131_v48  ;;  %v534_v48 = vsel %vm530_vm1, %v7540_v35, %v7552_v10 }
 0x260   :  { %1335 = vrot.lane.b32.xlu1 %v1262_v53, %s7052_s18  ;;  %1145 = vrot.lane.b32.xlu0 %v1056_v61, %s7051_s17  ;;  %v1263_v53 = vmul.f32 %v7331_v2, %v8316_v42  ;;  %v1485_v61 = vmul.f32 %v7345_v9, %v8316_v42  ;;  %v309_v2 = vsel %vm308_vm0, %v7361_v18, %v7359_v17 }
 0x261   :  { %v8390_v9 = vmul.f32 %v7353_v14, %v8301_v55  ;;  %v313_v18 = vsel %vm308_vm0, %v7377_v40, %v7375_v39  ;;  %v8401_v17 = vmul.f32 %v7351_v13, %v8301_v55  ;;  %v325_v40 = vsel %vm308_vm0, %v7448_v56, %v7468_v36 }
 0x262   :  { %v367_v20 = vadd.f32 %v309_v2, %v115_v37  ;;  %v369_v14 = vadd.f32 %v311_v1, %v117_v59  ;;  %v371_v7 = vadd.f32 %v313_v18, %v119_v58  ;;  %v327_v56 = vsel %vm308_vm0, %v7466_v16, %v7478_v0  ;;  %v10743_v59 = vld [vmem:[#allocation45_spill] sm:$0xff] }
 0x263   :  { %v8364_v5 = vpop.permute.xlu1 %2268  ;;  %v8366_v32 = vpop.permute.xlu0 %2266  ;;  %v384_v37 = vadd.f32 %v325_v40, %v132_v60  ;;  %v532_v58 = vsel %vm530_vm1, %v7530_v50, %v7542_v54  ;;  %v10745_v60 = vld [vmem:[#allocation44_spill] sm:$0xff]  ;;  %v10750_v2 = vld [vmem:[#allocation49_spill] sm:$0xff] }
 0x264   :  { %1365 = vrot.lane.b32.xlu1 %v1277_v22, %s7052_s18  ;;  %1337 = vrot.lane.b32.xlu0 %v1263_v53, %s7052_s18  ;;  %v323_v22 = vsel %vm308_vm0, %v7430_v26, %v7450_v62  ;;  %v326_v53 = vsel %vm308_vm0, %v7468_v36, %v7466_v16  ;;  %v8425_v26 = vmul.f32 %v7351_v13, %v8316_v42 }
 0x265   :  { %v370_v62 = vadd.f32 %v312_v8, %v118_v33  ;;  %v382_v36 = vadd.f32 %v323_v22, %v130_v44  ;;  %v385_v47 = vadd.f32 %v326_v53, %v133_v57  ;;  %v531_v13 = vsel %vm530_vm1, %v7532_v51, %v7530_v50  ;;  %v10744_v51 = vld [vmem:[#allocation42_spill] sm:$0xff] }
 0x266   :  { %v533_v16 = vsel %vm530_vm1, %v7542_v54, %v7540_v35  ;;  %v386_v57 = vadd.f32 %v327_v56, %v134_v4  ;;  %v535_v44 = vsel %vm530_vm1, %v7552_v10, %v7550_v46  ;;  %v545_v33 = vsel %vm530_vm1, %v10744_v51, %v10743_v59  ;;  %v10749_v4 = vld [vmem:[#allocation46_spill] sm:$0xff] }
 0x267   :  { %v8419_v12 = vpop.permute.xlu1 %1105  ;;  %v8421_v39 = vpop.permute.xlu0 %2260  ;;  %v546_v50 = vsel %vm530_vm1, %v10743_v59, %v10745_v60  ;;  %v549_v1 = vsel %vm530_vm1, %v10749_v4, %v10750_v2  ;;  %v2239_v8 = vrot.slane %v8232_v21, %v7150_v19  ;;  %v589_v18 = vadd.f32 %v531_v13, %v367_v20 }
 0x268   :  { %10742 = vst [vmem:[#allocation167_spill] sm:$0xff] %v8419_v12  ;;  %1557 = vrot.lane.b32.xlu1 %v1484_v23, %s7053_s19  ;;  %1367 = vrot.lane.b32.xlu0 %v1278_v31, %s7052_s18  ;;  %v10748_v31 = vld [vmem:[#allocation47_spill] sm:$0xff]  ;;  %v590_v22 = vadd.f32 %v532_v58, %v368_v6  ;;  %v591_v29 = vadd.f32 %v533_v16, %v369_v14  ;;  %v10755_v6 = vld [vmem:[#allocation61_spill] sm:$0xff] }
 0x269   :  { %v547_v35 = vsel %vm530_vm1, %v10745_v60, %v10748_v31  ;;  %v548_v10 = vsel %vm530_vm1, %v10748_v31, %v10749_v4  ;;  %v592_v40 = vadd.f32 %v534_v48, %v370_v62  ;;  %v593_v53 = vadd.f32 %v535_v44, %v371_v7  ;;  %v10751_v4 = vld [vmem:[#allocation58_spill] sm:$0xff]  ;;  %v10757_v14 = vld [vmem:[#allocation63_spill] sm:$0xff]  ;;  %v10759_v44 = vld [vmem:[#allocation64_spill] sm:$0xff] }
 0x26a   :  { %v604_v56 = vadd.f32 %v545_v33, %v382_v36  ;;  %v605_v59 = vadd.f32 %v546_v50, %v383_v43  ;;  %v606_v51 = vadd.f32 %v547_v35, %v384_v37  ;;  %v607_v60 = vadd.f32 %v548_v10, %v385_v47  ;;  %v10758_v43 = vld [vmem:[#allocation62_spill] sm:$0xff]  ;;  %v10760_v33 = vld [vmem:[#allocation65_spill] sm:$0xff]  ;;  %v10763_v10 = vld [vmem:[#allocation67_spill] sm:$0xff] }
 0x26b   :  { %v8453_v23 = vpop.permute.xlu1 %1109  ;;  %v8455_v54 = vpop.permute.xlu0 %1107  ;;  %v608_v31 = vadd.f32 %v549_v1, %v386_v57  ;;  %v846_v20 = vsel %vm844_vm2, %v10751_v4, %v10755_v6  ;;  %v2247_v36 = vrot.slane %v8232_v21, %v7163_v24  ;;  %v849_v37 = vsel %vm844_vm2, %v10757_v14, %v10758_v43  ;;  %v10764_v1 = vld [vmem:[#allocation66_spill] sm:$0xff]  ;;  %v10796_v12 = vld [vmem:[#allocation113_spill] sm:$0xff] }
 0x26c   :  { %10746 = vst [vmem:[#allocation45_spill] sm:$0xff] %v8453_v23  ;;  %10747 = vst [vmem:[#allocation42_spill] sm:$0xff] %v8455_v54  ;;  %1587 = vrot.lane.b32.xlu1 %v1499_v38, %s7053_s19  ;;  %1559 = vrot.lane.b32.xlu0 %v1485_v61, %s7053_s19  ;;  %v10752_v23 = vld [vmem:[#allocation59_spill] sm:$0xff]  ;;  %v10756_v61 = vld [vmem:[#allocation60_spill] sm:$0xff]  ;;  %v2243_v47 = vrot.slane %v8232_v21, %v7165_v25  ;;  %v8498_v13 = vmul.f32 %v7669_v3, %v8301_v55 }
 0x26d   :  { %v845_v38 = vsel %vm844_vm2, %v10752_v23, %v10751_v4  ;;  %v847_v7 = vsel %vm844_vm2, %v10755_v6, %v10756_v61  ;;  %v848_v62 = vsel %vm844_vm2, %v10756_v61, %v10757_v14  ;;  %v8502_v16 = vmul.f32 %v7667_v11, %v8301_v55  ;;  %v10769_v6 = vld [vmem:[#allocation73_spill] sm:$0xff]  ;;  %v10770_v61 = vld [vmem:[#allocation72_spill] sm:$0xff]  ;;  %v10771_v14 = vld [vmem:[#allocation74_spill] sm:$0xff] }
 0x26e   :  { %v905_v58 = vadd.f32 %v845_v38, %v589_v18  ;;  %v8506_v24 = vmul.f32 %v7669_v3, %v8316_v42  ;;  %v8510_v48 = vmul.f32 %v7667_v11, %v8316_v42  ;;  %v907_v57 = vadd.f32 %v847_v7, %v591_v29  ;;  %v10765_v42 = vld [vmem:[#allocation68_spill] sm:$0xff]  ;;  %v10766_v18 = vld [vmem:[#allocation69_spill] sm:$0xff]  ;;  %v10767_v29 = vld [vmem:[#allocation70_spill] sm:$0xff] }
 0x26f   :  { %v8473_v54 = vpop.permute.xlu1 %1135  ;;  %v8475_v19 = vpop.permute.xlu0 %1111  ;;  %v908_v25 = vadd.f32 %v848_v62, %v592_v40  ;;  %v862_v50 = vsel %vm844_vm2, %v10760_v33, %v10759_v44  ;;  %v909_v55 = vadd.f32 %v849_v37, %v593_v53  ;;  %v863_v3 = vsel %vm844_vm2, %v10759_v44, %v10763_v10  ;;  %v10768_v40 = vld [vmem:[#allocation71_spill] sm:$0xff] }
 0x270   :  { %10753 = vst [vmem:[#allocation44_spill] sm:$0xff] %v8473_v54  ;;  %10754 = vst [vmem:[#allocation47_spill] sm:$0xff] %v8475_v19  ;;  %2278 = vrot.lane.b32.xlu1 %v2239_v8, %s7051_s17  ;;  %1589 = vrot.lane.b32.xlu0 %v8376_v52, %s7053_s19  ;;  %v906_v52 = vadd.f32 %v846_v20, %v590_v22  ;;  %v864_v11 = vsel %vm844_vm2, %v10763_v10, %v10764_v1  ;;  %v10772_v62 = vld [vmem:[#allocation75_spill] sm:$0xff] }
 0x271   :  { %v861_v8 = vsel %vm844_vm2, %v10765_v42, %v10760_v33  ;;  %v860_v22 = vsel %vm844_vm2, %v10766_v18, %v10765_v42  ;;  %v1149_v53 = vsel %vm1147_vm3, %v10768_v40, %v10767_v29  ;;  %v2251_v4 = vrot.slane %v8232_v21, %v7169_v28  ;;  %v10773_v33 = vld [vmem:[#allocation77_spill] sm:$0xff]  ;;  %v10774_v28 = vld [vmem:[#allocation80_spill] sm:$0xff] }
 0x272   :  { %v922_v38 = vadd.f32 %v862_v50, %v606_v51  ;;  %v1150_v20 = vsel %vm1147_vm3, %v10767_v29, %v10769_v6  ;;  %v1151_v7 = vsel %vm1147_vm3, %v10769_v6, %v10770_v61  ;;  %v923_v37 = vadd.f32 %v863_v3, %v607_v60  ;;  %v10775_v51 = vld [vmem:[#allocation81_spill] sm:$0xff] }
 0x273   :  { %v8515_v23 = vpop.permute.xlu1 %1139  ;;  %v8517_v35 = vpop.permute.xlu0 %1137  ;;  %v924_v44 = vadd.f32 %v864_v11, %v608_v31  ;;  %v1371_v50 = vsel %vm1369_vm4, %v10775_v51, %v10774_v28  ;;  %v921_v18 = vadd.f32 %v861_v8, %v605_v59  ;;  %v920_v29 = vadd.f32 %v860_v22, %v604_v56  ;;  %v10781_v56 = vld [vmem:[#allocation78_spill] sm:$0xff]  ;;  %v10783_v22 = vld [vmem:[#allocation83_spill] sm:$0xff] }
 0x274   :  { %10761 = vst [vmem:[#allocation46_spill] sm:$0xff] %v8515_v23  ;;  %10762 = vst [vmem:[#allocation49_spill] sm:$0xff] %v8517_v35  ;;  %2282 = vrot.lane.b32.xlu1 %v2247_v36, %s7051_s17  ;;  %2280 = vrot.lane.b32.xlu0 %v2243_v47, %s7051_s17  ;;  %v1163_v36 = vsel %vm1147_vm3, %v10772_v62, %v10771_v14  ;;  %v1164_v47 = vsel %vm1147_vm3, %v10771_v14, %v10773_v33  ;;  %v10778_v23 = vld [vmem:[#allocation76_spill] sm:$0xff]  ;;  %v10779_v14 = vld [vmem:[#allocation90_spill] sm:$0xff] }
 0x275   :  { %v1208_v6 = vadd.f32 %v1149_v53, %v907_v57  ;;  %v1165_v60 = vsel %vm1147_vm3, %v10773_v33, %v10778_v23  ;;  %v1209_v31 = vadd.f32 %v1150_v20, %v908_v25  ;;  %v1210_v3 = vadd.f32 %v1151_v7, %v909_v55  ;;  %v10780_v35 = vld [vmem:[#allocation91_spill] sm:$0xff]  ;;  %v10782_v8 = vld [vmem:[#allocation82_spill] sm:$0xff]  ;;  %v10789_v33 = vld [vmem:[#allocation84_spill] sm:$0xff] }
 0x276   :  { %v1223_v11 = vadd.f32 %v1163_v36, %v922_v38  ;;  %v1593_v19 = vsel %vm1591_vm5, %v10780_v35, %v10779_v14  ;;  %v1162_v59 = vsel %vm1147_vm3, %v10781_v56, %v10772_v62  ;;  %v1373_v53 = vsel %vm1369_vm4, %v10783_v22, %v10782_v8  ;;  %v10784_v55 = vld [vmem:[#allocation79_spill] sm:$0xff]  ;;  %v10785_v20 = vld [vmem:[#allocation110_spill] sm:$0xff] }
 0x277   :  { %v8553_v10 = vpop.permute.xlu1 %1985  ;;  %v8555_v42 = vpop.permute.xlu0 %1141  ;;  %v1430_v57 = vadd.f32 %v1371_v50, %v1208_v6  ;;  %v1221_v25 = vadd.f32 %v10781_v56, %v920_v29  ;;  %v1148_v38 = vsel %vm1147_vm3, %v10784_v55, %v10768_v40  ;;  %v10786_v7 = vld [vmem:[#allocation111_spill] sm:$0xff]  ;;  %v1206_v62 = vadd.f32 %v10784_v55, %v905_v58  ;;  %v10792_v56 = vld [vmem:[#allocation93_spill] sm:$0xff]  ;;  %v10795_v55 = vld [vmem:[#allocation112_spill] sm:$0xff] }
 0x278   :  { %10776 = vst [vmem:[#allocation58_spill] sm:$0xff] %v8553_v10  ;;  %10777 = vst [vmem:[#allocation59_spill] sm:$0xff] %v8555_v42  ;;  %1779 = vrot.lane.b32.xlu1 %v8390_v9, %s7054_s25  ;;  %2284 = vrot.lane.b32.xlu0 %v2251_v4, %s7051_s17  ;;  %v1224_v42 = vadd.f32 %v1164_v47, %v923_v37  ;;  %v1225_v9 = vadd.f32 %v1165_v60, %v924_v44  ;;  %v10790_v47 = vld [vmem:[#allocation85_spill] sm:$0xff]  ;;  %v10791_v60 = vld [vmem:[#allocation92_spill] sm:$0xff] }
 0x279   :  { %v1815_v4 = vsel %vm1813_vm6, %v10786_v7, %v10785_v20  ;;  %v1372_v44 = vsel %vm1369_vm4, %v10774_v28, %v10783_v22  ;;  %v1385_v50 = vsel %vm1369_vm4, %v10790_v47, %v10789_v33  ;;  %v1652_v29 = vadd.f32 %v1593_v19, %v1430_v57  ;;  %v10793_v28 = vld [vmem:[#allocation87_spill] sm:$0xff]  ;;  %v10794_v57 = vld [vmem:[#allocation86_spill] sm:$0xff]  ;;  %v10797_v10 = vld [vmem:[#allocation97_spill] sm:$0xff] }
 0x27a   :  { %v8592_v40 = vadd.f32 %v1162_v59, %v921_v18  ;;  %v1432_v6 = vadd.f32 %v1373_v53, %v1210_v3  ;;  %v1595_v54 = vsel %vm1591_vm5, %v10792_v56, %v10791_v60  ;;  %v2037_v58 = vsel %vm2035_vm7, %v8109_v63, %v8107_v41 }
 0x27b   :  { %v8579_v36 = vpop.permute.xlu1 %1989  ;;  %v8581_v37 = vpop.permute.xlu0 %1987  ;;  %v1386_v19 = vsel %vm1369_vm4, %v10789_v33, %v10793_v28  ;;  %v1594_v18 = vsel %vm1591_vm5, %v10779_v14, %v10792_v56  ;;  %v1874_v3 = vadd.f32 %v1815_v4, %v1652_v29  ;;  %v1207_v59 = vadd.f32 %v1148_v38, %v906_v52  ;;  %v10799_v4 = vld [vmem:[#allocation128_spill] sm:$0xff]  ;;  %v10803_v56 = vld [vmem:[#allocation117_spill] sm:$0xff] }
 0x27c   :  { %10787 = vst [vmem:[#allocation61_spill] sm:$0xff] %v8579_v36  ;;  %10788 = vst [vmem:[#allocation60_spill] sm:$0xff] %v8581_v37  ;;  %1809 = vrot.lane.b32.xlu1 %v8401_v17, %s7054_s25  ;;  %1781 = vrot.lane.b32.xlu0 %v8405_v30, %s7054_s25  ;;  %v1387_v17 = vsel %vm1369_vm4, %v10793_v28, %v10794_v57  ;;  %v1431_v22 = vadd.f32 %v1372_v44, %v1209_v31  ;;  %v10798_v37 = vld [vmem:[#allocation94_spill] sm:$0xff] }
 0x27d   :  { %v1445_v53 = vadd.f32 %v1385_v50, %v1223_v11  ;;  %v1817_v30 = vsel %vm1813_vm6, %v10796_v12, %v10795_v55  ;;  %v1654_v33 = vadd.f32 %v1595_v54, %v1432_v6  ;;  %v1608_v28 = vsel %vm1591_vm5, %v10798_v37, %v10797_v10  ;;  %v10800_v54 = vld [vmem:[#allocation88_spill] sm:$0xff] }
 0x27e   :  { %v1816_v14 = vsel %vm1813_vm6, %v10785_v20, %v10796_v12  ;;  %v2096_v52 = vadd.f32 %v2037_v58, %v1874_v3  ;;  %v1446_v31 = vadd.f32 %v1386_v19, %v1224_v42  ;;  %v1447_v11 = vadd.f32 %v1387_v17, %v1225_v9  ;;  %v10801_v12 = vld [vmem:[#allocation95_spill] sm:$0xff]  ;;  %v10802_v9 = vld [vmem:[#allocation89_spill] sm:$0xff]  ;;  %v10804_v58 = vld [vmem:[#allocation114_spill] sm:$0xff] }
 0x27f   :  { %v8614_v60 = vpop.permute.xlu1 %2015  ;;  %v8616_v36 = vpop.permute.xlu0 %1991  ;;  %v1653_v38 = vadd.f32 %v1594_v18, %v1431_v22  ;;  %v2039_v44 = vsel %vm2035_vm7, %v10799_v4, %v8117_v45  ;;  %v8634_v50 = vsel %vm1369_vm4, %v10800_v54, %v10790_v47  ;;  %v1607_v20 = vsel %vm1591_vm5, %v10801_v12, %v10798_v37  ;;  %v10805_v37 = vld [vmem:[#allocation115_spill] sm:$0xff] }
 0x280   :  { %2001 = vrot.lane.b32.xlu1 %v8498_v13, %s7055_s0  ;;  %1811 = vrot.lane.b32.xlu0 %v8425_v26, %s7054_s25  ;;  %v1876_v13 = vadd.f32 %v1817_v30, %v1654_v33  ;;  %v2038_v42 = vsel %vm2035_vm7, %v8107_v41, %v10799_v4  ;;  %v1370_v29 = vsel %vm1369_vm4, %v10802_v9, %v10775_v51  ;;  %v10806_v3 = vld [vmem:[#allocation99_spill] sm:$0xff]  ;;  %v10809_v4 = vld [vmem:[#allocation96_spill] sm:$0xff] }
 0x281   :  { %v1668_v6 = vadd.f32 %v1608_v28, %v1446_v31  ;;  %v1875_v26 = vadd.f32 %v1816_v14, %v1653_v38  ;;  %v1830_v47 = vsel %vm1813_vm6, %v10804_v58, %v10803_v56  ;;  %v1829_v18 = vsel %vm1813_vm6, %v10805_v37, %v10804_v58  ;;  %v10807_v14 = vld [vmem:[#allocation132_spill] sm:$0xff]  ;;  %v10808_v31 = vld [vmem:[#allocation129_spill] sm:$0xff] }
 0x282   :  { %v2138_v41 = vadd.f32 %v10806_v3, %v2096_v52  ;;  %v2098_v22 = vadd.f32 %v2039_v44, %v1876_v13  ;;  %v2255_v51 = vrot.slane %v8232_v21, %v7167_v27  ;;  %v1428_v30 = vadd.f32 %v10802_v9, %v1206_v62  ;;  %v10810_v27 = vld [vmem:[#allocation130_spill] sm:$0xff] }
 0x283   :  { %v8648_v19 = vpop.permute.xlu1 %2019  ;;  %v8650_v17 = vpop.permute.xlu0 %2017  ;;  %v1667_v33 = vadd.f32 %v1607_v20, %v1445_v53  ;;  %v2097_v28 = vadd.f32 %v2038_v42, %v1875_v26  ;;  %v2052_v38 = vsel %vm2035_vm7, %v10808_v31, %v10807_v14  ;;  %v1443_v52 = vadd.f32 %v10800_v54, %v1221_v25  ;;  %v10811_v20 = vld [vmem:[#allocation101_spill] sm:$0xff]  ;;  %v10813_v54 = vld [vmem:[#allocation116_spill] sm:$0xff] }
 0x284   :  { %2031 = vrot.lane.b32.xlu1 %v8502_v16, %s7055_s0  ;;  %2003 = vrot.lane.b32.xlu0 %v8506_v24, %s7055_s0  ;;  %v1609_v16 = vsel %vm1591_vm5, %v10797_v10, %v10809_v4  ;;  %v1890_v44 = vadd.f32 %v1830_v47, %v1668_v6  ;;  %v2051_v62 = vsel %vm2035_vm7, %v10810_v27, %v10808_v31  ;;  %v2168_v58 = vmax.f32 %v2138_v41, 0.0 }
 0x285   :  { %v1429_v53 = vadd.f32 %v1370_v29, %v1207_v59  ;;  %v1650_v13 = vadd.f32 %v10811_v20, %v1428_v30  ;;  %v1889_v42 = vadd.f32 %v1829_v18, %v1667_v33  ;;  %v2291_v9 = vsel %vm1147_vm3, %v8336_v15, %v8334_v49  ;;  %v10814_v30 = vld [vmem:[#allocation119_spill] sm:$0xff] }
 0x286   :  { %v1831_v10 = vsel %vm1813_vm6, %v10803_v56, %v10813_v54  ;;  %v2140_v6 = vadd.f32 %v10806_v3, %v2098_v22  ;;  %v2112_v26 = vadd.f32 %v2052_v38, %v1890_v44  ;;  %v1669_v59 = vadd.f32 %v1609_v16, %v1447_v11  ;;  %v10815_v33 = vld [vmem:[#allocation131_spill] sm:$0xff]  ;;  %v10819_v38 = vld [vmem:[#allocation98_spill] sm:$0xff] }
 0x287   :  { %v8677_v24 = vpop.permute.xlu1 %1327  ;;  %v8679_v25 = vpop.permute.xlu0 %2021  ;;  %v2139_v29 = vadd.f32 %v10806_v3, %v2097_v28  ;;  %v2111_v47 = vadd.f32 %v2051_v62, %v1889_v42  ;;  %v2259_v18 = vrot.slane %v8232_v21, %v7183_v34  ;;  %v1592_v56 = vsel %vm1591_vm5, %v10811_v20, %v10780_v35  ;;  %v10820_v44 = vld [vmem:[#allocation134_spill] sm:$0xff] }
 0x288   :  { %10812 = vst [vmem:[#allocation63_spill] sm:$0xff] %v8677_v24  ;;  %2286 = vrot.lane.b32.xlu1 %v2255_v51, %s7051_s17  ;;  %2033 = vrot.lane.b32.xlu0 %v8510_v48, %s7055_s0  ;;  %v1872_v22 = vadd.f32 %v10814_v30, %v1650_v13  ;;  %v2053_v41 = vsel %vm2035_vm7, %v10807_v14, %v10815_v33  ;;  %v10816_v51 = vld [vmem:[#allocation100_spill] sm:$0xff]  ;;  %v2170_v62 = vmax.f32 %v2140_v6, 0.0 }
 0x289   :  { %v2321_v11 = vmul.f32 %v2291_v9, %v2168_v58  ;;  %v1665_v28 = vadd.f32 %v10816_v51, %v1443_v52  ;;  %v1891_v31 = vadd.f32 %v1831_v10, %v1669_v59  ;;  %v1814_v48 = vsel %vm1813_vm6, %v10814_v30, %v10786_v7 }
 0x28a   :  { %v2293_v34 = vsel %vm1147_vm3, %v8366_v32, %v8364_v5  ;;  %v2154_v16 = vadd.f32 %v10819_v38, %v2112_v26  ;;  %v2094_v14 = vadd.f32 %v10820_v44, %v1872_v22  ;;  %v2292_v52 = vsel %vm1147_vm3, %v8334_v49, %v8366_v32  ;;  %v10821_v26 = vld [vmem:[#allocation118_spill] sm:$0xff] }
 0x28b   :  { %v8705_v21 = vpop.permute.xlu1 %1331  ;;  %v8707_v35 = vpop.permute.xlu0 %1329  ;;  %v1651_v7 = vadd.f32 %v1592_v56, %v1429_v53  ;;  %v2153_v20 = vadd.f32 %v10819_v38, %v2111_v47  ;;  %v2113_v13 = vadd.f32 %v2053_v41, %v1891_v31  ;;  %v2169_v42 = vmax.f32 %v2139_v29, 0.0 }
 0x28c   :  { %10817 = vst [vmem:[#allocation62_spill] sm:$0xff] %v8705_v21  ;;  %10818 = vst [vmem:[#allocation64_spill] sm:$0xff] %v8707_v35  ;;  %2418 = vrot.lane.b32.xlu1 %v2321_v11, %s7056_s1  ;;  %2288 = vrot.lane.b32.xlu0 %v2259_v18, %s7051_s17  ;;  %v1606_v10 = vsel %vm1591_vm5, %v10816_v51, %v10801_v12  ;;  %v1887_v6 = vadd.f32 %v10821_v26, %v1665_v28  ;;  %v10824_v18 = vld [vmem:[#allocation133_spill] sm:$0xff]  ;;  %v2184_v22 = vmax.f32 %v2154_v16, 0.0 }
 0x28d   :  { %v2036_v49 = vsel %vm2035_vm7, %v10820_v44, %v8109_v63  ;;  %v2323_v32 = vmul.f32 %v2293_v34, %v2170_v62  ;;  %v1444_v53 = vadd.f32 %v8634_v50, %v8592_v40  ;;  %v1873_v58 = vadd.f32 %v1814_v48, %v1651_v7  ;;  %v10900_v35 = vld [vmem:[#allocation161_spill] sm:$0xff] }
 0x28e   :  { %v2322_v59 = vmul.f32 %v2292_v52, %v2169_v42  ;;  %v1828_v12 = vsel %vm1813_vm6, %v10821_v26, %v10805_v37  ;;  %v2109_v56 = vadd.f32 %v10824_v18, %v1887_v6  ;;  %v2136_v30 = vadd.f32 %v10806_v3, %v2094_v14  ;;  %v10829_v42 = vld [vmem:[#allocation5_spill] sm:$0xff] }
 0x28f   :  { %v8726_v47 = vpop.permute.xlu1 %1357  ;;  %v8728_v29 = vpop.permute.xlu0 %1333  ;;  %v7057_v63 = vmov 0.0   ;;  %v1666_v40 = vadd.f32 %v1606_v10, %v1444_v53  ;;  %v2155_v50 = vadd.f32 %v10819_v38, %v2113_v13  ;;  %v2095_v41 = vadd.f32 %v2036_v49, %v1873_v58  ;;  %v10828_v13 = vld [vmem:[#allocation3_spill] sm:$0xff] }
 0x290   :  { %10822 = vst [vmem:[#allocation65_spill] sm:$0xff] %v8726_v47  ;;  %10823 = vst [vmem:[#allocation67_spill] sm:$0xff] %v8728_v29  ;;  %2422 = vrot.lane.b32.xlu1 %v2323_v32, %s7056_s1  ;;  %v2183_v11 = vmax.f32 %v2153_v20, 0.0  ;;  %2420 = vrot.lane.b32.xlu0 %v2322_v59, %s7056_s1  ;;  %v2050_v37 = vsel %vm2035_vm7, %v10824_v18, %v10810_v27  ;;  %v2337_v51 = vmul.f32 %v2292_v52, %v2184_v22  ;;  %v10827_v52 = vld [vmem:[#allocation13_spill] sm:$0xff]  ;;  %v10832_v32 = vld [vmem:[#allocation4_spill] sm:$0xff] }
 0x291   :  { %2349 = vst [vmem:[#allocation2] sm:$0xff] %v7057_v63  ;;  %2364 = vst [vmem:[#allocation2 + $0x78] sm:$0xff] %v7057_v63  ;;  %v1888_v28 = vadd.f32 %v1828_v12, %v1666_v40  ;;  %v2151_v44 = vadd.f32 %v10819_v38, %v2109_v56  ;;  %v2166_v14 = vmax.f32 %v2136_v30, 0.0  ;;  %v2137_v7 = vadd.f32 %v10806_v3, %v2095_v41  ;;  %v10833_v58 = vld [vmem:[#allocation7_spill] sm:$0xff]  ;;  %v10834_v56 = vld [vmem:[#allocation17_spill] sm:$0xff] }
 0x292   :  { %2382 = vst [vmem:[#allocation2 + $0x100] sm:$0xff] %v7057_v63  ;;  %v2336_v31 = vmul.f32 %v2291_v9, %v2183_v11  ;;  %v2185_v20 = vmax.f32 %v2155_v50, 0.0  ;;  %v120_v9 = vmul.f32 %v10828_v13, %v10827_v52  ;;  %v121_v10 = vmul.f32 %v10829_v42, %v10827_v52  ;;  %v10835_v30 = vld [vmem:[#allocation15_spill] sm:$0xff]  ;;  %v10836_v22 = vld [vmem:[#allocation14_spill] sm:$0xff]  ;;  %v10837_v41 = vld [vmem:[#allocation16_spill] sm:$0xff] }
 0x293   :  { %v8741_v48 = vpop.permute.xlu1 %1361  ;;  %v8743_v16 = vpop.permute.xlu0 %1359  ;;  %v2110_v62 = vadd.f32 %v2050_v37, %v1888_v28  ;;  %v2319_v27 = vmul.f32 %v8421_v39, %v2166_v14  ;;  %v122_v53 = vmul.f32 %v10832_v32, %v10827_v52  ;;  %v123_v59 = vmul.f32 %v10833_v58, %v10827_v52  ;;  %v10838_v28 = vld [vmem:[#allocation19_spill] sm:$0xff] }
 0x294   :  { %10825 = vst [vmem:[#allocation66_spill] sm:$0xff] %v8741_v48  ;;  %10826 = vst [vmem:[#allocation68_spill] sm:$0xff] %v8743_v16  ;;  %2450 = vrot.lane.b32.xlu1 %v2337_v51, %s7056_s1  ;;  %2448 = vrot.lane.b32.xlu0 %v2336_v31, %s7056_s1  ;;  %v2338_v26 = vmul.f32 %v2293_v34, %v2185_v20  ;;  %v2181_v12 = vmax.f32 %v2151_v44, 0.0  ;;  %v2290_v18 = vsel %vm1147_vm3, %v8421_v39, %v8336_v15  ;;  %v10839_v44 = vld [vmem:[#allocation18_spill] sm:$0xff]  ;;  %v10848_v48 = vld [vmem:[#allocation37_spill] sm:$0xff] }
 0x295   :  { %v314_v34 = vsel %vm308_vm0, %v10835_v30, %v10834_v56  ;;  %v135_v63 = vmul.f32 %v10828_v13, %v10836_v22  ;;  %v2152_v40 = vadd.f32 %v10819_v38, %v2110_v62  ;;  %v2167_v50 = vmax.f32 %v2137_v7, 0.0  ;;  %v10840_v62 = vld [vmem:[#allocation25_spill] sm:$0xff] }
 0x296   :  { %v315_v11 = vsel %vm308_vm0, %v10834_v56, %v10837_v41  ;;  %v136_v15 = vmul.f32 %v10829_v42, %v10836_v22  ;;  %v137_v37 = vmul.f32 %v10832_v32, %v10836_v22  ;;  %v2334_v51 = vmul.f32 %v8421_v39, %v2181_v12  ;;  %v10844_v32 = vld [vmem:[#allocation26_spill] sm:$0xff]  ;;  %v10866_v16 = vld [vmem:[#allocation121_spill] sm:$0xff] }
 0x297   :  { %v8754_v6 = vpop.permute.xlu1 %1549  ;;  %v8756_v49 = vpop.permute.xlu0 %1363  ;;  %v316_v31 = vsel %vm308_vm0, %v10837_v41, %v10838_v28  ;;  %v317_v14 = vsel %vm308_vm0, %v10838_v28, %v10839_v44  ;;  %v328_v7 = vsel %vm308_vm0, %v7478_v0, %v10840_v62  ;;  %v2320_v20 = vmul.f32 %v2290_v18, %v2167_v50  ;;  %v10845_v0 = vld [vmem:[#allocation29_spill] sm:$0xff]  ;;  %v10846_v50 = vld [vmem:[#allocation35_spill] sm:$0xff] }
 0x298   :  { %10830 = vst [vmem:[#allocation69_spill] sm:$0xff] %v8754_v6  ;;  %10831 = vst [vmem:[#allocation70_spill] sm:$0xff] %v8756_v49  ;;  %2414 = vrot.lane.b32.xlu1 %v2319_v27, %s7056_s1  ;;  %2452 = vrot.lane.b32.xlu0 %v2338_v26, %s7056_s1  ;;  %v372_v42 = vadd.f32 %v314_v34, %v120_v9  ;;  %v10843_v26 = vld [vmem:[#allocation27_spill] sm:$0xff]  ;;  %v138_v56 = vmul.f32 %v10833_v58, %v10836_v22  ;;  %v10847_v34 = vld [vmem:[#allocation34_spill] sm:$0xff]  ;;  %v2182_v28 = vmax.f32 %v2152_v40, 0.0 }
 0x299   :  { %v329_v39 = vsel %vm308_vm0, %v10840_v62, %v10843_v26  ;;  %v330_v12 = vsel %vm308_vm0, %v10843_v26, %v10844_v32  ;;  %v331_v30 = vsel %vm308_vm0, %v10844_v32, %v10845_v0  ;;  %v536_v9 = vsel %vm530_vm1, %v7550_v46, %v10846_v50 }
 0x29a   :  { %v537_v41 = vsel %vm530_vm1, %v10846_v50, %v10847_v34  ;;  %v373_v62 = vadd.f32 %v315_v11, %v121_v10  ;;  %v374_v26 = vadd.f32 %v316_v31, %v122_v53  ;;  %v375_v58 = vadd.f32 %v317_v14, %v123_v59  ;;  %v10852_v59 = vld [vmem:[#allocation48_spill] sm:$0xff]  ;;  %v10853_v11 = vld [vmem:[#allocation51_spill] sm:$0xff]  ;;  %v10854_v31 = vld [vmem:[#allocation50_spill] sm:$0xff] }
 0x29b   :  { %v8790_v27 = vpop.permute.xlu1 %1553  ;;  %v8792_v13 = vpop.permute.xlu0 %1551  ;;  %v387_v49 = vadd.f32 %v328_v7, %v135_v63  ;;  %v538_v32 = vsel %vm530_vm1, %v10847_v34, %v10848_v48  ;;  %v2335_v6 = vmul.f32 %v2290_v18, %v2182_v28  ;;  %v389_v40 = vadd.f32 %v330_v12, %v137_v37  ;;  %v10855_v18 = vld [vmem:[#allocation53_spill] sm:$0xff]  ;;  %v10861_v28 = vld [vmem:[#allocation106_spill] sm:$0xff] }
 0x29c   :  { %10841 = vst [vmem:[#allocation71_spill] sm:$0xff] %v8790_v27  ;;  %10842 = vst [vmem:[#allocation73_spill] sm:$0xff] %v8792_v13  ;;  %2444 = vrot.lane.b32.xlu1 %v2334_v51, %s7056_s1  ;;  %2416 = vrot.lane.b32.xlu0 %v2320_v20, %s7056_s1  ;;  %v388_v51 = vadd.f32 %v329_v39, %v136_v15  ;;  %v10849_v27 = vld [vmem:[#allocation36_spill] sm:$0xff]  ;;  %v390_v20 = vadd.f32 %v331_v30, %v138_v56  ;;  %v10857_v39 = vld [vmem:[#allocation102_spill] sm:$0xff] }
 0x29d   :  { %v539_v46 = vsel %vm530_vm1, %v10848_v48, %v10849_v27  ;;  %v594_v10 = vadd.f32 %v536_v9, %v372_v42  ;;  %v595_v53 = vadd.f32 %v537_v41, %v373_v62  ;;  %v550_v63 = vsel %vm530_vm1, %v10750_v2, %v10852_v59  ;;  %v10856_v42 = vld [vmem:[#allocation103_spill] sm:$0xff]  ;;  %v10858_v56 = vld [vmem:[#allocation105_spill] sm:$0xff]  ;;  %v10859_v9 = vld [vmem:[#allocation104_spill] sm:$0xff] }
 0x29e   :  { %v551_v15 = vsel %vm530_vm1, %v10852_v59, %v10853_v11  ;;  %v552_v48 = vsel %vm530_vm1, %v10853_v11, %v10854_v31  ;;  %v553_v14 = vsel %vm530_vm1, %v10854_v31, %v10855_v18  ;;  %v596_v37 = vadd.f32 %v538_v32, %v374_v26  ;;  %v10860_v41 = vld [vmem:[#allocation107_spill] sm:$0xff] }
 0x29f   :  { %v8819_v13 = vpop.permute.xlu1 %1579  ;;  %v8821_v50 = vpop.permute.xlu0 %1555  ;;  %v597_v7 = vadd.f32 %v539_v46, %v375_v58  ;;  %v850_v2 = vsel %vm844_vm2, %v10758_v43, %v10856_v42  ;;  %v851_v12 = vsel %vm844_vm2, %v10856_v42, %v10857_v39  ;;  %v852_v30 = vsel %vm844_vm2, %v10857_v39, %v10858_v56  ;;  %v10864_v42 = vld [vmem:[#allocation109_spill] sm:$0xff] }
 0x2a0   :  { %10850 = vst [vmem:[#allocation72_spill] sm:$0xff] %v8819_v13  ;;  %10851 = vst [vmem:[#allocation74_spill] sm:$0xff] %v8821_v50  ;;  %2446 = vrot.lane.b32.xlu0 %v2335_v6, %s7056_s1  ;;  %v853_v34 = vsel %vm844_vm2, %v10858_v56, %v10859_v9  ;;  %v865_v6 = vsel %vm844_vm2, %v10764_v1, %v10860_v41  ;;  %v866_v43 = vsel %vm844_vm2, %v10860_v41, %v10861_v28  ;;  %v10865_v56 = vld [vmem:[#allocation108_spill] sm:$0xff] }
 0x2a1   :  { %v609_v58 = vadd.f32 %v550_v63, %v387_v49  ;;  %v610_v32 = vadd.f32 %v551_v15, %v388_v51  ;;  %v611_v46 = vadd.f32 %v552_v48, %v389_v40  ;;  %v612_v59 = vadd.f32 %v553_v14, %v390_v20  ;;  %v10867_v51 = vld [vmem:[#allocation120_spill] sm:$0xff]  ;;  %v10868_v20 = vld [vmem:[#allocation123_spill] sm:$0xff] }
 0x2a2   :  { %v910_v11 = vadd.f32 %v850_v2, %v594_v10  ;;  %v911_v31 = vadd.f32 %v851_v12, %v595_v53  ;;  %v867_v39 = vsel %vm844_vm2, %v10861_v28, %v10864_v42  ;;  %v868_v1 = vsel %vm844_vm2, %v10864_v42, %v10865_v56  ;;  %v10869_v53 = vld [vmem:[#allocation122_spill] sm:$0xff]  ;;  %v10873_v2 = vld [vmem:[#allocation124_spill] sm:$0xff]  ;;  %v10874_v12 = vld [vmem:[#allocation127_spill] sm:$0xff] }
 0x2a3   :  { %v8854_v62 = vpop.permute.xlu1 %1583  ;;  %v8856_v26 = vpop.permute.xlu0 %1581  ;;  %v912_v50 = vadd.f32 %v852_v30, %v596_v37  ;;  %v913_v41 = vadd.f32 %v853_v34, %v597_v7  ;;  %v925_v13 = vadd.f32 %v865_v6, %v609_v58  ;;  %v1152_v49 = vsel %vm1147_vm3, %v10770_v61, %v10866_v16  ;;  %v10872_v7 = vld [vmem:[#allocation125_spill] sm:$0xff]  ;;  %v10875_v34 = vld [vmem:[#allocation126_spill] sm:$0xff]  ;;  %v10876_v28 = vld [vmem:[#allocation135_spill] sm:$0xff] }
 0x2a4   :  { %10862 = vst [vmem:[#allocation75_spill] sm:$0xff] %v8854_v62  ;;  %10863 = vst [vmem:[#allocation77_spill] sm:$0xff] %v8856_v26  ;;  %v926_v62 = vadd.f32 %v866_v43, %v610_v32  ;;  %v1153_v40 = vsel %vm1147_vm3, %v10866_v16, %v10867_v51  ;;  %v1154_v10 = vsel %vm1147_vm3, %v10867_v51, %v10868_v20  ;;  %v10877_v43 = vld [vmem:[#allocation136_spill] sm:$0xff]  ;;  %v10878_v32 = vld [vmem:[#allocation138_spill] sm:$0xff] }
 0x2a5   :  { %v1155_v63 = vsel %vm1147_vm3, %v10868_v20, %v10869_v53  ;;  %v927_v14 = vadd.f32 %v867_v39, %v611_v46  ;;  %v928_v37 = vadd.f32 %v868_v1, %v612_v59  ;;  %v1166_v61 = vsel %vm1147_vm3, %v10778_v23, %v10872_v7  ;;  %v10879_v20 = vld [vmem:[#allocation143_spill] sm:$0xff] }
 0x2a6   :  { %v1167_v16 = vsel %vm1147_vm3, %v10872_v7, %v10873_v2  ;;  %v1168_v30 = vsel %vm1147_vm3, %v10873_v2, %v10874_v12  ;;  %v1169_v6 = vsel %vm1147_vm3, %v10874_v12, %v10875_v34  ;;  %v1375_v58 = vsel %vm1369_vm4, %v10877_v43, %v10876_v28  ;;  %v10880_v7 = vld [vmem:[#allocation144_spill] sm:$0xff] }
 0x2a7   :  { %v8876_v15 = vpop.permute.xlu1 %1771  ;;  %v8878_v48 = vpop.permute.xlu0 %1585  ;;  %v1376_v23 = vsel %vm1369_vm4, %v10876_v28, %v10878_v32  ;;  %v1211_v46 = vadd.f32 %v1152_v49, %v910_v11  ;;  %v1212_v59 = vadd.f32 %v1153_v40, %v911_v31  ;;  %v1213_v42 = vadd.f32 %v1154_v10, %v912_v50  ;;  %v10884_v50 = vld [vmem:[#allocation137_spill] sm:$0xff]  ;;  %v10886_v49 = vld [vmem:[#allocation160_spill] sm:$0xff]  ;;  %v10887_v10 = vld [vmem:[#allocation162_spill] sm:$0xff] }
 0x2a8   :  { %10870 = vst [vmem:[#allocation80_spill] sm:$0xff] %v8876_v15  ;;  %10871 = vst [vmem:[#allocation81_spill] sm:$0xff] %v8878_v48  ;;  %v1214_v39 = vadd.f32 %v1155_v63, %v913_v41  ;;  %v1226_v1 = vadd.f32 %v1166_v61, %v925_v13  ;;  %v1227_v51 = vadd.f32 %v1167_v16, %v926_v62  ;;  %v10881_v48 = vld [vmem:[#allocation146_spill] sm:$0xff]  ;;  %v10885_v41 = vld [vmem:[#allocation159_spill] sm:$0xff] }
 0x2a9   :  { %v1597_v2 = vsel %vm1591_vm5, %v10880_v7, %v10879_v20  ;;  %v1598_v12 = vsel %vm1591_vm5, %v10879_v20, %v10881_v48  ;;  %v1228_v29 = vadd.f32 %v1168_v30, %v927_v14  ;;  %v1229_v28 = vadd.f32 %v1169_v6, %v928_v37  ;;  %v10888_v14 = vld [vmem:[#allocation140_spill] sm:$0xff]  ;;  %v10889_v61 = vld [vmem:[#allocation139_spill] sm:$0xff]  ;;  %v10890_v6 = vld [vmem:[#allocation142_spill] sm:$0xff] }
 0x2aa   :  { %v1434_v11 = vadd.f32 %v1375_v58, %v1212_v59  ;;  %v1435_v31 = vadd.f32 %v1376_v23, %v1213_v42  ;;  %v1374_v13 = vsel %vm1369_vm4, %v10782_v8, %v10877_v43  ;;  %v1377_v62 = vsel %vm1369_vm4, %v10878_v32, %v10884_v50  ;;  %v10891_v58 = vld [vmem:[#allocation141_spill] sm:$0xff]  ;;  %v10892_v23 = vld [vmem:[#allocation60_spill] sm:$0xff]  ;;  %v10893_v59 = vld [vmem:[#allocation58_spill] sm:$0xff] }
 0x2ab   :  { %v8904_v26 = vpop.permute.xlu1 %1775  ;;  %v8906_v15 = vpop.permute.xlu0 %1773  ;;  %v1819_v40 = vsel %vm1813_vm6, %v10886_v49, %v10885_v41  ;;  %v1820_v63 = vsel %vm1813_vm6, %v10885_v41, %v10887_v10  ;;  %v1388_v37 = vsel %vm1369_vm4, %v10794_v57, %v10888_v14  ;;  %v1389_v8 = vsel %vm1369_vm4, %v10888_v14, %v10889_v61  ;;  %v10894_v20 = vld [vmem:[#allocation61_spill] sm:$0xff]  ;;  %v10899_v14 = vld [vmem:[#allocation148_spill] sm:$0xff] }
 0x2ac   :  { %10882 = vst [vmem:[#allocation76_spill] sm:$0xff] %v8904_v26  ;;  %10883 = vst [vmem:[#allocation90_spill] sm:$0xff] %v8906_v15  ;;  %v1656_v16 = vadd.f32 %v1597_v2, %v1434_v11  ;;  %v1657_v30 = vadd.f32 %v1598_v12, %v1435_v31  ;;  %v1390_v43 = vsel %vm1369_vm4, %v10889_v61, %v10890_v6  ;;  %v10897_v12 = vld [vmem:[#allocation145_spill] sm:$0xff]  ;;  %v10898_v31 = vld [vmem:[#allocation147_spill] sm:$0xff] }
 0x2ad   :  { %v1391_v32 = vsel %vm1369_vm4, %v10890_v6, %v10891_v58  ;;  %v2041_v42 = vsel %vm2035_vm7, %v10893_v59, %v10892_v23  ;;  %v2042_v57 = vsel %vm2035_vm7, %v10892_v23, %v10894_v20  ;;  %v1599_v11 = vsel %vm1591_vm5, %v10881_v48, %v10897_v12 }
 0x2ae   :  { %v1611_v61 = vsel %vm1591_vm5, %v10899_v14, %v10898_v31  ;;  %v1878_v6 = vadd.f32 %v1819_v40, %v1656_v16  ;;  %v1879_v26 = vadd.f32 %v1820_v63, %v1657_v30  ;;  %v1433_v15 = vadd.f32 %v1374_v13, %v1211_v46  ;;  %v10907_v16 = vld [vmem:[#allocation165_spill] sm:$0xff] }
 0x2af   :  { %v8938_v41 = vpop.permute.xlu1 %1801  ;;  %v8940_v2 = vpop.permute.xlu0 %1777  ;;  %v1436_v58 = vadd.f32 %v1377_v62, %v1214_v39  ;;  %v1448_v47 = vadd.f32 %v1388_v37, %v1226_v1  ;;  %v1449_v21 = vadd.f32 %v1389_v8, %v1227_v51  ;;  %v1821_v23 = vsel %vm1813_vm6, %v10887_v10, %v10900_v35  ;;  %v10903_v39 = vld [vmem:[#allocation150_spill] sm:$0xff]  ;;  %v10904_v51 = vld [vmem:[#allocation149_spill] sm:$0xff] }
 0x2b0   :  { %10895 = vst [vmem:[#allocation91_spill] sm:$0xff] %v8938_v41  ;;  %10896 = vst [vmem:[#allocation78_spill] sm:$0xff] %v8940_v2  ;;  %v10901_v41 = vld [vmem:[#allocation163_spill] sm:$0xff]  ;;  %v10902_v2 = vld [vmem:[#allocation164_spill] sm:$0xff]  ;;  %v2100_v24 = vadd.f32 %v2041_v42, %v1878_v6  ;;  %v2101_v48 = vadd.f32 %v2042_v57, %v1879_v26  ;;  %v1450_v12 = vadd.f32 %v1390_v43, %v1228_v29 }
 0x2b1   :  { %v1833_v50 = vsel %vm1813_vm6, %v10902_v2, %v10901_v41  ;;  %v1451_v34 = vadd.f32 %v1391_v32, %v1229_v28  ;;  %v1658_v53 = vadd.f32 %v1599_v11, %v1436_v58  ;;  %v1671_v56 = vadd.f32 %v1611_v61, %v1449_v21  ;;  %v10905_v29 = vld [vmem:[#allocation92_spill] sm:$0xff]  ;;  %v10906_v37 = vld [vmem:[#allocation166_spill] sm:$0xff] }
 0x2b2   :  { %v1612_v1 = vsel %vm1591_vm5, %v10898_v31, %v10903_v39  ;;  %v1613_v13 = vsel %vm1591_vm5, %v10903_v39, %v10904_v51  ;;  %v2043_v26 = vsel %vm2035_vm7, %v10894_v20, %v8616_v36  ;;  %v2055_v21 = vsel %vm2035_vm7, %v8614_v60, %v8650_v17 }
 0x2b3   :  { %v8954_v40 = vpop.permute.xlu1 %1805  ;;  %v8956_v46 = vpop.permute.xlu0 %1803  ;;  %v1596_v28 = vsel %vm1591_vm5, %v10905_v29, %v10880_v7  ;;  %v1610_v62 = vsel %vm1591_vm5, %v10809_v4, %v10899_v14  ;;  %v1880_v10 = vadd.f32 %v1821_v23, %v1658_v53  ;;  %v1893_v63 = vadd.f32 %v1833_v50, %v1671_v56 }
 0x2b4   :  { %v1834_v8 = vsel %vm1813_vm6, %v10901_v41, %v10906_v37  ;;  %v1835_v30 = vsel %vm1813_vm6, %v10906_v37, %v10907_v16  ;;  %v2142_v43 = vadd.f32 %v10806_v3, %v2100_v24  ;;  %v2143_v58 = vadd.f32 %v10806_v3, %v2101_v48 }
 0x2b5   :  { %v1672_v32 = vadd.f32 %v1612_v1, %v1450_v12  ;;  %v1673_v7 = vadd.f32 %v1613_v13, %v1451_v34  ;;  %v2102_v42 = vadd.f32 %v2043_v26, %v1880_v10  ;;  %v2115_v20 = vadd.f32 %v2055_v21, %v1893_v63 }
 0x2b6   :  { %v1655_v56 = vadd.f32 %v1596_v28, %v1433_v15  ;;  %v1670_v53 = vadd.f32 %v1610_v62, %v1448_v47  ;;  %v2056_v50 = vsel %vm2035_vm7, %v8650_v17, %v8648_v19  ;;  %v2057_v41 = vsel %vm2035_vm7, %v8648_v19, %v8679_v25 }
 0x2b7   :  { %v2271_v57 = vpop.permute.xlu1 %2270  ;;  %v8984_v4 = vpop.permute.xlu0 %1807  ;;  %v1818_v24 = vsel %vm1813_vm6, %v10795_v55, %v10886_v49  ;;  %v1832_v34 = vsel %vm1813_vm6, %v10813_v54, %v10902_v2  ;;  %v1894_v12 = vadd.f32 %v1834_v8, %v1672_v32  ;;  %v1895_v11 = vadd.f32 %v1835_v30, %v1673_v7 }
 0x2b8   :  { %v2040_v47 = vsel %vm2035_vm7, %v8117_v45, %v10893_v59  ;;  %v2054_v17 = vsel %vm2035_vm7, %v10815_v33, %v8614_v60  ;;  %v2172_v15 = vmax.f32 %v2142_v43, 0.0  ;;  %v2173_v19 = vmax.f32 %v2143_v58, 0.0 }
 0x2b9   :  { %v2144_v31 = vadd.f32 %v10806_v3, %v2102_v42  ;;  %v2116_v14 = vadd.f32 %v2056_v50, %v1894_v12  ;;  %v2157_v55 = vadd.f32 %v10819_v38, %v2115_v20  ;;  %v2117_v49 = vadd.f32 %v2057_v41, %v1895_v11  ;;  %v10910_v11 = vld [vmem:[#allocation9_spill] sm:$0xff] }
 0x2ba   :  { %v1877_v2 = vadd.f32 %v1818_v24, %v1655_v56  ;;  %v1892_v6 = vadd.f32 %v1832_v34, %v1670_v53  ;;  %v2294_v42 = vsel %vm1147_vm3, %v8364_v5, %v2271_v57  ;;  %v10909_v5 = vld [vmem:[#allocation6_spill] sm:$0xff] }
 0x2bb   :  { %v2275_v61 = vpop.permute.xlu1 %2274  ;;  %v2273_v54 = vpop.permute.xlu0 %2272  ;;  %v2158_v33 = vadd.f32 %v10819_v38, %v2116_v14  ;;  %v2159_v1 = vadd.f32 %v10819_v38, %v2117_v49  ;;  %v2187_v13 = vmax.f32 %v2157_v55, 0.0  ;;  %v2174_v21 = vmax.f32 %v2144_v31, 0.0  ;;  %v10913_v14 = vld [vmem:[#allocation21_spill] sm:$0xff]  ;;  %v10914_v49 = vld [vmem:[#allocation10_spill] sm:$0xff] }
 0x2bc   :  { %v2295_v23 = vsel %vm1147_vm3, %v2271_v57, %v2273_v54  ;;  %v2296_v45 = vsel %vm1147_vm3, %v2273_v54, %v2275_v61  ;;  %v2099_v39 = vadd.f32 %v2040_v47, %v1877_v2  ;;  %v2114_v60 = vadd.f32 %v2054_v17, %v1892_v6  ;;  %v10911_v17 = vld [vmem:[#allocation8_spill] sm:$0xff] }
 0x2bd   :  { %v2325_v59 = vmul.f32 %v2295_v23, %v2172_v15  ;;  %v2326_v48 = vmul.f32 %v2296_v45, %v2173_v19  ;;  %v2340_v62 = vmul.f32 %v2295_v23, %v2187_v13  ;;  %v2188_v8 = vmax.f32 %v2158_v33, 0.0  ;;  %v10912_v19 = vld [vmem:[#allocation11_spill] sm:$0xff]  ;;  %v10915_v54 = vld [vmem:[#allocation12_spill] sm:$0xff] }
 0x2be   :  { %v2141_v63 = vadd.f32 %v10806_v3, %v2099_v39  ;;  %v2156_v37 = vadd.f32 %v10819_v38, %v2114_v60  ;;  %v2189_v30 = vmax.f32 %v2159_v1, 0.0  ;;  %v124_v57 = vmul.f32 %v10909_v5, %v10827_v52  ;;  %v10916_v23 = vld [vmem:[#allocation20_spill] sm:$0xff]  ;;  %v10918_v39 = vld [vmem:[#allocation22_spill] sm:$0xff] }
 0x2bf   :  { %v9010_v26 = vpop.permute.xlu1 %808  ;;  %2428 = vrot.lane.b32.xlu0 %v2326_v48, %s7056_s1  ;;  %v9013_v29 = vpop.permute.xlu0 %2276  ;;  %2426 = vrot.lane.b32.xlu1 %v2325_v59, %s7056_s1  ;;  %v2341_v32 = vmul.f32 %v2296_v45, %v2188_v8  ;;  %v125_v47 = vmul.f32 %v10910_v11, %v10827_v52  ;;  %v126_v15 = vmul.f32 %v10911_v17, %v10827_v52  ;;  %v10917_v59 = vld [vmem:[#allocation23_spill] sm:$0xff]  ;;  %v10919_v33 = vld [vmem:[#allocation24_spill] sm:$0xff] }
 0x2c0   :  { %10908 = vst [vmem:[#allocation82_spill] sm:$0xff] %v9013_v29  ;;  %v2297_v28 = vsel %vm1147_vm3, %v2275_v61, %v9013_v29  ;;  %v2171_v20 = vmax.f32 %v2141_v63, 0.0  ;;  %v2186_v56 = vmax.f32 %v2156_v37, 0.0  ;;  %v127_v31 = vmul.f32 %v10912_v19, %v10827_v52  ;;  %v10920_v1 = vld [vmem:[#allocation28_spill] sm:$0xff] }
 0x2c1   :  { %v2327_v10 = vmul.f32 %v2297_v28, %v2174_v21  ;;  %v2342_v7 = vmul.f32 %v2297_v28, %v2189_v30  ;;  %v318_v55 = vsel %vm308_vm0, %v10839_v44, %v10913_v14  ;;  %v128_v61 = vmul.f32 %v10914_v49, %v10827_v52  ;;  %v10921_v28 = vld [vmem:[#allocation31_spill] sm:$0xff] }
 0x2c2   :  { %v2324_v41 = vmul.f32 %v2294_v42, %v2171_v20  ;;  %v2339_v24 = vmul.f32 %v2294_v42, %v2186_v56  ;;  %v129_v2 = vmul.f32 %v10915_v54, %v10827_v52  ;;  %v139_v6 = vmul.f32 %v10909_v5, %v10836_v22  ;;  %v10922_v20 = vld [vmem:[#allocation30_spill] sm:$0xff] }
 0x2c3   :  { %v9020_v43 = vpop.permute.xlu1 %840  ;;  %2456 = vrot.lane.b32.xlu0 %v2340_v62, %s7056_s1  ;;  %v9023_v58 = vpop.permute.xlu0 %810  ;;  %2430 = vrot.lane.b32.xlu1 %v2327_v10, %s7056_s1  ;;  %v319_v45 = vsel %vm308_vm0, %v10913_v14, %v10916_v23  ;;  %v320_v48 = vsel %vm308_vm0, %v10916_v23, %v10917_v59  ;;  %v321_v44 = vsel %vm308_vm0, %v10917_v59, %v10918_v39  ;;  %v10928_v23 = vld [vmem:[#allocation40_spill] sm:$0xff] }
 0x2c4   :  { %v140_v60 = vmul.f32 %v10910_v11, %v10836_v22  ;;  %v322_v52 = vsel %vm308_vm0, %v10918_v39, %v10919_v33  ;;  %v332_v13 = vsel %vm308_vm0, %v10845_v0, %v10920_v1  ;;  %v141_v21 = vmul.f32 %v10911_v17, %v10836_v22  ;;  %v10923_v11 = vld [vmem:[#allocation33_spill] sm:$0xff] }
 0x2c5   :  { %v333_v62 = vsel %vm308_vm0, %v10920_v1, %v10921_v28  ;;  %v376_v37 = vadd.f32 %v318_v55, %v124_v57  ;;  %v144_v8 = vmul.f32 %v10915_v54, %v10836_v22  ;;  %v142_v30 = vmul.f32 %v10912_v19, %v10836_v22  ;;  %v10924_v19 = vld [vmem:[#allocation32_spill] sm:$0xff] }
 0x2c6   :  { %v143_v0 = vmul.f32 %v10914_v49, %v10836_v22  ;;  %v379_v42 = vadd.f32 %v321_v44, %v127_v31  ;;  %v334_v56 = vsel %vm308_vm0, %v10921_v28, %v10922_v20  ;;  %v391_v5 = vadd.f32 %v332_v13, %v139_v6  ;;  %v10926_v31 = vld [vmem:[#allocation38_spill] sm:$0xff]  ;;  %v10931_v44 = vld [vmem:[#allocation55_spill] sm:$0xff] }
 0x2c7   :  { %v9028_v53 = vpop.permute.xlu1 %1993  ;;  %2460 = vrot.lane.b32.xlu0 %v2342_v7, %s7056_s1  ;;  %v9031_v50 = vpop.permute.xlu0 %842  ;;  %2458 = vrot.lane.b32.xlu1 %v2341_v32, %s7056_s1  ;;  %v377_v32 = vadd.f32 %v319_v45, %v125_v47  ;;  %v378_v7 = vadd.f32 %v320_v48, %v126_v15  ;;  %v392_v57 = vadd.f32 %v333_v62, %v140_v60  ;;  %v10925_v47 = vld [vmem:[#allocation39_spill] sm:$0xff]  ;;  %v10930_v48 = vld [vmem:[#allocation52_spill] sm:$0xff] }
 0x2c8   :  { %v335_v17 = vsel %vm308_vm0, %v10922_v20, %v10923_v11  ;;  %v336_v22 = vsel %vm308_vm0, %v10923_v11, %v10924_v19  ;;  %v540_v15 = vsel %vm530_vm1, %v10849_v27, %v10925_v47  ;;  %v541_v14 = vsel %vm530_vm1, %v10925_v47, %v10926_v31  ;;  %v10929_v27 = vld [vmem:[#allocation43_spill] sm:$0xff] }
 0x2c9   :  { %v396_v54 = vadd.f32 %v10924_v19, %v144_v8  ;;  %v544_v59 = vsel %vm530_vm1, %v10928_v23, %v10929_v27  ;;  %v554_v39 = vsel %vm530_vm1, %v10855_v18, %v10930_v48  ;;  %v555_v60 = vsel %vm530_vm1, %v10930_v48, %v10931_v44  ;;  %v10945_v48 = vld [vmem:[#allocation167_spill] sm:$0xff] }
 0x2ca   :  { %v394_v1 = vadd.f32 %v335_v17, %v142_v30  ;;  %v9128_v13 = vadd.f32 %v336_v22, %v143_v0  ;;  %v599_v28 = vadd.f32 %v541_v14, %v377_v32  ;;  %v613_v30 = vadd.f32 %v554_v39, %v391_v5  ;;  %v10946_v39 = vld [vmem:[#allocation122_spill] sm:$0xff] }
 0x2cb   :  { %v9034_v34 = vpop.permute.xlu1 %1997  ;;  %2454 = vrot.lane.b32.xlu0 %v2339_v24, %s7056_s1  ;;  %v9037_v12 = vpop.permute.xlu0 %1995  ;;  %2424 = vrot.lane.b32.xlu1 %v2324_v41, %s7056_s1  ;;  %v380_v41 = vadd.f32 %v322_v52, %v128_v61  ;;  %v381_v24 = vadd.f32 %v10919_v33, %v129_v2  ;;  %v393_v61 = vadd.f32 %v334_v56, %v141_v21  ;;  %v10927_v2 = vld [vmem:[#allocation41_spill] sm:$0xff]  ;;  %v10932_v33 = vld [vmem:[#allocation54_spill] sm:$0xff] }
 0x2cc   :  { %v542_v6 = vsel %vm530_vm1, %v10926_v31, %v10927_v2  ;;  %v543_v45 = vsel %vm530_vm1, %v10927_v2, %v10928_v23  ;;  %v556_v52 = vsel %vm530_vm1, %v10931_v44, %v10932_v33  ;;  %v598_v21 = vadd.f32 %v540_v15, %v376_v37  ;;  %v10933_v56 = vld [vmem:[#allocation57_spill] sm:$0xff]  ;;  %v10934_v37 = vld [vmem:[#allocation56_spill] sm:$0xff]  ;;  %v10938_v15 = vld [vmem:[#allocation154_spill] sm:$0xff] }
 0x2cd   :  { %v600_v62 = vadd.f32 %v542_v6, %v378_v7  ;;  %v601_v8 = vadd.f32 %v543_v45, %v379_v42  ;;  %v9131_v20 = vadd.f32 %v10929_v27, %v381_v24  ;;  %v557_v18 = vsel %vm530_vm1, %v10932_v33, %v10933_v56  ;;  %v10936_v7 = vld [vmem:[#allocation152_spill] sm:$0xff]  ;;  %v10937_v24 = vld [vmem:[#allocation151_spill] sm:$0xff]  ;;  %v10943_v23 = vld [vmem:[#allocation158_spill] sm:$0xff] }
 0x2ce   :  { %v9140_v47 = vadd.f32 %v544_v59, %v380_v41  ;;  %v614_v0 = vadd.f32 %v555_v60, %v392_v57  ;;  %v615_v17 = vadd.f32 %v556_v52, %v393_v61  ;;  %v9143_v32 = vadd.f32 %v10934_v37, %v396_v54  ;;  %v10939_v57 = vld [vmem:[#allocation153_spill] sm:$0xff]  ;;  %v10940_v61 = vld [vmem:[#allocation156_spill] sm:$0xff]  ;;  %v10942_v2 = vld [vmem:[#allocation155_spill] sm:$0xff] }
 0x2cf   :  { %v9079_v10 = vpop.permute.xlu1 %2023  ;;  %v9081_v63 = vpop.permute.xlu0 %1999  ;;  %v854_v42 = vsel %vm844_vm2, %v10859_v9, %v10936_v7  ;;  %v855_v22 = vsel %vm844_vm2, %v10936_v7, %v10937_v24  ;;  %v856_v31 = vsel %vm844_vm2, %v10937_v24, %v10938_v15  ;;  %v9157_v41 = vsel %vm530_vm1, %v10933_v56, %v10934_v37  ;;  %v10941_v9 = vld [vmem:[#allocation108_spill] sm:$0xff]  ;;  %v10944_v27 = vld [vmem:[#allocation157_spill] sm:$0xff] }
 0x2d0   :  { %10935 = vst [vmem:[#allocation83_spill] sm:$0xff] %v9143_v32  ;;  %v616_v5 = vadd.f32 %v557_v18, %v394_v1  ;;  %v857_v14 = vsel %vm844_vm2, %v10938_v15, %v10939_v57  ;;  %v869_v54 = vsel %vm844_vm2, %v10941_v9, %v10940_v61  ;;  %v870_v6 = vsel %vm844_vm2, %v10940_v61, %v10942_v2  ;;  %v10949_v18 = vld [vmem:[#allocation42_spill] sm:$0xff]  ;;  %v10950_v15 = vld [vmem:[#allocation45_spill] sm:$0xff]  ;;  %v10951_v9 = vld [vmem:[#allocation44_spill] sm:$0xff] }
 0x2d1   :  { %v871_v45 = vsel %vm844_vm2, %v10942_v2, %v10943_v23  ;;  %v872_v59 = vsel %vm844_vm2, %v10943_v23, %v10944_v27  ;;  %v1156_v44 = vsel %vm1147_vm3, %v10946_v39, %v10945_v48  ;;  %v914_v52 = vadd.f32 %v854_v42, %v598_v21  ;;  %v10952_v2 = vld [vmem:[#allocation126_spill] sm:$0xff] }
 0x2d2   :  { %v915_v1 = vadd.f32 %v855_v22, %v599_v28  ;;  %v916_v56 = vadd.f32 %v856_v31, %v600_v62  ;;  %v1157_v37 = vsel %vm1147_vm3, %v10945_v48, %v10949_v18  ;;  %v917_v7 = vadd.f32 %v857_v14, %v601_v8  ;;  %v10953_v62 = vld [vmem:[#allocation47_spill] sm:$0xff]  ;;  %v10954_v22 = vld [vmem:[#allocation49_spill] sm:$0xff] }
 0x2d3   :  { %v9105_v55 = vpop.permute.xlu1 %2027  ;;  %v9107_v49 = vpop.permute.xlu0 %2025  ;;  %v929_v24 = vadd.f32 %v869_v54, %v613_v30  ;;  %v1158_v61 = vsel %vm1147_vm3, %v10949_v18, %v10950_v15  ;;  %v1170_v23 = vsel %vm1147_vm3, %v10952_v2, %v10951_v9  ;;  %v930_v39 = vadd.f32 %v870_v6, %v614_v0  ;;  %v10955_v30 = vld [vmem:[#allocation46_spill] sm:$0xff] }
 0x2d4   :  { %v931_v29 = vadd.f32 %v871_v45, %v615_v17  ;;  %v1215_v21 = vadd.f32 %v1156_v44, %v914_v52  ;;  %v1216_v28 = vadd.f32 %v1157_v37, %v915_v1  ;;  %v1159_v42 = vsel %vm1147_vm3, %v10950_v15, %v10953_v62  ;;  %v10959_v45 = vld [vmem:[#allocation63_spill] sm:$0xff]  ;;  %v10961_v44 = vld [vmem:[#allocation64_spill] sm:$0xff]  ;;  %v10962_v1 = vld [vmem:[#allocation62_spill] sm:$0xff] }
 0x2d5   :  { %v1171_v8 = vsel %vm1147_vm3, %v10951_v9, %v10954_v22  ;;  %v1172_v31 = vsel %vm1147_vm3, %v10954_v22, %v10955_v30  ;;  %v1217_v0 = vadd.f32 %v1158_v61, %v916_v56  ;;  %v1230_v17 = vadd.f32 %v1170_v23, %v929_v24  ;;  %v10963_v37 = vld [vmem:[#allocation65_spill] sm:$0xff]  ;;  %v10965_v24 = vld [vmem:[#allocation67_spill] sm:$0xff]  ;;  %v10966_v22 = vld [vmem:[#allocation68_spill] sm:$0xff] }
 0x2d6   :  { %v1379_v52 = vsel %vm1369_vm4, %v10959_v45, %v10961_v44  ;;  %v1380_v18 = vsel %vm1369_vm4, %v10961_v44, %v10962_v1  ;;  %v10964_v15 = vld [vmem:[#allocation141_spill] sm:$0xff]  ;;  %v1381_v61 = vsel %vm1369_vm4, %v10962_v1, %v10965_v24  ;;  %v1218_v9 = vadd.f32 %v1159_v42, %v917_v7 }
 0x2d7   :  { %v9136_v11 = vpop.permute.xlu1 %1113  ;;  %v9138_v19 = vpop.permute.xlu0 %2029  ;;  %v1392_v56 = vsel %vm1369_vm4, %v10964_v15, %v10963_v37  ;;  %v1231_v2 = vadd.f32 %v1171_v8, %v930_v39  ;;  %v1232_v23 = vadd.f32 %v1172_v31, %v931_v29  ;;  %v1438_v7 = vadd.f32 %v1379_v52, %v1216_v28  ;;  %v10972_v8 = vld [vmem:[#allocation66_spill] sm:$0xff] }
 0x2d8   :  { %v1439_v29 = vadd.f32 %v1380_v18, %v1217_v0  ;;  %v1452_v39 = vadd.f32 %v1392_v56, %v1230_v17  ;;  %v1440_v42 = vadd.f32 %v1381_v61, %v1218_v9  ;;  %v10973_v31 = vld [vmem:[#allocation90_spill] sm:$0xff]  ;;  %v10978_v56 = vld [vmem:[#allocation72_spill] sm:$0xff] }
 0x2d9   :  { %v10977_v0 = vld [vmem:[#allocation70_spill] sm:$0xff]  ;;  %v1614_v61 = vsel %vm1591_vm5, %v10904_v51, %v10978_v56 }
 0x2da   :  { %v1395_v17 = vsel %vm1369_vm4, %v10972_v8, %v10977_v0  ;;  %v10979_v9 = vld [vmem:[#allocation74_spill] sm:$0xff]  ;;  %v10984_v0 = vld [vmem:[#allocation81_spill] sm:$0xff] }
 0x2db   :  { %v9177_v60 = vpop.permute.xlu1 %1143  ;;  %v9179_v33 = vpop.permute.xlu0 %1115 }
 0x2dc   :  { %10947 = vst [vmem:[#allocation79_spill] sm:$0xff] %v9177_v60  ;;  %10948 = vst [vmem:[#allocation110_spill] sm:$0xff] %v9179_v33  ;;  %v932_v33 = vadd.f32 %v872_v59, %v616_v5  ;;  %v10958_v5 = vld [vmem:[#allocation59_spill] sm:$0xff]  ;;  %v10960_v59 = vld [vmem:[#allocation137_spill] sm:$0xff] }
 0x2dd   :  { %v1173_v6 = vsel %vm1147_vm3, %v10955_v30, %v10958_v5  ;;  %v1378_v48 = vsel %vm1369_vm4, %v10960_v59, %v10959_v45  ;;  %v1393_v30 = vsel %vm1369_vm4, %v10963_v37, %v10966_v22  ;;  %v10968_v5 = vld [vmem:[#allocation69_spill] sm:$0xff]  ;;  %v10969_v60 = vld [vmem:[#allocation71_spill] sm:$0xff]  ;;  %v10975_v37 = vld [vmem:[#allocation76_spill] sm:$0xff] }
 0x2de   :  { %v1233_v45 = vadd.f32 %v1173_v6, %v932_v33  ;;  %v1437_v59 = vadd.f32 %v1378_v48, %v1215_v21  ;;  %v1394_v33 = vsel %vm1369_vm4, %v10966_v22, %v10972_v8  ;;  %v1453_v21 = vadd.f32 %v1393_v30, %v1231_v2  ;;  %v10974_v6 = vld [vmem:[#allocation80_spill] sm:$0xff] }
 0x2df   :  { %v9199_v14 = vpop.permute.xlu1 %1335  ;;  %v9201_v54 = vpop.permute.xlu0 %1145  ;;  %v1823_v48 = vsel %vm1813_vm6, %v10974_v6, %v10973_v31  ;;  %v1603_v2 = vsel %vm1591_vm5, %v10969_v60, %v10979_v9  ;;  %v2045_v22 = vsel %vm2035_vm7, %v9028_v53, %v9037_v12  ;;  %v1454_v8 = vadd.f32 %v1394_v33, %v1232_v23  ;;  %v10985_v9 = vld [vmem:[#allocation78_spill] sm:$0xff] }
 0x2e0   :  { %10956 = vst [vmem:[#allocation111_spill] sm:$0xff] %v9199_v14  ;;  %10957 = vst [vmem:[#allocation84_spill] sm:$0xff] %v9201_v54  ;;  %v10967_v54 = vld [vmem:[#allocation73_spill] sm:$0xff]  ;;  %v1822_v33 = vsel %vm1813_vm6, %v10900_v35, %v10974_v6  ;;  %v1839_v35 = vsel %vm1813_vm6, %v8954_v40, %v8984_v4 }
 0x2e1   :  { %v1601_v44 = vsel %vm1591_vm5, %v10968_v5, %v10967_v54  ;;  %v1602_v15 = vsel %vm1591_vm5, %v10967_v54, %v10969_v60  ;;  %v1824_v54 = vsel %vm1813_vm6, %v10973_v31, %v10975_v37 }
 0x2e2   :  { %v1660_v52 = vadd.f32 %v1601_v44, %v1438_v7  ;;  %v1661_v18 = vadd.f32 %v1602_v15, %v1439_v29  ;;  %v10982_v44 = vld [vmem:[#allocation77_spill] sm:$0xff]  ;;  %v10983_v15 = vld [vmem:[#allocation75_spill] sm:$0xff] }
 0x2e3   :  { %v9230_v14 = vpop.permute.xlu1 %1365  ;;  %v9232_v1 = vpop.permute.xlu0 %1337  ;;  %v1615_v51 = vsel %vm1591_vm5, %v10978_v56, %v10982_v44  ;;  %v1616_v60 = vsel %vm1591_vm5, %v10982_v44, %v10983_v15  ;;  %v1674_v44 = vadd.f32 %v1614_v61, %v1452_v39  ;;  %v2059_v39 = vsel %vm2035_vm7, %v9079_v10, %v9107_v49 }
 0x2e4   :  { %10970 = vst [vmem:[#allocation85_spill] sm:$0xff] %v9230_v14  ;;  %10971 = vst [vmem:[#allocation93_spill] sm:$0xff] %v9232_v1  ;;  %v10976_v14 = vld [vmem:[#allocation145_spill] sm:$0xff]  ;;  %v1882_v7 = vadd.f32 %v1823_v48, %v1660_v52  ;;  %v1883_v29 = vadd.f32 %v1824_v54, %v1661_v18  ;;  %v1455_v1 = vadd.f32 %v1395_v17, %v1233_v45 }
 0x2e5   :  { %v1600_v28 = vsel %vm1591_vm5, %v10976_v14, %v10968_v5  ;;  %v2046_v14 = vsel %vm2035_vm7, %v9037_v12, %v9034_v34  ;;  %v1617_v12 = vsel %vm1591_vm5, %v10983_v15, %v10984_v0  ;;  %v1662_v48 = vadd.f32 %v1603_v2, %v1440_v42 }
 0x2e6   :  { %v1659_v31 = vadd.f32 %v1600_v28, %v1437_v59  ;;  %v2104_v24 = vadd.f32 %v2045_v22, %v1882_v7  ;;  %v2105_v32 = vadd.f32 %v2046_v14, %v1883_v29  ;;  %v1675_v54 = vadd.f32 %v1615_v51, %v1453_v21 }
 0x2e7   :  { %v9261_v5 = vpop.permute.xlu1 %1557  ;;  %v9263_v30 = vpop.permute.xlu0 %1367  ;;  %v1676_v23 = vadd.f32 %v1616_v60, %v1454_v8  ;;  %v1677_v28 = vadd.f32 %v1617_v12, %v1455_v1  ;;  %v1838_v17 = vsel %vm1813_vm6, %v8956_v46, %v8954_v40  ;;  %v1160_v12 = vsel %vm1147_vm3, %v10953_v62, %v9136_v11  ;;  %v10987_v62 = vld [vmem:[#allocation83_spill] sm:$0xff] }
 0x2e8   :  { %10980 = vst [vmem:[#allocation87_spill] sm:$0xff] %v9261_v5  ;;  %10981 = vst [vmem:[#allocation86_spill] sm:$0xff] %v9263_v30  ;;  %v1825_v30 = vsel %vm1813_vm6, %v10975_v37, %v10985_v9  ;;  %v10986_v5 = vld [vmem:[#allocation91_spill] sm:$0xff]  ;;  %v2047_v37 = vsel %vm2035_vm7, %v9034_v34, %v9081_v63  ;;  %v2044_v34 = vsel %vm2035_vm7, %v8616_v36, %v9028_v53 }
 0x2e9   :  { %v1837_v56 = vsel %vm1813_vm6, %v10986_v5, %v8956_v46  ;;  %v1836_v42 = vsel %vm1813_vm6, %v10907_v16, %v10986_v5  ;;  %v1884_v21 = vadd.f32 %v1825_v30, %v1662_v48  ;;  %v2146_v1 = vadd.f32 %v10806_v3, %v2104_v24 }
 0x2ea   :  { %v1897_v52 = vadd.f32 %v1837_v56, %v1675_v54  ;;  %v2147_v6 = vadd.f32 %v10806_v3, %v2105_v32  ;;  %v2058_v16 = vsel %vm2035_vm7, %v8679_v25, %v9079_v10  ;;  %v2060_v46 = vsel %vm2035_vm7, %v9107_v49, %v9105_v55 }
 0x2eb   :  { %v9280_v59 = vpop.permute.xlu1 %1587  ;;  %v9282_v45 = vpop.permute.xlu0 %1559  ;;  %v2106_v18 = vadd.f32 %v2047_v37, %v1884_v21  ;;  %v1881_v22 = vadd.f32 %v1822_v33, %v1659_v31  ;;  %v1896_v36 = vadd.f32 %v1836_v42, %v1674_v44  ;;  %v1898_v53 = vadd.f32 %v1838_v17, %v1676_v23  ;;  %v10988_v42 = vld [vmem:[#allocation111_spill] sm:$0xff] }
 0x2ec   :  { %v2119_v61 = vadd.f32 %v2059_v39, %v1897_v52  ;;  %v2061_v32 = vsel %vm2035_vm7, %v9105_v55, %v9138_v19  ;;  %v617_v25 = vadd.f32 %v9157_v41, %v9128_v13  ;;  %v1899_v10 = vadd.f32 %v1839_v35, %v1677_v28  ;;  %v10989_v21 = vld [vmem:[#allocation67_spill] sm:$0xff] }
 0x2ed   :  { %v858_v49 = vsel %vm844_vm2, %v10939_v57, %v9010_v26  ;;  %v873_v24 = vsel %vm844_vm2, %v10944_v27, %v9020_v43  ;;  %v2103_v14 = vadd.f32 %v2044_v34, %v1881_v22  ;;  %v2118_v5 = vadd.f32 %v2058_v16, %v1896_v36  ;;  %v10990_v52 = vld [vmem:[#allocation79_spill] sm:$0xff] }
 0x2ee   :  { %v2120_v30 = vadd.f32 %v2060_v46, %v1898_v53  ;;  %v2176_v51 = vmax.f32 %v2146_v1, 0.0  ;;  %v2148_v15 = vadd.f32 %v10806_v3, %v2106_v18  ;;  %v2161_v55 = vadd.f32 %v10819_v38, %v2119_v61  ;;  %v10991_v35 = vld [vmem:[#allocation59_spill] sm:$0xff]  ;;  %v10992_v1 = vld [vmem:[#allocation110_spill] sm:$0xff] }
 0x2ef   :  { %v9313_v2 = vpop.permute.xlu1 %2278  ;;  %v9315_v40 = vpop.permute.xlu0 %1589  ;;  %v2121_v60 = vadd.f32 %v2061_v32, %v1899_v10  ;;  %v2177_v13 = vmax.f32 %v2147_v6, 0.0  ;;  %v918_v29 = vadd.f32 %v858_v49, %v9140_v47  ;;  %v859_v57 = vsel %vm844_vm2, %v9010_v26, %v9023_v58  ;;  %v10993_v46 = vld [vmem:[#allocation87_spill] sm:$0xff]  ;;  %v10994_v61 = vld [vmem:[#allocation74_spill] sm:$0xff]  ;;  %v10995_v10 = vld [vmem:[#allocation84_spill] sm:$0xff] }
 0x2f0   :  { %v874_v31 = vsel %vm844_vm2, %v9020_v43, %v9031_v50  ;;  %v933_v47 = vadd.f32 %v873_v24, %v617_v25  ;;  %v2145_v48 = vadd.f32 %v10806_v3, %v2103_v14  ;;  %v2160_v26 = vadd.f32 %v10819_v38, %v2118_v5  ;;  %v10996_v24 = vld [vmem:[#allocation85_spill] sm:$0xff]  ;;  %v10997_v14 = vld [vmem:[#allocation70_spill] sm:$0xff] }
 0x2f1   :  { %v2162_v58 = vadd.f32 %v10819_v38, %v2120_v30  ;;  %v919_v54 = vadd.f32 %v859_v57, %v9131_v20  ;;  %v2163_v23 = vadd.f32 %v10819_v38, %v2121_v60  ;;  %v2191_v33 = vmax.f32 %v2161_v55, 0.0  ;;  %v10998_v60 = vld [vmem:[#allocation93_spill] sm:$0xff] }
 0x2f2   :  { %v2178_v43 = vmax.f32 %v2148_v15, 0.0  ;;  %v934_v37 = vadd.f32 %v874_v31, %v10987_v62  ;;  %v1219_v39 = vadd.f32 %v1160_v12, %v918_v29  ;;  %v1382_v17 = vsel %vm1369_vm4, %v10989_v21, %v10988_v42 }
 0x2f3   :  { %v2283_v7 = vpop.permute.xlu1 %2282  ;;  %v2281_v41 = vpop.permute.xlu0 %2280  ;;  %v1174_v34 = vsel %vm1147_vm3, %v10991_v35, %v10990_v52  ;;  %v1161_v6 = vsel %vm1147_vm3, %v9136_v11, %v10992_v1  ;;  %v1604_v22 = vsel %vm1591_vm5, %v10994_v61, %v10993_v46  ;;  %v2175_v36 = vmax.f32 %v2145_v48, 0.0 }
 0x2f4   :  { %v2299_v27 = vsel %vm1147_vm3, %v9313_v2, %v2281_v41  ;;  %v2300_v8 = vsel %vm1147_vm3, %v2281_v41, %v2283_v7  ;;  %v2190_v53 = vmax.f32 %v2160_v26, 0.0  ;;  %v2192_v32 = vmax.f32 %v2162_v58, 0.0  ;;  %v11000_v26 = vld [vmem:[#allocation86_spill] sm:$0xff] }
 0x2f5   :  { %v2329_v56 = vmul.f32 %v2299_v27, %v2176_v51  ;;  %v2330_v44 = vmul.f32 %v2300_v8, %v2177_v13  ;;  %v2344_v16 = vmul.f32 %v2299_v27, %v2191_v33  ;;  %v1441_v25 = vadd.f32 %v1382_v17, %v1219_v39 }
 0x2f6   :  { %v1175_v49 = vsel %vm1147_vm3, %v10990_v52, %v10995_v10  ;;  %v1396_v5 = vsel %vm1369_vm4, %v10997_v14, %v10996_v24  ;;  %v2193_v30 = vmax.f32 %v2163_v23, 0.0  ;;  %v1234_v15 = vadd.f32 %v1174_v34, %v933_v47 }
 0x2f7   :  { %v1780_v28 = vpop.permute.xlu1 %1779  ;;  %2436 = vrot.lane.b32.xlu0 %v2330_v44, %s7056_s1  ;;  %v9349_v50 = vpop.permute.xlu0 %2284  ;;  %2434 = vrot.lane.b32.xlu1 %v2329_v56, %s7056_s1  ;;  %v1220_v55 = vadd.f32 %v1161_v6, %v919_v54  ;;  %v1663_v41 = vadd.f32 %v1604_v22, %v1441_v25  ;;  %v1618_v29 = vsel %vm1591_vm5, %v10984_v0, %v9280_v59  ;;  %v10999_v44 = vld [vmem:[#allocation82_spill] sm:$0xff] }
 0x2f8   :  { %v2301_v20 = vsel %vm1147_vm3, %v2283_v7, %v9349_v50  ;;  %v1383_v7 = vsel %vm1369_vm4, %v10988_v42, %v10998_v60  ;;  %v1826_v13 = vsel %vm1813_vm6, %v10985_v9, %v1780_v28  ;;  %v2345_v57 = vmul.f32 %v2300_v8, %v2192_v32 }
 0x2f9   :  { %v2331_v18 = vmul.f32 %v2301_v20, %v2178_v43  ;;  %v2346_v27 = vmul.f32 %v2301_v20, %v2193_v30  ;;  %v1235_v31 = vadd.f32 %v1175_v49, %v934_v37  ;;  %v1456_v12 = vadd.f32 %v1396_v5, %v1234_v15 }
 0x2fa   :  { %v1605_v56 = vsel %vm1591_vm5, %v10993_v46, %v9282_v45  ;;  %v2298_v47 = vsel %vm1147_vm3, %v10999_v44, %v9313_v2  ;;  %v1442_v48 = vadd.f32 %v1383_v7, %v1220_v55  ;;  %v1397_v9 = vsel %vm1369_vm4, %v10996_v24, %v11000_v26 }
 0x2fb   :  { %v1810_v11 = vpop.permute.xlu1 %1809  ;;  %2464 = vrot.lane.b32.xlu0 %v2344_v16, %s7056_s1  ;;  %v1782_v51 = vpop.permute.xlu0 %1781  ;;  %2438 = vrot.lane.b32.xlu1 %v2331_v18, %s7056_s1  ;;  %v1885_v58 = vadd.f32 %v1826_v13, %v1663_v41  ;;  %v1678_v8 = vadd.f32 %v1618_v29, %v1456_v12  ;;  %v2328_v43 = vmul.f32 %v2298_v47, %v2175_v36 }
 0x2fc   :  { %v1840_v45 = vsel %vm1813_vm6, %v8984_v4, %v1810_v11  ;;  %v1827_v23 = vsel %vm1813_vm6, %v1780_v28, %v1782_v51  ;;  %v1664_v33 = vadd.f32 %v1605_v56, %v1442_v48  ;;  %v2343_v62 = vmul.f32 %v2298_v47, %v2190_v53 }
 0x2fd   :  { %v1457_v39 = vadd.f32 %v1397_v9, %v1235_v31  ;;  %v1619_v42 = vsel %vm1591_vm5, %v9280_v59, %v9315_v40  ;;  %v1900_v21 = vadd.f32 %v1840_v45, %v1678_v8 }
 0x2fe   :  { %v1886_v17 = vadd.f32 %v1827_v23, %v1664_v33 }
 0x2ff   :  { %v2002_v54 = vpop.permute.xlu1 %2001  ;;  %2468 = vrot.lane.b32.xlu0 %v2346_v27, %s7056_s1  ;;  %v1812_v0 = vpop.permute.xlu0 %1811  ;;  %2466 = vrot.lane.b32.xlu1 %v2345_v57, %s7056_s1  ;;  %v1679_v34 = vadd.f32 %v1619_v42, %v1457_v39 }
 0x300   :  { %v2048_v2 = vsel %vm2035_vm7, %v9081_v63, %v2002_v54  ;;  %v1841_v63 = vsel %vm1813_vm6, %v1810_v11, %v1812_v0 }
 0x301   :  { %v2107_v37 = vadd.f32 %v2048_v2, %v1885_v58  ;;  %v1901_v40 = vadd.f32 %v1841_v63, %v1679_v34 }
 0x303   :  { %v2149_v20 = vadd.f32 %v10806_v3, %v2107_v37  ;;  %v2032_v52 = vpop.permute.xlu1 %2031  ;;  %2462 = vrot.lane.b32.xlu0 %v2343_v62, %s7056_s1  ;;  %v2004_v4 = vpop.permute.xlu0 %2003  ;;  %2432 = vrot.lane.b32.xlu1 %v2328_v43, %s7056_s1 }
 0x304   :  { %v2062_v28 = vsel %vm2035_vm7, %v9138_v19, %v2032_v52  ;;  %v2049_v35 = vsel %vm2035_vm7, %v2002_v54, %v2004_v4  ;;  %v9444_v54 = vld [vmem:[#allocation2] sm:$0xff] }
 0x305   :  { %v2122_v1 = vadd.f32 %v2062_v28, %v1900_v21  ;;  %v2108_v59 = vadd.f32 %v2049_v35, %v1886_v17  ;;  %v2179_v46 = vmax.f32 %v2149_v20, 0.0  ;;  %v9448_v0 = vpack.c.bf16 %v9444_v54, %v9444_v54 }
 0x307   :  { %v2164_v6 = vadd.f32 %v10819_v38, %v2122_v1  ;;  %v2150_v16 = vadd.f32 %v10806_v3, %v2108_v59  ;;  %v2287_v18 = vpop.permute.xlu1 %2286  ;;  %v2034_v61 = vpop.permute.xlu0 %2033 }
 0x308   :  { %v2302_v22 = vsel %vm1147_vm3, %v9349_v50, %v2287_v18  ;;  %v2063_v36 = vsel %vm2035_vm7, %v2032_v52, %v2034_v61 }
 0x309   :  { %v2194_v53 = vmax.f32 %v2164_v6, 0.0  ;;  %v2332_v19 = vmul.f32 %v2302_v22, %v2179_v46  ;;  %v2123_v32 = vadd.f32 %v2063_v36, %v1901_v40  ;;  %v2180_v49 = vmax.f32 %v2150_v16, 0.0 }
 0x30b   :  { %v2165_v25 = vadd.f32 %v10819_v38, %v2123_v32  ;;  %v2419_v10 = vpop.permute.xlu1 %2418  ;;  %v2289_v24 = vpop.permute.xlu0 %2288  ;;  %2440 = vrot.lane.b32.xlu1 %v2332_v19, %s7056_s1  ;;  %v2347_v14 = vmul.f32 %v2302_v22, %v2194_v53 }
 0x30c   :  { %v2303_v3 = vsel %vm1147_vm3, %v2287_v18, %v2289_v24 }
 0x30d   :  { %v2195_v5 = vmax.f32 %v2165_v25, 0.0  ;;  %v2333_v30 = vmul.f32 %v2303_v3, %v2180_v49 }
 0x30f   :  { %v2423_v11 = vpop.permute.xlu1 %2422  ;;  %2442 = vrot.lane.b32.xlu0 %v2333_v30, %s7056_s1  ;;  %v2421_v50 = vpop.permute.xlu0 %2420  ;;  %2470 = vrot.lane.b32.xlu1 %v2347_v14, %s7056_s1  ;;  %v2348_v15 = vmul.f32 %v2303_v3, %v2195_v5 }
 0x310   :  { %v2477_v51 = vsel %vm2474_vm9, %v2419_v10, %v2421_v50  ;;  %v2478_v38 = vsel %vm2474_vm9, %v2421_v50, %v2423_v11 }
 0x313   :  { %v2451_v55 = vpop.permute.xlu1 %2450  ;;  %2472 = vrot.lane.b32.xlu0 %v2348_v15, %s7056_s1  ;;  %v2449_v60 = vpop.permute.xlu0 %2448 }
 0x314   :  { %v2491_v7 = vsel %vm2474_vm9, %v2449_v60, %v2451_v55 }
 0x315   :  { %v9423_v13 = vpack.c.bf16 %v2491_v7, %v2477_v51 }
 0x317   :  { %v2453_v41 = vpop.permute.xlu0 %2452  ;;  %2636 = vrot.lane.b32.xlu1 %v9423_v13, %s7058_s9  ;;  %v2415_v57 = vpop.permute.xlu1 %2414 }
 0x318   :  { %v2492_v29 = vsel %vm2474_vm9, %v2451_v55, %v2453_v41 }
 0x319   :  { %v9428_v27 = vpack.c.bf16 %v2492_v29, %v2478_v38 }
 0x31b   :  { %v2417_v31 = vpop.permute.xlu0 %2416  ;;  %2638 = vrot.lane.b32.xlu0 %v9428_v27, %s7058_s9  ;;  %v2445_v44 = vpop.permute.xlu1 %2444 }
 0x31c   :  { %v2475_v12 = vsel %vm2474_vm9, %v2415_v57, %v2417_v31  ;;  %v2476_v56 = vsel %vm2474_vm9, %v2417_v31, %v2419_v10 }
 0x31f   :  { %v2447_v47 = vpop.permute.xlu0 %2446 }
 0x320   :  { %v2489_v48 = vsel %vm2474_vm9, %v2445_v44, %v2447_v47  ;;  %v2490_v26 = vsel %vm2474_vm9, %v2447_v47, %v2449_v60  ;;  %v6644_v44 = vld [vmem:[%s10363_s4 + $0x18] sm:$0xff] }
 0x321   :  { %v9436_v9 = vpack.c.bf16 %v2490_v26, %v2476_v56  ;;  %v9438_v58 = vpack.c.bf16 %v2489_v48, %v2475_v12  ;;  %v6643_v56 = vld [vmem:[%s10363_s4 + $0x10] sm:$0xff] }
 0x323   :  { %2634 = vrot.lane.b32.xlu0 %v9436_v9, %s7058_s9  ;;  %2632 = vrot.lane.b32.xlu1 %v9438_v58, %s7058_s9 }
 0x327   :  { %2630 = vrot.lane.b32.xlu1 %v9448_v0, %s7058_s9 }
 0x331   :  { %v2429_v8 = vpop.permute.xlu0 %2428  ;;  %v2427_v45 = vpop.permute.xlu1 %2426 }
 0x332   :  { %v2481_v23 = vsel %vm2474_vm9, %v2427_v45, %v2429_v8 }
 0x335   :  { %v2457_v2 = vpop.permute.xlu0 %2456  ;;  %v2431_v33 = vpop.permute.xlu1 %2430 }
 0x336   :  { %v2482_v43 = vsel %vm2474_vm9, %v2429_v8, %v2431_v33 }
 0x339   :  { %v2461_v62 = vpop.permute.xlu0 %2460  ;;  %v2459_v37 = vpop.permute.xlu1 %2458 }
 0x33a   :  { %v2495_v39 = vsel %vm2474_vm9, %v2457_v2, %v2459_v37  ;;  %v2496_v42 = vsel %vm2474_vm9, %v2459_v37, %v2461_v62 }
 0x33b   :  { %v9456_v21 = vpack.c.bf16 %v2496_v42, %v2482_v43  ;;  %v9458_v17 = vpack.c.bf16 %v2495_v39, %v2481_v23 }
 0x33d   :  { %v2455_v20 = vpop.permute.xlu0 %2454  ;;  %v2425_v52 = vpop.permute.xlu1 %2424  ;;  %2646 = vrot.lane.b32.xlu1 %v9456_v21, %s7058_s9  ;;  %2644 = vrot.lane.b32.xlu0 %v9458_v17, %s7058_s9 }
 0x33e   :  { %v2493_v4 = vsel %vm2474_vm9, %v2453_v41, %v2455_v20  ;;  %v2494_v63 = vsel %vm2474_vm9, %v2455_v20, %v2457_v2  ;;  %v2479_v28 = vsel %vm2474_vm9, %v2423_v11, %v2425_v52  ;;  %v2480_v35 = vsel %vm2474_vm9, %v2425_v52, %v2427_v45 }
 0x33f   :  { %v9468_v34 = vpack.c.bf16 %v2494_v63, %v2480_v35  ;;  %v9470_v1 = vpack.c.bf16 %v2493_v4, %v2479_v28  ;;  %v9537_v45 = vpack.c.bf16 %v6644_v44, %v6643_v56 }
 0x341   :  { %2642 = vrot.lane.b32.xlu1 %v9468_v34, %s7058_s9  ;;  %2640 = vrot.lane.b32.xlu0 %v9470_v1, %s7058_s9 }
 0x369   :  { %v2437_v59 = vpop.permute.xlu0 %2436  ;;  %v2435_v40 = vpop.permute.xlu1 %2434 }
 0x36a   :  { %v2485_v6 = vsel %vm2474_vm9, %v2435_v40, %v2437_v59 }
 0x36d   :  { %v2465_v16 = vpop.permute.xlu0 %2464  ;;  %v2439_v18 = vpop.permute.xlu1 %2438 }
 0x36e   :  { %v2486_v46 = vsel %vm2474_vm9, %v2437_v59, %v2439_v18 }
 0x371   :  { %v2469_v61 = vpop.permute.xlu0 %2468  ;;  %v2467_v22 = vpop.permute.xlu1 %2466 }
 0x372   :  { %v2499_v36 = vsel %vm2474_vm9, %v2465_v16, %v2467_v22  ;;  %v2500_v53 = vsel %vm2474_vm9, %v2467_v22, %v2469_v61 }
 0x373   :  { %v9480_v19 = vpack.c.bf16 %v2500_v53, %v2486_v46  ;;  %v9482_v32 = vpack.c.bf16 %v2499_v36, %v2485_v6 }
 0x375   :  { %v2463_v25 = vpop.permute.xlu0 %2462  ;;  %v2433_v10 = vpop.permute.xlu1 %2432  ;;  %2654 = vrot.lane.b32.xlu1 %v9480_v19, %s7058_s9  ;;  %2652 = vrot.lane.b32.xlu0 %v9482_v32, %s7058_s9 }
 0x376   :  { %v2497_v49 = vsel %vm2474_vm9, %v2461_v62, %v2463_v25  ;;  %v2498_v24 = vsel %vm2474_vm9, %v2463_v25, %v2465_v16  ;;  %v2483_v3 = vsel %vm2474_vm9, %v2431_v33, %v2433_v10  ;;  %v2484_v14 = vsel %vm2474_vm9, %v2433_v10, %v2435_v40 }
 0x377   :  { %v9492_v5 = vpack.c.bf16 %v2498_v24, %v2484_v14  ;;  %v9494_v30 = vpack.c.bf16 %v2497_v49, %v2483_v3  ;;  %v11001_v33 = vmov 0   ;;  %v2593_v14 = vld [vmem:[%s10363_s4] sm:$0xff] }
 0x379   :  { %2650 = vrot.lane.b32.xlu1 %v9492_v5, %s7058_s9  ;;  %2648 = vrot.lane.b32.xlu0 %v9494_v30, %s7058_s9 }
 0x37d   :  { %v2441_v11 = vpop.permute.xlu1 %2440 }
 0x37e   :  { %v2487_v50 = vsel %vm2474_vm9, %v2439_v18, %v2441_v11 }
 0x381   :  { %v2443_v51 = vpop.permute.xlu0 %2442  ;;  %v2471_v38 = vpop.permute.xlu1 %2470 }
 0x382   :  { %v2488_v15 = vsel %vm2474_vm9, %v2441_v11, %v2443_v51  ;;  %2547 = vst.msk [vmem:[#allocation2 + $0x78] sm:$0xff] %vm2365_vm8, %v2443_v51  ;;  %v2501_v55 = vsel %vm2474_vm9, %v2469_v61, %v2471_v38  ;;  %v2594_v11 = vld [vmem:[%s10363_s4 + $0x8] sm:$0xff] }
 0x383   :  { %v9504_v60 = vpack.c.bf16 %v2501_v55, %v2487_v50 }
 0x385   :  { %v2473_v7 = vpop.permute.xlu0 %2472  ;;  %2656 = vrot.lane.b32.xlu0 %v9504_v60, %s7058_s9 }
 0x386   :  { %v2502_v41 = vsel %vm2474_vm9, %v2471_v38, %v2473_v7  ;;  %2562 = vst.msk [vmem:[#allocation2 + $0x100] sm:$0xff] %vm2365_vm8, %v2473_v7  ;;  %v9684_v7 = vpack.c.bf16 %v2594_v11, %v2593_v14 }
 0x387   :  { %v9510_v29 = vpack.c.bf16 %v2502_v41, %v2488_v15 }
 0x389   :  { %2658 = vrot.lane.b32.xlu1 %v9510_v29, %s7058_s9  ;;  %3042 = vrot.lane.b32.xlu0 %v9423_v13, %s7056_s1  ;;  %v2637_v57 = vpop.permute.xlu1 %2636 }
 0x38d   :  { %v2639_v31 = vpop.permute.xlu0 %2638  ;;  %3044 = vrot.lane.b32.xlu1 %v9428_v27, %s7056_s1  ;;  %3038 = vrot.lane.b32.xlu0 %v9438_v58, %s7056_s1  ;;  %v3911_v63 = vld [vmem:[#allocation2 + $0x100] sm:$0xff] }
 0x38e   :  { %v2664_v12 = vsel %vm2660_vm10, %v2637_v57, %v2639_v31 }
 0x38f   :  { %2737 = vmatprep.subr.bf16.mxu1 %v2664_v12 }
 0x391   :  { %3040 = vrot.lane.b32.xlu1 %v9436_v9, %s7056_s1  ;;  %3036 = vrot.lane.b32.xlu0 %v9448_v0, %s7056_s1 }
 0x395   :  { %v2635_v47 = vpop.permute.xlu0 %2634  ;;  %3050 = vrot.lane.b32.xlu1 %v9458_v17, %s7056_s1  ;;  %3052 = vrot.lane.b32.xlu0 %v9456_v21, %s7056_s1  ;;  %v2633_v48 = vpop.permute.xlu1 %2632 }
 0x396   :  { %v2662_v26 = vsel %vm2660_vm10, %v2633_v48, %v2635_v47  ;;  %v2663_v8 = vsel %vm2660_vm10, %v2635_v47, %v2637_v57 }
 0x397   :  { %2694 = vmatprep.subr.bf16.mxu0 %v2662_v26  ;;  %2738 = vmatpush1.bf16.msra.mxu1 %v2663_v8 }
 0x399   :  { %3046 = vrot.lane.b32.xlu1 %v9470_v1, %s7056_s1  ;;  %3048 = vrot.lane.b32.xlu0 %v9468_v34, %s7056_s1  ;;  %v2631_v23 = vpop.permute.xlu1 %2630 }
 0x39a   :  { %v2661_v2 = vsel %vm2660_vm10, %v2631_v23, %v2633_v48  ;;  %6646 = vmatmul.mubr.msk.bf16.vlgmr.msra.gmra.mrb[0].mxu1 %vm2690_vm11, %v9537_v45 }
 0x39b   :  { %2695 = vmatpush1.bf16.msra.mxu0 %v2661_v2  ;;  %2855 = vmatprep.mubr.bf16.mxu1 %v11001_v33 }
 0x39d   :  { %3058 = vrot.lane.b32.xlu1 %v9482_v32, %s7056_s1  ;;  %3060 = vrot.lane.b32.xlu0 %v9480_v19, %s7056_s1 }
 0x39e   :  { %6645 = vmatmul.mubr.msk.bf16.vlgmr.msra.gmra.mrb[0].mxu0 %vm2690_vm11, %v9537_v45 }
 0x39f   :  { %2812 = vmatprep.mubr.bf16.mxu0 %v11001_v33 }
 0x3a1   :  { %3054 = vrot.lane.b32.xlu1 %v9494_v30, %s7056_s1  ;;  %3056 = vrot.lane.b32.xlu0 %v9492_v5, %s7056_s1 }
 0x3a5   :  { %3062 = vrot.lane.b32.xlu1 %v9504_v60, %s7056_s1  ;;  %3064 = vrot.lane.b32.xlu0 %v9510_v29, %s7056_s1 }
 0x3a9   :  { %3451 = vrot.lane.b32.xlu1 %v9423_v13, %s7059_s14  ;;  %3453 = vrot.lane.b32.xlu0 %v9428_v27, %s7059_s14 }
 0x3ad   :  { %3447 = vrot.lane.b32.xlu1 %v9438_v58, %s7059_s14  ;;  %3449 = vrot.lane.b32.xlu0 %v9436_v9, %s7059_s14 }
 0x3af   :  { %v2645_v43 = vpop.permute.xlu0 %2644  ;;  %v2647_v62 = vpop.permute.xlu1 %2646 }
 0x3b0   :  { %v2668_v37 = vsel %vm2660_vm10, %v2645_v43, %v2647_v62 }
 0x3b1   :  { %3445 = vrot.lane.b32.xlu1 %v9448_v0, %s7059_s14  ;;  %3459 = vrot.lane.b32.xlu0 %v9458_v17, %s7059_s14 }
 0x3b2   :  { %2823 = vmatprep.subr.bf16.mxu1 %v2668_v37 }
 0x3b3   :  { %v2641_v39 = vpop.permute.xlu0 %2640  ;;  %v2643_v42 = vpop.permute.xlu1 %2642 }
 0x3b4   :  { %v2666_v20 = vsel %vm2660_vm10, %v2641_v39, %v2643_v42  ;;  %v2667_v52 = vsel %vm2660_vm10, %v2643_v42, %v2645_v43  ;;  %v2665_v4 = vsel %vm2660_vm10, %v2639_v31, %v2641_v39 }
 0x3b5   :  { %3461 = vrot.lane.b32.xlu1 %v9456_v21, %s7059_s14  ;;  %3455 = vrot.lane.b32.xlu0 %v9470_v1, %s7059_s14 }
 0x3b6   :  { %2780 = vmatprep.subr.bf16.mxu0 %v2666_v20  ;;  %2824 = vmatpush1.bf16.msra.mxu1 %v2667_v52 }
 0x3b7   :  { %2781 = vmatpush1.bf16.msra.mxu0 %v2665_v4 }
 0x3b9   :  { %3457 = vrot.lane.b32.xlu1 %v9468_v34, %s7059_s14  ;;  %3467 = vrot.lane.b32.xlu0 %v9482_v32, %s7059_s14 }
 0x3ba   :  { %6648 = vmatmul.mubr.msk.bf16.vlgmr.msra.gmra.mrb[4].mxu1 %vm2690_vm11, %v9537_v45  ;;  %6647 = vmatmul.mubr.msk.bf16.vlgmr.msra.gmra.mrb[4].mxu0 %vm2690_vm11, %v9537_v45 }
 0x3bb   :  { %2941 = vmatprep.mubr.bf16.mxu1 %v11001_v33  ;;  %2898 = vmatprep.mubr.bf16.mxu0 %v11001_v33 }
 0x3bd   :  { %3469 = vrot.lane.b32.xlu1 %v9480_v19, %s7059_s14  ;;  %3463 = vrot.lane.b32.xlu0 %v9494_v30, %s7059_s14 }
 0x3c1   :  { %3465 = vrot.lane.b32.xlu1 %v9492_v5, %s7059_s14  ;;  %3471 = vrot.lane.b32.xlu0 %v9504_v60, %s7059_s14 }
 0x3c5   :  { %3473 = vrot.lane.b32.xlu1 %v9510_v29, %s7059_s14  ;;  %3954 = vrot.lane.b32.xlu0 %v9423_v13, %s7060_s15 }
 0x3c9   :  { %3956 = vrot.lane.b32.xlu1 %v9428_v27, %s7060_s15  ;;  %3950 = vrot.lane.b32.xlu0 %v9438_v58, %s7060_s15 }
 0x3cd   :  { %3952 = vrot.lane.b32.xlu1 %v9436_v9, %s7060_s15  ;;  %3948 = vrot.lane.b32.xlu0 %v9448_v0, %s7060_s15  ;;  %v3895_v0 = vld [vmem:[#allocation2 + $0x78] sm:$0xff] }
 0x3ce   :  { %v9617_v28 = vpack.c.bf16 %v3911_v63, %v3895_v0 }
 0x3d1   :  { %3962 = vrot.lane.b32.xlu1 %v9458_v17, %s7060_s15  ;;  %3964 = vrot.lane.b32.xlu0 %v9456_v21, %s7060_s15 }
 0x3d5   :  { %3958 = vrot.lane.b32.xlu1 %v9470_v1, %s7060_s15  ;;  %3960 = vrot.lane.b32.xlu0 %v9468_v34, %s7060_s15 }
 0x3d9   :  { %3970 = vrot.lane.b32.xlu1 %v9482_v32, %s7060_s15  ;;  %3972 = vrot.lane.b32.xlu0 %v9480_v19, %s7060_s15 }
 0x3dd   :  { %3966 = vrot.lane.b32.xlu1 %v9494_v30, %s7060_s15  ;;  %3968 = vrot.lane.b32.xlu0 %v9492_v5, %s7060_s15 }
 0x3e1   :  { %3974 = vrot.lane.b32.xlu1 %v9504_v60, %s7060_s15  ;;  %3976 = vrot.lane.b32.xlu0 %v9510_v29, %s7060_s15 }
 0x3e5   :  { %3978 = vrot.lane.b32.xlu1 %v9617_v28, %s7060_s15  ;;  %4775 = vrot.lane.b32.xlu0 %v9428_v27, %s7048_s7 }
 0x3e7   :  { %v2653_v35 = vpop.permute.xlu0 %2652  ;;  %v2655_v59 = vpop.permute.xlu1 %2654 }
 0x3e8   :  { %v2672_v40 = vsel %vm2660_vm10, %v2653_v35, %v2655_v59 }
 0x3e9   :  { %4777 = vrot.lane.b32.xlu1 %v9470_v1, %s7048_s7  ;;  %4771 = vrot.lane.b32.xlu0 %v9436_v9, %s7048_s7 }
 0x3ea   :  { %2909 = vmatprep.subr.bf16.mxu1 %v2672_v40 }
 0x3eb   :  { %v2649_v6 = vpop.permute.xlu0 %2648  ;;  %v2651_v16 = vpop.permute.xlu1 %2650 }
 0x3ec   :  { %v2670_v18 = vsel %vm2660_vm10, %v2649_v6, %v2651_v16  ;;  %v2671_v46 = vsel %vm2660_vm10, %v2651_v16, %v2653_v35  ;;  %v2669_v61 = vsel %vm2660_vm10, %v2647_v62, %v2649_v6  ;;  %v6661_v16 = vld [vmem:[%s10363_s4 + $0x20] sm:$0xff] }
 0x3ed   :  { %4773 = vrot.lane.b32.xlu1 %v9423_v13, %s7048_s7  ;;  %4769 = vrot.lane.b32.xlu0 %v9438_v58, %s7048_s7 }
 0x3ee   :  { %2866 = vmatprep.subr.bf16.mxu0 %v2670_v18  ;;  %2910 = vmatpush1.bf16.msra.mxu1 %v2671_v46  ;;  %v6662_v18 = vld [vmem:[%s10363_s4 + $0x28] sm:$0xff] }
 0x3ef   :  { %2867 = vmatpush1.bf16.msra.mxu0 %v2669_v61  ;;  %6749 = vmatprep.subr.bf16.mxu1 %v9444_v54 }
 0x3f1   :  { %4783 = vrot.lane.b32.xlu1 %v9456_v21, %s7048_s7  ;;  %4785 = vrot.lane.b32.xlu0 %v9494_v30, %s7048_s7 }
 0x3f2   :  { %6650 = vmatmul.mubr.msk.bf16.vlgmr.msra.gmra.mrb[8].mxu1 %vm2690_vm11, %v9537_v45  ;;  %6649 = vmatmul.mubr.msk.bf16.vlgmr.msra.gmra.mrb[8].mxu0 %vm2690_vm11, %v9537_v45 }
 0x3f3   :  { %6751 = vmatprep.mubr.msk.bf16.mxu1 %vm7061_vm12, %v9444_v54  ;;  %2984 = vmatprep.mubr.bf16.mxu0 %v11001_v33 }
 0x3f5   :  { %4779 = vrot.lane.b32.xlu1 %v9468_v34, %s7048_s7  ;;  %4781 = vrot.lane.b32.xlu0 %v9458_v17, %s7048_s7 }
 0x3f7   :  { %v2657_v22 = vpop.permute.xlu0 %2656 }
 0x3f8   :  { %v2673_v10 = vsel %vm2660_vm10, %v2655_v59, %v2657_v22 }
 0x3f9   :  { %4791 = vrot.lane.b32.xlu1 %v9480_v19, %s7048_s7  ;;  %4793 = vrot.lane.b32.xlu0 %v9504_v60, %s7048_s7 }
 0x3fb   :  { %v3043_v36 = vpop.permute.xlu0 %3042  ;;  %v2659_v53 = vpop.permute.xlu1 %2658 }
 0x3fc   :  { %6750 = vmatpush3.bf16.msra.mxu1 %v2659_v53  ;;  %v2674_v25 = vsel %vm2660_vm10, %v2657_v22, %v2659_v53 }
 0x3fd   :  { %4787 = vrot.lane.b32.xlu1 %v9492_v5, %s7048_s7  ;;  %4789 = vrot.lane.b32.xlu0 %v9482_v32, %s7048_s7 }
 0x3fe   :  { %2952 = vmatprep.subr.bf16.mxu0 %v2674_v25 }
 0x3ff   :  { %2953 = vmatpush1.bf16.msra.mxu0 %v2673_v10  ;;  %v3039_v49 = vpop.permute.xlu0 %3038  ;;  %v3045_v24 = vpop.permute.xlu1 %3044  ;;  %6752 = vmatmul.mubr.msk.bf16.vlgmr.msra.gmra.mrb[12].mxu1 %vm2690_vm11, %v9537_v45 }
 0x400   :  { %v3070_v3 = vsel %vm2474_vm9, %v3043_v36, %v3045_v24  ;;  %3174 = vmatprep.mubr.bf16.mxu1 %v11001_v33 }
 0x401   :  { %4795 = vrot.lane.b32.xlu1 %v9510_v29, %s7048_s7  ;;  %4797 = vrot.lane.b32.xlu0 %v9617_v28, %s7048_s7  ;;  %s7062_s7 = smov 99  }
 0x402   :  { %6651 = vmatmul.mubr.msk.bf16.vlgmr.msra.gmra.mrb[12].mxu0 %vm2690_vm11, %v9537_v45  ;;  %3142 = vmatprep.subr.bf16.mxu1 %v3070_v3 }
 0x403   :  { %v3037_v50 = vpop.permute.xlu0 %3036  ;;  %v3041_v51 = vpop.permute.xlu1 %3040  ;;  %3131 = vmatprep.mubr.bf16.mxu0 %v11001_v33 }
 0x404   :  { %v3067_v38 = vsel %vm2474_vm9, %v3037_v50, %v3039_v49  ;;  %v3068_v15 = vsel %vm2474_vm9, %v3039_v49, %v3041_v51  ;;  %v3069_v55 = vsel %vm2474_vm9, %v3041_v51, %v3043_v36  ;;  %v9762_v36 = vpack.c.bf16 %v6662_v18, %v6661_v16 }
 0x405   :  { %5214 = vrot.lane.b32.xlu1 %v9428_v27, %s7062_s7  ;;  %5216 = vrot.lane.b32.xlu0 %v9470_v1, %s7062_s7 }
 0x406   :  { %3099 = vmatprep.subr.bf16.mxu0 %v3068_v15  ;;  %3143 = vmatpush1.bf16.msra.mxu1 %v3069_v55 }
 0x407   :  { %3100 = vmatpush1.bf16.msra.mxu0 %v3067_v38  ;;  %v3053_v41 = vpop.permute.xlu0 %3052  ;;  %v3051_v57 = vpop.permute.xlu1 %3050 }
 0x408   :  { %v3074_v31 = vsel %vm2474_vm9, %v3051_v57, %v3053_v41 }
 0x409   :  { %6654 = vmatmul.mubr.msk.bf16.vlgmr.msra.gmra.mrb[0].mxu1 %vm2690_vm11, %v9684_v7  ;;  %5210 = vrot.lane.b32.xlu1 %v9436_v9, %s7062_s7 }
 0x40a   :  { %5212 = vrot.lane.b32.xlu0 %v9423_v13, %s7062_s7  ;;  %6653 = vmatmul.mubr.msk.bf16.vlgmr.msra.gmra.mrb[0].mxu0 %vm2690_vm11, %v9684_v7 }
 0x40b   :  { %3228 = vmatprep.subr.bf16.mxu1 %v3074_v31  ;;  %v3049_v12 = vpop.permute.xlu0 %3048  ;;  %v3047_v56 = vpop.permute.xlu1 %3046  ;;  %3260 = vmatprep.mubr.bf16.mxu1 %v11001_v33 }
 0x40c   :  { %v3072_v44 = vsel %vm2474_vm9, %v3047_v56, %v3049_v12  ;;  %v3073_v47 = vsel %vm2474_vm9, %v3049_v12, %v3051_v57  ;;  %v3071_v48 = vsel %vm2474_vm9, %v3045_v24, %v3047_v56  ;;  %3217 = vmatprep.mubr.bf16.mxu0 %v11001_v33 }
 0x40d   :  { %5208 = vrot.lane.b32.xlu1 %v9438_v58, %s7062_s7  ;;  %3185 = vmatprep.subr.bf16.mxu0 %v3072_v44 }
 0x40e   :  { %5222 = vrot.lane.b32.xlu0 %v9456_v21, %s7062_s7  ;;  %3229 = vmatpush1.bf16.msra.mxu1 %v3073_v47 }
 0x40f   :  { %3186 = vmatpush1.bf16.msra.mxu0 %v3071_v48  ;;  %v3061_v26 = vpop.permute.xlu0 %3060  ;;  %v3059_v8 = vpop.permute.xlu1 %3058 }
 0x410   :  { %v3078_v45 = vsel %vm2474_vm9, %v3059_v8, %v3061_v26 }
 0x411   :  { %6656 = vmatmul.mubr.msk.bf16.vlgmr.msra.gmra.mrb[4].mxu1 %vm2690_vm11, %v9684_v7  ;;  %5224 = vrot.lane.b32.xlu1 %v9494_v30, %s7062_s7 }
 0x412   :  { %5218 = vrot.lane.b32.xlu0 %v9468_v34, %s7062_s7  ;;  %6655 = vmatmul.mubr.msk.bf16.vlgmr.msra.gmra.mrb[4].mxu0 %vm2690_vm11, %v9684_v7 }
 0x413   :  { %3314 = vmatprep.subr.bf16.mxu1 %v3078_v45  ;;  %v3057_v23 = vpop.permute.xlu0 %3056  ;;  %v3055_v2 = vpop.permute.xlu1 %3054  ;;  %3346 = vmatprep.mubr.bf16.mxu1 %v11001_v33 }
 0x414   :  { %v3077_v43 = vsel %vm2474_vm9, %v3057_v23, %v3059_v8  ;;  %v3075_v62 = vsel %vm2474_vm9, %v3053_v41, %v3055_v2  ;;  %v3076_v37 = vsel %vm2474_vm9, %v3055_v2, %v3057_v23  ;;  %3303 = vmatprep.mubr.bf16.mxu0 %v11001_v33 }
 0x415   :  { %5220 = vrot.lane.b32.xlu1 %v9458_v17, %s7062_s7  ;;  %3271 = vmatprep.subr.bf16.mxu0 %v3076_v37  ;;  %v6672_v37 = vld [vmem:[%s10363_s4 + $0x38] sm:$0xff] }
 0x416   :  { %5230 = vrot.lane.b32.xlu0 %v9480_v19, %s7062_s7  ;;  %3315 = vmatpush1.bf16.msra.mxu1 %v3077_v43 }
 0x417   :  { %3272 = vmatpush1.bf16.msra.mxu0 %v3075_v62  ;;  %v3065_v39 = vpop.permute.xlu0 %3064  ;;  %v3063_v42 = vpop.permute.xlu1 %3062  ;;  %6755 = vmatprep.subr.bf16.mxu1 %v9444_v54  ;;  %v6671_v62 = vld [vmem:[%s10363_s4 + $0x30] sm:$0xff] }
 0x418   :  { %v3080_v20 = vsel %vm2474_vm9, %v3063_v42, %v3065_v39  ;;  %v3079_v52 = vsel %vm2474_vm9, %v3061_v26, %v3063_v42 }
 0x419   :  { %6658 = vmatmul.mubr.msk.bf16.vlgmr.msra.gmra.mrb[8].mxu1 %vm2690_vm11, %v9684_v7  ;;  %5232 = vrot.lane.b32.xlu1 %v9504_v60, %s7062_s7 }
 0x41a   :  { %5226 = vrot.lane.b32.xlu0 %v9492_v5, %s7062_s7  ;;  %6657 = vmatmul.mubr.msk.bf16.vlgmr.msra.gmra.mrb[8].mxu0 %vm2690_vm11, %v9684_v7 }
 0x41b   :  { %3357 = vmatprep.subr.bf16.mxu0 %v3080_v20  ;;  %6756 = vmatpush3.bf16.msra.mxu1 %v3065_v39  ;;  %v3454_v4 = vpop.permute.xlu0 %3453  ;;  %v3452_v63 = vpop.permute.xlu1 %3451 }
 0x41c   :  { %3358 = vmatpush1.bf16.msra.mxu0 %v3079_v52  ;;  %v3479_v0 = vsel %vm3475_vm13, %v3452_v63, %v3454_v4  ;;  %6757 = vmatprep.mubr.msk.bf16.mxu1 %vm7061_vm12, %v9444_v54  ;;  %v9842_v52 = vpack.c.bf16 %v6672_v37, %v6671_v62 }
 0x41d   :  { %5228 = vrot.lane.b32.xlu1 %v9482_v32, %s7062_s7  ;;  %3551 = vmatprep.subr.bf16.mxu1 %v3479_v0 }
 0x41e   :  { %5234 = vrot.lane.b32.xlu0 %v9510_v29, %s7062_s7  ;;  %3389 = vmatprep.mubr.bf16.mxu0 %v11001_v33 }
 0x41f   :  { %v3450_v35 = vpop.permute.xlu0 %3449  ;;  %v3448_v59 = vpop.permute.xlu1 %3447 }
 0x420   :  { %v3478_v40 = vsel %vm3475_vm13, %v3450_v35, %v3452_v63  ;;  %v3477_v6 = vsel %vm3475_vm13, %v3448_v59, %v3450_v35 }
 0x421   :  { %6758 = vmatmul.mubr.msk.bf16.vlgmr.msra.gmra.mrb[16].mxu1 %vm2690_vm11, %v9684_v7  ;;  %5236 = vrot.lane.b32.xlu1 %v9617_v28, %s7062_s7 }
 0x422   :  { %5653 = vrot.lane.b32.xlu0 %v9428_v27, %s7050_s2  ;;  %6659 = vmatmul.mubr.msk.bf16.vlgmr.msra.gmra.mrb[12].mxu0 %vm2690_vm11, %v9684_v7 }
 0x423   :  { %3508 = vmatprep.subr.bf16.mxu0 %v3477_v6  ;;  %3552 = vmatpush1.bf16.msra.mxu1 %v3478_v40  ;;  %v3460_v46 = vpop.permute.xlu0 %3459  ;;  %v3446_v61 = vpop.permute.xlu1 %3445 }
 0x424   :  { %v3476_v22 = vsel %vm3475_vm13, %v3446_v61, %v3448_v59  ;;  %3583 = vmatprep.mubr.bf16.mxu1 %v11001_v33  ;;  %3540 = vmatprep.mubr.bf16.mxu0 %v11001_v33 }
 0x425   :  { %5655 = vrot.lane.b32.xlu1 %v9470_v1, %s7050_s2  ;;  %3509 = vmatpush1.bf16.msra.mxu0 %v3476_v22 }
 0x426   :  { %5649 = vrot.lane.b32.xlu0 %v9436_v9, %s7050_s2 }
 0x427   :  { %v3456_v53 = vpop.permute.xlu0 %3455  ;;  %v3462_v25 = vpop.permute.xlu1 %3461 }
 0x428   :  { %v3483_v10 = vsel %vm3475_vm13, %v3460_v46, %v3462_v25  ;;  %v3480_v11 = vsel %vm3475_vm13, %v3454_v4, %v3456_v53 }
 0x429   :  { %6664 = vmatmul.mubr.msk.bf16.vlgmr.msra.gmra.mrb[0].mxu1 %vm2690_vm11, %v9762_v36  ;;  %5651 = vrot.lane.b32.xlu1 %v9423_v13, %s7050_s2 }
 0x42a   :  { %5647 = vrot.lane.b32.xlu0 %v9438_v58, %s7050_s2  ;;  %6663 = vmatmul.mubr.msk.bf16.vlgmr.msra.gmra.mrb[0].mxu0 %vm2690_vm11, %v9762_v36 }
 0x42b   :  { %3637 = vmatprep.subr.bf16.mxu1 %v3483_v10  ;;  %v3468_v49 = vpop.permute.xlu0 %3467  ;;  %v3458_v24 = vpop.permute.xlu1 %3457  ;;  %3669 = vmatprep.mubr.bf16.mxu1 %v11001_v33 }
 0x42c   :  { %v3482_v3 = vsel %vm3475_vm13, %v3458_v24, %v3460_v46  ;;  %v3481_v14 = vsel %vm3475_vm13, %v3456_v53, %v3458_v24  ;;  %3626 = vmatprep.mubr.bf16.mxu0 %v11001_v33 }
 0x42d   :  { %5661 = vrot.lane.b32.xlu1 %v9456_v21, %s7050_s2  ;;  %3594 = vmatprep.subr.bf16.mxu0 %v3481_v14 }
 0x42e   :  { %5663 = vrot.lane.b32.xlu0 %v9494_v30, %s7050_s2  ;;  %3638 = vmatpush1.bf16.msra.mxu1 %v3482_v3 }
 0x42f   :  { %3595 = vmatpush1.bf16.msra.mxu0 %v3480_v11  ;;  %v3464_v50 = vpop.permute.xlu0 %3463  ;;  %v3470_v51 = vpop.permute.xlu1 %3469 }
 0x430   :  { %v3487_v38 = vsel %vm3475_vm13, %v3468_v49, %v3470_v51  ;;  %v3484_v57 = vsel %vm3475_vm13, %v3462_v25, %v3464_v50 }
 0x431   :  { %6666 = vmatmul.mubr.msk.bf16.vlgmr.msra.gmra.mrb[4].mxu1 %vm2690_vm11, %v9762_v36  ;;  %5657 = vrot.lane.b32.xlu1 %v9468_v34, %s7050_s2 }
 0x432   :  { %5659 = vrot.lane.b32.xlu0 %v9458_v17, %s7050_s2  ;;  %6665 = vmatmul.mubr.msk.bf16.vlgmr.msra.gmra.mrb[4].mxu0 %vm2690_vm11, %v9762_v36 }
 0x433   :  { %3723 = vmatprep.subr.bf16.mxu1 %v3487_v38  ;;  %v3472_v15 = vpop.permute.xlu0 %3471  ;;  %v3466_v55 = vpop.permute.xlu1 %3465  ;;  %3755 = vmatprep.mubr.bf16.mxu1 %v11001_v33  ;;  %v6522_v38 = vld [vmem:[%s10364_s5 + $0x8] sm:$0xff] }
 0x434   :  { %v3486_v7 = vsel %vm3475_vm13, %v3466_v55, %v3468_v49  ;;  %v3485_v41 = vsel %vm3475_vm13, %v3464_v50, %v3466_v55  ;;  %3712 = vmatprep.mubr.bf16.mxu0 %v11001_v33  ;;  %v3488_v44 = vsel %vm3475_vm13, %v3470_v51, %v3472_v15  ;;  %v6521_v51 = vld [vmem:[%s10364_s5] sm:$0xff] }
 0x435   :  { %5669 = vrot.lane.b32.xlu1 %v9480_v19, %s7050_s2  ;;  %3680 = vmatprep.subr.bf16.mxu0 %v3485_v41 }
 0x436   :  { %5671 = vrot.lane.b32.xlu0 %v9504_v60, %s7050_s2  ;;  %3724 = vmatpush1.bf16.msra.mxu1 %v3486_v7 }
 0x437   :  { %3681 = vmatpush1.bf16.msra.mxu0 %v3484_v57  ;;  %v3955_v31 = vpop.permute.xlu0 %3954  ;;  %v3474_v12 = vpop.permute.xlu1 %3473  ;;  %6761 = vmatprep.subr.bf16.mxu1 %v9444_v54 }
 0x438   :  { %v3489_v56 = vsel %vm3475_vm13, %v3472_v15, %v3474_v12 }
 0x439   :  { %6668 = vmatmul.mubr.msk.bf16.vlgmr.msra.gmra.mrb[8].mxu1 %vm2690_vm11, %v9762_v36  ;;  %5665 = vrot.lane.b32.xlu1 %v9492_v5, %s7050_s2 }
 0x43a   :  { %5667 = vrot.lane.b32.xlu0 %v9482_v32, %s7050_s2  ;;  %6667 = vmatmul.mubr.msk.bf16.vlgmr.msra.gmra.mrb[8].mxu0 %vm2690_vm11, %v9762_v36 }
 0x43b   :  { %3766 = vmatprep.subr.bf16.mxu0 %v3489_v56  ;;  %6762 = vmatpush3.bf16.msra.mxu1 %v3474_v12  ;;  %v3951_v47 = vpop.permute.xlu0 %3950  ;;  %v3957_v48 = vpop.permute.xlu1 %3956  ;;  %v9978_v56 = vld [vmem:[#allocation2] sm:$0xff] }
 0x43c   :  { %3767 = vmatpush1.bf16.msra.mxu0 %v3488_v44  ;;  %v3984_v26 = vsel %vm3980_vm14, %v3955_v31, %v3957_v48  ;;  %6763 = vmatprep.mubr.msk.bf16.mxu1 %vm7061_vm12, %v9444_v54 }
 0x43d   :  { %5673 = vrot.lane.b32.xlu1 %v9510_v29, %s7050_s2  ;;  %4057 = vmatprep.subr.bf16.mxu1 %v3984_v26  ;;  %v6691_v26 = vld [vmem:[%s10363_s4 + $0x50] sm:$0xff] }
 0x43e   :  { %5675 = vrot.lane.b32.xlu0 %v9617_v28, %s7050_s2  ;;  %3798 = vmatprep.mubr.bf16.mxu0 %v11001_v33 }
 0x43f   :  { %v3949_v8 = vpop.permute.xlu0 %3948  ;;  %v3953_v45 = vpop.permute.xlu1 %3952 }
 0x440   :  { %v3983_v23 = vsel %vm3980_vm14, %v3953_v45, %v3955_v31  ;;  %v3982_v2 = vsel %vm3980_vm14, %v3951_v47, %v3953_v45  ;;  %v3981_v43 = vsel %vm3980_vm14, %v3949_v8, %v3951_v47  ;;  %v6692_v8 = vld [vmem:[%s10363_s4 + $0x58] sm:$0xff] }
 0x441   :  { %6764 = vmatmul.mubr.msk.bf16.vlgmr.msra.gmra.mrb[20].mxu1 %vm2690_vm11, %v9762_v36  ;;  %6092 = vrot.lane.b32.xlu1 %v9428_v27, %s7051_s17 }
 0x442   :  { %6094 = vrot.lane.b32.xlu0 %v9470_v1, %s7051_s17  ;;  %6669 = vmatmul.mubr.msk.bf16.vlgmr.msra.gmra.mrb[12].mxu0 %vm2690_vm11, %v9762_v36 }
 0x443   :  { %4014 = vmatprep.subr.bf16.mxu0 %v3982_v2  ;;  %4058 = vmatpush1.bf16.msra.mxu1 %v3983_v23  ;;  %v3965_v39 = vpop.permute.xlu0 %3964  ;;  %v3963_v42 = vpop.permute.xlu1 %3962 }
 0x444   :  { %4015 = vmatpush1.bf16.msra.mxu0 %v3981_v43  ;;  %v3988_v20 = vsel %vm3980_vm14, %v3963_v42, %v3965_v39  ;;  %4089 = vmatprep.mubr.bf16.mxu1 %v11001_v33  ;;  %v4768_v43 = vpack.c.bf16 %v6692_v8, %v6691_v26 }
 0x445   :  { %6088 = vrot.lane.b32.xlu1 %v9436_v9, %s7051_s17  ;;  %4143 = vmatprep.subr.bf16.mxu1 %v3988_v20 }
 0x446   :  { %6090 = vrot.lane.b32.xlu0 %v9423_v13, %s7051_s17  ;;  %4046 = vmatprep.mubr.bf16.mxu0 %v11001_v33 }
 0x447   :  { %v3961_v4 = vpop.permute.xlu0 %3960  ;;  %v3959_v63 = vpop.permute.xlu1 %3958 }
 0x448   :  { %v3987_v0 = vsel %vm3980_vm14, %v3961_v4, %v3963_v42  ;;  %v3986_v35 = vsel %vm3980_vm14, %v3959_v63, %v3961_v4  ;;  %v3985_v59 = vsel %vm3980_vm14, %v3957_v48, %v3959_v63 }
 0x449   :  { %6674 = vmatmul.mubr.msk.bf16.vlgmr.msra.gmra.mrb[0].mxu1 %vm2690_vm11, %v9842_v52  ;;  %6086 = vrot.lane.b32.xlu1 %v9438_v58, %s7051_s17 }
 0x44a   :  { %6100 = vrot.lane.b32.xlu0 %v9456_v21, %s7051_s17  ;;  %6673 = vmatmul.mubr.msk.bf16.vlgmr.msra.gmra.mrb[0].mxu0 %vm2690_vm11, %v9842_v52 }
 0x44b   :  { %4100 = vmatprep.subr.bf16.mxu0 %v3986_v35  ;;  %4144 = vmatpush1.bf16.msra.mxu1 %v3987_v0  ;;  %v3973_v40 = vpop.permute.xlu0 %3972  ;;  %v3971_v6 = vpop.permute.xlu1 %3970 }
 0x44c   :  { %4101 = vmatpush1.bf16.msra.mxu0 %v3985_v59  ;;  %v3992_v16 = vsel %vm3980_vm14, %v3971_v6, %v3973_v40  ;;  %4175 = vmatprep.mubr.bf16.mxu1 %v11001_v33 }
 0x44d   :  { %6102 = vrot.lane.b32.xlu1 %v9494_v30, %s7051_s17  ;;  %4229 = vmatprep.subr.bf16.mxu1 %v3992_v16 }
 0x44e   :  { %6096 = vrot.lane.b32.xlu0 %v9468_v34, %s7051_s17  ;;  %4132 = vmatprep.mubr.bf16.mxu0 %v11001_v33 }
 0x44f   :  { %v3969_v18 = vpop.permute.xlu0 %3968  ;;  %v3967_v46 = vpop.permute.xlu1 %3966 }
 0x450   :  { %v3991_v61 = vsel %vm3980_vm14, %v3969_v18, %v3971_v6  ;;  %v3990_v22 = vsel %vm3980_vm14, %v3967_v46, %v3969_v18  ;;  %v3989_v36 = vsel %vm3980_vm14, %v3965_v39, %v3967_v46 }
 0x451   :  { %6676 = vmatmul.mubr.msk.bf16.vlgmr.msra.gmra.mrb[4].mxu1 %vm2690_vm11, %v9842_v52  ;;  %6098 = vrot.lane.b32.xlu1 %v9458_v17, %s7051_s17 }
 0x452   :  { %6108 = vrot.lane.b32.xlu0 %v9480_v19, %s7051_s17  ;;  %6675 = vmatmul.mubr.msk.bf16.vlgmr.msra.gmra.mrb[4].mxu0 %vm2690_vm11, %v9842_v52 }
 0x453   :  { %4186 = vmatprep.subr.bf16.mxu0 %v3990_v22  ;;  %4230 = vmatpush1.bf16.msra.mxu1 %v3991_v61  ;;  %v3977_v53 = vpop.permute.xlu0 %3976  ;;  %v3975_v25 = vpop.permute.xlu1 %3974 }
 0x454   :  { %4187 = vmatpush1.bf16.msra.mxu0 %v3989_v36  ;;  %v3994_v10 = vsel %vm3980_vm14, %v3975_v25, %v3977_v53  ;;  %4261 = vmatprep.mubr.bf16.mxu1 %v11001_v33  ;;  %v3993_v14 = vsel %vm3980_vm14, %v3973_v40, %v3975_v25 }
 0x455   :  { %6110 = vrot.lane.b32.xlu1 %v9504_v60, %s7051_s17  ;;  %4272 = vmatprep.subr.bf16.mxu0 %v3994_v10 }
 0x456   :  { %6104 = vrot.lane.b32.xlu0 %v9492_v5, %s7051_s17  ;;  %4218 = vmatprep.mubr.bf16.mxu0 %v11001_v33 }
 0x457   :  { %v9883_v49 = vpop.permute.xlu0 %4775  ;;  %v3979_v24 = vpop.permute.xlu1 %3978  ;;  %6767 = vmatprep.subr.bf16.mxu1 %v9444_v54 }
 0x458   :  { %v3995_v3 = vsel %vm3980_vm14, %v3977_v53, %v3979_v24 }
 0x459   :  { %6678 = vmatmul.mubr.msk.bf16.vlgmr.msra.gmra.mrb[8].mxu1 %vm2690_vm11, %v9842_v52  ;;  %6106 = vrot.lane.b32.xlu1 %v9482_v32, %s7051_s17 }
 0x45a   :  { %6112 = vrot.lane.b32.xlu0 %v9510_v29, %s7051_s17  ;;  %6677 = vmatmul.mubr.msk.bf16.vlgmr.msra.gmra.mrb[8].mxu0 %vm2690_vm11, %v9842_v52 }
 0x45b   :  { %4273 = vmatpush1.bf16.msra.mxu0 %v3993_v14  ;;  %6768 = vmatpush3.bf16.msra.mxu1 %v3995_v3  ;;  %v9896_v11 = vpop.permute.xlu0 %4771  ;;  %v9898_v50 = vpop.permute.xlu1 %4777  ;;  %v6701_v3 = vld [vmem:[%s10363_s4 + $0x60] sm:$0xff]  ;;  %v6702_v14 = vld [vmem:[%s10363_s4 + $0x68] sm:$0xff] }
 0x45c   :  { %4393 = vmatprep.subr.bf16.mxu0 %v9436_v9  ;;  %4436 = vmatprep.subr.bf16.mxu1 %v9428_v27  ;;  %v6681_v27 = vld [vmem:[%s10363_s4 + $0x40] sm:$0xff]  ;;  %v6682_v9 = vld [vmem:[%s10363_s4 + $0x48] sm:$0xff] }
 0x45d   :  { %6114 = vrot.lane.b32.xlu1 %v9617_v28, %s7051_s17  ;;  %6769 = vmatprep.mubr.msk.bf16.mxu1 %vm7061_vm12, %v9444_v54 }
 0x45e   :  { %6525 = vperm.xlu0 %7043, %v6521_v51   ;;  %4304 = vmatprep.mubr.bf16.mxu0 %v11001_v33 }
 0x45f   :  { %v4770_v15 = vpop.permute.xlu0 %4769  ;;  %v4774_v55 = vpop.permute.xlu1 %4773 }
 0x460   :  { %v4800_v47 = vsel %vm308_vm0, %v4770_v15, %v9896_v11 }
 0x461   :  { %6770 = vmatmul.mubr.msk.bf16.vlgmr.msra.gmra.mrb[24].mxu1 %vm2690_vm11, %v9842_v52  ;;  %6530 = vperm.xlu1 %7044, %v6522_v38  }
 0x462   :  { %4437 = vmatpush1.bf16.msra.mxu1 %v9423_v13  ;;  %6679 = vmatmul.mubr.msk.bf16.vlgmr.msra.gmra.mrb[12].mxu0 %vm2690_vm11, %v9842_v52  ;;  %v4389_v13 = vpack.c.bf16 %v6682_v9, %v6681_v27 }
 0x463   :  { %4394 = vmatpush1.bf16.msra.mxu0 %v9438_v58  ;;  %4522 = vmatprep.subr.bf16.mxu1 %v9456_v21  ;;  %v9926_v7 = vpop.permute.xlu0 %4785  ;;  %v9928_v41 = vpop.permute.xlu1 %4783 }
 0x464   :  { %4479 = vmatprep.subr.bf16.mxu0 %v9468_v34  ;;  %4468 = vmatprep.mubr.bf16.mxu1 %v11001_v33  ;;  %v4807_v48 = vsel %vm308_vm0, %v9928_v41, %v9926_v7 }
 0x465   :  { %4425 = vmatprep.mubr.bf16.mxu0 %v11001_v33 }
 0x467   :  { %v4782_v57 = vpop.permute.xlu0 %4781  ;;  %v4780_v31 = vpop.permute.xlu1 %4779 }
 0x468   :  { %v4805_v45 = vsel %vm308_vm0, %v4780_v31, %v4782_v57  ;;  %v4806_v37 = vsel %vm308_vm0, %v4782_v57, %v9928_v41  ;;  %v4804_v39 = vsel %vm308_vm0, %v9898_v50, %v4780_v31 }
 0x469   :  { %6684 = vmatmul.mubr.msk.bf16.vlgmr.msra.gmra.mrb[0].mxu1 %vm2690_vm11, %v4389_v13 }
 0x46a   :  { %4523 = vmatpush1.bf16.msra.mxu1 %v9458_v17  ;;  %6683 = vmatmul.mubr.msk.bf16.vlgmr.msra.gmra.mrb[0].mxu0 %vm2690_vm11, %v4389_v13 }
 0x46b   :  { %4480 = vmatpush1.bf16.msra.mxu0 %v9470_v1  ;;  %4608 = vmatprep.subr.bf16.mxu1 %v9480_v19  ;;  %v9938_v58 = vpop.permute.xlu0 %4793  ;;  %v9940_v21 = vpop.permute.xlu1 %4791 }
 0x46c   :  { %4565 = vmatprep.subr.bf16.mxu0 %v9492_v5  ;;  %4554 = vmatprep.mubr.bf16.mxu1 %v11001_v33  ;;  %v4811_v20 = vsel %vm308_vm0, %v9940_v21, %v9938_v58 }
 0x46d   :  { %4511 = vmatprep.mubr.bf16.mxu0 %v11001_v33 }
 0x46f   :  { %v9945_v34 = vpop.permute.xlu0 %4789  ;;  %v9947_v12 = vpop.permute.xlu1 %4787 }
 0x470   :  { %v4809_v52 = vsel %vm308_vm0, %v9947_v12, %v9945_v34  ;;  %v4810_v35 = vsel %vm308_vm0, %v9945_v34, %v9940_v21  ;;  %v4808_v59 = vsel %vm308_vm0, %v9926_v7, %v9947_v12 }
 0x471   :  { %6686 = vmatmul.mubr.msk.bf16.vlgmr.msra.gmra.mrb[4].mxu1 %vm2690_vm11, %v4389_v13 }
 0x472   :  { %4609 = vmatpush1.bf16.msra.mxu1 %v9482_v32  ;;  %6685 = vmatmul.mubr.msk.bf16.vlgmr.msra.gmra.mrb[4].mxu0 %vm2690_vm11, %v4389_v13  ;;  %v4803_v32 = vsel %vm308_vm0, %v9883_v49, %v9898_v50  ;;  %v5207_v50 = vpack.c.bf16 %v6702_v14, %v6701_v3 }
 0x473   :  { %4566 = vmatpush1.bf16.msra.mxu0 %v9494_v30  ;;  %v9953_v17 = vpop.permute.xlu0 %4797  ;;  %v9955_v1 = vpop.permute.xlu1 %4795  ;;  %4640 = vmatprep.mubr.bf16.mxu1 %v11001_v33 }
 0x474   :  { %4651 = vmatprep.subr.bf16.mxu0 %v9510_v29  ;;  %6773 = vmatprep.subr.bf16.mxu1 %v9444_v54  ;;  %v4801_v54 = vsel %vm308_vm0, %v9896_v11, %v4774_v55  ;;  %v4813_v40 = vsel %vm308_vm0, %v9955_v1, %v9953_v17  ;;  %v4812_v18 = vsel %vm308_vm0, %v9938_v58, %v9955_v1 }
 0x475   :  { %4597 = vmatprep.mubr.bf16.mxu0 %v11001_v33 }
 0x477   :  { %v9961_v19 = vpop.permute.xlu0 %5216  ;;  %v9963_v5 = vpop.permute.xlu1 %5214 }
 0x478   :  { %v5242_v61 = vsel %vm5238_vm15, %v9963_v5, %v9961_v19 }
 0x479   :  { %6688 = vmatmul.mubr.msk.bf16.vlgmr.msra.gmra.mrb[8].mxu1 %vm2690_vm11, %v4389_v13 }
 0x47a   :  { %6774 = vmatpush3.bf16.msra.mxu1 %v9617_v28  ;;  %6687 = vmatmul.mubr.msk.bf16.vlgmr.msra.gmra.mrb[8].mxu0 %vm2690_vm11, %v4389_v13 }
 0x47b   :  { %4652 = vmatpush1.bf16.msra.mxu0 %v9504_v60  ;;  %4875 = vmatprep.subr.bf16.mxu1 %v4803_v32  ;;  %v9974_v30 = vpop.permute.xlu1 %5210  ;;  %v4802_v60 = vsel %vm308_vm0, %v4774_v55, %v9883_v49 }
 0x47c   :  { %4832 = vmatprep.subr.bf16.mxu0 %v4801_v54  ;;  %v9976_v29 = vpop.permute.xlu0 %5212  ;;  %6775 = vmatprep.mubr.msk.bf16.mxu1 %vm7061_vm12, %v9978_v56 }
 0x47d   :  { %4683 = vmatprep.mubr.bf16.mxu0 %v11001_v33  ;;  %v5240_v22 = vsel %vm5238_vm15, %v9974_v30, %v9976_v29  ;;  %v5241_v25 = vsel %vm5238_vm15, %v9976_v29, %v9963_v5 }
 0x47f   :  { %v9983_v28 = vpop.permute.xlu1 %5208 }
 0x480   :  { %v9985_v44 = vpop.permute.xlu0 %5222  ;;  %v5239_v10 = vsel %vm5238_vm15, %v9983_v28, %v9974_v30  ;;  %v6711_v28 = vld [vmem:[%s10363_s4 + $0x70] sm:$0xff] }
 0x481   :  { %6776 = vmatmul.mubr.msk.bf16.vlgmr.msra.gmra.mrb[28].mxu1 %vm2690_vm11, %v4389_v13 }
 0x482   :  { %4876 = vmatpush1.bf16.msra.mxu1 %v4802_v60  ;;  %6689 = vmatmul.mubr.msk.bf16.vlgmr.msra.gmra.mrb[12].mxu0 %vm2690_vm11, %v4389_v13 }
 0x483   :  { %4833 = vmatpush1.bf16.msra.mxu0 %v4800_v47  ;;  %4961 = vmatprep.subr.bf16.mxu1 %v4807_v48  ;;  %v10003_v23 = vpop.permute.xlu1 %5224 }
 0x484   :  { %4918 = vmatprep.subr.bf16.mxu0 %v4805_v45  ;;  %v10005_v2 = vpop.permute.xlu0 %5218  ;;  %4907 = vmatprep.mubr.bf16.mxu1 %v11001_v33  ;;  %v5246_v24 = vsel %vm5238_vm15, %v9985_v44, %v10003_v23 }
 0x485   :  { %4864 = vmatprep.mubr.bf16.mxu0 %v11001_v33  ;;  %v5243_v55 = vsel %vm5238_vm15, %v9961_v19, %v10005_v2 }
 0x487   :  { %v10009_v62 = vpop.permute.xlu1 %5220 }
 0x488   :  { %v10016_v42 = vpop.permute.xlu0 %5230  ;;  %v5244_v11 = vsel %vm5238_vm15, %v10005_v2, %v10009_v62  ;;  %v5245_v15 = vsel %vm5238_vm15, %v10009_v62, %v9985_v44  ;;  %v6712_v44 = vld [vmem:[%s10363_s4 + $0x78] sm:$0xff] }
 0x489   :  { %6694 = vmatmul.mubr.msk.bf16.vlgmr.msra.gmra.mrb[0].mxu1 %vm2690_vm11, %v4768_v43  ;;  %v5646_v48 = vpack.c.bf16 %v6712_v44, %v6711_v28 }
 0x48a   :  { %4962 = vmatpush1.bf16.msra.mxu1 %v4806_v37  ;;  %6693 = vmatmul.mubr.msk.bf16.vlgmr.msra.gmra.mrb[0].mxu0 %vm2690_vm11, %v4768_v43 }
 0x48b   :  { %4919 = vmatpush1.bf16.msra.mxu0 %v4804_v39  ;;  %5047 = vmatprep.subr.bf16.mxu1 %v4811_v20  ;;  %v10025_v4 = vpop.permute.xlu1 %5232 }
 0x48c   :  { %5004 = vmatprep.subr.bf16.mxu0 %v4809_v52  ;;  %4993 = vmatprep.mubr.bf16.mxu1 %v11001_v33  ;;  %v10031_v0 = vpop.permute.xlu0 %5226  ;;  %v5250_v27 = vsel %vm5238_vm15, %v10016_v42, %v10025_v4 }
 0x48d   :  { %4950 = vmatprep.mubr.bf16.mxu0 %v11001_v33  ;;  %v5247_v57 = vsel %vm5238_vm15, %v10003_v23, %v10031_v0 }
 0x48f   :  { %v10029_v63 = vpop.permute.xlu1 %5228 }
 0x490   :  { %v10049_v16 = vpop.permute.xlu0 %5234  ;;  %v5248_v9 = vsel %vm5238_vm15, %v10031_v0, %v10029_v63  ;;  %v5249_v13 = vsel %vm5238_vm15, %v10029_v63, %v10016_v42 }
 0x491   :  { %6696 = vmatmul.mubr.msk.bf16.vlgmr.msra.gmra.mrb[4].mxu1 %vm2690_vm11, %v4768_v43  ;;  %v5251_v12 = vsel %vm5238_vm15, %v10025_v4, %v10049_v16 }
 0x492   :  { %5048 = vmatpush1.bf16.msra.mxu1 %v4810_v35  ;;  %6695 = vmatmul.mubr.msk.bf16.vlgmr.msra.gmra.mrb[4].mxu0 %vm2690_vm11, %v4768_v43 }
 0x493   :  { %5005 = vmatpush1.bf16.msra.mxu0 %v4808_v59  ;;  %5079 = vmatprep.mubr.bf16.mxu1 %v11001_v33  ;;  %v10045_v6 = vpop.permute.xlu1 %5236 }
 0x494   :  { %5090 = vmatprep.subr.bf16.mxu0 %v4813_v40  ;;  %6779 = vmatprep.subr.bf16.mxu1 %v9978_v56  ;;  %v10065_v36 = vpop.permute.xlu0 %5653  ;;  %v5252_v58 = vsel %vm5238_vm15, %v10049_v16, %v10045_v6 }
 0x495   :  { %5036 = vmatprep.mubr.bf16.mxu0 %v11001_v33 }
 0x497   :  { %v10055_v46 = vpop.permute.xlu1 %5655 }
 0x498   :  { %v5650_v49 = vpop.permute.xlu0 %5649  ;;  %v5681_v1 = vsel %vm844_vm2, %v10065_v36, %v10055_v46 }
 0x499   :  { %6698 = vmatmul.mubr.msk.bf16.vlgmr.msra.gmra.mrb[8].mxu1 %vm2690_vm11, %v4768_v43 }
 0x49a   :  { %6780 = vmatpush3.bf16.msra.mxu1 %v9953_v17  ;;  %6697 = vmatmul.mubr.msk.bf16.vlgmr.msra.gmra.mrb[8].mxu0 %vm2690_vm11, %v4768_v43 }
 0x49b   :  { %5091 = vmatpush1.bf16.msra.mxu0 %v4812_v18  ;;  %5314 = vmatprep.subr.bf16.mxu1 %v5242_v61  ;;  %v5652_v53 = vpop.permute.xlu1 %5651 }
 0x49c   :  { %5271 = vmatprep.subr.bf16.mxu0 %v5240_v22  ;;  %6781 = vmatprep.mubr.msk.bf16.mxu1 %vm7061_vm12, %v9978_v56  ;;  %v5648_v38 = vpop.permute.xlu0 %5647  ;;  %v5679_v19 = vsel %vm844_vm2, %v5650_v49, %v5652_v53  ;;  %v5680_v54 = vsel %vm844_vm2, %v5652_v53, %v10065_v36 }
 0x49d   :  { %5122 = vmatprep.mubr.bf16.mxu0 %v11001_v33  ;;  %v5678_v30 = vsel %vm844_vm2, %v5648_v38, %v5650_v49  ;;  %v6722_v49 = vld [vmem:[%s10363_s4 + $0x88] sm:$0xff] }
 0x49f   :  { %v5662_v51 = vpop.permute.xlu1 %5661 }
 0x4a0   :  { %v10108_v41 = vpop.permute.xlu0 %5663 }
 0x4a1   :  { %6782 = vmatmul.mubr.msk.bf16.vlgmr.msra.gmra.mrb[32].mxu1 %vm2690_vm11, %v4768_v43  ;;  %v5685_v29 = vsel %vm844_vm2, %v5662_v51, %v10108_v41 }
 0x4a2   :  { %5315 = vmatpush1.bf16.msra.mxu1 %v5241_v25  ;;  %6699 = vmatmul.mubr.msk.bf16.vlgmr.msra.gmra.mrb[12].mxu0 %vm2690_vm11, %v4768_v43 }
 0x4a3   :  { %5272 = vmatpush1.bf16.msra.mxu0 %v5239_v10  ;;  %5400 = vmatprep.subr.bf16.mxu1 %v5246_v24  ;;  %v5658_v7 = vpop.permute.xlu1 %5657  ;;  %v6721_v10 = vld [vmem:[%s10363_s4 + $0x80] sm:$0xff] }
 0x4a4   :  { %5357 = vmatprep.subr.bf16.mxu0 %v5244_v11  ;;  %5346 = vmatprep.mubr.bf16.mxu1 %v11001_v33  ;;  %v5660_v21 = vpop.permute.xlu0 %5659  ;;  %v5682_v45 = vsel %vm844_vm2, %v10055_v46, %v5658_v7  ;;  %v6085_v14 = vpack.c.bf16 %v6722_v49, %v6721_v10 }
 0x4a5   :  { %5303 = vmatprep.mubr.bf16.mxu0 %v11001_v33  ;;  %v5683_v60 = vsel %vm844_vm2, %v5658_v7, %v5660_v21  ;;  %v5684_v8 = vsel %vm844_vm2, %v5660_v21, %v5662_v51 }
 0x4a7   :  { %v5670_v31 = vpop.permute.xlu1 %5669 }
 0x4a8   :  { %v10128_v17 = vpop.permute.xlu0 %5671 }
 0x4a9   :  { %6704 = vmatmul.mubr.msk.bf16.vlgmr.msra.gmra.mrb[0].mxu1 %vm2690_vm11, %v5207_v50  ;;  %v5689_v2 = vsel %vm844_vm2, %v5670_v31, %v10128_v17 }
 0x4aa   :  { %5401 = vmatpush1.bf16.msra.mxu1 %v5245_v15  ;;  %6703 = vmatmul.mubr.msk.bf16.vlgmr.msra.gmra.mrb[0].mxu0 %vm2690_vm11, %v5207_v50 }
 0x4ab   :  { %5358 = vmatpush1.bf16.msra.mxu0 %v5243_v55  ;;  %5486 = vmatprep.subr.bf16.mxu1 %v5250_v27  ;;  %v5666_v34 = vpop.permute.xlu1 %5665 }
 0x4ac   :  { %5443 = vmatprep.subr.bf16.mxu0 %v5248_v9  ;;  %5432 = vmatprep.mubr.bf16.mxu1 %v11001_v33  ;;  %v5668_v32 = vpop.permute.xlu0 %5667  ;;  %v5686_v42 = vsel %vm844_vm2, %v10108_v41, %v5666_v34 }
 0x4ad   :  { %5389 = vmatprep.mubr.bf16.mxu0 %v11001_v33  ;;  %v5687_v43 = vsel %vm844_vm2, %v5666_v34, %v5668_v32  ;;  %v5688_v39 = vsel %vm844_vm2, %v5668_v32, %v5670_v31 }
 0x4af   :  { %v5674_v5 = vpop.permute.xlu1 %5673 }
 0x4b0   :  { %v5676_v26 = vpop.permute.xlu0 %5675 }
 0x4b1   :  { %6706 = vmatmul.mubr.msk.bf16.vlgmr.msra.gmra.mrb[4].mxu1 %vm2690_vm11, %v5207_v50  ;;  %v5691_v4 = vsel %vm844_vm2, %v5674_v5, %v5676_v26 }
 0x4b2   :  { %5487 = vmatpush1.bf16.msra.mxu1 %v5249_v13  ;;  %6705 = vmatmul.mubr.msk.bf16.vlgmr.msra.gmra.mrb[4].mxu0 %vm2690_vm11, %v5207_v50 }
 0x4b3   :  { %5444 = vmatpush1.bf16.msra.mxu0 %v5247_v57  ;;  %5518 = vmatprep.mubr.bf16.mxu1 %v11001_v33  ;;  %v6093_v47 = vpop.permute.xlu1 %6092 }
 0x4b4   :  { %5529 = vmatprep.subr.bf16.mxu0 %v5252_v58  ;;  %6785 = vmatprep.subr.bf16.mxu1 %v9978_v56  ;;  %v6095_v62 = vpop.permute.xlu0 %6094 }
 0x4b5   :  { %5475 = vmatprep.mubr.bf16.mxu0 %v11001_v33  ;;  %v6120_v16 = vsel %vm1147_vm3, %v6093_v47, %v6095_v62 }
 0x4b7   :  { %v6089_v23 = vpop.permute.xlu1 %6088 }
 0x4b8   :  { %v6091_v20 = vpop.permute.xlu0 %6090 }
 0x4b9   :  { %6708 = vmatmul.mubr.msk.bf16.vlgmr.msra.gmra.mrb[8].mxu1 %vm2690_vm11, %v5207_v50  ;;  %v6118_v18 = vsel %vm1147_vm3, %v6089_v23, %v6091_v20  ;;  %v6119_v22 = vsel %vm1147_vm3, %v6091_v20, %v6093_v47 }
 0x4ba   :  { %6786 = vmatpush3.bf16.msra.mxu1 %v10045_v6  ;;  %6707 = vmatmul.mubr.msk.bf16.vlgmr.msra.gmra.mrb[8].mxu0 %vm2690_vm11, %v5207_v50  ;;  %v5690_v6 = vsel %vm844_vm2, %v10128_v17, %v5674_v5 }
 0x4bb   :  { %5530 = vmatpush1.bf16.msra.mxu0 %v5251_v12  ;;  %5753 = vmatprep.subr.bf16.mxu1 %v5681_v1  ;;  %v6087_v37 = vpop.permute.xlu1 %6086 }
 0x4bc   :  { %5710 = vmatprep.subr.bf16.mxu0 %v5679_v19  ;;  %6787 = vmatprep.mubr.msk.bf16.mxu1 %vm7061_vm12, %v9978_v56  ;;  %v6101_v40 = vpop.permute.xlu0 %6100  ;;  %v6117_v36 = vsel %vm1147_vm3, %v6087_v37, %v6089_v23 }
 0x4bd   :  { %5561 = vmatprep.mubr.bf16.mxu0 %v11001_v33 }
 0x4bf   :  { %v6103_v59 = vpop.permute.xlu1 %6102 }
 0x4c0   :  { %v6097_v61 = vpop.permute.xlu0 %6096  ;;  %v6124_v25 = vsel %vm1147_vm3, %v6101_v40, %v6103_v59 }
 0x4c1   :  { %6788 = vmatmul.mubr.msk.bf16.vlgmr.msra.gmra.mrb[36].mxu1 %vm2690_vm11, %v5207_v50  ;;  %v6121_v51 = vsel %vm1147_vm3, %v6095_v62, %v6097_v61 }
 0x4c2   :  { %5754 = vmatpush1.bf16.msra.mxu1 %v5680_v54  ;;  %6709 = vmatmul.mubr.msk.bf16.vlgmr.msra.gmra.mrb[12].mxu0 %vm2690_vm11, %v5207_v50 }
 0x4c3   :  { %5711 = vmatpush1.bf16.msra.mxu0 %v5678_v30  ;;  %5839 = vmatprep.subr.bf16.mxu1 %v5685_v29  ;;  %v6099_v46 = vpop.permute.xlu1 %6098 }
 0x4c4   :  { %5796 = vmatprep.subr.bf16.mxu0 %v5683_v60  ;;  %5785 = vmatprep.mubr.bf16.mxu1 %v11001_v33  ;;  %v6122_v24 = vsel %vm1147_vm3, %v6097_v61, %v6099_v46  ;;  %v6109_v3 = vpop.permute.xlu0 %6108  ;;  %v6123_v50 = vsel %vm1147_vm3, %v6099_v46, %v6101_v40 }
 0x4c5   :  { %5742 = vmatprep.mubr.bf16.mxu0 %v11001_v33 }
 0x4c7   :  { %v6111_v53 = vpop.permute.xlu1 %6110 }
 0x4c8   :  { %v6105_v38 = vpop.permute.xlu0 %6104  ;;  %v6128_v15 = vsel %vm1147_vm3, %v6109_v3, %v6111_v53 }
 0x4c9   :  { %6714 = vmatmul.mubr.msk.bf16.vlgmr.msra.gmra.mrb[0].mxu1 %vm2690_vm11, %v5646_v48  ;;  %v6125_v7 = vsel %vm1147_vm3, %v6103_v59, %v6105_v38 }
 0x4ca   :  { %5840 = vmatpush1.bf16.msra.mxu1 %v5684_v8  ;;  %6713 = vmatmul.mubr.msk.bf16.vlgmr.msra.gmra.mrb[0].mxu0 %vm2690_vm11, %v5646_v48 }
 0x4cb   :  { %5797 = vmatpush1.bf16.msra.mxu0 %v5682_v45  ;;  %5925 = vmatprep.subr.bf16.mxu1 %v5689_v2  ;;  %v6107_v11 = vpop.permute.xlu1 %6106 }
 0x4cc   :  { %5882 = vmatprep.subr.bf16.mxu0 %v5687_v43  ;;  %5871 = vmatprep.mubr.bf16.mxu1 %v11001_v33  ;;  %v6126_v55 = vsel %vm1147_vm3, %v6105_v38, %v6107_v11  ;;  %v6127_v9 = vsel %vm1147_vm3, %v6107_v11, %v6109_v3  ;;  %v6113_v41 = vpop.permute.xlu0 %6112 }
 0x4cd   :  { %5828 = vmatprep.mubr.bf16.mxu0 %v11001_v33  ;;  %v6129_v17 = vsel %vm1147_vm3, %v6111_v53, %v6113_v41 }
 0x4cf   :  { %v6115_v27 = vpop.permute.xlu1 %6114 }
 0x4d0   :  { %v6130_v13 = vsel %vm1147_vm3, %v6113_v41, %v6115_v27 }
 0x4d1   :  { %6716 = vmatmul.mubr.msk.bf16.vlgmr.msra.gmra.mrb[4].mxu1 %vm2690_vm11, %v5646_v48 }
 0x4d2   :  { %5926 = vmatpush1.bf16.msra.mxu1 %v5688_v39  ;;  %6715 = vmatmul.mubr.msk.bf16.vlgmr.msra.gmra.mrb[4].mxu0 %vm2690_vm11, %v5646_v48  ;;  %v10170_v52 = vpop.f32.mrb[12].mxu1 }
 0x4d3   :  { %5883 = vmatpush1.bf16.msra.mxu0 %v5686_v42  ;;  %v6753_v63 = vpop.f32.mrb[13].mxu1  ;;  %5957 = vmatprep.mubr.bf16.mxu1 %v11001_v33 }
 0x4d4   :  { %5968 = vmatprep.subr.bf16.mxu0 %v5691_v4  ;;  %v10174_v0 = vpop.f32.mrb[14].mxu1  ;;  %6791 = vmatprep.subr.bf16.mxu1 %v9978_v56 }
 0x4d5   :  { %v6754_v35 = vpop.f32.mrb[15].mxu1  ;;  %5914 = vmatprep.mubr.bf16.mxu0 %v11001_v33 }
 0x4d9   :  { %6718 = vmatmul.mubr.msk.bf16.vlgmr.msra.gmra.mrb[8].mxu1 %vm2690_vm11, %v5646_v48 }
 0x4da   :  { %6792 = vmatpush3.bf16.msra.mxu1 %v5676_v26  ;;  %6717 = vmatmul.mubr.msk.bf16.vlgmr.msra.gmra.mrb[8].mxu0 %vm2690_vm11, %v5646_v48 }
 0x4db   :  { %5969 = vmatpush1.bf16.msra.mxu0 %v5690_v6  ;;  %6192 = vmatprep.subr.bf16.mxu1 %v6120_v16 }
 0x4dc   :  { %6149 = vmatprep.subr.bf16.mxu0 %v6118_v18  ;;  %6793 = vmatprep.mubr.msk.bf16.mxu1 %vm7061_vm12, %v9978_v56 }
 0x4dd   :  { %6000 = vmatprep.mubr.bf16.mxu0 %v11001_v33  ;;  %v10231_v61 = vpop.permute.xlu0 %6525 }
 0x4e1   :  { %6794 = vmatmul.mubr.msk.bf16.vlgmr.msra.gmra.mrb[40].mxu1 %vm2690_vm11, %v5646_v48 }
 0x4e2   :  { %6193 = vmatpush1.bf16.msra.mxu1 %v6119_v22  ;;  %6719 = vmatmul.mubr.msk.bf16.vlgmr.msra.gmra.mrb[12].mxu0 %vm2690_vm11, %v5646_v48  ;;  %v10233_v22 = vpop.permute.xlu1 %6530 }
 0x4e3   :  { %6150 = vmatpush1.bf16.msra.mxu0 %v6117_v36  ;;  %6278 = vmatprep.subr.bf16.mxu1 %v6124_v25 }
 0x4e4   :  { %6235 = vmatprep.subr.bf16.mxu0 %v6122_v24  ;;  %6224 = vmatprep.mubr.bf16.mxu1 %v11001_v33 }
 0x4e5   :  { %6181 = vmatprep.mubr.bf16.mxu0 %v11001_v33 }
 0x4e9   :  { %6724 = vmatmul.mubr.msk.bf16.vlgmr.msra.gmra.mrb[0].mxu1 %vm2690_vm11, %v6085_v14 }
 0x4ea   :  { %6279 = vmatpush1.bf16.msra.mxu1 %v6123_v50  ;;  %6723 = vmatmul.mubr.msk.bf16.vlgmr.msra.gmra.mrb[0].mxu0 %vm2690_vm11, %v6085_v14 }
 0x4eb   :  { %6236 = vmatpush1.bf16.msra.mxu0 %v6121_v51  ;;  %6364 = vmatprep.subr.bf16.mxu1 %v6128_v15 }
 0x4ec   :  { %6321 = vmatprep.subr.bf16.mxu0 %v6126_v55  ;;  %6310 = vmatprep.mubr.bf16.mxu1 %v11001_v33 }
 0x4ed   :  { %6267 = vmatprep.mubr.bf16.mxu0 %v11001_v33 }
 0x4f1   :  { %6726 = vmatmul.mubr.msk.bf16.vlgmr.msra.gmra.mrb[4].mxu1 %vm2690_vm11, %v6085_v14 }
 0x4f2   :  { %6365 = vmatpush1.bf16.msra.mxu1 %v6127_v9  ;;  %6725 = vmatmul.mubr.msk.bf16.vlgmr.msra.gmra.mrb[4].mxu0 %vm2690_vm11, %v6085_v14 }
 0x4f3   :  { %6322 = vmatpush1.bf16.msra.mxu0 %v6125_v7  ;;  %6396 = vmatprep.mubr.bf16.mxu1 %v11001_v33 }
 0x4f4   :  { %6407 = vmatprep.subr.bf16.mxu0 %v6130_v13  ;;  %v3434_v57 = vpop.f32.mrb[16].mxu1  ;;  %6797 = vmatprep.subr.bf16.mxu1 %v9978_v56 }
 0x4f5   :  { %v3435_v31 = vadd.f32 %v3434_v57, %v10170_v52  ;;  %v6759_v58 = vpop.f32.mrb[17].mxu1  ;;  %6353 = vmatprep.mubr.bf16.mxu0 %v11001_v33 }
 0x4f6   :  { %v3437_v21 = vpop.f32.mrb[18].mxu1 }
 0x4f7   :  { %v3438_v34 = vadd.f32 %v3437_v21, %v10174_v0  ;;  %v6760_v12 = vpop.f32.mrb[19].mxu1 }
 0x4f9   :  { %6728 = vmatmul.mubr.msk.bf16.vlgmr.msra.gmra.mrb[8].mxu1 %vm2690_vm11, %v6085_v14 }
 0x4fa   :  { %6798 = vmatpush3.bf16.msra.mxu1 %v6115_v27  ;;  %6727 = vmatmul.mubr.msk.bf16.vlgmr.msra.gmra.mrb[8].mxu0 %vm2690_vm11, %v6085_v14 }
 0x4fb   :  { %6408 = vmatpush1.bf16.msra.mxu0 %v6129_v17  ;;  %6799 = vmatprep.mubr.msk.bf16.mxu1 %vm7061_vm12, %v9978_v56 }
 0x4fc   :  { %6439 = vmatprep.mubr.bf16.mxu0 %v11001_v33 }
 0x501   :  { %6800 = vmatmul.mubr.msk.bf16.vlgmr.msra.gmra.mrb[44].mxu1 %vm2690_vm11, %v6085_v14 }
 0x502   :  { %6729 = vmatmul.mubr.msk.bf16.vlgmr.msra.gmra.mrb[12].mxu0 %vm2690_vm11, %v6085_v14 }
 0x514   :  { %v3843_v1 = vpop.f32.mrb[20].mxu1 }
 0x515   :  { %v3864_v19 = vadd.f32 %v3843_v1, %v3435_v31  ;;  %v6765_v5 = vpop.f32.mrb[21].mxu1 }
 0x516   :  { %v3846_v32 = vpop.f32.mrb[22].mxu1 }
 0x517   :  { %v3879_v54 = vadd.f32 %v3846_v32, %v3438_v34  ;;  %v6766_v30 = vpop.f32.mrb[23].mxu1 }
 0x534   :  { %v4349_v29 = vpop.f32.mrb[24].mxu1 }
 0x535   :  { %v4370_v28 = vadd.f32 %v4349_v29, %v3864_v19  ;;  %v6771_v44 = vpop.f32.mrb[25].mxu1 }
 0x536   :  { %v4352_v60 = vpop.f32.mrb[26].mxu1 }
 0x537   :  { %v4385_v47 = vadd.f32 %v4352_v60, %v3879_v54  ;;  %v6772_v48 = vpop.f32.mrb[27].mxu1 }
 0x554   :  { %v4728_v26 = vpop.f32.mrb[28].mxu1 }
 0x555   :  { %v4749_v56 = vadd.f32 %v4728_v26, %v4370_v28  ;;  %v6777_v8 = vpop.f32.mrb[29].mxu1 }
 0x556   :  { %v4731_v33 = vpop.f32.mrb[30].mxu1 }
 0x557   :  { %v4764_v45 = vadd.f32 %v4731_v33, %v4385_v47  ;;  %v6778_v23 = vpop.f32.mrb[31].mxu1 }
 0x574   :  { %v5167_v2 = vpop.f32.mrb[32].mxu1 }
 0x575   :  { %v5188_v43 = vadd.f32 %v5167_v2, %v4749_v56  ;;  %v6783_v62 = vpop.f32.mrb[33].mxu1 }
 0x576   :  { %v5170_v37 = vpop.f32.mrb[34].mxu1 }
 0x577   :  { %v5203_v39 = vadd.f32 %v5170_v37, %v4764_v45  ;;  %v6784_v42 = vpop.f32.mrb[35].mxu1 }
 0x594   :  { %v5606_v20 = vpop.f32.mrb[36].mxu1 }
 0x595   :  { %v5627_v52 = vadd.f32 %v5606_v20, %v5188_v43  ;;  %v6789_v4 = vpop.f32.mrb[37].mxu1 }
 0x596   :  { %v5609_v63 = vpop.f32.mrb[38].mxu1 }
 0x597   :  { %v5642_v0 = vadd.f32 %v5609_v63, %v5203_v39  ;;  %v6790_v35 = vpop.f32.mrb[39].mxu1 }
 0x5b4   :  { %v6045_v59 = vpop.f32.mrb[40].mxu1 }
 0x5b5   :  { %v10227_v40 = vadd.f32 %v6045_v59, %v5627_v52  ;;  %v6795_v6 = vpop.f32.mrb[41].mxu1 }
 0x5b6   :  { %v6048_v16 = vpop.f32.mrb[42].mxu1 }
 0x5b7   :  { %v10229_v18 = vadd.f32 %v6048_v16, %v5642_v0  ;;  %v6796_v46 = vpop.f32.mrb[43].mxu1 }
 0x5bc   :  { %v6226_v36 = vpop.f32.mrb[0].mxu1 }
 0x5bd   :  { %v6535_v53 = vadd.f32 %v10231_v61, %v6226_v36  ;;  %v6183_v25 = vpop.f32.mrb[0].mxu0  ;;  %v6228_v10 = vpop.f32.mrb[1].mxu1 }
 0x5be   :  { %v6533_v49 = vadd.f32 %v10231_v61, %v6183_v25  ;;  %v6536_v24 = vadd.f32 %v10231_v61, %v6228_v10  ;;  %v6185_v3 = vpop.f32.mrb[1].mxu0  ;;  %v6230_v14 = vpop.f32.mrb[2].mxu1 }
 0x5bf   :  { %v6565_v11 = vmax.f32 %v6535_v53, 0.0  ;;  %v6534_v50 = vadd.f32 %v10231_v61, %v6185_v3  ;;  %v6550_v51 = vadd.f32 %v10233_v22, %v6230_v14  ;;  %v6187_v38 = vpop.f32.mrb[2].mxu0  ;;  %v6232_v15 = vpop.f32.mrb[3].mxu1 }
 0x5c0   :  { %v6563_v55 = vmax.f32 %v6533_v49, 0.0  ;;  %v6566_v27 = vmax.f32 %v6536_v24, 0.0  ;;  %v6548_v9 = vadd.f32 %v10233_v22, %v6187_v38  ;;  %v6551_v7 = vadd.f32 %v10233_v22, %v6232_v15  ;;  %v6189_v41 = vpop.f32.mrb[3].mxu0 }
 0x5c1   :  { %6595 = vst [vmem:[%s10365_s6 + $0x10] sm:$0xff] %v6565_v11  ;;  %v6564_v13 = vmax.f32 %v6534_v50, 0.0  ;;  %v6580_v57 = vmax.f32 %v6550_v51, 0.0  ;;  %v6549_v31 = vadd.f32 %v10233_v22, %v6189_v41 }
 0x5c2   :  { %6593 = vst [vmem:[%s10365_s6] sm:$0xff] %v6563_v55  ;;  %6596 = vst [vmem:[%s10365_s6 + $0x18] sm:$0xff] %v6566_v27  ;;  %v6578_v58 = vmax.f32 %v6548_v9, 0.0  ;;  %v6581_v21 = vmax.f32 %v6551_v7, 0.0 }
 0x5c3   :  { %6594 = vst [vmem:[%s10365_s6 + $0x8] sm:$0xff] %v6564_v13  ;;  %6610 = vst [vmem:[%s10365_s6 + $0x88] sm:$0xff] %v6580_v57  ;;  %v6579_v34 = vmax.f32 %v6549_v31, 0.0 }
 0x5c4   :  { %6608 = vst [vmem:[%s10365_s6 + $0x78] sm:$0xff] %v6578_v58  ;;  %6611 = vst [vmem:[%s10365_s6 + $0x90] sm:$0xff] %v6581_v21  ;;  %v6312_v12 = vpop.f32.mrb[4].mxu1 }
 0x5c5   :  { %6609 = vst [vmem:[%s10365_s6 + $0x80] sm:$0xff] %v6579_v34  ;;  %v6539_v17 = vadd.f32 %v10231_v61, %v6312_v12  ;;  %v6269_v1 = vpop.f32.mrb[4].mxu0  ;;  %v6314_v19 = vpop.f32.mrb[5].mxu1 }
 0x5c6   :  { %v6537_v5 = vadd.f32 %v10231_v61, %v6269_v1  ;;  %v6540_v32 = vadd.f32 %v10231_v61, %v6314_v19  ;;  %v6271_v54 = vpop.f32.mrb[5].mxu0  ;;  %v6316_v30 = vpop.f32.mrb[6].mxu1 }
 0x5c7   :  { %v6569_v29 = vmax.f32 %v6539_v17, 0.0  ;;  %v6538_v28 = vadd.f32 %v10231_v61, %v6271_v54  ;;  %v6554_v44 = vadd.f32 %v10233_v22, %v6316_v30  ;;  %v6273_v60 = vpop.f32.mrb[6].mxu0  ;;  %v6318_v47 = vpop.f32.mrb[7].mxu1 }
 0x5c8   :  { %v6567_v48 = vmax.f32 %v6537_v5, 0.0  ;;  %v6570_v26 = vmax.f32 %v6540_v32, 0.0  ;;  %v6552_v56 = vadd.f32 %v10233_v22, %v6273_v60  ;;  %v6555_v8 = vadd.f32 %v10233_v22, %v6318_v47  ;;  %v6275_v33 = vpop.f32.mrb[7].mxu0 }
 0x5c9   :  { %6599 = vst [vmem:[%s10365_s6 + $0x30] sm:$0xff] %v6569_v29  ;;  %v6568_v45 = vmax.f32 %v6538_v28, 0.0  ;;  %v6584_v23 = vmax.f32 %v6554_v44, 0.0  ;;  %v6553_v2 = vadd.f32 %v10233_v22, %v6275_v33 }
 0x5ca   :  { %6597 = vst [vmem:[%s10365_s6 + $0x20] sm:$0xff] %v6567_v48  ;;  %6600 = vst [vmem:[%s10365_s6 + $0x38] sm:$0xff] %v6570_v26  ;;  %v6582_v43 = vmax.f32 %v6552_v56, 0.0  ;;  %v6585_v62 = vmax.f32 %v6555_v8, 0.0 }
 0x5cb   :  { %6598 = vst [vmem:[%s10365_s6 + $0x28] sm:$0xff] %v6568_v45  ;;  %6614 = vst [vmem:[%s10365_s6 + $0xa8] sm:$0xff] %v6584_v23  ;;  %v6583_v37 = vmax.f32 %v6553_v2, 0.0 }
 0x5cc   :  { %6612 = vst [vmem:[%s10365_s6 + $0x98] sm:$0xff] %v6582_v43  ;;  %6615 = vst [vmem:[%s10365_s6 + $0xb0] sm:$0xff] %v6585_v62  ;;  %v6398_v39 = vpop.f32.mrb[8].mxu1 }
 0x5cd   :  { %6613 = vst [vmem:[%s10365_s6 + $0xa0] sm:$0xff] %v6583_v37  ;;  %v6543_v42 = vadd.f32 %v10231_v61, %v6398_v39  ;;  %v6355_v20 = vpop.f32.mrb[8].mxu0  ;;  %v6400_v52 = vpop.f32.mrb[9].mxu1 }
 0x5ce   :  { %v6541_v4 = vadd.f32 %v10231_v61, %v6355_v20  ;;  %v6544_v63 = vadd.f32 %v10231_v61, %v6400_v52  ;;  %v6357_v0 = vpop.f32.mrb[9].mxu0  ;;  %v6402_v35 = vpop.f32.mrb[10].mxu1 }
 0x5cf   :  { %v6573_v59 = vmax.f32 %v6543_v42, 0.0  ;;  %v6542_v6 = vadd.f32 %v10231_v61, %v6357_v0  ;;  %v6558_v16 = vadd.f32 %v10233_v22, %v6402_v35  ;;  %v6359_v46 = vpop.f32.mrb[10].mxu0  ;;  %v6404_v36 = vpop.f32.mrb[11].mxu1 }
 0x5d0   :  { %v6571_v53 = vmax.f32 %v6541_v4, 0.0  ;;  %v6574_v25 = vmax.f32 %v6544_v63, 0.0  ;;  %v6556_v10 = vadd.f32 %v10233_v22, %v6359_v46  ;;  %v6559_v49 = vadd.f32 %v10233_v22, %v6404_v36  ;;  %v6361_v24 = vpop.f32.mrb[11].mxu0 }
 0x5d1   :  { %6603 = vst [vmem:[%s10365_s6 + $0x50] sm:$0xff] %v6573_v59  ;;  %v6572_v3 = vmax.f32 %v6542_v6, 0.0  ;;  %v6588_v14 = vmax.f32 %v6558_v16, 0.0  ;;  %v6557_v11 = vadd.f32 %v10233_v22, %v6361_v24 }
 0x5d2   :  { %6601 = vst [vmem:[%s10365_s6 + $0x40] sm:$0xff] %v6571_v53  ;;  %6604 = vst [vmem:[%s10365_s6 + $0x58] sm:$0xff] %v6574_v25  ;;  %v6586_v50 = vmax.f32 %v6556_v10, 0.0  ;;  %v6589_v51 = vmax.f32 %v6559_v49, 0.0 }
 0x5d3   :  { %6602 = vst [vmem:[%s10365_s6 + $0x48] sm:$0xff] %v6572_v3  ;;  %6618 = vst [vmem:[%s10365_s6 + $0xc8] sm:$0xff] %v6588_v14  ;;  %v6587_v38 = vmax.f32 %v6557_v11, 0.0 }
 0x5d4   :  { %6616 = vst [vmem:[%s10365_s6 + $0xb8] sm:$0xff] %v6586_v50  ;;  %6619 = vst [vmem:[%s10365_s6 + $0xd0] sm:$0xff] %v6589_v51  ;;  %v6484_v15 = vpop.f32.mrb[44].mxu1 }
 0x5d5   :  { %6617 = vst [vmem:[%s10365_s6 + $0xc0] sm:$0xff] %v6587_v38  ;;  %v6505_v55 = vadd.f32 %v6484_v15, %v10227_v40  ;;  %v6441_v27 = vpop.f32.mrb[12].mxu0  ;;  %v6801_v9 = vpop.f32.mrb[45].mxu1 }
 0x5d6   :  { %v6545_v7 = vadd.f32 %v10231_v61, %v6441_v27  ;;  %v6443_v41 = vpop.f32.mrb[13].mxu0  ;;  %v6487_v13 = vpop.f32.mrb[46].mxu1 }
 0x5d7   :  { %v6547_v57 = vadd.f32 %v10231_v61, %v6505_v55  ;;  %v6546_v31 = vadd.f32 %v10231_v61, %v6443_v41  ;;  %v6520_v58 = vadd.f32 %v6487_v13, %v10229_v18  ;;  %v6445_v21 = vpop.f32.mrb[14].mxu0  ;;  %v6802_v34 = vpop.f32.mrb[47].mxu1 }
 0x5d8   :  { %v6575_v12 = vmax.f32 %v6545_v7, 0.0  ;;  %v6560_v17 = vadd.f32 %v10233_v22, %v6445_v21  ;;  %v6447_v1 = vpop.f32.mrb[15].mxu0 }
 0x5d9   :  { %v6577_v19 = vmax.f32 %v6547_v57, 0.0  ;;  %v6576_v40 = vmax.f32 %v6546_v31, 0.0  ;;  %v6562_v5 = vadd.f32 %v10233_v22, %v6520_v58  ;;  %v6561_v32 = vadd.f32 %v10233_v22, %v6447_v1 }
 0x5da   :  { %6605 = vst [vmem:[%s10365_s6 + $0x60] sm:$0xff] %v6575_v12  ;;  %v6590_v54 = vmax.f32 %v6560_v17, 0.0 }
 0x5db   :  { %6607 = vst.msk [vmem:[%s10365_s6 + $0x70] sm:$0xff] %vm2365_vm8, %v6577_v19  ;;  %6606 = vst [vmem:[%s10365_s6 + $0x68] sm:$0xff] %v6576_v40  ;;  %v6592_v18 = vmax.f32 %v6562_v5, 0.0  ;;  %v6591_v61 = vmax.f32 %v6561_v32, 0.0 }
 0x5dc   :  { %6620 = vst [vmem:[%s10365_s6 + $0xd8] sm:$0xff] %v6590_v54 }
 0x5dd   :  { %6622 = vst.msk [vmem:[%s10365_s6 + $0xe8] sm:$0xff] %vm2365_vm8, %v6592_v18  ;;  %6621 = vst [vmem:[%s10365_s6 + $0xe0] sm:$0xff] %v6591_v61 }

// kernel: mnist_ae_forward.4
= control target key start
LH: loop header
LB: loop body
LE: loop exit
PB: predicated region body
PF: predicated region fallthrough
CT: control target
= control target key end

     0   :  { %v2020_v10 = vmov 0   ;;  %s2021_s13 = smov 16   ;;  %s2022_s18 = smov 17   ;;  %vm61_vm0 = vcmask 130048   ;;  %vm166_vm1 = vcmask 138240   ;;  %vm273_vm2 = vcmask 121856   ;;  %s2726_s0 = inlined_call_operand.vmem [shape: f32[1,16,768], index: 0, kind: input, shape index: {}]   ;;  %s2727_s3 = inlined_call_operand.<no memory space> [shape: f32[1,1], index: 3, kind: input, shape index: {}]   ;;  %s2728_s4 = inlined_call_operand.vmem [shape: f32[9,16,1], index: 4, kind: input, shape index: {}]   ;;  %s2729_s5 = inlined_call_operand.vmem [shape: f32[16,1], index: 5, kind: input, shape index: {}]   ;;  %s2730_s2 = inlined_call_operand.vmem [shape: f32[9,1,16], index: 2, kind: input, shape index: {}]   ;;  %s2731_s1 = inlined_call_operand.vmem [shape: f32[1,512], index: 1, kind: input, shape index: {}]   ;;  %s2732_s6 = inlined_call_operand.vmem [shape: f32[1,16,512], index: 6, kind: output, shape index: {}]  }
   0x1   :  { %v29_v0 = vld [vmem:[%s2726_s0 + $0x18] sm:$0xff]  ;;  %v34_v1 = vld [vmem:[%s2726_s0 + $0x48] sm:$0xff]  ;;  %v30_v5 = vld [vmem:[%s2726_s0 + $0x20] sm:$0xff]  ;;  %106 = vmatprep.mubr.bf16.mxu0 %v2020_v10  ;;  %147 = vmatprep.mubr.bf16.mxu1 %v2020_v10  ;;  %s2023_s19 = smov 15   ;;  %s2024_s20 = smov 1   ;;  %v11_v19 = vstv %s2727_s3  ;;  %vm384_vm3 = vcmask 7168  }
   0x2   :  { %v27_v2 = vld [vmem:[%s2726_s0 + $0x8] sm:$0xff]  ;;  %v2080_v3 = vpack.c.bf16 %v34_v1, %v29_v0  ;;  %v32_v4 = vld [vmem:[%s2726_s0 + $0x38] sm:$0xff]  ;;  %v35_v6 = vld [vmem:[%s2726_s0 + $0x50] sm:$0xff]  ;;  %2018 = vset.pattern.permute.xlu0 %v2020_v10  ;;  %2019 = vset.pattern.permute.xlu1 %v2020_v10  ;;  %s2025_s25 = smov 127   ;;  %s2026_s26 = smov 113   ;;  %vm607_vm4 = vcmask 1039360  }
   0x3   :  { %v2091_v7 = vpack.c.bf16 %v32_v4, %v27_v2  ;;  %v28_v8 = vld [vmem:[%s2726_s0 + $0x10] sm:$0xff]  ;;  %v33_v9 = vld [vmem:[%s2726_s0 + $0x40] sm:$0xff]  ;;  %v2102_v11 = vpack.c.bf16 %v35_v6, %v30_v5  ;;  %v578_v16 = vld [vmem:[%s2726_s0 + $0x28] sm:$0xff]  ;;  %s2028_s27 = smov 111   ;;  %12 = vst [vmem:[#allocation3] sm:$0x1] %v11_v19 }
   0x4   :  { %57 = vrot.lane.b32.xlu1 %v2080_v3, %s2021_s13  ;;  %v2106_v12 = vpack.c.bf16 %v33_v9, %v28_v8  ;;  %v26_v13 = vld [vmem:[%s2726_s0] sm:$0xff]  ;;  %v31_v14 = vld [vmem:[%s2726_s0 + $0x30] sm:$0xff]  ;;  %v583_v17 = vld [vmem:[%s2726_s0 + $0x58] sm:$0xff]  ;;  %s2027_s0 = smov 112   ;;  %vm718_vm5 = vcmask 924672   ;;  %vm829_vm6 = vcmask 916480  }
   0x5   :  { %53 = vrot.lane.b32.xlu0 %v2091_v7, %s2021_s13  ;;  %v38_v15 = vpack.c.bf16 %v31_v14, %v26_v13  ;;  %v591_v18 = vpack.c.bf16 %v583_v17, %v578_v16  ;;  %v1116_v20 = vld [vmem:[%s2728_s4] sm:$0xff]  ;;  %v1117_v22 = vld [vmem:[%s2728_s4 + $0x8] sm:$0xff]  ;;  %v1986_v23 = vld [vmem:[%s2728_s4 + $0x10] sm:$0xff]  ;;  %vm940_vm7 = vcmask 908288   ;;  %vm1309_vm10 = vcmask 1031168  }
   0x6   :  { %v1987_v24 = vld [vmem:[%s2728_s4 + $0x18] sm:$0xff]  ;;  %v1988_v25 = vld [vmem:[%s2728_s4 + $0x20] sm:$0xff]  ;;  %v1989_v26 = vld [vmem:[%s2728_s4 + $0x28] sm:$0xff]  ;;  %vm1594_vm11 = vcmask 900096   ;;  %vm1676_vm12 = vcmask 785408   ;;  %vm1758_vm13 = vcmask 777216  }
   0x7   :  { %v1990_v27 = vld [vmem:[%s2728_s4 + $0x30] sm:$0xff]  ;;  %v1991_v28 = vld [vmem:[%s2728_s4 + $0x38] sm:$0xff]  ;;  %v1992_v29 = vld [vmem:[%s2728_s4 + $0x40] sm:$0xff]  ;;  %vm1840_vm14 = vcmask 769024  }
   0x8   :  { %59 = vrot.lane.b32.xlu1 %v2102_v11, %s2021_s13  ;;  %v1993_v30 = vld [vmem:[%s2728_s4 + $0x48] sm:$0xff]  ;;  %v1994_v31 = vld [vmem:[%s2728_s4 + $0x50] sm:$0xff]  ;;  %v1995_v32 = vld [vmem:[%s2728_s4 + $0x58] sm:$0xff] }
   0x9   :  { %55 = vrot.lane.b32.xlu0 %v2106_v12, %s2021_s13  ;;  %v1996_v33 = vld [vmem:[%s2728_s4 + $0x60] sm:$0xff]  ;;  %v1997_v34 = vld [vmem:[%s2728_s4 + $0x68] sm:$0xff]  ;;  %v1998_v35 = vld [vmem:[%s2728_s4 + $0x70] sm:$0xff] }
   0xa   :  { %v1038_v21 = vld [vmem:[#allocation3] sm:$0x1]  ;;  %v1999_v36 = vld [vmem:[%s2728_s4 + $0x78] sm:$0xff]  ;;  %v2001_v38 = vld [vmem:[%s2728_s4 + $0x88] sm:$0xff] }
   0xb   :  { %v2000_v37 = vld [vmem:[%s2728_s4 + $0x80] sm:$0xff]  ;;  %v1870_v43 = vld [vmem:[%s2729_s5 + $0x8] sm:$0xff] }
   0xc   :  { %158 = vrot.lane.b32.xlu1 %v2091_v7, %s2022_s18  ;;  %v1869_v40 = vld [vmem:[%s2729_s5] sm:$0xff] }
   0xd   :  { %51 = vrot.lane.b32.xlu0 %v38_v15, %s2021_s13  ;;  %v1960_v42 = vld [vmem:[%s2730_s2 + $0x1] sm:$0x1]  ;;  %v36_v56 = vld [vmem:[%s2730_s2] sm:$0x1]  ;;  %v1965_v4 = vld [vmem:[%s2730_s2 + $0x2] sm:$0x1] }
   0xe   :  { %v45_v49 = vpack.c.bf16 %v1960_v42, %v1960_v42  ;;  %v37_v61 = vpack.c.bf16 %v36_v56, %v36_v56  ;;  %v262_v9 = vpack.c.bf16 %v1965_v4, %v1965_v4  ;;  %v1968_v19 = vld [vmem:[%s2730_s2 + $0x3] sm:$0x1] }
  0x10   :  { %162 = vrot.lane.b32.xlu1 %v2080_v3, %s2022_s18 }
  0x11   :  { %160 = vrot.lane.b32.xlu0 %v2106_v12, %s2022_s18 }
  0x14   :  { %156 = vrot.lane.b32.xlu1 %v38_v15, %s2022_s18 }
  0x15   :  { %164 = vrot.lane.b32.xlu0 %v2102_v11, %s2022_s18 }
  0x18   :  { %267 = vrot.lane.b32.xlu1 %v2106_v12, %s2023_s19 }
  0x19   :  { %265 = vrot.lane.b32.xlu0 %v2091_v7, %s2023_s19 }
  0x1c   :  { %271 = vrot.lane.b32.xlu1 %v2102_v11, %s2023_s19 }
  0x1d   :  { %269 = vrot.lane.b32.xlu0 %v2080_v3, %s2023_s19 }
  0x20   :  { %376 = vrot.lane.b32.xlu1 %v2091_v7, %s2024_s20 }
  0x21   :  { %263 = vrot.lane.b32.xlu0 %v38_v15, %s2023_s19  ;;  %s2035_s19 = smov 94  }
  0x24   :  { %380 = vrot.lane.b32.xlu1 %v2080_v3, %s2024_s20 }
  0x25   :  { %378 = vrot.lane.b32.xlu0 %v2106_v12, %s2024_s20 }
  0x28   :  { %374 = vrot.lane.b32.xlu1 %v38_v15, %s2024_s20 }
  0x29   :  { %382 = vrot.lane.b32.xlu0 %v2102_v11, %s2024_s20 }
  0x2c   :  { %601 = vrot.lane.b32.xlu1 %v2080_v3, %s2025_s25 }
  0x2d   :  { %599 = vrot.lane.b32.xlu0 %v2106_v12, %s2025_s25 }
  0x30   :  { %605 = vrot.lane.b32.xlu1 %v591_v18, %s2025_s25 }
  0x31   :  { %603 = vrot.lane.b32.xlu0 %v2102_v11, %s2025_s25 }
  0x34   :  { %710 = vrot.lane.b32.xlu1 %v2106_v12, %s2026_s26 }
  0x35   :  { %597 = vrot.lane.b32.xlu0 %v2091_v7, %s2025_s25 }
  0x38   :  { %714 = vrot.lane.b32.xlu1 %v2102_v11, %s2026_s26 }
  0x39   :  { %712 = vrot.lane.b32.xlu0 %v2080_v3, %s2026_s26 }
  0x3c   :  { %708 = vrot.lane.b32.xlu1 %v2091_v7, %s2026_s26 }
  0x3d   :  { %716 = vrot.lane.b32.xlu0 %v591_v18, %s2026_s26 }
  0x40   :  { %823 = vrot.lane.b32.xlu1 %v2080_v3, %s2027_s0 }
  0x41   :  { %821 = vrot.lane.b32.xlu0 %v2106_v12, %s2027_s0 }
  0x44   :  { %827 = vrot.lane.b32.xlu1 %v591_v18, %s2027_s0 }
  0x45   :  { %825 = vrot.lane.b32.xlu0 %v2102_v11, %s2027_s0 }
  0x48   :  { %932 = vrot.lane.b32.xlu1 %v2106_v12, %s2028_s27 }
  0x49   :  { %819 = vrot.lane.b32.xlu0 %v2091_v7, %s2027_s0 }
  0x4c   :  { %936 = vrot.lane.b32.xlu1 %v2102_v11, %s2028_s27 }
  0x4d   :  { %934 = vrot.lane.b32.xlu0 %v2080_v3, %s2028_s27 }
  0x50   :  { %930 = vrot.lane.b32.xlu1 %v2091_v7, %s2028_s27 }
  0x51   :  { %938 = vrot.lane.b32.xlu0 %v591_v18, %s2028_s27 }
  0x54   :  { %1120 = vperm.xlu1 %2019, %v1116_v20  }
  0x55   :  { %1041 = vperm.xlu0 %2018, %v1038_v21  }
  0x58   :  { %1125 = vperm.xlu1 %2019, %v1117_v22  }
  0x59   :  { %1179 = vperm.xlu0 %2018, %v1986_v23  }
  0x5c   :  { %1184 = vperm.xlu1 %2019, %v1987_v24   ;;  %v373_v24 = vpack.c.bf16 %v1968_v19, %v1968_v19 }
  0x5d   :  { %1261 = vperm.xlu0 %2018, %v1988_v25  }
  0x60   :  { %1266 = vperm.xlu1 %2019, %v1989_v26  }
  0x61   :  { %1343 = vperm.xlu0 %2018, %v1990_v27  }
  0x64   :  { %1348 = vperm.xlu1 %2019, %v1991_v28  }
  0x65   :  { %1426 = vperm.xlu0 %2018, %v1992_v29   ;;  %v1971_v29 = vld [vmem:[%s2730_s2 + $0x4] sm:$0x1] }
  0x68   :  { %1431 = vperm.xlu1 %2019, %v1993_v30  }
  0x69   :  { %1520 = vperm.xlu0 %2018, %v1994_v31   ;;  %v484_v31 = vpack.c.bf16 %v1971_v29, %v1971_v29 }
  0x6c   :  { %1525 = vperm.xlu1 %2019, %v1995_v32  }
  0x6d   :  { %1628 = vperm.xlu0 %2018, %v1996_v33  }
  0x70   :  { %1633 = vperm.xlu1 %2019, %v1997_v34   ;;  %v1974_v34 = vld [vmem:[%s2730_s2 + $0x5] sm:$0x1] }
  0x71   :  { %1710 = vperm.xlu0 %2018, %v1998_v35  }
  0x74   :  { %1715 = vperm.xlu1 %2019, %v1999_v36  }
  0x75   :  { %1792 = vperm.xlu0 %2018, %v2000_v37  }
  0x76   :  { %v58_v39 = vpop.permute.xlu1 %57 }
  0x77   :  { %v54_v41 = vpop.permute.xlu0 %53 }
  0x78   :  { %1797 = vperm.xlu1 %2019, %v2001_v38   ;;  %v586_v38 = vpack.c.bf16 %v1974_v34, %v1974_v34 }
  0x79   :  { %1873 = vperm.xlu0 %2018, %v1869_v40  }
  0x7a   :  { %v60_v44 = vpop.permute.xlu1 %59 }
  0x7b   :  { %v56_v45 = vpop.permute.xlu0 %55  ;;  %v65_v46 = vsel %vm61_vm0, %v58_v39, %v60_v44 }
  0x7c   :  { %v63_v47 = vsel %vm61_vm0, %v54_v41, %v56_v45  ;;  %115 = vmatprep.subr.bf16.mxu1 %v65_v46  ;;  %v64_v48 = vsel %vm61_vm0, %v56_v45, %v58_v39  ;;  %1878 = vperm.xlu1 %2019, %v1870_v43   ;;  %v1977_v43 = vld [vmem:[%s2730_s2 + $0x6] sm:$0x1] }
  0x7d   :  { %74 = vmatprep.subr.bf16.mxu0 %v63_v47  ;;  %116 = vmatpush1.bf16.msra.mxu1 %v64_v48  ;;  %v707_v48 = vpack.c.bf16 %v1977_v43, %v1977_v43 }
  0x7e   :  { %v159_v50 = vpop.permute.xlu1 %158 }
  0x7f   :  { %v52_v51 = vpop.permute.xlu0 %51 }
  0x80   :  { %v62_v52 = vsel %vm61_vm0, %v52_v51, %v54_v41  ;;  %1962 = vmatmul.mubr.msk.bf16.vlgmr.msra.gmra.mrb[0].mxu1 %vm61_vm0, %v45_v49 }
  0x81   :  { %75 = vmatpush1.bf16.msra.mxu0 %v62_v52  ;;  %251 = vmatprep.mubr.bf16.mxu1 %v2020_v10 }
  0x82   :  { %v163_v53 = vpop.permute.xlu1 %162 }
  0x83   :  { %v161_v54 = vpop.permute.xlu0 %160 }
  0x84   :  { %1961 = vmatmul.mubr.msk.bf16.vlgmr.msra.gmra.mrb[0].mxu0 %vm61_vm0, %v45_v49  ;;  %v168_v55 = vsel %vm166_vm1, %v159_v50, %v161_v54  ;;  %v169_v62 = vsel %vm166_vm1, %v161_v54, %v163_v53 }
  0x85   :  { %178 = vmatprep.subr.bf16.mxu0 %v168_v55  ;;  %210 = vmatprep.mubr.bf16.mxu0 %v2020_v10 }
  0x86   :  { %v157_v57 = vpop.permute.xlu1 %156 }
  0x87   :  { %v167_v58 = vsel %vm166_vm1, %v157_v57, %v159_v50  ;;  %v165_v59 = vpop.permute.xlu0 %164 }
  0x88   :  { %179 = vmatpush1.bf16.msra.mxu0 %v167_v58  ;;  %v170_v60 = vsel %vm166_vm1, %v163_v53, %v165_v59  ;;  %v1980_v53 = vld [vmem:[%s2730_s2 + $0x7] sm:$0x1] }
  0x89   :  { %219 = vmatprep.subr.bf16.mxu1 %v170_v60  ;;  %v818_v57 = vpack.c.bf16 %v1980_v53, %v1980_v53 }
  0x8a   :  { %220 = vmatpush1.bf16.msra.mxu1 %v169_v62  ;;  %v268_v63 = vpop.permute.xlu1 %267 }
  0x8b   :  { %v266_v0 = vpop.permute.xlu0 %265 }
  0x8c   :  { %1963 = vmatmul.mubr.msk.bf16.vlgmr.msra.gmra.mrb[4].mxu0 %vm61_vm0, %v37_v61  ;;  %v275_v1 = vsel %vm273_vm2, %v266_v0, %v268_v63 }
  0x8d   :  { %1964 = vmatmul.mubr.msk.bf16.vlgmr.msra.gmra.mrb[4].mxu1 %vm61_vm0, %v37_v61  ;;  %285 = vmatprep.subr.bf16.mxu0 %v275_v1  ;;  %v1983_v61 = vld [vmem:[%s2730_s2 + $0x8] sm:$0x1] }
  0x8e   :  { %v272_v2 = vpop.permute.xlu1 %271  ;;  %358 = vmatprep.mubr.bf16.mxu1 %v2020_v10  ;;  %317 = vmatprep.mubr.bf16.mxu0 %v2020_v10 }
  0x8f   :  { %v270_v5 = vpop.permute.xlu0 %269 }
  0x90   :  { %v277_v6 = vsel %vm273_vm2, %v270_v5, %v272_v2  ;;  %v276_v8 = vsel %vm273_vm2, %v268_v63, %v270_v5  ;;  %v929_v2 = vpack.c.bf16 %v1983_v61, %v1983_v61  ;;  %v1044_v5 = vlaneseq }
  0x91   :  { %326 = vmatprep.subr.bf16.mxu1 %v277_v6  ;;  %v2029_v6 = vmov 0.0  }
  0x92   :  { %327 = vmatpush1.bf16.msra.mxu1 %v276_v8  ;;  %v377_v13 = vpop.permute.xlu1 %376  ;;  %vm1080_vm8 = vcmp.lt.s32.totalorder %v1044_v5, 768  ;;  %vm1112_vm9 = vcmp.lt.s32.totalorder %v1044_v5, 512 }
  0x93   :  { %v264_v14 = vpop.permute.xlu0 %263  ;;  %1082 = vst.msk [vmem:[#allocation2] sm:$0x3f] %vm1080_vm8, %v2029_v6 }
  0x94   :  { %v274_v15 = vsel %vm273_vm2, %v264_v14, %v266_v0 }
  0x95   :  { %286 = vmatpush1.bf16.msra.mxu0 %v274_v15  ;;  %1967 = vmatmul.mubr.msk.bf16.vlgmr.msra.gmra.mrb[8].mxu1 %vm61_vm0, %v262_v9 }
  0x96   :  { %v381_v16 = vpop.permute.xlu1 %380  ;;  %469 = vmatprep.mubr.bf16.mxu1 %v2020_v10 }
  0x97   :  { %v379_v17 = vpop.permute.xlu0 %378 }
  0x98   :  { %1966 = vmatmul.mubr.msk.bf16.vlgmr.msra.gmra.mrb[8].mxu0 %vm61_vm0, %v262_v9  ;;  %v386_v18 = vsel %vm384_vm3, %v377_v13, %v379_v17  ;;  %v387_v25 = vsel %vm384_vm3, %v379_v17, %v381_v16 }
  0x99   :  { %396 = vmatprep.subr.bf16.mxu0 %v386_v18  ;;  %428 = vmatprep.mubr.bf16.mxu0 %v2020_v10 }
  0x9a   :  { %v375_v20 = vpop.permute.xlu1 %374 }
  0x9b   :  { %v385_v21 = vsel %vm384_vm3, %v375_v20, %v377_v13  ;;  %v383_v22 = vpop.permute.xlu0 %382 }
  0x9c   :  { %397 = vmatpush1.bf16.msra.mxu0 %v385_v21  ;;  %v388_v23 = vsel %vm384_vm3, %v381_v16, %v383_v22 }
  0x9d   :  { %437 = vmatprep.subr.bf16.mxu1 %v388_v23  ;;  %488 = vmatprep.subr.bf16.mxu0 %v2106_v12 }
  0x9e   :  { %438 = vmatpush1.bf16.msra.mxu1 %v387_v25  ;;  %v602_v26 = vpop.permute.xlu1 %601 }
  0x9f   :  { %v600_v27 = vpop.permute.xlu0 %599  ;;  %529 = vmatprep.subr.bf16.mxu1 %v2102_v11 }
  0xa0   :  { %1969 = vmatmul.mubr.msk.bf16.vlgmr.msra.gmra.mrb[12].mxu0 %vm61_vm0, %v373_v24  ;;  %v609_v28 = vsel %vm607_vm4, %v600_v27, %v602_v26 }
  0xa1   :  { %1970 = vmatmul.mubr.msk.bf16.vlgmr.msra.gmra.mrb[12].mxu1 %vm61_vm0, %v373_v24  ;;  %489 = vmatpush1.bf16.msra.mxu0 %v2091_v7 }
  0xa2   :  { %619 = vmatprep.subr.bf16.mxu0 %v609_v28  ;;  %v606_v12 = vpop.permute.xlu1 %605  ;;  %530 = vmatpush1.bf16.msra.mxu1 %v2080_v3 }
  0xa3   :  { %v604_v30 = vpop.permute.xlu0 %603  ;;  %520 = vmatprep.mubr.bf16.mxu0 %v2020_v10  ;;  %561 = vmatprep.mubr.bf16.mxu1 %v2020_v10 }
  0xa4   :  { %v611_v11 = vsel %vm607_vm4, %v604_v30, %v606_v12  ;;  %v610_v3 = vsel %vm607_vm4, %v602_v26, %v604_v30 }
  0xa5   :  { %660 = vmatprep.subr.bf16.mxu1 %v611_v11 }
  0xa6   :  { %v711_v32 = vpop.permute.xlu1 %710 }
  0xa7   :  { %v598_v33 = vpop.permute.xlu0 %597 }
  0xa8   :  { %v608_v7 = vsel %vm607_vm4, %v598_v33, %v600_v27  ;;  %1972 = vmatmul.mubr.msk.bf16.vlgmr.msra.gmra.mrb[16].mxu0 %vm61_vm0, %v484_v31 }
  0xa9   :  { %1973 = vmatmul.mubr.msk.bf16.vlgmr.msra.gmra.mrb[16].mxu1 %vm61_vm0, %v484_v31  ;;  %620 = vmatpush1.bf16.msra.mxu0 %v608_v7 }
  0xaa   :  { %661 = vmatpush1.bf16.msra.mxu1 %v610_v3  ;;  %v715_v35 = vpop.permute.xlu1 %714  ;;  %651 = vmatprep.mubr.bf16.mxu0 %v2020_v10 }
  0xab   :  { %v713_v36 = vpop.permute.xlu0 %712  ;;  %692 = vmatprep.mubr.bf16.mxu1 %v2020_v10 }
  0xac   :  { %v720_v37 = vsel %vm718_vm5, %v711_v32, %v713_v36  ;;  %v721_v44 = vsel %vm718_vm5, %v713_v36, %v715_v35 }
  0xad   :  { %730 = vmatprep.subr.bf16.mxu0 %v720_v37 }
  0xae   :  { %v709_v39 = vpop.permute.xlu1 %708 }
  0xaf   :  { %v719_v40 = vsel %vm718_vm5, %v709_v39, %v711_v32  ;;  %v717_v41 = vpop.permute.xlu0 %716 }
  0xb0   :  { %1975 = vmatmul.mubr.msk.bf16.vlgmr.msra.gmra.mrb[20].mxu0 %vm61_vm0, %v586_v38  ;;  %v722_v42 = vsel %vm718_vm5, %v715_v35, %v717_v41 }
  0xb1   :  { %1976 = vmatmul.mubr.msk.bf16.vlgmr.msra.gmra.mrb[20].mxu1 %vm61_vm0, %v586_v38  ;;  %731 = vmatpush1.bf16.msra.mxu0 %v719_v40 }
  0xb2   :  { %771 = vmatprep.subr.bf16.mxu1 %v722_v42  ;;  %v824_v45 = vpop.permute.xlu1 %823  ;;  %762 = vmatprep.mubr.bf16.mxu0 %v2020_v10 }
  0xb3   :  { %772 = vmatpush1.bf16.msra.mxu1 %v721_v44  ;;  %v822_v46 = vpop.permute.xlu0 %821  ;;  %803 = vmatprep.mubr.bf16.mxu1 %v2020_v10 }
  0xb4   :  { %v831_v47 = vsel %vm829_vm6, %v822_v46, %v824_v45 }
  0xb5   :  { %841 = vmatprep.subr.bf16.mxu0 %v831_v47 }
  0xb6   :  { %v828_v49 = vpop.permute.xlu1 %827 }
  0xb7   :  { %v826_v50 = vpop.permute.xlu0 %825 }
  0xb8   :  { %1978 = vmatmul.mubr.msk.bf16.vlgmr.msra.gmra.mrb[24].mxu0 %vm61_vm0, %v707_v48  ;;  %v833_v51 = vsel %vm829_vm6, %v826_v50, %v828_v49  ;;  %v832_v52 = vsel %vm829_vm6, %v824_v45, %v826_v50 }
  0xb9   :  { %1979 = vmatmul.mubr.msk.bf16.vlgmr.msra.gmra.mrb[24].mxu1 %vm61_vm0, %v707_v48  ;;  %882 = vmatprep.subr.bf16.mxu1 %v833_v51 }
  0xba   :  { %883 = vmatpush1.bf16.msra.mxu1 %v832_v52  ;;  %v933_v54 = vpop.permute.xlu1 %932  ;;  %873 = vmatprep.mubr.bf16.mxu0 %v2020_v10 }
  0xbb   :  { %v820_v55 = vpop.permute.xlu0 %819  ;;  %914 = vmatprep.mubr.bf16.mxu1 %v2020_v10 }
  0xbc   :  { %v830_v56 = vsel %vm829_vm6, %v820_v55, %v822_v46 }
  0xbd   :  { %842 = vmatpush1.bf16.msra.mxu0 %v830_v56 }
  0xbe   :  { %v937_v58 = vpop.permute.xlu1 %936 }
  0xbf   :  { %v935_v59 = vpop.permute.xlu0 %934 }
  0xc0   :  { %1981 = vmatmul.mubr.msk.bf16.vlgmr.msra.gmra.mrb[28].mxu0 %vm61_vm0, %v818_v57  ;;  %v942_v60 = vsel %vm940_vm7, %v933_v54, %v935_v59  ;;  %v943_v4 = vsel %vm940_vm7, %v935_v59, %v937_v58 }
  0xc1   :  { %1982 = vmatmul.mubr.msk.bf16.vlgmr.msra.gmra.mrb[28].mxu1 %vm61_vm0, %v818_v57  ;;  %952 = vmatprep.subr.bf16.mxu0 %v942_v60 }
  0xc2   :  { %v931_v62 = vpop.permute.xlu1 %930  ;;  %984 = vmatprep.mubr.bf16.mxu0 %v2020_v10  ;;  %1025 = vmatprep.mubr.bf16.mxu1 %v2020_v10 }
  0xc3   :  { %v941_v63 = vsel %vm940_vm7, %v931_v62, %v933_v54  ;;  %v939_v0 = vpop.permute.xlu0 %938 }
  0xc4   :  { %953 = vmatpush1.bf16.msra.mxu0 %v941_v63  ;;  %v944_v1 = vsel %vm940_vm7, %v937_v58, %v939_v0 }
  0xc5   :  { %993 = vmatprep.subr.bf16.mxu1 %v944_v1 }
  0xc6   :  { %994 = vmatpush1.bf16.msra.mxu1 %v943_v4 }
  0xc8   :  { %1984 = vmatmul.mubr.msk.bf16.vlgmr.msra.gmra.mrb[32].mxu0 %vm61_vm0, %v929_v2 }
  0xc9   :  { %1985 = vmatmul.mubr.msk.bf16.vlgmr.msra.gmra.mrb[32].mxu1 %vm61_vm0, %v929_v2 }
 0x153   :  { %v149_v10 = vpop.f32.mrb[0].mxu1 }
 0x154   :  { %v151_v8 = vpop.f32.mrb[1].mxu1 }
 0x155   :  { %v153_v9 = vpop.f32.mrb[2].mxu1 }
 0x156   :  { %v154_v13 = vpop.f32.mrb[3].mxu1 }
 0x157   :  { %v108_v14 = vpop.f32.mrb[0].mxu0 }
 0x158   :  { %v110_v15 = vpop.f32.mrb[1].mxu0 }
 0x159   :  { %v112_v16 = vpop.f32.mrb[2].mxu0 }
 0x15a   :  { %v113_v17 = vpop.f32.mrb[3].mxu0 }
 0x15f   :  { %v212_v18 = vpop.f32.mrb[4].mxu0 }
 0x160   :  { %v213_v19 = vadd.f32 %v212_v18, %v108_v14  ;;  %v253_v20 = vpop.f32.mrb[4].mxu1  ;;  %v214_v21 = vpop.f32.mrb[5].mxu0 }
 0x161   :  { %v254_v22 = vadd.f32 %v253_v20, %v149_v10  ;;  %v215_v23 = vadd.f32 %v214_v21, %v110_v15  ;;  %v255_v24 = vpop.f32.mrb[5].mxu1  ;;  %v216_v25 = vpop.f32.mrb[6].mxu0 }
 0x162   :  { %v256_v26 = vadd.f32 %v255_v24, %v151_v8  ;;  %v257_v27 = vpop.f32.mrb[6].mxu1  ;;  %v217_v28 = vpop.f32.mrb[7].mxu0 }
 0x163   :  { %v258_v29 = vpop.f32.mrb[7].mxu1  ;;  %v2333_v27 = vshrl.u32 %v1044_v5, 7 }
 0x168   :  { %v360_v12 = vpop.f32.mrb[8].mxu1 }
 0x169   :  { %v369_v30 = vadd.f32 %v360_v12, %v254_v22  ;;  %v362_v11 = vpop.f32.mrb[9].mxu1 }
 0x16a   :  { %v370_v31 = vadd.f32 %v362_v11, %v256_v26  ;;  %v364_v32 = vpop.f32.mrb[10].mxu1 }
 0x16b   :  { %v319_v33 = vpop.f32.mrb[8].mxu0  ;;  %v365_v7 = vpop.f32.mrb[11].mxu1 }
 0x16c   :  { %v367_v3 = vadd.f32 %v319_v33, %v213_v19  ;;  %v321_v34 = vpop.f32.mrb[9].mxu0  ;;  %v2336_v7 = vsub.s32 0, %v2333_v27 }
 0x16d   :  { %v368_v35 = vadd.f32 %v321_v34, %v215_v23  ;;  %v323_v36 = vpop.f32.mrb[10].mxu0 }
 0x16e   :  { %v324_v37 = vpop.f32.mrb[11].mxu0 }
 0x16f   :  { %v2339_v37 = vsub.s32 1, %v2333_v27 }
 0x173   :  { %v430_v38 = vpop.f32.mrb[12].mxu0 }
 0x174   :  { %v478_v39 = vadd.f32 %v430_v38, %v367_v3  ;;  %v432_v40 = vpop.f32.mrb[13].mxu0  ;;  %v471_v41 = vpop.f32.mrb[12].mxu1 }
 0x175   :  { %v479_v42 = vadd.f32 %v432_v40, %v368_v35  ;;  %v480_v43 = vadd.f32 %v471_v41, %v369_v30  ;;  %v473_v44 = vpop.f32.mrb[13].mxu1  ;;  %v434_v45 = vpop.f32.mrb[14].mxu0  ;;  %v2030_v40 = vmov 1966171168  }
 0x176   :  { %v481_v46 = vadd.f32 %v473_v44, %v370_v31  ;;  %v475_v47 = vpop.f32.mrb[14].mxu1  ;;  %v435_v48 = vpop.f32.mrb[15].mxu0  ;;  %v1090_v41 = vunpack.c.l.s4 %v2030_v40  ;;  %v2349_v44 = vsub.s32 3, %v2333_v27 }
 0x177   :  { %v476_v49 = vpop.f32.mrb[15].mxu1  ;;  %v1042_v38 = vpop.permute.xlu0 %1041 }
 0x17b   :  { %v522_v50 = vpop.f32.mrb[16].mxu0 }
 0x17c   :  { %v570_v51 = vadd.f32 %v522_v50, %v478_v39  ;;  %v524_v52 = vpop.f32.mrb[17].mxu0  ;;  %v563_v53 = vpop.f32.mrb[16].mxu1  ;;  %v1052_v39 = vld [vmem:[%s2731_s1] sm:$0xf]  ;;  %s2031_s1 = smov 126  }
 0x17d   :  { %v571_v54 = vadd.f32 %v524_v52, %v479_v42  ;;  %v572_v55 = vadd.f32 %v563_v53, %v480_v43  ;;  %v565_v56 = vpop.f32.mrb[17].mxu1  ;;  %v526_v57 = vpop.f32.mrb[18].mxu0  ;;  %v2345_v42 = vsub.s32 2, %v2333_v27  ;;  %v1047_v43 = vrot.slane %v1042_v38, %v2336_v7 }
 0x17e   :  { %v573_v58 = vadd.f32 %v565_v56, %v481_v46  ;;  %v567_v59 = vpop.f32.mrb[18].mxu1  ;;  %v527_v60 = vpop.f32.mrb[19].mxu0  ;;  %v1057_v47 = vrot.slane %v1052_v39, %v2336_v7  ;;  %v1061_v49 = vrot.slane %v1052_v39, %v2339_v37  ;;  %v1091_v52 = vunpack.c.0.s8 %v1090_v41 }
 0x17f   :  { %v568_v61 = vpop.f32.mrb[19].mxu1  ;;  %v1069_v59 = vrot.slane %v1052_v39, %v2349_v44 }
 0x183   :  { %v653_v62 = vpop.f32.mrb[20].mxu0 }
 0x184   :  { %v701_v63 = vadd.f32 %v653_v62, %v570_v51  ;;  %v655_v0 = vpop.f32.mrb[21].mxu0  ;;  %v694_v1 = vpop.f32.mrb[20].mxu1 }
 0x185   :  { %v702_v2 = vadd.f32 %v655_v0, %v571_v54  ;;  %v703_v4 = vadd.f32 %v694_v1, %v572_v55  ;;  %v696_v6 = vpop.f32.mrb[21].mxu1  ;;  %v657_v10 = vpop.f32.mrb[22].mxu0  ;;  %v1065_v54 = vrot.slane %v1052_v39, %v2345_v42 }
 0x186   :  { %v704_v8 = vadd.f32 %v696_v6, %v573_v58  ;;  %v698_v9 = vpop.f32.mrb[22].mxu1  ;;  %v658_v13 = vpop.f32.mrb[23].mxu0  ;;  %v1094_v6 = vsub.s32 %v1091_v52, %v2333_v27 }
 0x187   :  { %v699_v14 = vpop.f32.mrb[23].mxu1 }
 0x18b   :  { %v764_v15 = vpop.f32.mrb[24].mxu0 }
 0x18c   :  { %v812_v16 = vadd.f32 %v764_v15, %v701_v63  ;;  %v766_v17 = vpop.f32.mrb[25].mxu0  ;;  %v805_v18 = vpop.f32.mrb[24].mxu1 }
 0x18d   :  { %v813_v19 = vadd.f32 %v766_v17, %v702_v2  ;;  %v814_v20 = vadd.f32 %v805_v18, %v703_v4  ;;  %v807_v21 = vpop.f32.mrb[25].mxu1  ;;  %v768_v22 = vpop.f32.mrb[26].mxu0 }
 0x18e   :  { %v815_v23 = vadd.f32 %v807_v21, %v704_v8  ;;  %v809_v24 = vpop.f32.mrb[26].mxu1  ;;  %v769_v25 = vpop.f32.mrb[27].mxu0 }
 0x18f   :  { %v810_v26 = vpop.f32.mrb[27].mxu1  ;;  %v2357_v18 = vpop.permute.xlu1 %1120 }
 0x190   :  { %v1180_v22 = vpop.permute.xlu0 %1179 }
 0x193   :  { %v875_v28 = vpop.f32.mrb[28].mxu0 }
 0x194   :  { %v923_v29 = vadd.f32 %v875_v28, %v812_v16  ;;  %v877_v12 = vpop.f32.mrb[29].mxu0  ;;  %v916_v30 = vpop.f32.mrb[28].mxu1 }
 0x195   :  { %v924_v11 = vadd.f32 %v877_v12, %v813_v19  ;;  %v925_v31 = vadd.f32 %v916_v30, %v814_v20  ;;  %v918_v32 = vpop.f32.mrb[29].mxu1  ;;  %v879_v33 = vpop.f32.mrb[30].mxu0 }
 0x196   :  { %v926_v3 = vadd.f32 %v918_v32, %v815_v23  ;;  %v920_v34 = vpop.f32.mrb[30].mxu1  ;;  %v880_v35 = vpop.f32.mrb[31].mxu0  ;;  %v1147_v23 = vsub.s32 4, %v2333_v27 }
 0x197   :  { %v921_v36 = vpop.f32.mrb[31].mxu1  ;;  %v2374_v28 = vpop.permute.xlu1 %1125 }
 0x198   :  { %v1262_v36 = vpop.permute.xlu0 %1261 }
 0x19b   :  { %v986_v45 = vpop.f32.mrb[32].mxu0 }
 0x19c   :  { %v1034_v46 = vadd.f32 %v986_v45, %v923_v29  ;;  %v988_v48 = vpop.f32.mrb[33].mxu0  ;;  %v1027_v50 = vpop.f32.mrb[32].mxu1 }
 0x19d   :  { %v1035_v51 = vadd.f32 %v988_v48, %v924_v11  ;;  %v1036_v53 = vadd.f32 %v1027_v50, %v925_v31  ;;  %v1029_v55 = vpop.f32.mrb[33].mxu1  ;;  %v990_v56 = vpop.f32.mrb[34].mxu0 }
 0x19e   :  { %v1048_v57 = vadd.f32 %v1047_v43, %v1034_v46  ;;  %v1037_v58 = vadd.f32 %v1029_v55, %v926_v3  ;;  %v1031_v60 = vpop.f32.mrb[34].mxu1  ;;  %v991_v61 = vpop.f32.mrb[35].mxu0 }
 0x19f   :  { %v1049_v62 = vadd.f32 %v1047_v43, %v1035_v51  ;;  %v1050_v63 = vadd.f32 %v1047_v43, %v1036_v53  ;;  %v1032_v0 = vpop.f32.mrb[35].mxu1  ;;  %v1185_v11 = vpop.permute.xlu1 %1184 }
 0x1a0   :  { %v1074_v1 = vmul.f32 %v1057_v47, %v1048_v57  ;;  %v1051_v2 = vadd.f32 %v1047_v43, %v1037_v58  ;;  %v1344_v51 = vpop.permute.xlu0 %1343 }
 0x1a1   :  { %v1075_v4 = vmul.f32 %v1061_v49, %v1049_v62  ;;  %v1076_v10 = vmul.f32 %v1065_v54, %v1050_v63 }
 0x1a2   :  { %v1077_v8 = vmul.f32 %v1069_v59, %v1051_v2 }
 0x1a3   :  { %v1087_v9 = vcombine.low %v1074_v1, %v1075_v4  ;;  %v1267_v43 = vpop.permute.xlu1 %1266 }
 0x1a4   :  { %v1088_v13 = vcombine.low %v1076_v10, %v1077_v8  ;;  %v1427_v2 = vpop.permute.xlu0 %1426 }
 0x1a5   :  { %v1095_v14 = vrot.slane %v1087_v9, %v1094_v6 }
 0x1a6   :  { %v1102_v15 = vrot.slane %v1088_v13, %v1094_v6 }
 0x1a7   :  { %v1349_v56 = vpop.permute.xlu1 %1348 }
 0x1a8   :  { %v1103_v16 = vcombine.low %v1095_v14, %v1102_v15 }
 0x1aa   :  { %v1110_v17 = vrot.slane %v1103_v16, %v1094_v6 }
 0x1ab   :  { %v1432_v14 = vpop.permute.xlu1 %1431 }
 0x1ac   :  { %1114 = vst.msk [vmem:[#allocation2 + $0x1] sm:$0xf] %vm1112_vm9, %v1110_v17 }
 0x1b3   :  { %v1115_v19 = vld [vmem:[#allocation2] sm:$0x1f] }
 0x1b4   :  { %v2360_v20 = vrot.slane %v1115_v19, %v2336_v7  ;;  %v2363_v21 = vrot.slane %v1115_v19, %v2339_v37  ;;  %v2367_v24 = vrot.slane %v1115_v19, %v2345_v42  ;;  %v2370_v25 = vrot.slane %v1115_v19, %v2349_v44  ;;  %v1420_v61 = vld [vmem:[#allocation2 + $0x1] sm:$0xf] }
 0x1b5   :  { %v2380_v29 = vrot.slane %v1115_v19, %v1147_v23  ;;  %v1442_v0 = vrot.slane %v1420_v61, %v2339_v37  ;;  %v1438_v1 = vrot.slane %v1420_v61, %v2336_v7  ;;  %v1450_v10 = vrot.slane %v1420_v61, %v2349_v44  ;;  %v1514_v17 = vld [vmem:[#allocation2 + $0x1] sm:$0x1f] }
 0x1b6   :  { %v1188_v5 = vmul.f32 %v1180_v22, %v2363_v21  ;;  %v1187_v26 = vmul.f32 %v1180_v22, %v2360_v20  ;;  %v1190_v12 = vmul.f32 %v1180_v22, %v2370_v25  ;;  %v1189_v30 = vmul.f32 %v1180_v22, %v2367_v24 }
 0x1b7   :  { %v1192_v31 = vmul.f32 %v1185_v11, %v2360_v20  ;;  %v1191_v32 = vmul.f32 %v1180_v22, %v2380_v29  ;;  %v1194_v33 = vmul.f32 %v1185_v11, %v2367_v24  ;;  %v1193_v3 = vmul.f32 %v1185_v11, %v2363_v21 }
 0x1b8   :  { %1209 = vrot.lane.b32.xlu1 %v1188_v5, %s2025_s25  ;;  %1207 = vrot.lane.b32.xlu0 %v1187_v26, %s2025_s25  ;;  %v1196_v34 = vmul.f32 %v1185_v11, %v2380_v29  ;;  %v1195_v35 = vmul.f32 %v1185_v11, %v2370_v25  ;;  %v1270_v38 = vmul.f32 %v1262_v36, %v2363_v21 }
 0x1b9   :  { %v1269_v39 = vmul.f32 %v1262_v36, %v2360_v20  ;;  %v1272_v40 = vmul.f32 %v1262_v36, %v2370_v25  ;;  %v1271_v41 = vmul.f32 %v1262_v36, %v2367_v24  ;;  %v1274_v45 = vmul.f32 %v1267_v43, %v2360_v20 }
 0x1ba   :  { %v1273_v46 = vmul.f32 %v1262_v36, %v2380_v29  ;;  %v1276_v47 = vmul.f32 %v1267_v43, %v2367_v24  ;;  %v1275_v48 = vmul.f32 %v1267_v43, %v2363_v21  ;;  %v1278_v49 = vmul.f32 %v1267_v43, %v2380_v29 }
 0x1bb   :  { %v1277_v50 = vmul.f32 %v1267_v43, %v2370_v25  ;;  %v1352_v52 = vmul.f32 %v1344_v51, %v2363_v21  ;;  %v1351_v53 = vmul.f32 %v1344_v51, %v2360_v20  ;;  %v1354_v54 = vmul.f32 %v1344_v51, %v2370_v25 }
 0x1bc   :  { %1213 = vrot.lane.b32.xlu1 %v1190_v12, %s2025_s25  ;;  %1211 = vrot.lane.b32.xlu0 %v1189_v30, %s2025_s25  ;;  %v1353_v55 = vmul.f32 %v1344_v51, %v2367_v24  ;;  %v1356_v57 = vmul.f32 %v1349_v56, %v2360_v20  ;;  %v1355_v58 = vmul.f32 %v1344_v51, %v2380_v29  ;;  %v1521_v12 = vpop.permute.xlu0 %1520 }
 0x1bd   :  { %v1358_v59 = vmul.f32 %v1349_v56, %v2367_v24  ;;  %v1357_v60 = vmul.f32 %v1349_v56, %v2363_v21  ;;  %v1360_v62 = vmul.f32 %v1349_v56, %v2380_v29  ;;  %v1359_v63 = vmul.f32 %v1349_v56, %v2370_v25 }
 0x1be   :  { %v1456_v4 = vmul.f32 %v1442_v0, %v1427_v2  ;;  %v1455_v6 = vmul.f32 %v1438_v1, %v1427_v2  ;;  %v1446_v8 = vrot.slane %v1420_v61, %v2345_v42  ;;  %v1458_v9 = vmul.f32 %v1450_v10, %v1427_v2 }
 0x1bf   :  { %v1460_v15 = vmul.f32 %v1442_v0, %v1432_v14  ;;  %v1459_v16 = vmul.f32 %v1438_v1, %v1432_v14  ;;  %v2439_v19 = vrot.slane %v1514_v17, %v2336_v7  ;;  %v2442_v22 = vrot.slane %v1514_v17, %v2339_v37 }
 0x1c0   :  { %1217 = vrot.lane.b32.xlu1 %v1192_v31, %s2025_s25  ;;  %1215 = vrot.lane.b32.xlu0 %v1191_v32, %s2025_s25  ;;  %v1457_v13 = vmul.f32 %v1446_v8, %v1427_v2  ;;  %v1462_v5 = vmul.f32 %v1450_v10, %v1432_v14  ;;  %v1461_v26 = vmul.f32 %v1446_v8, %v1432_v14  ;;  %v1629_v36 = vpop.permute.xlu0 %1628 }
 0x1c1   :  { %v2447_v30 = vrot.slane %v1514_v17, %v2345_v42  ;;  %v2450_v11 = vrot.slane %v1514_v17, %v2349_v44  ;;  %v1555_v31 = vmul.f32 %v2442_v22, %v1521_v12  ;;  %v1554_v7 = vmul.f32 %v2439_v19, %v1521_v12  ;;  %v1526_v42 = vpop.permute.xlu1 %1525 }
 0x1c2   :  { %v2456_v37 = vrot.slane %v1514_v17, %v1147_v23  ;;  %v1559_v44 = vmul.f32 %v2439_v19, %v1526_v42  ;;  %v1155_v1 = vmul.f32 %v2363_v21, %v2357_v18  ;;  %v1156_v2 = vmul.f32 %v2367_v24, %v2357_v18 }
 0x1c3   :  { %v1557_v32 = vmul.f32 %v2450_v11, %v1521_v12  ;;  %v1562_v23 = vmul.f32 %v2450_v11, %v1526_v42  ;;  %v1157_v17 = vmul.f32 %v2370_v25, %v2357_v18 }
 0x1c4   :  { %1221 = vrot.lane.b32.xlu1 %v1194_v33, %s2025_s25  ;;  %1219 = vrot.lane.b32.xlu0 %v1193_v3, %s2025_s25  ;;  %v1556_v33 = vmul.f32 %v2447_v30, %v1521_v12  ;;  %v1558_v3 = vmul.f32 %v2456_v37, %v1521_v12  ;;  %v1563_v27 = vmul.f32 %v2456_v37, %v1526_v42 }
 0x1c8   :  { %1225 = vrot.lane.b32.xlu1 %v1196_v34, %s2025_s25  ;;  %1223 = vrot.lane.b32.xlu0 %v1195_v35, %s2025_s25  ;;  %s2032_s25 = smov 110   ;;  %v1561_v34 = vmul.f32 %v2447_v30, %v1526_v42  ;;  %v1560_v35 = vmul.f32 %v2442_v22, %v1526_v42  ;;  %v1159_v42 = vmul.f32 %v2360_v20, %v2374_v28 }
 0x1cc   :  { %1291 = vrot.lane.b32.xlu1 %v1270_v38, %s2031_s1  ;;  %1289 = vrot.lane.b32.xlu0 %v1269_v39, %s2031_s1  ;;  %v1634_v38 = vpop.permute.xlu1 %1633  ;;  %v1637_v39 = vmul.f32 %v1629_v36, %v2442_v22 }
 0x1cd   :  { %v1643_v51 = vmul.f32 %v1634_v38, %v2447_v30  ;;  %v1644_v56 = vmul.f32 %v1634_v38, %v2450_v11 }
 0x1d0   :  { %1295 = vrot.lane.b32.xlu1 %v1272_v40, %s2031_s1  ;;  %1293 = vrot.lane.b32.xlu0 %v1271_v41, %s2031_s1  ;;  %v1636_v40 = vmul.f32 %v1629_v36, %v2439_v19  ;;  %v1711_v41 = vpop.permute.xlu0 %1710  ;;  %v2468_v43 = vpop.permute.xlu1 %1715 }
 0x1d1   :  { %v1718_v61 = vmul.f32 %v1711_v41, %v2439_v19  ;;  %v1720_v10 = vmul.f32 %v1711_v41, %v2447_v30  ;;  %v1722_v12 = vmul.f32 %v1711_v41, %v2456_v37 }
 0x1d4   :  { %1299 = vrot.lane.b32.xlu1 %v1274_v45, %s2031_s1  ;;  %1297 = vrot.lane.b32.xlu0 %v1273_v46, %s2031_s1  ;;  %v1639_v45 = vmul.f32 %v1629_v36, %v2450_v11  ;;  %v1638_v46 = vmul.f32 %v1629_v36, %v2447_v30 }
 0x1d8   :  { %1303 = vrot.lane.b32.xlu1 %v1276_v47, %s2031_s1  ;;  %1301 = vrot.lane.b32.xlu0 %v1275_v48, %s2031_s1  ;;  %v1641_v47 = vmul.f32 %v1634_v38, %v2439_v19  ;;  %v1640_v48 = vmul.f32 %v1629_v36, %v2456_v37 }
 0x1dc   :  { %1307 = vrot.lane.b32.xlu1 %v1278_v49, %s2031_s1  ;;  %1305 = vrot.lane.b32.xlu0 %v1277_v50, %s2031_s1  ;;  %v2474_v49 = vpop.permute.xlu0 %1792  ;;  %v2476_v50 = vpop.permute.xlu1 %1797 }
 0x1e0   :  { %1373 = vrot.lane.b32.xlu1 %v1352_v52, %s2027_s0  ;;  %1371 = vrot.lane.b32.xlu0 %v1351_v53, %s2027_s0  ;;  %v1642_v52 = vmul.f32 %v1634_v38, %v2442_v22  ;;  %v2480_v53 = vpop.permute.xlu0 %1873 }
 0x1e4   :  { %1377 = vrot.lane.b32.xlu1 %v1354_v54, %s2027_s0  ;;  %1375 = vrot.lane.b32.xlu0 %v1353_v55, %s2027_s0  ;;  %v2482_v54 = vpop.permute.xlu1 %1878  ;;  %v1645_v55 = vmul.f32 %v1634_v38, %v2456_v37  ;;  %v1161_v38 = vmul.f32 %v2367_v24, %v2374_v28 }
 0x1e8   :  { %1381 = vrot.lane.b32.xlu1 %v1356_v57, %s2027_s0  ;;  %1379 = vrot.lane.b32.xlu0 %v1355_v58, %s2027_s0  ;;  %v1154_v58 = vmul.f32 %v2360_v20, %v2357_v18  ;;  %v1163_v20 = vmul.f32 %v2380_v29, %v2374_v28 }
 0x1ec   :  { %1385 = vrot.lane.b32.xlu1 %v1358_v59, %s2027_s0  ;;  %1383 = vrot.lane.b32.xlu0 %v1357_v60, %s2027_s0  ;;  %v1719_v60 = vmul.f32 %v1711_v41, %v2442_v22 }
 0x1f0   :  { %1389 = vrot.lane.b32.xlu1 %v1360_v62, %s2027_s0  ;;  %1387 = vrot.lane.b32.xlu0 %v1359_v63, %s2027_s0  ;;  %s2033_s0 = smov 96  }
 0x1f4   :  { %1473 = vrot.lane.b32.xlu1 %v1456_v4, %s2028_s27  ;;  %1471 = vrot.lane.b32.xlu0 %v1455_v6, %s2028_s27  ;;  %v1721_v6 = vmul.f32 %v1711_v41, %v2450_v11  ;;  %v1727_v41 = vmul.f32 %v2468_v43, %v2456_v37 }
 0x1f8   :  { %1477 = vrot.lane.b32.xlu1 %v1458_v9, %s2028_s27  ;;  %1475 = vrot.lane.b32.xlu0 %v1457_v13, %s2028_s27 }
 0x1fc   :  { %1481 = vrot.lane.b32.xlu1 %v1460_v15, %s2028_s27  ;;  %1479 = vrot.lane.b32.xlu0 %v1459_v16, %s2028_s27  ;;  %v1158_v15 = vmul.f32 %v2380_v29, %v2357_v18  ;;  %v1160_v18 = vmul.f32 %v2363_v21, %v2374_v28 }
 0x200   :  { %1485 = vrot.lane.b32.xlu1 %v1462_v5, %s2028_s27  ;;  %1483 = vrot.lane.b32.xlu0 %v1461_v26, %s2028_s27  ;;  %s2034_s27 = smov 95   ;;  %v1723_v26 = vmul.f32 %v2468_v43, %v2439_v19 }
 0x204   :  { %1576 = vrot.lane.b32.xlu1 %v1555_v31, %s2032_s25  ;;  %1574 = vrot.lane.b32.xlu0 %v1554_v7, %s2032_s25 }
 0x208   :  { %1580 = vrot.lane.b32.xlu1 %v1557_v32, %s2032_s25  ;;  %1578 = vrot.lane.b32.xlu0 %v1556_v33, %s2032_s25 }
 0x20c   :  { %1584 = vrot.lane.b32.xlu1 %v1559_v44, %s2032_s25  ;;  %1582 = vrot.lane.b32.xlu0 %v1558_v3, %s2032_s25  ;;  %v1725_v3 = vmul.f32 %v2468_v43, %v2447_v30 }
 0x210   :  { %1588 = vrot.lane.b32.xlu1 %v1561_v34, %s2032_s25  ;;  %1586 = vrot.lane.b32.xlu0 %v1560_v35, %s2032_s25  ;;  %v1724_v34 = vmul.f32 %v2468_v43, %v2442_v22 }
 0x214   :  { %1592 = vrot.lane.b32.xlu1 %v1563_v27, %s2032_s25  ;;  %1590 = vrot.lane.b32.xlu0 %v1562_v23, %s2032_s25 }
 0x218   :  { %1658 = vrot.lane.b32.xlu1 %v1637_v39, %s2033_s0  ;;  %1656 = vrot.lane.b32.xlu0 %v1636_v40, %s2033_s0  ;;  %v1162_v39 = vmul.f32 %v2370_v25, %v2374_v28  ;;  %v1801_v28 = vmul.f32 %v2474_v49, %v2442_v22 }
 0x21c   :  { %1662 = vrot.lane.b32.xlu1 %v1639_v45, %s2033_s0  ;;  %1660 = vrot.lane.b32.xlu0 %v1638_v46, %s2033_s0  ;;  %v1726_v45 = vmul.f32 %v2468_v43, %v2450_v11  ;;  %v1800_v43 = vmul.f32 %v2474_v49, %v2439_v19 }
 0x220   :  { %1666 = vrot.lane.b32.xlu1 %v1641_v47, %s2033_s0  ;;  %1664 = vrot.lane.b32.xlu0 %v1640_v48, %s2033_s0 }
 0x224   :  { %1670 = vrot.lane.b32.xlu1 %v1643_v51, %s2033_s0  ;;  %1668 = vrot.lane.b32.xlu0 %v1642_v52, %s2033_s0 }
 0x228   :  { %1674 = vrot.lane.b32.xlu1 %v1645_v55, %s2033_s0  ;;  %1672 = vrot.lane.b32.xlu0 %v1644_v56, %s2033_s0 }
 0x22a   :  { %v1210_v57 = vpop.permute.xlu1 %1209  ;;  %v1208_v59 = vpop.permute.xlu0 %1207 }
 0x22b   :  { %v1228_v62 = vsel %vm607_vm4, %v1208_v59, %v1210_v57  ;;  %v1802_v59 = vmul.f32 %v2474_v49, %v2447_v30 }
 0x22c   :  { %v1246_v63 = vadd.f32 %v1228_v62, %v1154_v58  ;;  %1740 = vrot.lane.b32.xlu1 %v1719_v60, %s2034_s27  ;;  %1738 = vrot.lane.b32.xlu0 %v1718_v61, %s2034_s27  ;;  %v1803_v58 = vmul.f32 %v2474_v49, %v2450_v11 }
 0x22e   :  { %v1214_v0 = vpop.permute.xlu1 %1213  ;;  %v1212_v4 = vpop.permute.xlu0 %1211 }
 0x22f   :  { %v1229_v8 = vsel %vm607_vm4, %v1210_v57, %v1212_v4  ;;  %v1230_v9 = vsel %vm607_vm4, %v1212_v4, %v1214_v0  ;;  %v1804_v4 = vmul.f32 %v2474_v49, %v2456_v37 }
 0x230   :  { %v1247_v13 = vadd.f32 %v1229_v8, %v1155_v1  ;;  %v1248_v14 = vadd.f32 %v1230_v9, %v1156_v2  ;;  %1744 = vrot.lane.b32.xlu1 %v1721_v6, %s2034_s27  ;;  %1742 = vrot.lane.b32.xlu0 %v1720_v10, %s2034_s27  ;;  %v1805_v2 = vmul.f32 %v2476_v50, %v2439_v19 }
 0x232   :  { %v1218_v16 = vpop.permute.xlu1 %1217  ;;  %v1216_v5 = vpop.permute.xlu0 %1215 }
 0x233   :  { %v1231_v31 = vsel %vm607_vm4, %v1214_v0, %v1216_v5  ;;  %v1250_v7 = vadd.f32 %v1216_v5, %v1158_v15  ;;  %v1806_v15 = vmul.f32 %v2476_v50, %v2442_v22 }
 0x234   :  { %v1249_v32 = vadd.f32 %v1231_v31, %v1157_v17  ;;  %1748 = vrot.lane.b32.xlu1 %v1723_v26, %s2034_s27  ;;  %1746 = vrot.lane.b32.xlu0 %v1722_v12, %s2034_s27  ;;  %v1809_v12 = vmul.f32 %v2476_v50, %v2456_v37 }
 0x236   :  { %v1222_v33 = vpop.permute.xlu1 %1221  ;;  %v1220_v44 = vpop.permute.xlu0 %1219 }
 0x237   :  { %v1232_v35 = vsel %vm607_vm4, %v1218_v16, %v1220_v44  ;;  %v1233_v27 = vsel %vm607_vm4, %v1220_v44, %v1222_v33 }
 0x238   :  { %v1251_v23 = vadd.f32 %v1232_v35, %v1159_v42  ;;  %v1252_v36 = vadd.f32 %v1233_v27, %v1160_v18  ;;  %1752 = vrot.lane.b32.xlu1 %v1725_v3, %s2034_s27  ;;  %1750 = vrot.lane.b32.xlu0 %v1724_v34, %s2034_s27 }
 0x23a   :  { %v1226_v21 = vpop.permute.xlu1 %1225  ;;  %v1224_v40 = vpop.permute.xlu0 %1223 }
 0x23b   :  { %v1255_v46 = vadd.f32 %v1226_v21, %v1163_v20  ;;  %v1234_v47 = vsel %vm607_vm4, %v1222_v33, %v1224_v40  ;;  %v1235_v48 = vsel %vm607_vm4, %v1224_v40, %v1226_v21 }
 0x23c   :  { %v1253_v29 = vadd.f32 %v1234_v47, %v1161_v38  ;;  %v1254_v51 = vadd.f32 %v1235_v48, %v1162_v39  ;;  %1756 = vrot.lane.b32.xlu1 %v1727_v41, %s2034_s27  ;;  %1754 = vrot.lane.b32.xlu0 %v1726_v45, %s2034_s27 }
 0x23e   :  { %v1292_v24 = vpop.permute.xlu1 %1291  ;;  %v1290_v25 = vpop.permute.xlu0 %1289 }
 0x23f   :  { %v1310_v52 = vsel %vm1309_vm10, %v1290_v25, %v1292_v24 }
 0x240   :  { %v1328_v55 = vadd.f32 %v1310_v52, %v1246_v63  ;;  %1822 = vrot.lane.b32.xlu1 %v1801_v28, %s2035_s19  ;;  %1820 = vrot.lane.b32.xlu0 %v1800_v43, %s2035_s19 }
 0x242   :  { %v1296_v56 = vpop.permute.xlu1 %1295  ;;  %v1294_v57 = vpop.permute.xlu0 %1293 }
 0x243   :  { %v1311_v60 = vsel %vm1309_vm10, %v1292_v24, %v1294_v57  ;;  %v1312_v61 = vsel %vm1309_vm10, %v1294_v57, %v1296_v56 }
 0x244   :  { %v1329_v62 = vadd.f32 %v1311_v60, %v1247_v13  ;;  %v1330_v0 = vadd.f32 %v1312_v61, %v1248_v14  ;;  %1826 = vrot.lane.b32.xlu1 %v1803_v58, %s2035_s19  ;;  %1824 = vrot.lane.b32.xlu0 %v1802_v59, %s2035_s19  ;;  %v1807_v14 = vmul.f32 %v2476_v50, %v2447_v30 }
 0x245   :  { %v1808_v30 = vmul.f32 %v2476_v50, %v2450_v11 }
 0x246   :  { %v1300_v63 = vpop.permute.xlu1 %1299  ;;  %v1298_v1 = vpop.permute.xlu0 %1297 }
 0x247   :  { %v1313_v6 = vsel %vm1309_vm10, %v1296_v56, %v1298_v1  ;;  %v1332_v10 = vadd.f32 %v1298_v1, %v1250_v7 }
 0x248   :  { %v1331_v8 = vadd.f32 %v1313_v6, %v1249_v32  ;;  %1830 = vrot.lane.b32.xlu1 %v1805_v2, %s2035_s19  ;;  %1828 = vrot.lane.b32.xlu0 %v1804_v4, %s2035_s19 }
 0x24a   :  { %v1304_v9 = vpop.permute.xlu1 %1303  ;;  %v1302_v13 = vpop.permute.xlu0 %1301 }
 0x24b   :  { %v1314_v19 = vsel %vm1309_vm10, %v1300_v63, %v1302_v13  ;;  %v1315_v49 = vsel %vm1309_vm10, %v1302_v13, %v1304_v9 }
 0x24c   :  { %v1333_v16 = vadd.f32 %v1314_v19, %v1251_v23  ;;  %v1334_v17 = vadd.f32 %v1315_v49, %v1252_v36  ;;  %1834 = vrot.lane.b32.xlu1 %v1807_v14, %s2035_s19  ;;  %1832 = vrot.lane.b32.xlu0 %v1806_v15, %s2035_s19 }
 0x24e   :  { %v1308_v5 = vpop.permute.xlu1 %1307  ;;  %v1306_v26 = vpop.permute.xlu0 %1305 }
 0x24f   :  { %v1337_v31 = vadd.f32 %v1308_v5, %v1255_v46  ;;  %v1316_v22 = vsel %vm1309_vm10, %v1304_v9, %v1306_v26  ;;  %v1317_v7 = vsel %vm1309_vm10, %v1306_v26, %v1308_v5 }
 0x250   :  { %v1335_v32 = vadd.f32 %v1316_v22, %v1253_v29  ;;  %v1336_v33 = vadd.f32 %v1317_v7, %v1254_v51  ;;  %1838 = vrot.lane.b32.xlu1 %v1809_v12, %s2035_s19  ;;  %1836 = vrot.lane.b32.xlu0 %v1808_v30, %s2035_s19 }
 0x252   :  { %v1374_v42 = vpop.permute.xlu1 %1373  ;;  %v1372_v18 = vpop.permute.xlu0 %1371 }
 0x253   :  { %v1392_v44 = vsel %vm829_vm6, %v1372_v18, %v1374_v42 }
 0x254   :  { %v1410_v3 = vadd.f32 %v1392_v44, %v1328_v55 }
 0x256   :  { %v1378_v37 = vpop.permute.xlu1 %1377  ;;  %v1376_v34 = vpop.permute.xlu0 %1375 }
 0x257   :  { %v1393_v11 = vsel %vm829_vm6, %v1374_v42, %v1376_v34  ;;  %v1394_v50 = vsel %vm829_vm6, %v1376_v34, %v1378_v37 }
 0x258   :  { %v1411_v35 = vadd.f32 %v1393_v11, %v1329_v62  ;;  %v1412_v27 = vadd.f32 %v1394_v50, %v1330_v0 }
 0x25a   :  { %v1382_v23 = vpop.permute.xlu1 %1381  ;;  %v1380_v36 = vpop.permute.xlu0 %1379 }
 0x25b   :  { %v1395_v20 = vsel %vm829_vm6, %v1378_v37, %v1380_v36  ;;  %v1414_v21 = vadd.f32 %v1380_v36, %v1332_v10 }
 0x25c   :  { %v1413_v38 = vadd.f32 %v1395_v20, %v1331_v8 }
 0x25e   :  { %v1386_v39 = vpop.permute.xlu1 %1385  ;;  %v1384_v40 = vpop.permute.xlu0 %1383 }
 0x25f   :  { %v1396_v41 = vsel %vm829_vm6, %v1382_v23, %v1384_v40  ;;  %v1397_v45 = vsel %vm829_vm6, %v1384_v40, %v1386_v39 }
 0x260   :  { %v1415_v46 = vadd.f32 %v1396_v41, %v1333_v16  ;;  %v1416_v47 = vadd.f32 %v1397_v45, %v1334_v17 }
 0x262   :  { %v1390_v48 = vpop.permute.xlu1 %1389  ;;  %v1388_v29 = vpop.permute.xlu0 %1387 }
 0x263   :  { %v1419_v51 = vadd.f32 %v1390_v48, %v1337_v31  ;;  %v1398_v24 = vsel %vm829_vm6, %v1386_v39, %v1388_v29  ;;  %v1399_v25 = vsel %vm829_vm6, %v1388_v29, %v1390_v48 }
 0x264   :  { %v1417_v28 = vadd.f32 %v1398_v24, %v1335_v32  ;;  %v1418_v43 = vadd.f32 %v1399_v25, %v1336_v33 }
 0x266   :  { %v1474_v52 = vpop.permute.xlu1 %1473  ;;  %v1472_v55 = vpop.permute.xlu0 %1471 }
 0x267   :  { %v1488_v56 = vsel %vm940_vm7, %v1472_v55, %v1474_v52  ;;  %v1504_v57 = vadd.f32 %v1472_v55, %v1410_v3 }
 0x268   :  { %v1505_v58 = vadd.f32 %v1488_v56, %v1411_v35 }
 0x26a   :  { %v1478_v59 = vpop.permute.xlu1 %1477  ;;  %v1476_v60 = vpop.permute.xlu0 %1475 }
 0x26b   :  { %v2586_v61 = vadd.f32 %v1478_v59, %v1414_v21  ;;  %v1489_v62 = vsel %vm940_vm7, %v1474_v52, %v1476_v60  ;;  %v1490_v0 = vsel %vm940_vm7, %v1476_v60, %v1478_v59 }
 0x26c   :  { %v1506_v63 = vadd.f32 %v1489_v62, %v1412_v27  ;;  %v1507_v1 = vadd.f32 %v1490_v0, %v1413_v38 }
 0x26e   :  { %v1482_v2 = vpop.permute.xlu1 %1481  ;;  %v1480_v4 = vpop.permute.xlu0 %1479 }
 0x26f   :  { %v1491_v6 = vsel %vm940_vm7, %v1480_v4, %v1482_v2  ;;  %v2591_v10 = vadd.f32 %v1480_v4, %v1415_v46 }
 0x270   :  { %v1510_v8 = vadd.f32 %v1491_v6, %v1416_v47 }
 0x272   :  { %v1486_v9 = vpop.permute.xlu1 %1485  ;;  %v1484_v13 = vpop.permute.xlu0 %1483 }
 0x273   :  { %v2593_v14 = vadd.f32 %v1486_v9, %v1419_v51  ;;  %v1492_v15 = vsel %vm940_vm7, %v1482_v2, %v1484_v13  ;;  %v1493_v19 = vsel %vm940_vm7, %v1484_v13, %v1486_v9 }
 0x274   :  { %v2597_v49 = vadd.f32 %v1492_v15, %v1417_v28  ;;  %v1512_v16 = vadd.f32 %v1493_v19, %v1418_v43 }
 0x276   :  { %v1577_v17 = vpop.permute.xlu1 %1576  ;;  %v1575_v5 = vpop.permute.xlu0 %1574 }
 0x277   :  { %v1613_v26 = vadd.f32 %v1575_v5, %v1504_v57  ;;  %v1595_v25 = vsel %vm1594_vm11, %v1575_v5, %v1577_v17 }
 0x278   :  { %v1614_v43 = vadd.f32 %v1595_v25, %v1505_v58 }
 0x27a   :  { %v1581_v12 = vpop.permute.xlu1 %1580  ;;  %v1579_v30 = vpop.permute.xlu0 %1578 }
 0x27b   :  { %v1596_v31 = vsel %vm1594_vm11, %v1577_v17, %v1579_v30  ;;  %v1597_v56 = vsel %vm1594_vm11, %v1579_v30, %v1581_v12 }
 0x27c   :  { %v2600_v22 = vadd.f32 %v1596_v31, %v1506_v63  ;;  %v1616_v62 = vadd.f32 %v1597_v56, %v1507_v1 }
 0x27e   :  { %v1585_v7 = vpop.permute.xlu1 %1584  ;;  %v1583_v32 = vpop.permute.xlu0 %1582 }
 0x27f   :  { %v1598_v0 = vsel %vm1594_vm11, %v1581_v12, %v1583_v32  ;;  %v1618_v15 = vadd.f32 %v1585_v7, %v2591_v10 }
 0x280   :  { %v1617_v19 = vadd.f32 %v1598_v0, %v2586_v61 }
 0x282   :  { %v1589_v33 = vpop.permute.xlu1 %1588  ;;  %v1587_v42 = vpop.permute.xlu0 %1586 }
 0x283   :  { %v1599_v18 = vsel %vm1594_vm11, %v1585_v7, %v1587_v42  ;;  %v1600_v58 = vsel %vm1594_vm11, %v1587_v42, %v1589_v33 }
 0x284   :  { %v2603_v44 = vadd.f32 %v1599_v18, %v1510_v8  ;;  %v1620_v17 = vadd.f32 %v1600_v58, %v2597_v49 }
 0x286   :  { %v1593_v3 = vpop.permute.xlu1 %1592  ;;  %v1591_v37 = vpop.permute.xlu0 %1590 }
 0x287   :  { %v1601_v34 = vsel %vm1594_vm11, %v1589_v33, %v1591_v37 }
 0x288   :  { %v2606_v11 = vadd.f32 %v1601_v34, %v1512_v16  ;;  %v1602_v16 = vsel %vm1594_vm11, %v1591_v37, %v1593_v3 }
 0x289   :  { %v1622_v61 = vadd.f32 %v1602_v16, %v2593_v14 }
 0x28a   :  { %v1659_v50 = vpop.permute.xlu1 %1658  ;;  %v1657_v35 = vpop.permute.xlu0 %1656 }
 0x28b   :  { %v1677_v28 = vsel %vm1676_vm12, %v1657_v35, %v1659_v50  ;;  %v1695_v5 = vadd.f32 %v1657_v35, %v1613_v26 }
 0x28c   :  { %v1696_v59 = vadd.f32 %v1677_v28, %v1614_v43 }
 0x28e   :  { %v1663_v27 = vpop.permute.xlu1 %1662  ;;  %v1661_v23 = vpop.permute.xlu0 %1660 }
 0x28f   :  { %v1679_v60 = vsel %vm1676_vm12, %v1661_v23, %v1663_v27  ;;  %v1678_v33 = vsel %vm1676_vm12, %v1659_v50, %v1661_v23 }
 0x290   :  { %v1698_v9 = vadd.f32 %v1679_v60, %v1616_v62  ;;  %v1697_v50 = vadd.f32 %v1678_v33, %v2600_v22 }
 0x292   :  { %v1667_v36 = vpop.permute.xlu1 %1666  ;;  %v1665_v20 = vpop.permute.xlu0 %1664 }
 0x293   :  { %v1680_v1 = vsel %vm1676_vm12, %v1663_v27, %v1665_v20  ;;  %v1700_v42 = vadd.f32 %v1667_v36, %v1618_v15 }
 0x294   :  { %v1699_v7 = vadd.f32 %v1680_v1, %v1617_v19 }
 0x296   :  { %v2608_v21 = vpop.permute.xlu1 %1670  ;;  %v1669_v38 = vpop.permute.xlu0 %1668 }
 0x297   :  { %v1681_v49 = vsel %vm1676_vm12, %v1667_v36, %v1669_v38  ;;  %v1682_v26 = vsel %vm1676_vm12, %v1669_v38, %v2608_v21 }
 0x298   :  { %v1701_v25 = vadd.f32 %v1681_v49, %v2603_v44  ;;  %v1702_v22 = vadd.f32 %v1682_v26, %v1620_v17 }
 0x29a   :  { %v2610_v39 = vpop.permute.xlu1 %1674  ;;  %v2612_v40 = vpop.permute.xlu0 %1672 }
 0x29b   :  { %v1684_v43 = vsel %vm1676_vm12, %v2612_v40, %v2610_v39 }
 0x29e   :  { %v1741_v41 = vpop.permute.xlu1 %1740  ;;  %v1739_v45 = vpop.permute.xlu0 %1738 }
 0x29f   :  { %v1759_v57 = vsel %vm1758_vm13, %v1739_v45, %v1741_v41  ;;  %v1777_v34 = vadd.f32 %v1739_v45, %v1695_v5 }
 0x2a0   :  { %v1778_v63 = vadd.f32 %v1759_v57, %v1696_v59 }
 0x2a2   :  { %v1745_v46 = vpop.permute.xlu1 %1744  ;;  %v1743_v47 = vpop.permute.xlu0 %1742 }
 0x2a3   :  { %v1761_v6 = vsel %vm1758_vm13, %v1743_v47, %v1745_v46  ;;  %v1760_v27 = vsel %vm1758_vm13, %v1741_v41, %v1743_v47  ;;  %v1683_v47 = vsel %vm1676_vm12, %v2608_v21, %v2612_v40 }
 0x2a4   :  { %v1780_v12 = vadd.f32 %v1761_v6, %v1698_v9  ;;  %v1779_v59 = vadd.f32 %v1760_v27, %v1697_v50  ;;  %v1703_v19 = vadd.f32 %v1683_v47, %v2606_v11 }
 0x2a6   :  { %v2614_v48 = vpop.permute.xlu1 %1748  ;;  %v1747_v29 = vpop.permute.xlu0 %1746 }
 0x2a7   :  { %v1762_v18 = vsel %vm1758_vm13, %v1745_v46, %v1747_v29  ;;  %v1782_v35 = vadd.f32 %v2614_v48, %v1700_v42 }
 0x2a8   :  { %v1781_v23 = vadd.f32 %v1762_v18, %v1699_v7 }
 0x2aa   :  { %v2616_v51 = vpop.permute.xlu1 %1752  ;;  %v2618_v24 = vpop.permute.xlu0 %1750 }
 0x2ab   :  { %v1764_v36 = vsel %vm1758_vm13, %v2618_v24, %v2616_v51  ;;  %v1763_v44 = vsel %vm1758_vm13, %v2614_v48, %v2618_v24 }
 0x2ac   :  { %v1784_v60 = vadd.f32 %v1764_v36, %v1702_v22 }
 0x2ae   :  { %v2622_v52 = vpop.permute.xlu1 %1756  ;;  %v2624_v55 = vpop.permute.xlu0 %1754 }
 0x2af   :  { %v1766_v39 = vsel %vm1758_vm13, %v2624_v55, %v2622_v52  ;;  %v1765_v16 = vsel %vm1758_vm13, %v2616_v51, %v2624_v55 }
 0x2b0   :  { %v1785_v33 = vadd.f32 %v1765_v16, %v1703_v19 }
 0x2b2   :  { %v1823_v2 = vpop.permute.xlu1 %1822  ;;  %v1821_v4 = vpop.permute.xlu0 %1820 }
 0x2b3   :  { %v1841_v8 = vsel %vm1840_vm14, %v1821_v4, %v1823_v2  ;;  %v1859_v29 = vadd.f32 %v1821_v4, %v1777_v34  ;;  %v1704_v4 = vadd.f32 %v1684_v43, %v1622_v61 }
 0x2b4   :  { %v1860_v13 = vadd.f32 %v1841_v8, %v1778_v63  ;;  %v1783_v8 = vadd.f32 %v1763_v44, %v1701_v25 }
 0x2b5   :  { %v1881_v40 = vadd.f32 %v2480_v53, %v1859_v29  ;;  %v1786_v9 = vadd.f32 %v1766_v39, %v1704_v4 }
 0x2b6   :  { %v1882_v30 = vadd.f32 %v2480_v53, %v1860_v13  ;;  %v1827_v31 = vpop.permute.xlu1 %1826  ;;  %v1825_v32 = vpop.permute.xlu0 %1824 }
 0x2b7   :  { %v1843_v10 = vsel %vm1840_vm14, %v1825_v32, %v1827_v31  ;;  %v1842_v56 = vsel %vm1840_vm14, %v1823_v2, %v1825_v32  ;;  %v1891_v1 = vmax.f32 %v1881_v40, 0.0 }
 0x2b8   :  { %v1892_v3 = vmax.f32 %v1882_v30, 0.0  ;;  %v1862_v37 = vadd.f32 %v1843_v10, %v1780_v12  ;;  %v1861_v58 = vadd.f32 %v1842_v56, %v1779_v59 }
 0x2ba   :  { %v1884_v20 = vadd.f32 %v2480_v53, %v1862_v37  ;;  %v1831_v46 = vpop.permute.xlu1 %1830  ;;  %1913 = vrot.lane.b32.xlu1 %v1892_v3, %s2022_s18  ;;  %v1829_v14 = vpop.permute.xlu0 %1828  ;;  %v1883_v5 = vadd.f32 %v2480_v53, %v1861_v58 }
 0x2bb   :  { %v1864_v38 = vadd.f32 %v1831_v46, %v1782_v35  ;;  %v1844_v45 = vsel %vm1840_vm14, %v1827_v31, %v1829_v14 }
 0x2bc   :  { %v1894_v28 = vmax.f32 %v1884_v20, 0.0  ;;  %v1863_v41 = vadd.f32 %v1844_v45, %v1781_v23  ;;  %v1893_v11 = vmax.f32 %v1883_v5, 0.0 }
 0x2bd   :  { %v1886_v57 = vadd.f32 %v2482_v54, %v1864_v38 }
 0x2be   :  { %v1885_v62 = vadd.f32 %v2480_v53, %v1863_v41  ;;  %v1835_v0 = vpop.permute.xlu1 %1834  ;;  %1917 = vrot.lane.b32.xlu1 %v1894_v28, %s2022_s18  ;;  %v1833_v21 = vpop.permute.xlu0 %1832 }
 0x2bf   :  { %v1896_v63 = vmax.f32 %v1886_v57, 0.0  ;;  %v1846_v2 = vsel %vm1840_vm14, %v1833_v21, %v1835_v0  ;;  %v1845_v24 = vsel %vm1840_vm14, %v1831_v46, %v1833_v21 }
 0x2c0   :  { %v1895_v6 = vmax.f32 %v1885_v62, 0.0  ;;  %v1866_v48 = vadd.f32 %v1846_v2, %v1784_v60  ;;  %v1865_v12 = vadd.f32 %v1845_v24, %v1783_v8 }
 0x2c2   :  { %v1888_v13 = vadd.f32 %v2482_v54, %v1866_v48  ;;  %v1839_v15 = vpop.permute.xlu1 %1838  ;;  %1921 = vrot.lane.b32.xlu1 %v1896_v63, %s2022_s18  ;;  %1919 = vrot.lane.b32.xlu0 %v1895_v6, %s2022_s18  ;;  %v1837_v52 = vpop.permute.xlu0 %1836  ;;  %v1887_v51 = vadd.f32 %v2482_v54, %v1865_v12 }
 0x2c3   :  { %v1848_v17 = vsel %vm1840_vm14, %v1837_v52, %v1839_v15  ;;  %v1847_v32 = vsel %vm1840_vm14, %v1835_v0, %v1837_v52 }
 0x2c4   :  { %v1898_v30 = vmax.f32 %v1888_v13, 0.0  ;;  %v1868_v31 = vadd.f32 %v1848_v17, %v1786_v9  ;;  %v1867_v55 = vadd.f32 %v1847_v32, %v1785_v33  ;;  %v1897_v53 = vmax.f32 %v1887_v51, 0.0 }
 0x2c6   :  { %v1890_v42 = vadd.f32 %v2482_v54, %v1868_v31  ;;  %1911 = vrot.lane.b32.xlu0 %v1891_v1, %s2022_s18  ;;  %1925 = vrot.lane.b32.xlu1 %v1898_v30, %s2022_s18  ;;  %v1889_v10 = vadd.f32 %v2482_v54, %v1867_v55 }
 0x2c8   :  { %v1900_v18 = vmax.f32 %v1890_v42, 0.0  ;;  %v1899_v61 = vmax.f32 %v1889_v10, 0.0 }
 0x2ca   :  { %1915 = vrot.lane.b32.xlu0 %v1893_v11, %s2022_s18  ;;  %1929 = vrot.lane.b32.xlu1 %v1900_v18, %s2022_s18 }
 0x2ce   :  { %1923 = vrot.lane.b32.xlu0 %v1897_v53, %s2022_s18 }
 0x2d2   :  { %1927 = vrot.lane.b32.xlu0 %v1899_v61, %s2022_s18 }
 0x32c   :  { %v1914_v7 = vpop.permute.xlu1 %1913 }
 0x330   :  { %v1918_v3 = vpop.permute.xlu1 %1917 }
 0x334   :  { %v1920_v37 = vpop.permute.xlu0 %1919  ;;  %v1922_v26 = vpop.permute.xlu1 %1921 }
 0x335   :  { %v1935_v49 = vsel %vm166_vm1, %v1918_v3, %v1920_v37 }
 0x336   :  { %1951 = vst [vmem:[%s2732_s6 + $0x18] sm:$0xff] %v1935_v49 }
 0x338   :  { %v1912_v34 = vpop.permute.xlu0 %1911  ;;  %v1926_v23 = vpop.permute.xlu1 %1925 }
 0x339   :  { %v1932_v35 = vsel %vm166_vm1, %v1912_v34, %v1914_v7 }
 0x33a   :  { %1948 = vst [vmem:[%s2732_s6] sm:$0xff] %v1932_v35 }
 0x33c   :  { %v1916_v54 = vpop.permute.xlu0 %1915  ;;  %v1930_v36 = vpop.permute.xlu1 %1929 }
 0x33d   :  { %v1933_v50 = vsel %vm166_vm1, %v1914_v7, %v1916_v54  ;;  %v1934_v27 = vsel %vm166_vm1, %v1916_v54, %v1918_v3 }
 0x33e   :  { %1949 = vst [vmem:[%s2732_s6 + $0x8] sm:$0xff] %v1933_v50  ;;  %1950 = vst [vmem:[%s2732_s6 + $0x10] sm:$0xff] %v1934_v27 }
 0x340   :  { %v1924_v20 = vpop.permute.xlu0 %1923 }
 0x341   :  { %v1936_v46 = vsel %vm166_vm1, %v1922_v26, %v1924_v20  ;;  %v1937_v14 = vsel %vm166_vm1, %v1924_v20, %v1926_v23 }
 0x342   :  { %1952 = vst [vmem:[%s2732_s6 + $0x20] sm:$0xff] %v1936_v46  ;;  %1953 = vst [vmem:[%s2732_s6 + $0x28] sm:$0xff] %v1937_v14 }
 0x344   :  { %v1928_v29 = vpop.permute.xlu0 %1927 }
 0x345   :  { %v1938_v38 = vsel %vm166_vm1, %v1926_v23, %v1928_v29  ;;  %v1939_v45 = vsel %vm166_vm1, %v1928_v29, %v1930_v36 }
 0x346   :  { %1954 = vst [vmem:[%s2732_s6 + $0x30] sm:$0xff] %v1938_v38  ;;  %1955 = vst [vmem:[%s2732_s6 + $0x38] sm:$0xff] %v1939_v45 }

// kernel: mnist_ae_forward.5
= control target key start
LH: loop header
LB: loop body
LE: loop exit
PB: predicated region body
PF: predicated region fallthrough
CT: control target
= control target key end

     0   :  { %v8632_v3 = vmov 0   ;;  %s8633_s13 = smov 30   ;;  %v8634_v39 = vmov 0.0   ;;  %s8635_s11 = smov 31   ;;  %vm123_vm0 = vcmask 244736   ;;  %vm153_vm1 = vcmask 130048   ;;  %s10732_s0 = inlined_call_operand.vmem [shape: f32[1,16,2056], index: 0, kind: input, shape index: {}]   ;;  %s10733_s2 = inlined_call_operand.vmem [shape: f32[9,16,16], index: 2, kind: input, shape index: {}]   ;;  %s10734_s3 = inlined_call_operand.vmem [shape: f32[16,1], index: 3, kind: input, shape index: {}]   ;;  %s10735_s1 = inlined_call_operand.vmem [shape: f32[1,1800], index: 1, kind: input, shape index: {}]   ;;  %s10736_s5 = inlined_call_operand.<no memory space> [shape: f32[1,1], index: 5, kind: input, shape index: {}]   ;;  %s10737_s4 = inlined_call_operand.vmem [shape: f32[9,1,16], index: 4, kind: input, shape index: {}]   ;;  %s10738_s6 = inlined_call_operand.vmem [shape: f32[1,1,1800], index: 6, kind: output, shape index: {}]  }
   0x1   :  { %v27_v0 = vld [vmem:[%s10732_s0 + $0x8] sm:$0xff]  ;;  %v42_v1 = vld [vmem:[%s10732_s0 + $0x90] sm:$0xff]  ;;  %v26_v2 = vld [vmem:[%s10732_s0] sm:$0xff]  ;;  %189 = vmatprep.mubr.bf16.mxu0 %v8632_v3  ;;  %232 = vmatprep.mubr.bf16.mxu1 %v8632_v3  ;;  %4165 = vst [vmem:[#allocation2] sm:$0xff] %v8634_v39  ;;  %s8636_s12 = smov 29   ;;  %s8637_s14 = smov 1  }
   0x2   :  { %v8690_v4 = vpack.c.bf16 %v42_v1, %v27_v0  ;;  %v41_v5 = vld [vmem:[%s10732_s0 + $0x88] sm:$0xff]  ;;  %v28_v6 = vld [vmem:[%s10732_s0 + $0x10] sm:$0xff]  ;;  %v43_v7 = vld [vmem:[%s10732_s0 + $0x98] sm:$0xff]  ;;  %8627 = vset.pattern.permute.xlu1 %v8632_v3  ;;  %8628 = vset.pattern.permute.xlu0 %v8632_v3  ;;  %4180 = vst [vmem:[#allocation2 + $0x78] sm:$0xff] %v8634_v39  ;;  %vm529_vm2 = vcmask 252928   ;;  %vm8639_vm3 = vmmov 0  }
   0x3   :  { %v8703_v8 = vpack.c.bf16 %v41_v5, %v26_v2  ;;  %v29_v9 = vld [vmem:[%s10732_s0 + $0x18] sm:$0xff]  ;;  %v44_v10 = vld [vmem:[%s10732_s0 + $0xa0] sm:$0xff]  ;;  %v8713_v11 = vpack.c.bf16 %v43_v7, %v28_v6  ;;  %v45_v14 = vld [vmem:[%s10732_s0 + $0xa8] sm:$0xff]  ;;  %4198 = vst [vmem:[#allocation2 + $0x100] sm:$0xff] %v8634_v39  ;;  %s8640_s27 = smov 99   ;;  %vm938_vm4 = vcmask 236544  }
   0x4   :  { %95 = vrot.lane.b32.xlu0 %v8690_v4, %s8633_s13  ;;  %v8717_v12 = vpack.c.bf16 %v44_v10, %v29_v9  ;;  %v30_v13 = vld [vmem:[%s10732_s0 + $0x20] sm:$0xff]  ;;  %v31_v15 = vld [vmem:[%s10732_s0 + $0x28] sm:$0xff]  ;;  %v46_v16 = vld [vmem:[%s10732_s0 + $0xb0] sm:$0xff]  ;;  %s8641_s8 = smov 98   ;;  %vm1443_vm5 = vcmask 7168   ;;  %s8642_s17 = smov 97  }
   0x5   :  { %93 = vrot.lane.b32.xlu1 %v8703_v8, %s8633_s13  ;;  %v8733_v17 = vpack.c.bf16 %v45_v14, %v30_v13  ;;  %v8737_v18 = vpack.c.bf16 %v46_v16, %v31_v15  ;;  %v32_v19 = vld [vmem:[%s10732_s0 + $0x30] sm:$0xff]  ;;  %v47_v20 = vld [vmem:[%s10732_s0 + $0xb8] sm:$0xff]  ;;  %v48_v22 = vld [vmem:[%s10732_s0 + $0xc0] sm:$0xff]  ;;  %vm2262_vm6 = vcmask 1039360   ;;  %vm2701_vm7 = vcmask 809984  }
   0x6   :  { %v33_v21 = vld [vmem:[%s10732_s0 + $0x38] sm:$0xff]  ;;  %v8753_v23 = vpack.c.bf16 %v47_v20, %v32_v19  ;;  %v34_v25 = vld [vmem:[%s10732_s0 + $0x40] sm:$0xff]  ;;  %v49_v26 = vld [vmem:[%s10732_s0 + $0xc8] sm:$0xff]  ;;  %vm3140_vm8 = vcmask 801792   ;;  %vm3579_vm9 = vcmask 793600   ;;  %vm4181_vm10 = vcmask 64512  }
   0x7   :  { %v8757_v24 = vpack.c.bf16 %v48_v22, %v33_v21  ;;  %v35_v27 = vld [vmem:[%s10732_s0 + $0x48] sm:$0xff]  ;;  %v50_v28 = vld [vmem:[%s10732_s0 + $0xd0] sm:$0xff]  ;;  %v8773_v29 = vpack.c.bf16 %v49_v26, %v34_v25  ;;  %v51_v32 = vld [vmem:[%s10732_s0 + $0xd8] sm:$0xff] }
   0x8   :  { %97 = vrot.lane.b32.xlu0 %v8713_v11, %s8633_s13  ;;  %v8777_v30 = vpack.c.bf16 %v50_v28, %v35_v27  ;;  %v36_v31 = vld [vmem:[%s10732_s0 + $0x50] sm:$0xff]  ;;  %v37_v33 = vld [vmem:[%s10732_s0 + $0x58] sm:$0xff]  ;;  %v52_v34 = vld [vmem:[%s10732_s0 + $0xe0] sm:$0xff] }
   0x9   :  { %99 = vrot.lane.b32.xlu1 %v8717_v12, %s8633_s13  ;;  %v8793_v35 = vpack.c.bf16 %v51_v32, %v36_v31  ;;  %v8797_v36 = vpack.c.bf16 %v52_v34, %v37_v33  ;;  %v38_v37 = vld [vmem:[%s10732_s0 + $0x60] sm:$0xff]  ;;  %v53_v38 = vld [vmem:[%s10732_s0 + $0xe8] sm:$0xff]  ;;  %v54_v41 = vld [vmem:[%s10732_s0 + $0xf0] sm:$0xff] }
   0xa   :  { %v39_v40 = vld [vmem:[%s10732_s0 + $0x68] sm:$0xff]  ;;  %v8816_v42 = vpack.c.bf16 %v53_v38, %v38_v37  ;;  %v40_v44 = vld [vmem:[%s10732_s0 + $0x70] sm:$0xff]  ;;  %v55_v45 = vld [vmem:[%s10732_s0 + $0xf8] sm:$0xff] }
   0xb   :  { %v8820_v43 = vpack.c.bf16 %v54_v41, %v39_v40  ;;  %v8830_v46 = vpack.c.bf16 %v55_v45, %v40_v44  ;;  %v1358_v47 = vld [vmem:[%s10732_s0 + $0x78] sm:$0xff]  ;;  %v1374_v48 = vld [vmem:[%s10732_s0 + $0x100] sm:$0xff]  ;;  %v8079_v52 = vld [vmem:[%s10733_s2 + $0x10] sm:$0xff]  ;;  %s8638_s0 = smov 127  }
   0xc   :  { %101 = vrot.lane.b32.xlu0 %v8733_v17, %s8633_s13  ;;  %v8930_v51 = vpack.c.bf16 %v1374_v48, %v1358_v47  ;;  %v8080_v53 = vld [vmem:[%s10733_s2 + $0x18] sm:$0xff]  ;;  %v56_v33 = vld [vmem:[%s10733_s2] sm:$0xff]  ;;  %v57_v34 = vld [vmem:[%s10733_s2 + $0x8] sm:$0xff] }
   0xd   :  { %103 = vrot.lane.b32.xlu1 %v8737_v18, %s8633_s13  ;;  %v8944_v58 = vpack.c.bf16 %v8080_v53, %v8079_v52  ;;  %v9023_v44 = vpack.c.bf16 %v57_v34, %v56_v33 }
  0x10   :  { %105 = vrot.lane.b32.xlu0 %v8753_v23, %s8633_s13 }
  0x11   :  { %107 = vrot.lane.b32.xlu1 %v8757_v24, %s8633_s13 }
  0x14   :  { %109 = vrot.lane.b32.xlu0 %v8773_v29, %s8633_s13 }
  0x15   :  { %111 = vrot.lane.b32.xlu1 %v8777_v30, %s8633_s13 }
  0x18   :  { %113 = vrot.lane.b32.xlu0 %v8793_v35, %s8633_s13 }
  0x19   :  { %115 = vrot.lane.b32.xlu1 %v8797_v36, %s8633_s13 }
  0x1c   :  { %117 = vrot.lane.b32.xlu0 %v8816_v42, %s8633_s13 }
  0x1d   :  { %119 = vrot.lane.b32.xlu1 %v8820_v43, %s8633_s13 }
  0x20   :  { %121 = vrot.lane.b32.xlu0 %v8830_v46, %s8633_s13 }
  0x21   :  { %501 = vrot.lane.b32.xlu1 %v8690_v4, %s8635_s11 }
  0x24   :  { %503 = vrot.lane.b32.xlu0 %v8713_v11, %s8635_s11 }
  0x25   :  { %499 = vrot.lane.b32.xlu1 %v8703_v8, %s8635_s11 }
  0x28   :  { %505 = vrot.lane.b32.xlu0 %v8717_v12, %s8635_s11 }
  0x29   :  { %507 = vrot.lane.b32.xlu1 %v8733_v17, %s8635_s11 }
  0x2c   :  { %509 = vrot.lane.b32.xlu0 %v8737_v18, %s8635_s11 }
  0x2d   :  { %511 = vrot.lane.b32.xlu1 %v8753_v23, %s8635_s11 }
  0x30   :  { %513 = vrot.lane.b32.xlu0 %v8757_v24, %s8635_s11 }
  0x31   :  { %515 = vrot.lane.b32.xlu1 %v8773_v29, %s8635_s11 }
  0x34   :  { %517 = vrot.lane.b32.xlu0 %v8777_v30, %s8635_s11 }
  0x35   :  { %519 = vrot.lane.b32.xlu1 %v8793_v35, %s8635_s11 }
  0x38   :  { %521 = vrot.lane.b32.xlu0 %v8797_v36, %s8635_s11 }
  0x39   :  { %523 = vrot.lane.b32.xlu1 %v8816_v42, %s8635_s11 }
  0x3c   :  { %525 = vrot.lane.b32.xlu0 %v8820_v43, %s8635_s11 }
  0x3d   :  { %527 = vrot.lane.b32.xlu1 %v8830_v46, %s8635_s11 }
  0x40   :  { %910 = vrot.lane.b32.xlu0 %v8690_v4, %s8636_s12 }
  0x41   :  { %912 = vrot.lane.b32.xlu1 %v8713_v11, %s8636_s12 }
  0x44   :  { %908 = vrot.lane.b32.xlu0 %v8703_v8, %s8636_s12 }
  0x45   :  { %914 = vrot.lane.b32.xlu1 %v8717_v12, %s8636_s12 }
  0x48   :  { %916 = vrot.lane.b32.xlu0 %v8733_v17, %s8636_s12 }
  0x49   :  { %918 = vrot.lane.b32.xlu1 %v8737_v18, %s8636_s12 }
  0x4c   :  { %920 = vrot.lane.b32.xlu0 %v8753_v23, %s8636_s12 }
  0x4d   :  { %922 = vrot.lane.b32.xlu1 %v8757_v24, %s8636_s12 }
  0x50   :  { %924 = vrot.lane.b32.xlu0 %v8773_v29, %s8636_s12 }
  0x51   :  { %926 = vrot.lane.b32.xlu1 %v8777_v30, %s8636_s12 }
  0x54   :  { %928 = vrot.lane.b32.xlu0 %v8793_v35, %s8636_s12 }
  0x55   :  { %930 = vrot.lane.b32.xlu1 %v8797_v36, %s8636_s12 }
  0x58   :  { %932 = vrot.lane.b32.xlu0 %v8816_v42, %s8636_s12 }
  0x59   :  { %934 = vrot.lane.b32.xlu1 %v8820_v43, %s8636_s12 }
  0x5c   :  { %936 = vrot.lane.b32.xlu0 %v8830_v46, %s8636_s12 }
  0x5d   :  { %1413 = vrot.lane.b32.xlu1 %v8690_v4, %s8637_s14 }
  0x60   :  { %1415 = vrot.lane.b32.xlu0 %v8713_v11, %s8637_s14 }
  0x61   :  { %1411 = vrot.lane.b32.xlu1 %v8703_v8, %s8637_s14 }
  0x64   :  { %1417 = vrot.lane.b32.xlu0 %v8717_v12, %s8637_s14 }
  0x65   :  { %1419 = vrot.lane.b32.xlu1 %v8733_v17, %s8637_s14 }
  0x68   :  { %1421 = vrot.lane.b32.xlu0 %v8737_v18, %s8637_s14 }
  0x69   :  { %1423 = vrot.lane.b32.xlu1 %v8753_v23, %s8637_s14 }
  0x6c   :  { %1425 = vrot.lane.b32.xlu0 %v8757_v24, %s8637_s14 }
  0x6d   :  { %1427 = vrot.lane.b32.xlu1 %v8773_v29, %s8637_s14 }
  0x70   :  { %1429 = vrot.lane.b32.xlu0 %v8777_v30, %s8637_s14 }
  0x71   :  { %1431 = vrot.lane.b32.xlu1 %v8793_v35, %s8637_s14 }
  0x74   :  { %1433 = vrot.lane.b32.xlu0 %v8797_v36, %s8637_s14 }
  0x75   :  { %1435 = vrot.lane.b32.xlu1 %v8816_v42, %s8637_s14 }
  0x76   :  { %v96_v49 = vpop.permute.xlu0 %95 }
  0x77   :  { %v94_v50 = vpop.permute.xlu1 %93 }
  0x78   :  { %1437 = vrot.lane.b32.xlu0 %v8820_v43, %s8637_s14  ;;  %v124_v57 = vsel %vm123_vm0, %v94_v50, %v96_v49 }
  0x79   :  { %1439 = vrot.lane.b32.xlu1 %v8830_v46, %s8637_s14 }
  0x7a   :  { %v98_v54 = vpop.permute.xlu0 %97 }
  0x7b   :  { %v100_v55 = vpop.permute.xlu1 %99  ;;  %v125_v56 = vsel %vm123_vm0, %v96_v49, %v98_v54 }
  0x7c   :  { %157 = vmatprep.subr.bf16.mxu0 %v125_v56  ;;  %1441 = vrot.lane.b32.xlu0 %v8930_v51, %s8637_s14  ;;  %v126_v62 = vsel %vm123_vm0, %v98_v54, %v100_v55 }
  0x7d   :  { %158 = vmatpush1.bf16.msra.mxu0 %v124_v57  ;;  %2234 = vrot.lane.b32.xlu1 %v8713_v11, %s8638_s0 }
  0x7e   :  { %v102_v59 = vpop.permute.xlu0 %101 }
  0x7f   :  { %v104_v60 = vpop.permute.xlu1 %103  ;;  %v127_v61 = vsel %vm123_vm0, %v100_v55, %v102_v59 }
  0x80   :  { %8081 = vmatmul.mubr.msk.bf16.vlgmr.msra.gmra.mrb[0].mxu0 %vm153_vm1, %v8944_v58  ;;  %200 = vmatprep.subr.bf16.mxu1 %v127_v61  ;;  %v128_v2 = vsel %vm123_vm0, %v102_v59, %v104_v60 }
  0x81   :  { %201 = vmatpush1.bf16.msra.mxu1 %v126_v62  ;;  %275 = vmatprep.mubr.bf16.mxu0 %v8632_v3 }
  0x82   :  { %v106_v63 = vpop.permute.xlu0 %105  ;;  %2236 = vrot.lane.b32.xlu0 %v8717_v12, %s8638_s0  ;;  %2232 = vrot.lane.b32.xlu1 %v8690_v4, %s8638_s0 }
  0x83   :  { %v108_v0 = vpop.permute.xlu1 %107  ;;  %v129_v1 = vsel %vm123_vm0, %v104_v60, %v106_v63 }
  0x84   :  { %8082 = vmatmul.mubr.msk.bf16.vlgmr.msra.gmra.mrb[0].mxu1 %vm153_vm1, %v8944_v58  ;;  %243 = vmatprep.subr.bf16.mxu0 %v129_v1  ;;  %v130_v8 = vsel %vm123_vm0, %v106_v63, %v108_v0 }
  0x85   :  { %244 = vmatpush1.bf16.msra.mxu0 %v128_v2  ;;  %318 = vmatprep.mubr.bf16.mxu1 %v8632_v3 }
  0x86   :  { %v110_v5 = vpop.permute.xlu0 %109  ;;  %2238 = vrot.lane.b32.xlu0 %v8733_v17, %s8638_s0  ;;  %2240 = vrot.lane.b32.xlu1 %v8737_v18, %s8638_s0 }
  0x87   :  { %v112_v6 = vpop.permute.xlu1 %111  ;;  %v131_v7 = vsel %vm123_vm0, %v108_v0, %v110_v5 }
  0x88   :  { %8083 = vmatmul.mubr.msk.bf16.vlgmr.msra.gmra.mrb[4].mxu0 %vm153_vm1, %v8944_v58  ;;  %286 = vmatprep.subr.bf16.mxu1 %v131_v7  ;;  %v132_v14 = vsel %vm123_vm0, %v110_v5, %v112_v6 }
  0x89   :  { %287 = vmatpush1.bf16.msra.mxu1 %v130_v8  ;;  %361 = vmatprep.mubr.bf16.mxu0 %v8632_v3 }
  0x8a   :  { %v114_v9 = vpop.permute.xlu0 %113  ;;  %2242 = vrot.lane.b32.xlu0 %v8753_v23, %s8638_s0  ;;  %2244 = vrot.lane.b32.xlu1 %v8757_v24, %s8638_s0 }
  0x8b   :  { %v116_v10 = vpop.permute.xlu1 %115  ;;  %v133_v13 = vsel %vm123_vm0, %v112_v6, %v114_v9 }
  0x8c   :  { %8084 = vmatmul.mubr.msk.bf16.vlgmr.msra.gmra.mrb[4].mxu1 %vm153_vm1, %v8944_v58  ;;  %329 = vmatprep.subr.bf16.mxu0 %v133_v13  ;;  %v134_v20 = vsel %vm123_vm0, %v114_v9, %v116_v10  ;;  %v8097_v13 = vld [vmem:[%s10733_s2 + $0x20] sm:$0xff] }
  0x8d   :  { %330 = vmatpush1.bf16.msra.mxu0 %v132_v14  ;;  %404 = vmatprep.mubr.bf16.mxu1 %v8632_v3  ;;  %v8098_v14 = vld [vmem:[%s10733_s2 + $0x28] sm:$0xff] }
  0x8e   :  { %v118_v15 = vpop.permute.xlu0 %117  ;;  %2246 = vrot.lane.b32.xlu0 %v8773_v29, %s8638_s0  ;;  %2248 = vrot.lane.b32.xlu1 %v8777_v30, %s8638_s0 }
  0x8f   :  { %v120_v16 = vpop.permute.xlu1 %119  ;;  %v135_v19 = vsel %vm123_vm0, %v116_v10, %v118_v15 }
  0x90   :  { %8085 = vmatmul.mubr.msk.bf16.vlgmr.msra.gmra.mrb[8].mxu0 %vm153_vm1, %v8944_v58  ;;  %372 = vmatprep.subr.bf16.mxu1 %v135_v19  ;;  %v136_v26 = vsel %vm123_vm0, %v118_v15, %v120_v16 }
  0x91   :  { %373 = vmatpush1.bf16.msra.mxu1 %v134_v20  ;;  %447 = vmatprep.mubr.bf16.mxu0 %v8632_v3 }
  0x92   :  { %v122_v21 = vpop.permute.xlu0 %121  ;;  %8283 = vmatprep.subr.bf16.mxu1 %v8634_v39  ;;  %2250 = vrot.lane.b32.xlu0 %v8793_v35, %s8638_s0 }
  0x93   :  { %v502_v22 = vpop.permute.xlu1 %501  ;;  %v137_v25 = vsel %vm123_vm0, %v120_v16, %v122_v21  ;;  %2252 = vrot.lane.b32.xlu1 %v8797_v36, %s8638_s0 }
  0x94   :  { %8086 = vmatmul.mubr.msk.bf16.vlgmr.msra.gmra.mrb[8].mxu1 %vm153_vm1, %v8944_v58  ;;  %415 = vmatprep.subr.bf16.mxu0 %v137_v25 }
  0x95   :  { %416 = vmatpush1.bf16.msra.mxu0 %v136_v26  ;;  %8284 = vmatpush3.bf16.msra.mxu1 %v122_v21  ;;  %v9103_v21 = vpack.c.bf16 %v8098_v14, %v8097_v13 }
  0x96   :  { %v504_v27 = vpop.permute.xlu0 %503  ;;  %8285 = vmatprep.mubr.msk.bf16.mxu1 %vm8639_vm3, %v8634_v39  ;;  %2254 = vrot.lane.b32.xlu0 %v8816_v42, %s8638_s0 }
  0x97   :  { %v500_v28 = vpop.permute.xlu1 %499  ;;  %v531_v31 = vsel %vm529_vm2, %v502_v22, %v504_v27  ;;  %2256 = vrot.lane.b32.xlu1 %v8820_v43, %s8638_s0 }
  0x98   :  { %v530_v32 = vsel %vm529_vm2, %v500_v28, %v502_v22  ;;  %8087 = vmatmul.mubr.msk.bf16.vlgmr.msra.gmra.mrb[12].mxu0 %vm153_vm1, %v8944_v58  ;;  %562 = vmatprep.subr.bf16.mxu0 %v531_v31 }
  0x99   :  { %563 = vmatpush1.bf16.msra.mxu0 %v530_v32  ;;  %594 = vmatprep.mubr.bf16.mxu0 %v8632_v3 }
  0x9a   :  { %v506_v37 = vpop.permute.xlu0 %505  ;;  %2258 = vrot.lane.b32.xlu0 %v8830_v46, %s8638_s0 }
  0x9b   :  { %v508_v38 = vpop.permute.xlu1 %507  ;;  %v532_v40 = vsel %vm529_vm2, %v504_v27, %v506_v37  ;;  %2260 = vrot.lane.b32.xlu1 %v8930_v51, %s8638_s0 }
  0x9c   :  { %8286 = vmatmul.mubr.msk.bf16.vlgmr.msra.gmra.mrb[12].mxu1 %vm153_vm1, %v8944_v58  ;;  %v533_v41 = vsel %vm529_vm2, %v506_v37, %v508_v38 }
  0x9d   :  { %605 = vmatprep.subr.bf16.mxu1 %v533_v41  ;;  %637 = vmatprep.mubr.bf16.mxu1 %v8632_v3 }
  0x9e   :  { %606 = vmatpush1.bf16.msra.mxu1 %v532_v40  ;;  %v510_v45 = vpop.permute.xlu0 %509  ;;  %2673 = vrot.lane.b32.xlu0 %v8713_v11, %s8640_s27 }
  0x9f   :  { %v512_v47 = vpop.permute.xlu1 %511  ;;  %v534_v48 = vsel %vm529_vm2, %v508_v38, %v510_v45  ;;  %2675 = vrot.lane.b32.xlu1 %v8717_v12, %s8640_s27 }
  0xa0   :  { %8089 = vmatmul.mubr.msk.bf16.vlgmr.msra.gmra.mrb[0].mxu0 %vm153_vm1, %v9023_v44  ;;  %v535_v49 = vsel %vm529_vm2, %v510_v45, %v512_v47 }
  0xa1   :  { %648 = vmatprep.subr.bf16.mxu0 %v535_v49  ;;  %680 = vmatprep.mubr.bf16.mxu0 %v8632_v3 }
  0xa2   :  { %649 = vmatpush1.bf16.msra.mxu0 %v534_v48  ;;  %v514_v50 = vpop.permute.xlu0 %513  ;;  %2671 = vrot.lane.b32.xlu0 %v8690_v4, %s8640_s27 }
  0xa3   :  { %v516_v52 = vpop.permute.xlu1 %515  ;;  %v536_v53 = vsel %vm529_vm2, %v512_v47, %v514_v50  ;;  %2677 = vrot.lane.b32.xlu1 %v8733_v17, %s8640_s27 }
  0xa4   :  { %8090 = vmatmul.mubr.msk.bf16.vlgmr.msra.gmra.mrb[0].mxu1 %vm153_vm1, %v9023_v44  ;;  %v537_v54 = vsel %vm529_vm2, %v514_v50, %v516_v52 }
  0xa5   :  { %691 = vmatprep.subr.bf16.mxu1 %v537_v54  ;;  %723 = vmatprep.mubr.bf16.mxu1 %v8632_v3 }
  0xa6   :  { %692 = vmatpush1.bf16.msra.mxu1 %v536_v53  ;;  %v518_v55 = vpop.permute.xlu0 %517  ;;  %2679 = vrot.lane.b32.xlu0 %v8737_v18, %s8640_s27 }
  0xa7   :  { %v520_v56 = vpop.permute.xlu1 %519  ;;  %v538_v57 = vsel %vm529_vm2, %v516_v52, %v518_v55  ;;  %2681 = vrot.lane.b32.xlu1 %v8753_v23, %s8640_s27 }
  0xa8   :  { %8091 = vmatmul.mubr.msk.bf16.vlgmr.msra.gmra.mrb[4].mxu0 %vm153_vm1, %v9023_v44  ;;  %v539_v58 = vsel %vm529_vm2, %v518_v55, %v520_v56 }
  0xa9   :  { %734 = vmatprep.subr.bf16.mxu0 %v539_v58  ;;  %766 = vmatprep.mubr.bf16.mxu0 %v8632_v3 }
  0xaa   :  { %735 = vmatpush1.bf16.msra.mxu0 %v538_v57  ;;  %v522_v59 = vpop.permute.xlu0 %521  ;;  %2683 = vrot.lane.b32.xlu0 %v8757_v24, %s8640_s27 }
  0xab   :  { %v524_v60 = vpop.permute.xlu1 %523  ;;  %v540_v61 = vsel %vm529_vm2, %v520_v56, %v522_v59  ;;  %2685 = vrot.lane.b32.xlu1 %v8773_v29, %s8640_s27 }
  0xac   :  { %8092 = vmatmul.mubr.msk.bf16.vlgmr.msra.gmra.mrb[4].mxu1 %vm153_vm1, %v9023_v44  ;;  %v541_v62 = vsel %vm529_vm2, %v522_v59, %v524_v60 }
  0xad   :  { %777 = vmatprep.subr.bf16.mxu1 %v541_v62  ;;  %809 = vmatprep.mubr.bf16.mxu1 %v8632_v3 }
  0xae   :  { %778 = vmatpush1.bf16.msra.mxu1 %v540_v61  ;;  %v526_v63 = vpop.permute.xlu0 %525  ;;  %2687 = vrot.lane.b32.xlu0 %v8777_v30, %s8640_s27  ;;  %v8108_v61 = vld [vmem:[%s10733_s2 + $0x38] sm:$0xff] }
  0xaf   :  { %v528_v0 = vpop.permute.xlu1 %527  ;;  %v542_v1 = vsel %vm529_vm2, %v524_v60, %v526_v63  ;;  %8289 = vmatprep.subr.bf16.mxu1 %v8634_v39  ;;  %2689 = vrot.lane.b32.xlu1 %v8793_v35, %s8640_s27  ;;  %v8107_v60 = vld [vmem:[%s10733_s2 + $0x30] sm:$0xff] }
  0xb0   :  { %8093 = vmatmul.mubr.msk.bf16.vlgmr.msra.gmra.mrb[8].mxu0 %vm153_vm1, %v9023_v44  ;;  %v543_v2 = vsel %vm529_vm2, %v526_v63, %v528_v0 }
  0xb1   :  { %820 = vmatprep.subr.bf16.mxu0 %v543_v2  ;;  %852 = vmatprep.mubr.bf16.mxu0 %v8632_v3  ;;  %v9184_v2 = vpack.c.bf16 %v8108_v61, %v8107_v60 }
  0xb2   :  { %821 = vmatpush1.bf16.msra.mxu0 %v542_v1  ;;  %v911_v5 = vpop.permute.xlu0 %910  ;;  %2691 = vrot.lane.b32.xlu0 %v8797_v36, %s8640_s27 }
  0xb3   :  { %v913_v6 = vpop.permute.xlu1 %912  ;;  %2693 = vrot.lane.b32.xlu1 %v8816_v42, %s8640_s27 }
  0xb4   :  { %8094 = vmatmul.mubr.msk.bf16.vlgmr.msra.gmra.mrb[8].mxu1 %vm153_vm1, %v9023_v44  ;;  %v940_v7 = vsel %vm938_vm4, %v911_v5, %v913_v6 }
  0xb5   :  { %8290 = vmatpush3.bf16.msra.mxu1 %v528_v0  ;;  %971 = vmatprep.subr.bf16.mxu0 %v940_v7 }
  0xb6   :  { %v909_v8 = vpop.permute.xlu0 %908  ;;  %8291 = vmatprep.mubr.msk.bf16.mxu1 %vm8639_vm3, %v8634_v39  ;;  %2695 = vrot.lane.b32.xlu0 %v8820_v43, %s8640_s27 }
  0xb7   :  { %v939_v9 = vsel %vm938_vm4, %v909_v8, %v911_v5  ;;  %v915_v10 = vpop.permute.xlu1 %914  ;;  %2697 = vrot.lane.b32.xlu1 %v8830_v46, %s8640_s27 }
  0xb8   :  { %8095 = vmatmul.mubr.msk.bf16.vlgmr.msra.gmra.mrb[12].mxu0 %vm153_vm1, %v9023_v44  ;;  %v941_v16 = vsel %vm938_vm4, %v913_v6, %v915_v10 }
  0xb9   :  { %972 = vmatpush1.bf16.msra.mxu0 %v939_v9  ;;  %1003 = vmatprep.mubr.bf16.mxu0 %v8632_v3 }
  0xba   :  { %v917_v15 = vpop.permute.xlu0 %916  ;;  %2699 = vrot.lane.b32.xlu0 %v8930_v51, %s8640_s27 }
  0xbb   :  { %v942_v19 = vsel %vm938_vm4, %v915_v10, %v917_v15  ;;  %v919_v20 = vpop.permute.xlu1 %918  ;;  %3112 = vrot.lane.b32.xlu1 %v8713_v11, %s8641_s8 }
  0xbc   :  { %8292 = vmatmul.mubr.msk.bf16.vlgmr.msra.gmra.mrb[16].mxu1 %vm153_vm1, %v9023_v44  ;;  %1014 = vmatprep.subr.bf16.mxu1 %v942_v19  ;;  %v943_v25 = vsel %vm938_vm4, %v917_v15, %v919_v20 }
  0xbd   :  { %1015 = vmatpush1.bf16.msra.mxu1 %v941_v16  ;;  %1046 = vmatprep.mubr.bf16.mxu1 %v8632_v3 }
  0xbe   :  { %v921_v22 = vpop.permute.xlu0 %920  ;;  %3114 = vrot.lane.b32.xlu0 %v8717_v12, %s8641_s8 }
  0xbf   :  { %v944_v26 = vsel %vm938_vm4, %v919_v20, %v921_v22  ;;  %v923_v27 = vpop.permute.xlu1 %922  ;;  %3110 = vrot.lane.b32.xlu1 %v8690_v4, %s8641_s8 }
  0xc0   :  { %8099 = vmatmul.mubr.msk.bf16.vlgmr.msra.gmra.mrb[0].mxu0 %vm153_vm1, %v9103_v21  ;;  %1057 = vmatprep.subr.bf16.mxu0 %v944_v26  ;;  %v945_v31 = vsel %vm938_vm4, %v921_v22, %v923_v27 }
  0xc1   :  { %1058 = vmatpush1.bf16.msra.mxu0 %v943_v25  ;;  %1089 = vmatprep.mubr.bf16.mxu0 %v8632_v3 }
  0xc2   :  { %v925_v28 = vpop.permute.xlu0 %924  ;;  %3116 = vrot.lane.b32.xlu0 %v8733_v17, %s8641_s8 }
  0xc3   :  { %v946_v32 = vsel %vm938_vm4, %v923_v27, %v925_v28  ;;  %v927_v33 = vpop.permute.xlu1 %926  ;;  %3118 = vrot.lane.b32.xlu1 %v8737_v18, %s8641_s8 }
  0xc4   :  { %8100 = vmatmul.mubr.msk.bf16.vlgmr.msra.gmra.mrb[0].mxu1 %vm153_vm1, %v9103_v21  ;;  %1100 = vmatprep.subr.bf16.mxu1 %v946_v32  ;;  %v947_v37 = vsel %vm938_vm4, %v925_v28, %v927_v33 }
  0xc5   :  { %1101 = vmatpush1.bf16.msra.mxu1 %v945_v31  ;;  %1132 = vmatprep.mubr.bf16.mxu1 %v8632_v3 }
  0xc6   :  { %v929_v34 = vpop.permute.xlu0 %928  ;;  %3120 = vrot.lane.b32.xlu0 %v8753_v23, %s8641_s8 }
  0xc7   :  { %v948_v38 = vsel %vm938_vm4, %v927_v33, %v929_v34  ;;  %v931_v40 = vpop.permute.xlu1 %930  ;;  %3122 = vrot.lane.b32.xlu1 %v8757_v24, %s8641_s8 }
  0xc8   :  { %8101 = vmatmul.mubr.msk.bf16.vlgmr.msra.gmra.mrb[4].mxu0 %vm153_vm1, %v9103_v21  ;;  %1143 = vmatprep.subr.bf16.mxu0 %v948_v38  ;;  %v949_v44 = vsel %vm938_vm4, %v929_v34, %v931_v40  ;;  %v8117_v38 = vld [vmem:[%s10733_s2 + $0x40] sm:$0xff] }
  0xc9   :  { %1144 = vmatpush1.bf16.msra.mxu0 %v947_v37  ;;  %1175 = vmatprep.mubr.bf16.mxu0 %v8632_v3 }
  0xca   :  { %v933_v41 = vpop.permute.xlu0 %932  ;;  %3124 = vrot.lane.b32.xlu0 %v8773_v29, %s8641_s8 }
  0xcb   :  { %v950_v45 = vsel %vm938_vm4, %v931_v40, %v933_v41  ;;  %v935_v47 = vpop.permute.xlu1 %934  ;;  %3126 = vrot.lane.b32.xlu1 %v8777_v30, %s8641_s8 }
  0xcc   :  { %8102 = vmatmul.mubr.msk.bf16.vlgmr.msra.gmra.mrb[4].mxu1 %vm153_vm1, %v9103_v21  ;;  %1186 = vmatprep.subr.bf16.mxu1 %v950_v45  ;;  %v951_v49 = vsel %vm938_vm4, %v933_v41, %v935_v47 }
  0xcd   :  { %1187 = vmatpush1.bf16.msra.mxu1 %v949_v44  ;;  %1218 = vmatprep.mubr.bf16.mxu1 %v8632_v3 }
  0xce   :  { %v937_v48 = vpop.permute.xlu0 %936  ;;  %8295 = vmatprep.subr.bf16.mxu1 %v8634_v39  ;;  %3128 = vrot.lane.b32.xlu0 %v8793_v35, %s8641_s8 }
  0xcf   :  { %v952_v50 = vsel %vm938_vm4, %v935_v47, %v937_v48  ;;  %v1414_v52 = vpop.permute.xlu1 %1413  ;;  %3130 = vrot.lane.b32.xlu1 %v8797_v36, %s8641_s8 }
  0xd0   :  { %8103 = vmatmul.mubr.msk.bf16.vlgmr.msra.gmra.mrb[8].mxu0 %vm153_vm1, %v9103_v21  ;;  %1229 = vmatprep.subr.bf16.mxu0 %v952_v50 }
  0xd1   :  { %1230 = vmatpush1.bf16.msra.mxu0 %v951_v49  ;;  %1261 = vmatprep.mubr.bf16.mxu0 %v8632_v3 }
  0xd2   :  { %v1416_v53 = vpop.permute.xlu0 %1415  ;;  %3132 = vrot.lane.b32.xlu0 %v8816_v42, %s8641_s8 }
  0xd3   :  { %v1412_v54 = vpop.permute.xlu1 %1411  ;;  %v1445_v55 = vsel %vm1443_vm5, %v1414_v52, %v1416_v53  ;;  %3134 = vrot.lane.b32.xlu1 %v8820_v43, %s8641_s8 }
  0xd4   :  { %8104 = vmatmul.mubr.msk.bf16.vlgmr.msra.gmra.mrb[8].mxu1 %vm153_vm1, %v9103_v21  ;;  %1477 = vmatprep.subr.bf16.mxu0 %v1445_v55  ;;  %v1444_v56 = vsel %vm1443_vm5, %v1412_v54, %v1414_v52  ;;  %v8128_v52 = vld [vmem:[%s10733_s2 + $0x58] sm:$0xff] }
  0xd5   :  { %8296 = vmatpush3.bf16.msra.mxu1 %v937_v48  ;;  %8297 = vmatprep.mubr.msk.bf16.mxu1 %vm8639_vm3, %v8634_v39 }
  0xd6   :  { %v1418_v57 = vpop.permute.xlu0 %1417  ;;  %3136 = vrot.lane.b32.xlu0 %v8830_v46, %s8641_s8 }
  0xd7   :  { %v1420_v58 = vpop.permute.xlu1 %1419  ;;  %3138 = vrot.lane.b32.xlu1 %v8930_v51, %s8641_s8  ;;  %v1446_v62 = vsel %vm1443_vm5, %v1416_v53, %v1418_v57 }
  0xd8   :  { %8105 = vmatmul.mubr.msk.bf16.vlgmr.msra.gmra.mrb[12].mxu0 %vm153_vm1, %v9103_v21  ;;  %v1447_v59 = vsel %vm1443_vm5, %v1418_v57, %v1420_v58 }
  0xd9   :  { %1478 = vmatpush1.bf16.msra.mxu0 %v1444_v56  ;;  %1520 = vmatprep.subr.bf16.mxu1 %v1447_v59 }
  0xda   :  { %v1422_v63 = vpop.permute.xlu0 %1421  ;;  %1509 = vmatprep.mubr.bf16.mxu0 %v8632_v3  ;;  %3551 = vrot.lane.b32.xlu0 %v8713_v11, %s8642_s17 }
  0xdb   :  { %v1424_v0 = vpop.permute.xlu1 %1423  ;;  %3553 = vrot.lane.b32.xlu1 %v8717_v12, %s8642_s17  ;;  %v1448_v5 = vsel %vm1443_vm5, %v1420_v58, %v1422_v63 }
  0xdc   :  { %8298 = vmatmul.mubr.msk.bf16.vlgmr.msra.gmra.mrb[20].mxu1 %vm153_vm1, %v9103_v21  ;;  %v1449_v1 = vsel %vm1443_vm5, %v1422_v63, %v1424_v0 }
  0xdd   :  { %1521 = vmatpush1.bf16.msra.mxu1 %v1446_v62  ;;  %1563 = vmatprep.subr.bf16.mxu0 %v1449_v1 }
  0xde   :  { %v1426_v6 = vpop.permute.xlu0 %1425  ;;  %1552 = vmatprep.mubr.bf16.mxu1 %v8632_v3  ;;  %3549 = vrot.lane.b32.xlu0 %v8690_v4, %s8642_s17 }
  0xdf   :  { %v1428_v7 = vpop.permute.xlu1 %1427  ;;  %3555 = vrot.lane.b32.xlu1 %v8733_v17, %s8642_s17  ;;  %v1450_v9 = vsel %vm1443_vm5, %v1424_v0, %v1426_v6 }
  0xe0   :  { %8109 = vmatmul.mubr.msk.bf16.vlgmr.msra.gmra.mrb[0].mxu0 %vm153_vm1, %v9184_v2  ;;  %v1451_v8 = vsel %vm1443_vm5, %v1426_v6, %v1428_v7 }
  0xe1   :  { %1564 = vmatpush1.bf16.msra.mxu0 %v1448_v5  ;;  %1606 = vmatprep.subr.bf16.mxu1 %v1451_v8 }
  0xe2   :  { %v1430_v10 = vpop.permute.xlu0 %1429  ;;  %1595 = vmatprep.mubr.bf16.mxu0 %v8632_v3  ;;  %3557 = vrot.lane.b32.xlu0 %v8737_v18, %s8642_s17 }
  0xe3   :  { %v1432_v13 = vpop.permute.xlu1 %1431  ;;  %3559 = vrot.lane.b32.xlu1 %v8753_v23, %s8642_s17  ;;  %v1452_v15 = vsel %vm1443_vm5, %v1428_v7, %v1430_v10 }
  0xe4   :  { %8110 = vmatmul.mubr.msk.bf16.vlgmr.msra.gmra.mrb[0].mxu1 %vm153_vm1, %v9184_v2  ;;  %v1453_v14 = vsel %vm1443_vm5, %v1430_v10, %v1432_v13 }
  0xe5   :  { %1607 = vmatpush1.bf16.msra.mxu1 %v1450_v9  ;;  %1649 = vmatprep.subr.bf16.mxu0 %v1453_v14 }
  0xe6   :  { %v1434_v16 = vpop.permute.xlu0 %1433  ;;  %1638 = vmatprep.mubr.bf16.mxu1 %v8632_v3  ;;  %3561 = vrot.lane.b32.xlu0 %v8757_v24, %s8642_s17 }
  0xe7   :  { %v1436_v19 = vpop.permute.xlu1 %1435  ;;  %3563 = vrot.lane.b32.xlu1 %v8773_v29, %s8642_s17  ;;  %v1454_v21 = vsel %vm1443_vm5, %v1432_v13, %v1434_v16 }
  0xe8   :  { %8111 = vmatmul.mubr.msk.bf16.vlgmr.msra.gmra.mrb[4].mxu0 %vm153_vm1, %v9184_v2  ;;  %v1455_v20 = vsel %vm1443_vm5, %v1434_v16, %v1436_v19 }
  0xe9   :  { %1650 = vmatpush1.bf16.msra.mxu0 %v1452_v15  ;;  %1692 = vmatprep.subr.bf16.mxu1 %v1455_v20 }
  0xea   :  { %v1438_v22 = vpop.permute.xlu0 %1437  ;;  %1681 = vmatprep.mubr.bf16.mxu0 %v8632_v3  ;;  %3565 = vrot.lane.b32.xlu0 %v8777_v30, %s8642_s17 }
  0xeb   :  { %v1440_v25 = vpop.permute.xlu1 %1439  ;;  %3567 = vrot.lane.b32.xlu1 %v8793_v35, %s8642_s17  ;;  %v1456_v27 = vsel %vm1443_vm5, %v1436_v19, %v1438_v22  ;;  %v9424_v19 = vld [vmem:[#allocation2] sm:$0xff] }
  0xec   :  { %8112 = vmatmul.mubr.msk.bf16.vlgmr.msra.gmra.mrb[4].mxu1 %vm153_vm1, %v9184_v2  ;;  %v1457_v26 = vsel %vm1443_vm5, %v1438_v22, %v1440_v25 }
  0xed   :  { %1693 = vmatpush1.bf16.msra.mxu1 %v1454_v21  ;;  %1735 = vmatprep.subr.bf16.mxu0 %v1457_v26  ;;  %v8138_v26 = vld [vmem:[%s10733_s2 + $0x68] sm:$0xff] }
  0xee   :  { %1724 = vmatprep.mubr.bf16.mxu1 %v8632_v3  ;;  %8301 = vmatprep.subr.bf16.mxu1 %v8634_v39  ;;  %v1442_v28 = vpop.permute.xlu0 %1441 }
  0xef   :  { %v9225_v31 = vpop.permute.xlu1 %2234  ;;  %3569 = vrot.lane.b32.xlu0 %v8797_v36, %s8642_s17  ;;  %3571 = vrot.lane.b32.xlu1 %v8816_v42, %s8642_s17  ;;  %v1458_v32 = vsel %vm1443_vm5, %v1440_v25, %v1442_v28  ;;  %v8137_v25 = vld [vmem:[%s10733_s2 + $0x60] sm:$0xff] }
  0xf0   :  { %8113 = vmatmul.mubr.msk.bf16.vlgmr.msra.gmra.mrb[8].mxu0 %vm153_vm1, %v9184_v2 }
  0xf1   :  { %1736 = vmatpush1.bf16.msra.mxu0 %v1456_v27  ;;  %1767 = vmatprep.mubr.bf16.mxu0 %v8632_v3 }
  0xf2   :  { %1856 = vmatprep.subr.bf16.mxu0 %v8713_v11 }
  0xf3   :  { %3573 = vrot.lane.b32.xlu0 %v8820_v43, %s8642_s17  ;;  %3575 = vrot.lane.b32.xlu1 %v8830_v46, %s8642_s17 }
  0xf4   :  { %8114 = vmatmul.mubr.msk.bf16.vlgmr.msra.gmra.mrb[8].mxu1 %vm153_vm1, %v9184_v2  ;;  %v9242_v33 = vpop.permute.xlu0 %2236  ;;  %v2233_v34 = vpop.permute.xlu1 %2232 }
  0xf5   :  { %8302 = vmatpush3.bf16.msra.mxu1 %v1458_v32  ;;  %8303 = vmatprep.mubr.msk.bf16.mxu1 %vm8639_vm3, %v8634_v39  ;;  %v9453_v32 = vpack.c.bf16 %v8138_v26, %v8137_v25  ;;  %v8157_v26 = vld [vmem:[%s10733_s2 + $0x80] sm:$0xff] }
  0xf6   :  { %1899 = vmatprep.subr.bf16.mxu1 %v8733_v17  ;;  %v8118_v17 = vld [vmem:[%s10733_s2 + $0x48] sm:$0xff] }
  0xf7   :  { %3577 = vrot.lane.b32.xlu0 %v8930_v51, %s8642_s17  ;;  %v1852_v40 = vpack.c.bf16 %v8118_v17, %v8117_v38 }
  0xf8   :  { %8115 = vmatmul.mubr.msk.bf16.vlgmr.msra.gmra.mrb[12].mxu0 %vm153_vm1, %v9184_v2  ;;  %v9251_v11 = vpop.permute.xlu0 %2238  ;;  %v9253_v37 = vpop.permute.xlu1 %2240 }
  0xf9   :  { %1857 = vmatpush1.bf16.msra.mxu0 %v8690_v4  ;;  %1888 = vmatprep.mubr.bf16.mxu0 %v8632_v3  ;;  %v2265_v54 = vsel %vm2262_vm6, %v9242_v33, %v9251_v11 }
  0xfa   :  { %1942 = vmatprep.subr.bf16.mxu0 %v8753_v23 }
  0xfc   :  { %8304 = vmatmul.mubr.msk.bf16.vlgmr.msra.gmra.mrb[24].mxu1 %vm153_vm1, %v9184_v2  ;;  %v9266_v41 = vpop.permute.xlu0 %2242  ;;  %v9268_v44 = vpop.permute.xlu1 %2244 }
  0xfd   :  { %1900 = vmatpush1.bf16.msra.mxu1 %v8717_v12  ;;  %1931 = vmatprep.mubr.bf16.mxu1 %v8632_v3  ;;  %v2268_v49 = vsel %vm2262_vm6, %v9266_v41, %v9268_v44  ;;  %v2267_v59 = vsel %vm2262_vm6, %v9253_v37, %v9266_v41 }
  0xfe   :  { %1985 = vmatprep.subr.bf16.mxu1 %v8773_v29 }
 0x100   :  { %8119 = vmatmul.mubr.msk.bf16.vlgmr.msra.gmra.mrb[0].mxu0 %vm153_vm1, %v1852_v40  ;;  %v9274_v4 = vpop.permute.xlu0 %2246  ;;  %v9276_v45 = vpop.permute.xlu1 %2248 }
 0x101   :  { %1943 = vmatpush1.bf16.msra.mxu0 %v8737_v18  ;;  %1974 = vmatprep.mubr.bf16.mxu0 %v8632_v3  ;;  %v2270_v55 = vsel %vm2262_vm6, %v9274_v4, %v9276_v45  ;;  %v2269_v63 = vsel %vm2262_vm6, %v9268_v44, %v9274_v4 }
 0x102   :  { %2028 = vmatprep.subr.bf16.mxu0 %v8793_v35 }
 0x104   :  { %8120 = vmatmul.mubr.msk.bf16.vlgmr.msra.gmra.mrb[0].mxu1 %vm153_vm1, %v1852_v40  ;;  %v9282_v23 = vpop.permute.xlu0 %2250 }
 0x105   :  { %1986 = vmatpush1.bf16.msra.mxu1 %v8757_v24  ;;  %2017 = vmatprep.mubr.bf16.mxu1 %v8632_v3  ;;  %v9286_v12 = vpop.permute.xlu1 %2252  ;;  %v2271_v2 = vsel %vm2262_vm6, %v9276_v45, %v9282_v23 }
 0x106   :  { %2071 = vmatprep.subr.bf16.mxu1 %v8816_v42  ;;  %v2272_v60 = vsel %vm2262_vm6, %v9282_v23, %v9286_v12 }
 0x108   :  { %8121 = vmatmul.mubr.msk.bf16.vlgmr.msra.gmra.mrb[4].mxu0 %vm153_vm1, %v1852_v40  ;;  %v9290_v29 = vpop.permute.xlu0 %2254 }
 0x109   :  { %2029 = vmatpush1.bf16.msra.mxu0 %v8777_v30  ;;  %2060 = vmatprep.mubr.bf16.mxu0 %v8632_v3  ;;  %v9294_v18 = vpop.permute.xlu1 %2256  ;;  %v2264_v30 = vsel %vm2262_vm6, %v9225_v31, %v9242_v33  ;;  %v2273_v8 = vsel %vm2262_vm6, %v9286_v12, %v9290_v29 }
 0x10a   :  { %2114 = vmatprep.subr.bf16.mxu0 %v8830_v46  ;;  %v2274_v0 = vsel %vm2262_vm6, %v9290_v29, %v9294_v18 }
 0x10c   :  { %8122 = vmatmul.mubr.msk.bf16.vlgmr.msra.gmra.mrb[4].mxu1 %vm153_vm1, %v1852_v40  ;;  %v9298_v24 = vpop.permute.xlu0 %2258 }
 0x10d   :  { %2072 = vmatpush1.bf16.msra.mxu1 %v8797_v36  ;;  %2103 = vmatprep.mubr.bf16.mxu1 %v8632_v3  ;;  %v9302_v35 = vpop.permute.xlu1 %2260  ;;  %v2266_v36 = vsel %vm2262_vm6, %v9251_v11, %v9253_v37  ;;  %v2275_v10 = vsel %vm2262_vm6, %v9294_v18, %v9298_v24 }
 0x10e   :  { %8307 = vmatprep.subr.bf16.mxu1 %v8634_v39  ;;  %v2276_v5 = vsel %vm2262_vm6, %v9298_v24, %v9302_v35 }
 0x110   :  { %8123 = vmatmul.mubr.msk.bf16.vlgmr.msra.gmra.mrb[8].mxu0 %vm153_vm1, %v1852_v40  ;;  %v9309_v42 = vpop.permute.xlu0 %2673 }
 0x111   :  { %2115 = vmatpush1.bf16.msra.mxu0 %v8820_v43  ;;  %2146 = vmatprep.mubr.bf16.mxu0 %v8632_v3  ;;  %v9313_v46 = vpop.permute.xlu1 %2675  ;;  %v2263_v43 = vsel %vm2262_vm6, %v2233_v34, %v9225_v31 }
 0x112   :  { %2295 = vmatprep.subr.bf16.mxu0 %v2264_v30  ;;  %v2703_v14 = vsel %vm2701_vm7, %v9309_v42, %v9313_v46 }
 0x114   :  { %8124 = vmatmul.mubr.msk.bf16.vlgmr.msra.gmra.mrb[8].mxu1 %vm153_vm1, %v1852_v40  ;;  %v9319_v47 = vpop.permute.xlu0 %2671 }
 0x115   :  { %8308 = vmatpush3.bf16.msra.mxu1 %v8930_v51  ;;  %8309 = vmatprep.mubr.msk.bf16.mxu1 %vm8639_vm3, %v8634_v39  ;;  %v9324_v48 = vpop.permute.xlu1 %2677  ;;  %v8127_v51 = vld [vmem:[%s10733_s2 + $0x50] sm:$0xff]  ;;  %v2702_v20 = vsel %vm2701_vm7, %v9319_v47, %v9309_v42  ;;  %v3984_v42 = vld [vmem:[%s10734_s3] sm:$0xff] }
 0x116   :  { %2338 = vmatprep.subr.bf16.mxu1 %v2266_v36  ;;  %v9350_v56 = vpack.c.bf16 %v8128_v52, %v8127_v51  ;;  %v2704_v28 = vsel %vm2701_vm7, %v9313_v46, %v9324_v48  ;;  %v3985_v46 = vld [vmem:[%s10734_s3 + $0x8] sm:$0xff]  ;;  %3988 = vperm.xlu1 %8627, %v3984_v42  }
 0x117   :  { %3993 = vperm.xlu0 %8628, %v3985_v46  }
 0x118   :  { %8125 = vmatmul.mubr.msk.bf16.vlgmr.msra.gmra.mrb[12].mxu0 %vm153_vm1, %v1852_v40  ;;  %v9332_v50 = vpop.permute.xlu0 %2679 }
 0x119   :  { %2296 = vmatpush1.bf16.msra.mxu0 %v2263_v43  ;;  %2327 = vmatprep.mubr.bf16.mxu0 %v8632_v3  ;;  %v9341_v53 = vpop.permute.xlu1 %2681  ;;  %v2705_v16 = vsel %vm2701_vm7, %v9324_v48, %v9332_v50 }
 0x11a   :  { %2381 = vmatprep.subr.bf16.mxu0 %v2268_v49  ;;  %v2706_v33 = vsel %vm2701_vm7, %v9332_v50, %v9341_v53  ;;  %v8147_v49 = vld [vmem:[%s10733_s2 + $0x70] sm:$0xff]  ;;  %v8148_v50 = vld [vmem:[%s10733_s2 + $0x78] sm:$0xff] }
 0x11c   :  { %8310 = vmatmul.mubr.msk.bf16.vlgmr.msra.gmra.mrb[28].mxu1 %vm153_vm1, %v1852_v40  ;;  %v9352_v57 = vpop.permute.xlu0 %2683 }
 0x11d   :  { %2339 = vmatpush1.bf16.msra.mxu1 %v2265_v54  ;;  %2370 = vmatprep.mubr.bf16.mxu1 %v8632_v3  ;;  %v9355_v58 = vpop.permute.xlu1 %2685  ;;  %v2707_v21 = vsel %vm2701_vm7, %v9341_v53, %v9352_v57  ;;  %v9539_v53 = vpack.c.bf16 %v8148_v50, %v8147_v49 }
 0x11e   :  { %2424 = vmatprep.subr.bf16.mxu1 %v2270_v55  ;;  %v2708_v38 = vsel %vm2701_vm7, %v9352_v57, %v9355_v58 }
 0x120   :  { %8129 = vmatmul.mubr.msk.bf16.vlgmr.msra.gmra.mrb[0].mxu0 %vm153_vm1, %v9350_v56  ;;  %v9365_v61 = vpop.permute.xlu0 %2687 }
 0x121   :  { %2382 = vmatpush1.bf16.msra.mxu0 %v2267_v59  ;;  %2413 = vmatprep.mubr.bf16.mxu0 %v8632_v3  ;;  %v9368_v62 = vpop.permute.xlu1 %2689  ;;  %v2709_v31 = vsel %vm2701_vm7, %v9355_v58, %v9365_v61 }
 0x122   :  { %2467 = vmatprep.subr.bf16.mxu0 %v2272_v60  ;;  %v2710_v44 = vsel %vm2701_vm7, %v9365_v61, %v9368_v62 }
 0x124   :  { %8130 = vmatmul.mubr.msk.bf16.vlgmr.msra.gmra.mrb[0].mxu1 %vm153_vm1, %v9350_v56  ;;  %v9378_v1 = vpop.permute.xlu0 %2691 }
 0x125   :  { %2425 = vmatpush1.bf16.msra.mxu1 %v2269_v63  ;;  %2456 = vmatprep.mubr.bf16.mxu1 %v8632_v3  ;;  %v9387_v6 = vpop.permute.xlu1 %2693  ;;  %v2711_v11 = vsel %vm2701_vm7, %v9368_v62, %v9378_v1 }
 0x126   :  { %2510 = vmatprep.subr.bf16.mxu1 %v2274_v0  ;;  %v2712_v45 = vsel %vm2701_vm7, %v9378_v1, %v9387_v6 }
 0x128   :  { %8131 = vmatmul.mubr.msk.bf16.vlgmr.msra.gmra.mrb[4].mxu0 %vm153_vm1, %v9350_v56  ;;  %v9391_v7 = vpop.permute.xlu0 %2695 }
 0x129   :  { %2468 = vmatpush1.bf16.msra.mxu0 %v2271_v2  ;;  %2499 = vmatprep.mubr.bf16.mxu0 %v8632_v3  ;;  %v9400_v9 = vpop.permute.xlu1 %2697  ;;  %v2713_v17 = vsel %vm2701_vm7, %v9387_v6, %v9391_v7 }
 0x12a   :  { %2553 = vmatprep.subr.bf16.mxu0 %v2276_v5  ;;  %v2714_v29 = vsel %vm2701_vm7, %v9391_v7, %v9400_v9 }
 0x12c   :  { %8132 = vmatmul.mubr.msk.bf16.vlgmr.msra.gmra.mrb[4].mxu1 %vm153_vm1, %v9350_v56  ;;  %v9406_v13 = vpop.permute.xlu0 %2699 }
 0x12d   :  { %2511 = vmatpush1.bf16.msra.mxu1 %v2273_v8  ;;  %2542 = vmatprep.mubr.bf16.mxu1 %v8632_v3  ;;  %v2715_v4 = vsel %vm2701_vm7, %v9400_v9, %v9406_v13 }
 0x12e   :  { %8313 = vmatprep.subr.bf16.mxu1 %v8634_v39  ;;  %v9419_v39 = vpop.permute.xlu1 %3112 }
 0x130   :  { %8133 = vmatmul.mubr.msk.bf16.vlgmr.msra.gmra.mrb[8].mxu0 %vm153_vm1, %v9350_v56  ;;  %v9414_v15 = vpop.permute.xlu0 %3114 }
 0x131   :  { %2554 = vmatpush1.bf16.msra.mxu0 %v2275_v10  ;;  %2585 = vmatprep.mubr.bf16.mxu0 %v8632_v3  ;;  %v3142_v18 = vsel %vm3140_vm8, %v9419_v39, %v9414_v15 }
 0x132   :  { %2734 = vmatprep.subr.bf16.mxu0 %v2703_v14  ;;  %v3111_v27 = vpop.permute.xlu1 %3110 }
 0x133   :  { %v3141_v36 = vsel %vm3140_vm8, %v3111_v27, %v9419_v39  ;;  %v8158_v27 = vld [vmem:[%s10733_s2 + $0x88] sm:$0xff] }
 0x134   :  { %8134 = vmatmul.mubr.msk.bf16.vlgmr.msra.gmra.mrb[8].mxu1 %vm153_vm1, %v9350_v56  ;;  %v9436_v22 = vpop.permute.xlu0 %3116 }
 0x135   :  { %8314 = vmatpush3.bf16.msra.mxu1 %v9302_v35  ;;  %8315 = vmatprep.mubr.msk.bf16.mxu1 %vm8639_vm3, %v9424_v19  ;;  %v3143_v51 = vsel %vm3140_vm8, %v9414_v15, %v9436_v22 }
 0x136   :  { %2777 = vmatprep.subr.bf16.mxu1 %v2705_v16  ;;  %v9464_v37 = vpop.permute.xlu1 %3118 }
 0x137   :  { %v3144_v30 = vsel %vm3140_vm8, %v9436_v22, %v9464_v37 }
 0x138   :  { %8135 = vmatmul.mubr.msk.bf16.vlgmr.msra.gmra.mrb[12].mxu0 %vm153_vm1, %v9350_v56  ;;  %v9459_v34 = vpop.permute.xlu0 %3120 }
 0x139   :  { %2735 = vmatpush1.bf16.msra.mxu0 %v2702_v20  ;;  %2766 = vmatprep.mubr.bf16.mxu0 %v8632_v3 }
 0x13a   :  { %2820 = vmatprep.subr.bf16.mxu0 %v2707_v21  ;;  %v3123_v41 = vpop.permute.xlu1 %3122 }
 0x13b   :  { %v3146_v48 = vsel %vm3140_vm8, %v9459_v34, %v3123_v41 }
 0x13c   :  { %8316 = vmatmul.mubr.msk.bf16.vlgmr.msra.gmra.mrb[32].mxu1 %vm153_vm1, %v9350_v56  ;;  %v9477_v40 = vpop.permute.xlu0 %3124  ;;  %v3145_v56 = vsel %vm3140_vm8, %v9464_v37, %v9459_v34 }
 0x13d   :  { %2778 = vmatpush1.bf16.msra.mxu1 %v2704_v28  ;;  %2809 = vmatprep.mubr.bf16.mxu1 %v8632_v3  ;;  %v3147_v59 = vsel %vm3140_vm8, %v3123_v41, %v9477_v40 }
 0x13e   :  { %2863 = vmatprep.subr.bf16.mxu1 %v2709_v31  ;;  %v3127_v12 = vpop.permute.xlu1 %3126 }
 0x13f   :  { %v3148_v52 = vsel %vm3140_vm8, %v9477_v40, %v3127_v12 }
 0x140   :  { %8139 = vmatmul.mubr.msk.bf16.vlgmr.msra.gmra.mrb[0].mxu0 %vm153_vm1, %v9453_v32  ;;  %v3129_v23 = vpop.permute.xlu0 %3128 }
 0x141   :  { %2821 = vmatpush1.bf16.msra.mxu0 %v2706_v33  ;;  %2852 = vmatprep.mubr.bf16.mxu0 %v8632_v3  ;;  %v3149_v62 = vsel %vm3140_vm8, %v3127_v12, %v3129_v23 }
 0x142   :  { %2906 = vmatprep.subr.bf16.mxu0 %v2711_v11  ;;  %v3131_v35 = vpop.permute.xlu1 %3130 }
 0x143   :  { %v3150_v57 = vsel %vm3140_vm8, %v3129_v23, %v3131_v35 }
 0x144   :  { %8140 = vmatmul.mubr.msk.bf16.vlgmr.msra.gmra.mrb[0].mxu1 %vm153_vm1, %v9453_v32  ;;  %v3133_v24 = vpop.permute.xlu0 %3132 }
 0x145   :  { %2864 = vmatpush1.bf16.msra.mxu1 %v2708_v38  ;;  %2895 = vmatprep.mubr.bf16.mxu1 %v8632_v3  ;;  %v3151_v2 = vsel %vm3140_vm8, %v3131_v35, %v3133_v24 }
 0x146   :  { %2949 = vmatprep.subr.bf16.mxu1 %v2713_v17  ;;  %v3135_v43 = vpop.permute.xlu1 %3134 }
 0x147   :  { %v3152_v61 = vsel %vm3140_vm8, %v3133_v24, %v3135_v43 }
 0x148   :  { %8141 = vmatmul.mubr.msk.bf16.vlgmr.msra.gmra.mrb[4].mxu0 %vm153_vm1, %v9453_v32  ;;  %v3137_v47 = vpop.permute.xlu0 %3136 }
 0x149   :  { %2907 = vmatpush1.bf16.msra.mxu0 %v2710_v44  ;;  %2938 = vmatprep.mubr.bf16.mxu0 %v8632_v3  ;;  %v3153_v7 = vsel %vm3140_vm8, %v3135_v43, %v3137_v47 }
 0x14a   :  { %2992 = vmatprep.subr.bf16.mxu0 %v2715_v4  ;;  %v3139_v55 = vpop.permute.xlu1 %3138 }
 0x14b   :  { %v3154_v63 = vsel %vm3140_vm8, %v3137_v47, %v3139_v55 }
 0x14c   :  { %8142 = vmatmul.mubr.msk.bf16.vlgmr.msra.gmra.mrb[4].mxu1 %vm153_vm1, %v9453_v32  ;;  %v3552_v54 = vpop.permute.xlu0 %3551 }
 0x14d   :  { %2950 = vmatpush1.bf16.msra.mxu1 %v2712_v45  ;;  %2981 = vmatprep.mubr.bf16.mxu1 %v8632_v3 }
 0x14e   :  { %8319 = vmatprep.subr.bf16.mxu1 %v9424_v19  ;;  %v3554_v58 = vpop.permute.xlu1 %3553 }
 0x14f   :  { %v3581_v9 = vsel %vm3579_vm9, %v3552_v54, %v3554_v58 }
 0x150   :  { %8143 = vmatmul.mubr.msk.bf16.vlgmr.msra.gmra.mrb[8].mxu0 %vm153_vm1, %v9453_v32  ;;  %v3550_v60 = vpop.permute.xlu0 %3549 }
 0x151   :  { %2993 = vmatpush1.bf16.msra.mxu0 %v2714_v29  ;;  %3024 = vmatprep.mubr.bf16.mxu0 %v8632_v3  ;;  %v3580_v20 = vsel %vm3579_vm9, %v3550_v60, %v3552_v54 }
 0x152   :  { %3173 = vmatprep.subr.bf16.mxu0 %v3142_v18  ;;  %v3556_v0 = vpop.permute.xlu1 %3555 }
 0x153   :  { %v3582_v28 = vsel %vm3579_vm9, %v3554_v58, %v3556_v0 }
 0x154   :  { %8144 = vmatmul.mubr.msk.bf16.vlgmr.msra.gmra.mrb[8].mxu1 %vm153_vm1, %v9453_v32  ;;  %v3558_v1 = vpop.permute.xlu0 %3557 }
 0x155   :  { %8320 = vmatpush3.bf16.msra.mxu1 %v9406_v13  ;;  %8321 = vmatprep.mubr.msk.bf16.mxu1 %vm8639_vm3, %v9424_v19  ;;  %v3583_v39 = vsel %vm3579_vm9, %v3556_v0, %v3558_v1 }
 0x156   :  { %3216 = vmatprep.subr.bf16.mxu1 %v3144_v30  ;;  %v3560_v5 = vpop.permute.xlu1 %3559 }
 0x157   :  { %v3584_v33 = vsel %vm3579_vm9, %v3558_v1, %v3560_v5 }
 0x158   :  { %8145 = vmatmul.mubr.msk.bf16.vlgmr.msra.gmra.mrb[12].mxu0 %vm153_vm1, %v9453_v32  ;;  %v3562_v6 = vpop.permute.xlu0 %3561 }
 0x159   :  { %3174 = vmatpush1.bf16.msra.mxu0 %v3141_v36  ;;  %3205 = vmatprep.mubr.bf16.mxu0 %v8632_v3  ;;  %v3585_v21 = vsel %vm3579_vm9, %v3560_v5, %v3562_v6 }
 0x15a   :  { %3259 = vmatprep.subr.bf16.mxu0 %v3146_v48  ;;  %v3564_v14 = vpop.permute.xlu1 %3563 }
 0x15b   :  { %v3586_v38 = vsel %vm3579_vm9, %v3562_v6, %v3564_v14 }
 0x15c   :  { %8322 = vmatmul.mubr.msk.bf16.vlgmr.msra.gmra.mrb[36].mxu1 %vm153_vm1, %v9453_v32  ;;  %v3566_v16 = vpop.permute.xlu0 %3565  ;;  %v3548_v32 = vpack.c.bf16 %v8158_v27, %v8157_v26 }
 0x15d   :  { %3217 = vmatpush1.bf16.msra.mxu1 %v3143_v51  ;;  %3248 = vmatprep.mubr.bf16.mxu1 %v8632_v3  ;;  %v3587_v31 = vsel %vm3579_vm9, %v3564_v14, %v3566_v16 }
 0x15e   :  { %3302 = vmatprep.subr.bf16.mxu1 %v3148_v52  ;;  %v3568_v25 = vpop.permute.xlu1 %3567 }
 0x15f   :  { %v3588_v44 = vsel %vm3579_vm9, %v3566_v16, %v3568_v25 }
 0x160   :  { %8149 = vmatmul.mubr.msk.bf16.vlgmr.msra.gmra.mrb[0].mxu0 %vm153_vm1, %v9539_v53 }
 0x161   :  { %3260 = vmatpush1.bf16.msra.mxu0 %v3145_v56  ;;  %3291 = vmatprep.mubr.bf16.mxu0 %v8632_v3  ;;  %v3570_v22 = vpop.permute.xlu0 %3569 }
 0x162   :  { %3345 = vmatprep.subr.bf16.mxu0 %v3150_v57  ;;  %v3572_v11 = vpop.permute.xlu1 %3571  ;;  %v3589_v37 = vsel %vm3579_vm9, %v3568_v25, %v3570_v22  ;;  %v9639_v25 = vld [vmem:[%s10735_s1] sm:$0xff] }
 0x163   :  { %v3590_v45 = vsel %vm3579_vm9, %v3570_v22, %v3572_v11 }
 0x164   :  { %8150 = vmatmul.mubr.msk.bf16.vlgmr.msra.gmra.mrb[0].mxu1 %vm153_vm1, %v9539_v53 }
 0x165   :  { %3303 = vmatpush1.bf16.msra.mxu1 %v3147_v59  ;;  %3334 = vmatprep.mubr.bf16.mxu1 %v8632_v3  ;;  %v3574_v34 = vpop.permute.xlu0 %3573 }
 0x166   :  { %3388 = vmatprep.subr.bf16.mxu1 %v3152_v61  ;;  %v3591_v17 = vsel %vm3579_vm9, %v3572_v11, %v3574_v34  ;;  %v3576_v41 = vpop.permute.xlu1 %3575 }
 0x167   :  { %v3592_v23 = vsel %vm3579_vm9, %v3574_v34, %v3576_v41 }
 0x168   :  { %8151 = vmatmul.mubr.msk.bf16.vlgmr.msra.gmra.mrb[4].mxu0 %vm153_vm1, %v9539_v53 }
 0x169   :  { %3346 = vmatpush1.bf16.msra.mxu0 %v3149_v62  ;;  %3377 = vmatprep.mubr.bf16.mxu0 %v8632_v3  ;;  %v3578_v40 = vpop.permute.xlu0 %3577 }
 0x16a   :  { %3431 = vmatprep.subr.bf16.mxu0 %v3154_v63  ;;  %v3593_v4 = vsel %vm3579_vm9, %v3576_v41, %v3578_v40 }
 0x16c   :  { %8152 = vmatmul.mubr.msk.bf16.vlgmr.msra.gmra.mrb[4].mxu1 %vm153_vm1, %v9539_v53 }
 0x16d   :  { %3389 = vmatpush1.bf16.msra.mxu1 %v3151_v2  ;;  %3420 = vmatprep.mubr.bf16.mxu1 %v8632_v3 }
 0x16e   :  { %8325 = vmatprep.subr.bf16.mxu1 %v9424_v19 }
 0x16f   :  { %v492_v8 = vpop.f32.mrb[12].mxu1 }
 0x170   :  { %v8287_v10 = vpop.f32.mrb[13].mxu1  ;;  %8153 = vmatmul.mubr.msk.bf16.vlgmr.msra.gmra.mrb[8].mxu0 %vm153_vm1, %v9539_v53 }
 0x171   :  { %3432 = vmatpush1.bf16.msra.mxu0 %v3153_v7  ;;  %v9569_v13 = vpop.f32.mrb[14].mxu1  ;;  %3463 = vmatprep.mubr.bf16.mxu0 %v8632_v3 }
 0x172   :  { %v8288_v15 = vpop.f32.mrb[15].mxu1  ;;  %3612 = vmatprep.subr.bf16.mxu0 %v3581_v9 }
 0x174   :  { %8154 = vmatmul.mubr.msk.bf16.vlgmr.msra.gmra.mrb[8].mxu1 %vm153_vm1, %v9539_v53 }
 0x175   :  { %8326 = vmatpush3.bf16.msra.mxu1 %v3139_v55  ;;  %8327 = vmatprep.mubr.msk.bf16.mxu1 %vm8639_vm3, %v9424_v19  ;;  %v9622_v55 = vpack.c.bf16 %v9424_v19, %v9424_v19 }
 0x176   :  { %3655 = vmatprep.subr.bf16.mxu1 %v3583_v39 }
 0x177   :  { %4295 = vrot.lane.b32.xlu0 %v9622_v55, %s8633_s13 }
 0x178   :  { %8155 = vmatmul.mubr.msk.bf16.vlgmr.msra.gmra.mrb[12].mxu0 %vm153_vm1, %v9539_v53 }
 0x179   :  { %3613 = vmatpush1.bf16.msra.mxu0 %v3580_v20  ;;  %3644 = vmatprep.mubr.bf16.mxu0 %v8632_v3 }
 0x17a   :  { %3698 = vmatprep.subr.bf16.mxu0 %v3585_v21 }
 0x17c   :  { %8328 = vmatmul.mubr.msk.bf16.vlgmr.msra.gmra.mrb[40].mxu1 %vm153_vm1, %v9539_v53 }
 0x17d   :  { %3656 = vmatpush1.bf16.msra.mxu1 %v3582_v28  ;;  %3687 = vmatprep.mubr.bf16.mxu1 %v8632_v3 }
 0x17e   :  { %3741 = vmatprep.subr.bf16.mxu1 %v3587_v31 }
 0x180   :  { %8159 = vmatmul.mubr.msk.bf16.vlgmr.msra.gmra.mrb[0].mxu0 %vm153_vm1, %v3548_v32 }
 0x181   :  { %3699 = vmatpush1.bf16.msra.mxu0 %v3584_v33  ;;  %3730 = vmatprep.mubr.bf16.mxu0 %v8632_v3 }
 0x182   :  { %3784 = vmatprep.subr.bf16.mxu0 %v3589_v37 }
 0x184   :  { %8160 = vmatmul.mubr.msk.bf16.vlgmr.msra.gmra.mrb[0].mxu1 %vm153_vm1, %v3548_v32 }
 0x185   :  { %3742 = vmatpush1.bf16.msra.mxu1 %v3586_v38  ;;  %3773 = vmatprep.mubr.bf16.mxu1 %v8632_v3 }
 0x186   :  { %3827 = vmatprep.subr.bf16.mxu1 %v3591_v17 }
 0x188   :  { %8161 = vmatmul.mubr.msk.bf16.vlgmr.msra.gmra.mrb[4].mxu0 %vm153_vm1, %v3548_v32 }
 0x189   :  { %3785 = vmatpush1.bf16.msra.mxu0 %v3588_v44  ;;  %3816 = vmatprep.mubr.bf16.mxu0 %v8632_v3 }
 0x18a   :  { %3870 = vmatprep.subr.bf16.mxu0 %v3593_v4 }
 0x18c   :  { %8162 = vmatmul.mubr.msk.bf16.vlgmr.msra.gmra.mrb[4].mxu1 %vm153_vm1, %v3548_v32 }
 0x18d   :  { %3828 = vmatpush1.bf16.msra.mxu1 %v3590_v45  ;;  %3859 = vmatprep.mubr.bf16.mxu1 %v8632_v3 }
 0x18e   :  { %8331 = vmatprep.subr.bf16.mxu1 %v9424_v19 }
 0x18f   :  { %v897_v12 = vpop.f32.mrb[16].mxu1 }
 0x190   :  { %v898_v29 = vadd.f32 %v897_v12, %v492_v8  ;;  %v8293_v18 = vpop.f32.mrb[17].mxu1  ;;  %8163 = vmatmul.mubr.msk.bf16.vlgmr.msra.gmra.mrb[8].mxu0 %vm153_vm1, %v3548_v32 }
 0x191   :  { %v900_v24 = vpop.f32.mrb[18].mxu1  ;;  %3871 = vmatpush1.bf16.msra.mxu0 %v3592_v23  ;;  %3902 = vmatprep.mubr.bf16.mxu0 %v8632_v3 }
 0x192   :  { %v901_v35 = vadd.f32 %v900_v24, %v9569_v13  ;;  %v8294_v30 = vpop.f32.mrb[19].mxu1  ;;  %v4060_v13 = vlaneseq }
 0x194   :  { %8164 = vmatmul.mubr.msk.bf16.vlgmr.msra.gmra.mrb[8].mxu1 %vm153_vm1, %v3548_v32  ;;  %v9627_v14 = vshrl.u32 %v4060_v13, 7  ;;  %vm8072_vm11 = vcmp.lt.s32.totalorder %v4060_v13, 776 }
 0x195   :  { %8332 = vmatpush3.bf16.msra.mxu1 %v3578_v40  ;;  %8333 = vmatprep.mubr.msk.bf16.mxu1 %vm8639_vm3, %v9424_v19  ;;  %v9634_v22 = vpop.permute.xlu1 %3988 }
 0x196   :  { %v9632_v20 = vsub.s32 0, %v9627_v14  ;;  %v4066_v26 = vsub.s32 1, %v9627_v14  ;;  %v4070_v33 = vsub.s32 2, %v9627_v14  ;;  %v4074_v34 = vsub.s32 3, %v9627_v14 }
 0x197   :  { %v4078_v17 = vsub.s32 4, %v9627_v14  ;;  %v4082_v4 = vsub.s32 5, %v9627_v14 }
 0x198   :  { %8165 = vmatmul.mubr.msk.bf16.vlgmr.msra.gmra.mrb[12].mxu0 %vm153_vm1, %v3548_v32  ;;  %v4063_v38 = vrot.slane %v9639_v25, %v9632_v20  ;;  %v4067_v41 = vrot.slane %v9639_v25, %v4066_v26  ;;  %v4075_v30 = vrot.slane %v9639_v25, %v4074_v34 }
 0x199   :  { %4389 = vmatprep.mubr.bf16.mxu0 %v8632_v3 }
 0x19c   :  { %8334 = vmatmul.mubr.msk.bf16.vlgmr.msra.gmra.mrb[44].mxu1 %vm153_vm1, %v3548_v32  ;;  %v9644_v32 = vpop.permute.xlu0 %3993 }
 0x19d   :  { %4430 = vmatprep.mubr.bf16.mxu1 %v8632_v3 }
 0x1af   :  { %v1306_v42 = vpop.f32.mrb[20].mxu1 }
 0x1b0   :  { %v1327_v46 = vadd.f32 %v1306_v42, %v898_v29  ;;  %v8299_v36 = vpop.f32.mrb[21].mxu1 }
 0x1b1   :  { %v1309_v47 = vpop.f32.mrb[22].mxu1 }
 0x1b2   :  { %v1342_v48 = vadd.f32 %v1309_v47, %v901_v35  ;;  %v8300_v43 = vpop.f32.mrb[23].mxu1  ;;  %v4071_v35 = vrot.slane %v9639_v25, %v4070_v33 }
 0x1cf   :  { %v1812_v49 = vpop.f32.mrb[24].mxu1 }
 0x1d0   :  { %v1833_v50 = vadd.f32 %v1812_v49, %v1327_v46  ;;  %v8305_v51 = vpop.f32.mrb[25].mxu1 }
 0x1d1   :  { %v1815_v52 = vpop.f32.mrb[26].mxu1 }
 0x1d2   :  { %v1848_v53 = vadd.f32 %v1815_v52, %v1342_v48  ;;  %v8306_v54 = vpop.f32.mrb[27].mxu1  ;;  %v4079_v48 = vrot.slane %v9639_v25, %v4078_v17  ;;  %v4083_v52 = vrot.slane %v9639_v25, %v4082_v4 }
 0x1ef   :  { %v2191_v56 = vpop.f32.mrb[28].mxu1 }
 0x1f0   :  { %v2212_v57 = vadd.f32 %v2191_v56, %v1833_v50  ;;  %v8311_v58 = vpop.f32.mrb[29].mxu1 }
 0x1f1   :  { %v2194_v59 = vpop.f32.mrb[30].mxu1  ;;  %v4086_v58 = vsub.s32 6, %v9627_v14 }
 0x1f2   :  { %v2227_v60 = vadd.f32 %v2194_v59, %v1848_v53  ;;  %v8312_v61 = vpop.f32.mrb[31].mxu1 }
 0x20f   :  { %v2630_v62 = vpop.f32.mrb[32].mxu1 }
 0x210   :  { %v2651_v63 = vadd.f32 %v2630_v62, %v2212_v57  ;;  %v8317_v0 = vpop.f32.mrb[33].mxu1 }
 0x211   :  { %v2633_v1 = vpop.f32.mrb[34].mxu1 }
 0x212   :  { %v2666_v2 = vadd.f32 %v2633_v1, %v2227_v60  ;;  %v8318_v5 = vpop.f32.mrb[35].mxu1 }
 0x22f   :  { %v3069_v6 = vpop.f32.mrb[36].mxu1 }
 0x230   :  { %v3090_v7 = vadd.f32 %v3069_v6, %v2651_v63  ;;  %v8323_v19 = vpop.f32.mrb[37].mxu1  ;;  %v4090_v63 = vsub.s32 7, %v9627_v14 }
 0x231   :  { %v3072_v8 = vpop.f32.mrb[38].mxu1 }
 0x232   :  { %v3105_v9 = vadd.f32 %v3072_v8, %v2666_v2  ;;  %v8324_v10 = vpop.f32.mrb[39].mxu1 }
 0x24f   :  { %v3508_v15 = vpop.f32.mrb[40].mxu1 }
 0x250   :  { %v9629_v16 = vadd.f32 %v3508_v15, %v3090_v7  ;;  %v8329_v39 = vpop.f32.mrb[41].mxu1 }
 0x251   :  { %v3511_v21 = vpop.f32.mrb[42].mxu1 }
 0x252   :  { %v9642_v27 = vadd.f32 %v3511_v21, %v3105_v9  ;;  %v8330_v28 = vpop.f32.mrb[43].mxu1 }
 0x253   :  { %v3646_v31 = vpop.f32.mrb[0].mxu0 }
 0x254   :  { %v3648_v11 = vpop.f32.mrb[1].mxu0  ;;  %v3996_v37 = vadd.f32 %v9634_v22, %v3646_v31  ;;  %v4087_v31 = vrot.slane %v9639_v25, %v4086_v58 }
 0x255   :  { %v3997_v40 = vadd.f32 %v9634_v22, %v3648_v11  ;;  %v3650_v44 = vpop.f32.mrb[2].mxu0 }
 0x256   :  { %v4011_v45 = vadd.f32 %v9644_v32, %v3650_v44  ;;  %v4026_v23 = vmax.f32 %v3996_v37, 0.0  ;;  %v3652_v12 = vpop.f32.mrb[3].mxu0  ;;  %v9694_v44 = vld [vmem:[%s10735_s1 + $0x8] sm:$0x7f] }
 0x257   :  { %v4027_v29 = vmax.f32 %v3997_v40, 0.0  ;;  %v4012_v18 = vadd.f32 %v9644_v32, %v3652_v12  ;;  %v3689_v24 = vpop.f32.mrb[0].mxu1 }
 0x258   :  { %v4041_v42 = vmax.f32 %v4011_v45, 0.0  ;;  %v4135_v46 = vmul.f32 %v4063_v38, %v4026_v23  ;;  %v3998_v36 = vadd.f32 %v9634_v22, %v3689_v24  ;;  %v3691_v47 = vpop.f32.mrb[1].mxu1 }
 0x259   :  { %v4136_v43 = vmul.f32 %v4067_v41, %v4027_v29  ;;  %v4042_v49 = vmax.f32 %v4012_v18, 0.0  ;;  %v3999_v50 = vadd.f32 %v9634_v22, %v3691_v47  ;;  %v3693_v51 = vpop.f32.mrb[2].mxu1 }
 0x25a   :  { %v4150_v53 = vmul.f32 %v4063_v38, %v4041_v42  ;;  %v4028_v54 = vmax.f32 %v3998_v36, 0.0  ;;  %v4013_v56 = vadd.f32 %v9644_v32, %v3693_v51  ;;  %v3695_v57 = vpop.f32.mrb[3].mxu1 }
 0x25b   :  { %v4151_v59 = vmul.f32 %v4067_v41, %v4042_v49  ;;  %v4029_v60 = vmax.f32 %v3999_v50, 0.0  ;;  %v4014_v61 = vadd.f32 %v9644_v32, %v3695_v57  ;;  %v3732_v62 = vpop.f32.mrb[4].mxu0  ;;  %v4091_v41 = vrot.slane %v9639_v25, %v4090_v63 }
 0x25c   :  { %v4137_v0 = vmul.f32 %v4071_v35, %v4028_v54  ;;  %v4043_v1 = vmax.f32 %v4013_v56, 0.0  ;;  %v4000_v2 = vadd.f32 %v9634_v22, %v3732_v62  ;;  %v3734_v5 = vpop.f32.mrb[5].mxu0  ;;  %v9678_v6 = vpack.c.bf16 %v4150_v53, %v4135_v46 }
 0x25d   :  { %v4138_v7 = vmul.f32 %v4075_v30, %v4029_v60  ;;  %v4044_v19 = vmax.f32 %v4014_v61, 0.0  ;;  %v4001_v8 = vadd.f32 %v9634_v22, %v3734_v5  ;;  %v3736_v9 = vpop.f32.mrb[6].mxu0  ;;  %v9681_v10 = vpack.c.bf16 %v4151_v59, %v4136_v43 }
 0x25e   :  { %v4152_v15 = vmul.f32 %v4071_v35, %v4043_v1  ;;  %v4030_v39 = vmax.f32 %v4000_v2, 0.0  ;;  %v4015_v21 = vadd.f32 %v9644_v32, %v3736_v9  ;;  %v3738_v28 = vpop.f32.mrb[7].mxu0  ;;  %4297 = vrot.lane.b32.xlu1 %v9678_v6, %s8633_s13  ;;  %v4095_v49 = vrot.slane %v9694_v44, %v9632_v20 }
 0x25f   :  { %v4153_v11 = vmul.f32 %v4075_v30, %v4044_v19  ;;  %v4031_v37 = vmax.f32 %v4001_v8, 0.0  ;;  %v4016_v38 = vadd.f32 %v9644_v32, %v3738_v28  ;;  %v3775_v40 = vpop.f32.mrb[4].mxu1  ;;  %v4099_v56 = vrot.slane %v9694_v44, %v4066_v26 }
 0x260   :  { %v4139_v45 = vmul.f32 %v4079_v48, %v4030_v39  ;;  %v4045_v23 = vmax.f32 %v4015_v21, 0.0  ;;  %v4002_v12 = vadd.f32 %v9634_v22, %v3775_v40  ;;  %v3777_v29 = vpop.f32.mrb[5].mxu1  ;;  %v9697_v18 = vpack.c.bf16 %v4152_v15, %v4137_v0 }
 0x261   :  { %v4140_v24 = vmul.f32 %v4083_v52, %v4031_v37  ;;  %v4046_v35 = vmax.f32 %v4016_v38, 0.0  ;;  %v4003_v30 = vadd.f32 %v9634_v22, %v3777_v29  ;;  %v3779_v42 = vpop.f32.mrb[6].mxu1  ;;  %v9700_v46 = vpack.c.bf16 %v4153_v11, %v4138_v7 }
 0x262   :  { %v4154_v25 = vmul.f32 %v4079_v48, %v4045_v23  ;;  %v4032_v36 = vmax.f32 %v4002_v12, 0.0  ;;  %v4017_v47 = vadd.f32 %v9644_v32, %v3779_v42  ;;  %v3781_v43 = vpop.f32.mrb[7].mxu1  ;;  %4299 = vrot.lane.b32.xlu1 %v9681_v10, %s8633_s13  ;;  %v4103_v19 = vrot.slane %v9694_v44, %v4070_v33 }
 0x263   :  { %v4155_v50 = vmul.f32 %v4083_v52, %v4046_v35  ;;  %v4033_v51 = vmax.f32 %v4003_v30, 0.0  ;;  %v4018_v53 = vadd.f32 %v9644_v32, %v3781_v43  ;;  %v3818_v54 = vpop.f32.mrb[8].mxu0  ;;  %4303 = vrot.lane.b32.xlu0 %v9700_v46, %s8633_s13  ;;  %v4107_v21 = vrot.slane %v9694_v44, %v4074_v34 }
 0x264   :  { %v4141_v48 = vmul.f32 %v4087_v31, %v4032_v36  ;;  %v4047_v57 = vmax.f32 %v4017_v47, 0.0  ;;  %v4004_v59 = vadd.f32 %v9634_v22, %v3818_v54  ;;  %v3820_v60 = vpop.f32.mrb[9].mxu0  ;;  %v9714_v61 = vpack.c.bf16 %v4154_v25, %v4139_v45 }
 0x265   :  { %v4142_v62 = vmul.f32 %v4091_v41, %v4033_v51  ;;  %v4048_v52 = vmax.f32 %v4018_v53, 0.0  ;;  %v4005_v63 = vadd.f32 %v9634_v22, %v3820_v60  ;;  %v3822_v0 = vpop.f32.mrb[10].mxu0  ;;  %v9717_v1 = vpack.c.bf16 %v4155_v50, %v4140_v24 }
 0x266   :  { %v4156_v2 = vmul.f32 %v4087_v31, %v4047_v57  ;;  %v4034_v5 = vmax.f32 %v4004_v59, 0.0  ;;  %v4019_v26 = vadd.f32 %v9644_v32, %v3822_v0  ;;  %v3824_v7 = vpop.f32.mrb[11].mxu0  ;;  %4301 = vrot.lane.b32.xlu1 %v9697_v18, %s8633_s13  ;;  %v4111_v35 = vrot.slane %v9694_v44, %v4078_v17 }
 0x267   :  { %v4157_v8 = vmul.f32 %v4091_v41, %v4048_v52  ;;  %v4035_v9 = vmax.f32 %v4005_v63, 0.0  ;;  %v4020_v15 = vadd.f32 %v9644_v32, %v3824_v7  ;;  %v3861_v39 = vpop.f32.mrb[8].mxu1  ;;  %4307 = vrot.lane.b32.xlu0 %v9717_v1, %s8633_s13  ;;  %v4115_v47 = vrot.slane %v9694_v44, %v4082_v4 }
 0x268   :  { %v4143_v28 = vmul.f32 %v4095_v49, %v4034_v5  ;;  %v4049_v31 = vmax.f32 %v4019_v26, 0.0  ;;  %v4006_v11 = vadd.f32 %v9634_v22, %v3861_v39  ;;  %v3863_v33 = vpop.f32.mrb[9].mxu1  ;;  %v9732_v37 = vpack.c.bf16 %v4156_v2, %v4141_v48 }
 0x269   :  { %v4144_v38 = vmul.f32 %v4099_v56, %v4035_v9  ;;  %v4050_v40 = vmax.f32 %v4020_v15, 0.0  ;;  %v4007_v41 = vadd.f32 %v9634_v22, %v3863_v33  ;;  %v3865_v45 = vpop.f32.mrb[10].mxu1  ;;  %v9735_v23 = vpack.c.bf16 %v4157_v8, %v4142_v62 }
 0x26a   :  { %v4158_v12 = vmul.f32 %v4095_v49, %v4049_v31  ;;  %v4036_v29 = vmax.f32 %v4006_v11, 0.0  ;;  %v4021_v34 = vadd.f32 %v9644_v32, %v3865_v45  ;;  %v3867_v24 = vpop.f32.mrb[11].mxu1  ;;  %4305 = vrot.lane.b32.xlu1 %v9714_v61, %s8633_s13  ;;  %v4119_v11 = vrot.slane %v9694_v44, %v4086_v58  ;;  %v4296_v58 = vpop.permute.xlu0 %4295 }
 0x26b   :  { %v4159_v30 = vmul.f32 %v4099_v56, %v4050_v40  ;;  %v4037_v42 = vmax.f32 %v4007_v41, 0.0  ;;  %v4022_v25 = vadd.f32 %v9644_v32, %v3867_v24  ;;  %v3904_v36 = vpop.f32.mrb[12].mxu0  ;;  %4311 = vrot.lane.b32.xlu0 %v9735_v23, %s8633_s13 }
 0x26c   :  { %v4145_v43 = vmul.f32 %v4103_v19, %v4036_v29  ;;  %v4051_v49 = vmax.f32 %v4021_v34, 0.0  ;;  %v4008_v50 = vadd.f32 %v9634_v22, %v3904_v36  ;;  %v3906_v17 = vpop.f32.mrb[13].mxu0  ;;  %v9750_v51 = vpack.c.bf16 %v4158_v12, %v4143_v28 }
 0x26d   :  { %v4146_v53 = vmul.f32 %v4107_v21, %v4037_v42  ;;  %v4052_v54 = vmax.f32 %v4022_v25, 0.0  ;;  %v4009_v56 = vadd.f32 %v9634_v22, %v3906_v17  ;;  %v3908_v48 = vpop.f32.mrb[14].mxu0  ;;  %v9753_v57 = vpack.c.bf16 %v4159_v30, %v4144_v38 }
 0x26e   :  { %v4160_v59 = vmul.f32 %v4103_v19, %v4051_v49  ;;  %v4038_v60 = vmax.f32 %v4008_v50, 0.0  ;;  %v4023_v4 = vadd.f32 %v9644_v32, %v3908_v48  ;;  %v3910_v62 = vpop.f32.mrb[15].mxu0  ;;  %4309 = vrot.lane.b32.xlu1 %v9732_v37, %s8633_s13 }
 0x26f   :  { %v4161_v52 = vmul.f32 %v4107_v21, %v4052_v54  ;;  %v4039_v63 = vmax.f32 %v4009_v56, 0.0  ;;  %v4024_v0 = vadd.f32 %v9644_v32, %v3910_v62  ;;  %v3947_v2 = vpop.f32.mrb[44].mxu1  ;;  %4315 = vrot.lane.b32.xlu0 %v9753_v57, %s8633_s13 }
 0x270   :  { %v4147_v5 = vmul.f32 %v4111_v35, %v4038_v60  ;;  %v4053_v26 = vmax.f32 %v4023_v4, 0.0  ;;  %v3968_v7 = vadd.f32 %v3947_v2, %v9629_v16  ;;  %v8335_v19 = vpop.f32.mrb[45].mxu1  ;;  %v9762_v8 = vpack.c.bf16 %v4160_v59, %v4145_v43 }
 0x271   :  { %v4148_v9 = vmul.f32 %v4115_v47, %v4039_v63  ;;  %v4054_v15 = vmax.f32 %v4024_v0, 0.0  ;;  %v3950_v39 = vpop.f32.mrb[46].mxu1  ;;  %v9764_v28 = vpack.c.bf16 %v4161_v52, %v4146_v53 }
 0x272   :  { %v4162_v21 = vmul.f32 %v4111_v35, %v4053_v26  ;;  %v4010_v31 = vadd.f32 %v9634_v22, %v3968_v7  ;;  %v3983_v33 = vadd.f32 %v3950_v39, %v9642_v27  ;;  %4313 = vrot.lane.b32.xlu1 %v9750_v51, %s8633_s13  ;;  %v8336_v16 = vpop.f32.mrb[47].mxu1  ;;  %v8167_v35 = vld [vmem:[%s10737_s4 + $0x1] sm:$0x1] }
 0x273   :  { %v4163_v38 = vmul.f32 %v4115_v47, %v4054_v15  ;;  %4319 = vrot.lane.b32.xlu0 %v9764_v28, %s8633_s13  ;;  %v9890_v47 = vpack.c.bf16 %v8167_v35, %v8167_v35 }
 0x274   :  { %v4040_v40 = vmax.f32 %v4010_v31, 0.0  ;;  %v4025_v41 = vadd.f32 %v9644_v32, %v3983_v33  ;;  %v9776_v45 = vpack.c.bf16 %v4162_v21, %v4147_v5  ;;  %v9940_v21 = vld [vmem:[#allocation2] sm:$0xff] }
 0x275   :  { %v9778_v22 = vpack.c.bf16 %v4163_v38, %v4148_v9 }
 0x276   :  { %v4149_v12 = vmul.f32 %v4119_v11, %v4040_v40  ;;  %v4055_v29 = vmax.f32 %v4025_v41, 0.0  ;;  %4317 = vrot.lane.b32.xlu1 %v9762_v8, %s8633_s13  ;;  %v4260_v40 = vld [vmem:[%s10737_s4] sm:$0x1] }
 0x277   :  { %4323 = vrot.lane.b32.xlu0 %v9778_v22, %s8633_s13 }
 0x278   :  { %4214 = vst.msk [vmem:[#allocation2 + $0x78] sm:$0xff] %vm4181_vm10, %v4149_v12  ;;  %v4164_v27 = vmul.f32 %v4119_v11, %v4055_v29  ;;  %v9970_v29 = vpack.c.bf16 %v4260_v40, %v4260_v40 }
 0x27a   :  { %4229 = vst.msk [vmem:[#allocation2 + $0x100] sm:$0xff] %vm4181_vm10, %v4164_v27  ;;  %4321 = vrot.lane.b32.xlu1 %v9776_v45, %s8633_s13 }
 0x27b   :  { %4688 = vrot.lane.b32.xlu0 %v9681_v10, %s8635_s11 }
 0x27e   :  { %4686 = vrot.lane.b32.xlu1 %v9678_v6, %s8635_s11 }
 0x27f   :  { %4690 = vrot.lane.b32.xlu0 %v9697_v18, %s8635_s11  ;;  %v5495_v34 = vld [vmem:[#allocation2 + $0x78] sm:$0xff] }
 0x281   :  { %v5511_v32 = vld [vmem:[#allocation2 + $0x100] sm:$0xff] }
 0x282   :  { %4684 = vrot.lane.b32.xlu1 %v9622_v55, %s8635_s11  ;;  %v9877_v24 = vpack.c.bf16 %v5511_v32, %v5495_v34 }
 0x283   :  { %4694 = vrot.lane.b32.xlu0 %v9714_v61, %s8635_s11 }
 0x286   :  { %4692 = vrot.lane.b32.xlu1 %v9700_v46, %s8635_s11 }
 0x287   :  { %4698 = vrot.lane.b32.xlu0 %v9732_v37, %s8635_s11 }
 0x28a   :  { %4696 = vrot.lane.b32.xlu1 %v9717_v1, %s8635_s11 }
 0x28b   :  { %4702 = vrot.lane.b32.xlu0 %v9750_v51, %s8635_s11 }
 0x28e   :  { %4700 = vrot.lane.b32.xlu1 %v9735_v23, %s8635_s11 }
 0x28f   :  { %4706 = vrot.lane.b32.xlu0 %v9762_v8, %s8635_s11 }
 0x292   :  { %4704 = vrot.lane.b32.xlu1 %v9753_v57, %s8635_s11 }
 0x293   :  { %4710 = vrot.lane.b32.xlu0 %v9776_v45, %s8635_s11 }
 0x296   :  { %4708 = vrot.lane.b32.xlu1 %v9764_v28, %s8635_s11 }
 0x297   :  { %5078 = vrot.lane.b32.xlu0 %v9678_v6, %s8636_s12 }
 0x29a   :  { %4712 = vrot.lane.b32.xlu1 %v9778_v22, %s8635_s11 }
 0x29b   :  { %5076 = vrot.lane.b32.xlu0 %v9622_v55, %s8636_s12 }
 0x29e   :  { %5080 = vrot.lane.b32.xlu1 %v9681_v10, %s8636_s12 }
 0x29f   :  { %5084 = vrot.lane.b32.xlu0 %v9700_v46, %s8636_s12 }
 0x2a2   :  { %5082 = vrot.lane.b32.xlu1 %v9697_v18, %s8636_s12 }
 0x2a3   :  { %5088 = vrot.lane.b32.xlu0 %v9717_v1, %s8636_s12 }
 0x2a6   :  { %5086 = vrot.lane.b32.xlu1 %v9714_v61, %s8636_s12 }
 0x2a7   :  { %5092 = vrot.lane.b32.xlu0 %v9735_v23, %s8636_s12 }
 0x2aa   :  { %5090 = vrot.lane.b32.xlu1 %v9732_v37, %s8636_s12 }
 0x2ab   :  { %5096 = vrot.lane.b32.xlu0 %v9753_v57, %s8636_s12 }
 0x2ae   :  { %5094 = vrot.lane.b32.xlu1 %v9750_v51, %s8636_s12 }
 0x2af   :  { %5100 = vrot.lane.b32.xlu0 %v9764_v28, %s8636_s12 }
 0x2b2   :  { %5098 = vrot.lane.b32.xlu1 %v9762_v8, %s8636_s12 }
 0x2b3   :  { %5104 = vrot.lane.b32.xlu0 %v9778_v22, %s8636_s12 }
 0x2b6   :  { %5102 = vrot.lane.b32.xlu1 %v9776_v45, %s8636_s12 }
 0x2b7   :  { %5551 = vrot.lane.b32.xlu0 %v9681_v10, %s8637_s14 }
 0x2ba   :  { %5549 = vrot.lane.b32.xlu1 %v9678_v6, %s8637_s14 }
 0x2bb   :  { %5553 = vrot.lane.b32.xlu0 %v9697_v18, %s8637_s14 }
 0x2be   :  { %5547 = vrot.lane.b32.xlu1 %v9622_v55, %s8637_s14  ;;  %v11_v55 = vstv %s10736_s5 }
 0x2bf   :  { %5557 = vrot.lane.b32.xlu0 %v9714_v61, %s8637_s14  ;;  %12 = vst [vmem:[#allocation3] sm:$0x1] %v11_v55 }
 0x2c2   :  { %5555 = vrot.lane.b32.xlu1 %v9700_v46, %s8637_s14 }
 0x2c3   :  { %5561 = vrot.lane.b32.xlu0 %v9732_v37, %s8637_s14 }
 0x2c6   :  { %5559 = vrot.lane.b32.xlu1 %v9717_v1, %s8637_s14 }
 0x2c7   :  { %5565 = vrot.lane.b32.xlu0 %v9750_v51, %s8637_s14 }
 0x2ca   :  { %5563 = vrot.lane.b32.xlu1 %v9735_v23, %s8637_s14 }
 0x2cb   :  { %5569 = vrot.lane.b32.xlu0 %v9762_v8, %s8637_s14 }
 0x2ce   :  { %5567 = vrot.lane.b32.xlu1 %v9753_v57, %s8637_s14 }
 0x2cf   :  { %5573 = vrot.lane.b32.xlu0 %v9776_v45, %s8637_s14 }
 0x2d0   :  { %v4298_v44 = vpop.permute.xlu1 %4297 }
 0x2d1   :  { %v4325_v36 = vsel %vm123_vm0, %v4296_v58, %v4298_v44 }
 0x2d2   :  { %5571 = vrot.lane.b32.xlu1 %v9764_v28, %s8637_s14 }
 0x2d3   :  { %5577 = vrot.lane.b32.xlu0 %v9877_v24, %s8637_s14 }
 0x2d4   :  { %v4300_v30 = vpop.permute.xlu1 %4299 }
 0x2d5   :  { %v4304_v42 = vpop.permute.xlu0 %4303  ;;  %v4326_v25 = vsel %vm123_vm0, %v4298_v44, %v4300_v30 }
 0x2d6   :  { %5575 = vrot.lane.b32.xlu1 %v9778_v22, %s8637_s14  ;;  %4357 = vmatprep.subr.bf16.mxu0 %v4326_v25 }
 0x2d7   :  { %6309 = vrot.lane.b32.xlu0 %v9697_v18, %s8638_s0  ;;  %4358 = vmatpush1.bf16.msra.mxu0 %v4325_v36 }
 0x2d8   :  { %v4302_v43 = vpop.permute.xlu1 %4301 }
 0x2d9   :  { %v4308_v49 = vpop.permute.xlu0 %4307  ;;  %v4328_v50 = vsel %vm123_vm0, %v4302_v43, %v4304_v42  ;;  %v4327_v17 = vsel %vm123_vm0, %v4300_v30, %v4302_v43 }
 0x2da   :  { %6307 = vrot.lane.b32.xlu1 %v9681_v10, %s8638_s0  ;;  %8168 = vmatmul.mubr.msk.bf16.vlgmr.msra.gmra.mrb[16].mxu0 %vm153_vm1, %v9890_v47 }
 0x2db   :  { %4398 = vmatprep.subr.bf16.mxu1 %v4328_v50  ;;  %6311 = vrot.lane.b32.xlu0 %v9700_v46, %s8638_s0 }
 0x2dc   :  { %4399 = vmatpush1.bf16.msra.mxu1 %v4327_v17  ;;  %v4306_v53 = vpop.permute.xlu1 %4305  ;;  %4471 = vmatprep.mubr.bf16.mxu0 %v8632_v3 }
 0x2dd   :  { %v4312_v54 = vpop.permute.xlu0 %4311  ;;  %v4330_v56 = vsel %vm123_vm0, %v4306_v53, %v4308_v49  ;;  %v4329_v48 = vsel %vm123_vm0, %v4304_v42, %v4306_v53 }
 0x2de   :  { %6305 = vrot.lane.b32.xlu1 %v9678_v6, %s8638_s0  ;;  %4439 = vmatprep.subr.bf16.mxu0 %v4330_v56 }
 0x2df   :  { %8169 = vmatmul.mubr.msk.bf16.vlgmr.msra.gmra.mrb[48].mxu1 %vm153_vm1, %v9890_v47  ;;  %6315 = vrot.lane.b32.xlu0 %v9717_v1, %s8638_s0 }
 0x2e0   :  { %4440 = vmatpush1.bf16.msra.mxu0 %v4329_v48  ;;  %v4310_v59 = vpop.permute.xlu1 %4309  ;;  %4512 = vmatprep.mubr.bf16.mxu1 %v8632_v3 }
 0x2e1   :  { %v4316_v60 = vpop.permute.xlu0 %4315  ;;  %v4332_v4 = vsel %vm123_vm0, %v4310_v59, %v4312_v54  ;;  %v4331_v62 = vsel %vm123_vm0, %v4308_v49, %v4310_v59 }
 0x2e2   :  { %6313 = vrot.lane.b32.xlu1 %v9714_v61, %s8638_s0  ;;  %4480 = vmatprep.subr.bf16.mxu1 %v4332_v4 }
 0x2e3   :  { %8170 = vmatmul.mubr.msk.bf16.vlgmr.msra.gmra.mrb[20].mxu0 %vm153_vm1, %v9890_v47  ;;  %6319 = vrot.lane.b32.xlu0 %v9735_v23, %s8638_s0 }
 0x2e4   :  { %4481 = vmatpush1.bf16.msra.mxu1 %v4331_v62  ;;  %v4314_v52 = vpop.permute.xlu1 %4313  ;;  %4553 = vmatprep.mubr.bf16.mxu0 %v8632_v3 }
 0x2e5   :  { %v4320_v63 = vpop.permute.xlu0 %4319  ;;  %v4334_v0 = vsel %vm123_vm0, %v4314_v52, %v4316_v60  ;;  %v4333_v2 = vsel %vm123_vm0, %v4312_v54, %v4314_v52 }
 0x2e6   :  { %6317 = vrot.lane.b32.xlu1 %v9732_v37, %s8638_s0  ;;  %4521 = vmatprep.subr.bf16.mxu0 %v4334_v0 }
 0x2e7   :  { %8171 = vmatmul.mubr.msk.bf16.vlgmr.msra.gmra.mrb[52].mxu1 %vm153_vm1, %v9890_v47  ;;  %6323 = vrot.lane.b32.xlu0 %v9753_v57, %s8638_s0 }
 0x2e8   :  { %4522 = vmatpush1.bf16.msra.mxu0 %v4333_v2  ;;  %v4318_v5 = vpop.permute.xlu1 %4317  ;;  %4594 = vmatprep.mubr.bf16.mxu1 %v8632_v3 }
 0x2e9   :  { %v4324_v26 = vpop.permute.xlu0 %4323  ;;  %v4336_v7 = vsel %vm123_vm0, %v4318_v5, %v4320_v63  ;;  %v4335_v19 = vsel %vm123_vm0, %v4316_v60, %v4318_v5 }
 0x2ea   :  { %6321 = vrot.lane.b32.xlu1 %v9750_v51, %s8638_s0  ;;  %4562 = vmatprep.subr.bf16.mxu1 %v4336_v7 }
 0x2eb   :  { %8172 = vmatmul.mubr.msk.bf16.vlgmr.msra.gmra.mrb[24].mxu0 %vm153_vm1, %v9890_v47  ;;  %6327 = vrot.lane.b32.xlu0 %v9764_v28, %s8638_s0 }
 0x2ec   :  { %4563 = vmatpush1.bf16.msra.mxu1 %v4335_v19  ;;  %v4322_v9 = vpop.permute.xlu1 %4321  ;;  %4635 = vmatprep.mubr.bf16.mxu0 %v8632_v3 }
 0x2ed   :  { %v4689_v15 = vpop.permute.xlu0 %4688  ;;  %v4338_v39 = vsel %vm123_vm0, %v4322_v9, %v4324_v26  ;;  %8337 = vmatprep.subr.bf16.mxu1 %v9940_v21  ;;  %v4337_v31 = vsel %vm123_vm0, %v4320_v63, %v4322_v9 }
 0x2ee   :  { %6325 = vrot.lane.b32.xlu1 %v9762_v8, %s8638_s0  ;;  %4603 = vmatprep.subr.bf16.mxu0 %v4338_v39 }
 0x2ef   :  { %8173 = vmatmul.mubr.msk.bf16.vlgmr.msra.gmra.mrb[56].mxu1 %vm153_vm1, %v9890_v47  ;;  %6331 = vrot.lane.b32.xlu0 %v9778_v22, %s8638_s0 }
 0x2f0   :  { %4604 = vmatpush1.bf16.msra.mxu0 %v4337_v31  ;;  %8338 = vmatpush3.bf16.msra.mxu1 %v4324_v26  ;;  %v4687_v11 = vpop.permute.xlu1 %4686  ;;  %v8184_v26 = vld [vmem:[%s10737_s4 + $0x2] sm:$0x1] }
 0x2f1   :  { %v4691_v33 = vpop.permute.xlu0 %4690  ;;  %v4715_v16 = vsel %vm529_vm2, %v4687_v11, %v4689_v15  ;;  %8339 = vmatprep.mubr.msk.bf16.mxu1 %vm8639_vm3, %v9940_v21 }
 0x2f2   :  { %6329 = vrot.lane.b32.xlu1 %v9776_v45, %s8638_s0  ;;  %4746 = vmatprep.subr.bf16.mxu0 %v4715_v16  ;;  %v4716_v58 = vsel %vm529_vm2, %v4689_v15, %v4691_v33  ;;  %v10049_v15 = vpack.c.bf16 %v8184_v26, %v8184_v26 }
 0x2f3   :  { %8174 = vmatmul.mubr.msk.bf16.vlgmr.msra.gmra.mrb[28].mxu0 %vm153_vm1, %v9890_v47  ;;  %6714 = vrot.lane.b32.xlu0 %v9681_v10, %s8640_s27 }
 0x2f4   :  { %v4685_v38 = vpop.permute.xlu1 %4684  ;;  %4778 = vmatprep.mubr.bf16.mxu0 %v8632_v3 }
 0x2f5   :  { %v4714_v41 = vsel %vm529_vm2, %v4685_v38, %v4687_v11  ;;  %v4695_v12 = vpop.permute.xlu0 %4694 }
 0x2f6   :  { %6333 = vrot.lane.b32.xlu1 %v9877_v24, %s8638_s0  ;;  %4747 = vmatpush1.bf16.msra.mxu0 %v4714_v41 }
 0x2f7   :  { %8340 = vmatmul.mubr.msk.bf16.vlgmr.msra.gmra.mrb[60].mxu1 %vm153_vm1, %v9890_v47  ;;  %6712 = vrot.lane.b32.xlu0 %v9678_v6, %s8640_s27 }
 0x2f8   :  { %v4693_v27 = vpop.permute.xlu1 %4692  ;;  %4819 = vmatprep.mubr.bf16.mxu1 %v8632_v3 }
 0x2f9   :  { %v4699_v55 = vpop.permute.xlu0 %4698  ;;  %v4717_v32 = vsel %vm529_vm2, %v4691_v33, %v4693_v27  ;;  %v4718_v30 = vsel %vm529_vm2, %v4693_v27, %v4695_v12 }
 0x2fa   :  { %6716 = vrot.lane.b32.xlu1 %v9697_v18, %s8640_s27  ;;  %4787 = vmatprep.subr.bf16.mxu1 %v4717_v32 }
 0x2fb   :  { %8176 = vmatmul.mubr.msk.bf16.vlgmr.msra.gmra.mrb[32].mxu0 %vm153_vm1, %v9970_v29  ;;  %6720 = vrot.lane.b32.xlu0 %v9714_v61, %s8640_s27 }
 0x2fc   :  { %4788 = vmatpush1.bf16.msra.mxu1 %v4716_v58  ;;  %v4697_v44 = vpop.permute.xlu1 %4696  ;;  %4860 = vmatprep.mubr.bf16.mxu0 %v8632_v3 }
 0x2fd   :  { %v4703_v34 = vpop.permute.xlu0 %4702  ;;  %v4719_v35 = vsel %vm529_vm2, %v4695_v12, %v4697_v44  ;;  %v4720_v47 = vsel %vm529_vm2, %v4697_v44, %v4699_v55 }
 0x2fe   :  { %6718 = vrot.lane.b32.xlu1 %v9700_v46, %s8640_s27  ;;  %4828 = vmatprep.subr.bf16.mxu0 %v4719_v35 }
 0x2ff   :  { %8177 = vmatmul.mubr.msk.bf16.vlgmr.msra.gmra.mrb[64].mxu1 %vm153_vm1, %v9970_v29  ;;  %6724 = vrot.lane.b32.xlu0 %v9732_v37, %s8640_s27 }
 0x300   :  { %4829 = vmatpush1.bf16.msra.mxu0 %v4718_v30  ;;  %v4701_v42 = vpop.permute.xlu1 %4700  ;;  %4901 = vmatprep.mubr.bf16.mxu1 %v8632_v3 }
 0x301   :  { %v4707_v25 = vpop.permute.xlu0 %4706  ;;  %v4721_v36 = vsel %vm529_vm2, %v4699_v55, %v4701_v42  ;;  %v4722_v17 = vsel %vm529_vm2, %v4701_v42, %v4703_v34 }
 0x302   :  { %6722 = vrot.lane.b32.xlu1 %v9717_v1, %s8640_s27  ;;  %4869 = vmatprep.subr.bf16.mxu1 %v4721_v36 }
 0x303   :  { %8178 = vmatmul.mubr.msk.bf16.vlgmr.msra.gmra.mrb[36].mxu0 %vm153_vm1, %v9970_v29  ;;  %6728 = vrot.lane.b32.xlu0 %v9750_v51, %s8640_s27 }
 0x304   :  { %4870 = vmatpush1.bf16.msra.mxu1 %v4720_v47  ;;  %v4705_v43 = vpop.permute.xlu1 %4704  ;;  %4942 = vmatprep.mubr.bf16.mxu0 %v8632_v3 }
 0x305   :  { %v4711_v49 = vpop.permute.xlu0 %4710  ;;  %v4723_v50 = vsel %vm529_vm2, %v4703_v34, %v4705_v43  ;;  %v4724_v48 = vsel %vm529_vm2, %v4705_v43, %v4707_v25 }
 0x306   :  { %6726 = vrot.lane.b32.xlu1 %v9735_v23, %s8640_s27  ;;  %4910 = vmatprep.subr.bf16.mxu0 %v4723_v50 }
 0x307   :  { %8179 = vmatmul.mubr.msk.bf16.vlgmr.msra.gmra.mrb[68].mxu1 %vm153_vm1, %v9970_v29  ;;  %6732 = vrot.lane.b32.xlu0 %v9762_v8, %s8640_s27 }
 0x308   :  { %4911 = vmatpush1.bf16.msra.mxu0 %v4722_v17  ;;  %v4709_v53 = vpop.permute.xlu1 %4708  ;;  %4983 = vmatprep.mubr.bf16.mxu1 %v8632_v3 }
 0x309   :  { %v5079_v54 = vpop.permute.xlu0 %5078  ;;  %v4725_v56 = vsel %vm529_vm2, %v4707_v25, %v4709_v53  ;;  %v4726_v62 = vsel %vm529_vm2, %v4709_v53, %v4711_v49 }
 0x30a   :  { %6730 = vrot.lane.b32.xlu1 %v9753_v57, %s8640_s27  ;;  %4951 = vmatprep.subr.bf16.mxu1 %v4725_v56 }
 0x30b   :  { %8180 = vmatmul.mubr.msk.bf16.vlgmr.msra.gmra.mrb[40].mxu0 %vm153_vm1, %v9970_v29  ;;  %6736 = vrot.lane.b32.xlu0 %v9776_v45, %s8640_s27 }
 0x30c   :  { %4952 = vmatpush1.bf16.msra.mxu1 %v4724_v48  ;;  %v4713_v59 = vpop.permute.xlu1 %4712  ;;  %5024 = vmatprep.mubr.bf16.mxu0 %v8632_v3 }
 0x30d   :  { %v5077_v60 = vpop.permute.xlu0 %5076  ;;  %v4727_v4 = vsel %vm529_vm2, %v4711_v49, %v4713_v59  ;;  %8343 = vmatprep.subr.bf16.mxu1 %v9940_v21 }
 0x30e   :  { %6734 = vrot.lane.b32.xlu1 %v9764_v28, %s8640_s27  ;;  %4992 = vmatprep.subr.bf16.mxu0 %v4727_v4  ;;  %v5106_v2 = vsel %vm938_vm4, %v5077_v60, %v5079_v54 }
 0x30f   :  { %8181 = vmatmul.mubr.msk.bf16.vlgmr.msra.gmra.mrb[72].mxu1 %vm153_vm1, %v9970_v29  ;;  %6740 = vrot.lane.b32.xlu0 %v9877_v24, %s8640_s27 }
 0x310   :  { %4993 = vmatpush1.bf16.msra.mxu0 %v4726_v62  ;;  %8344 = vmatpush3.bf16.msra.mxu1 %v4713_v59  ;;  %v5081_v52 = vpop.permute.xlu1 %5080 }
 0x311   :  { %v5085_v63 = vpop.permute.xlu0 %5084  ;;  %v5107_v0 = vsel %vm938_vm4, %v5079_v54, %v5081_v52  ;;  %8345 = vmatprep.mubr.msk.bf16.mxu1 %vm8639_vm3, %v9940_v21  ;;  %v8193_v54 = vld [vmem:[%s10737_s4 + $0x3] sm:$0x1] }
 0x312   :  { %6738 = vrot.lane.b32.xlu1 %v9778_v22, %s8640_s27  ;;  %5138 = vmatprep.subr.bf16.mxu0 %v5107_v0  ;;  %v10126_v60 = vpack.c.bf16 %v8193_v54, %v8193_v54 }
 0x313   :  { %8182 = vmatmul.mubr.msk.bf16.vlgmr.msra.gmra.mrb[44].mxu0 %vm153_vm1, %v9970_v29  ;;  %7123 = vrot.lane.b32.xlu0 %v9697_v18, %s8641_s8 }
 0x314   :  { %5139 = vmatpush1.bf16.msra.mxu0 %v5106_v2  ;;  %v5083_v5 = vpop.permute.xlu1 %5082  ;;  %5170 = vmatprep.mubr.bf16.mxu0 %v8632_v3 }
 0x315   :  { %v5108_v7 = vsel %vm938_vm4, %v5081_v52, %v5083_v5  ;;  %v5089_v19 = vpop.permute.xlu0 %5088  ;;  %v5109_v9 = vsel %vm938_vm4, %v5083_v5, %v5085_v63 }
 0x316   :  { %7121 = vrot.lane.b32.xlu1 %v9681_v10, %s8641_s8  ;;  %5179 = vmatprep.subr.bf16.mxu1 %v5109_v9 }
 0x317   :  { %8346 = vmatmul.mubr.msk.bf16.vlgmr.msra.gmra.mrb[76].mxu1 %vm153_vm1, %v9970_v29  ;;  %7125 = vrot.lane.b32.xlu0 %v9700_v46, %s8641_s8 }
 0x318   :  { %5180 = vmatpush1.bf16.msra.mxu1 %v5108_v7  ;;  %v5087_v39 = vpop.permute.xlu1 %5086  ;;  %5211 = vmatprep.mubr.bf16.mxu1 %v8632_v3 }
 0x319   :  { %v5110_v31 = vsel %vm938_vm4, %v5085_v63, %v5087_v39  ;;  %v5093_v11 = vpop.permute.xlu0 %5092  ;;  %v5111_v33 = vsel %vm938_vm4, %v5087_v39, %v5089_v19 }
 0x31a   :  { %7119 = vrot.lane.b32.xlu1 %v9678_v6, %s8641_s8  ;;  %5220 = vmatprep.subr.bf16.mxu0 %v5111_v33 }
 0x31b   :  { %8185 = vmatmul.mubr.msk.bf16.vlgmr.msra.gmra.mrb[48].mxu0 %vm153_vm1, %v10049_v15  ;;  %7129 = vrot.lane.b32.xlu0 %v9717_v1, %s8641_s8 }
 0x31c   :  { %5221 = vmatpush1.bf16.msra.mxu0 %v5110_v31  ;;  %v5091_v16 = vpop.permute.xlu1 %5090  ;;  %5252 = vmatprep.mubr.bf16.mxu0 %v8632_v3 }
 0x31d   :  { %v5112_v38 = vsel %vm938_vm4, %v5089_v19, %v5091_v16  ;;  %v5097_v40 = vpop.permute.xlu0 %5096  ;;  %v5113_v41 = vsel %vm938_vm4, %v5091_v16, %v5093_v11 }
 0x31e   :  { %7127 = vrot.lane.b32.xlu1 %v9714_v61, %s8641_s8  ;;  %5261 = vmatprep.subr.bf16.mxu1 %v5113_v41 }
 0x31f   :  { %8186 = vmatmul.mubr.msk.bf16.vlgmr.msra.gmra.mrb[80].mxu1 %vm153_vm1, %v10049_v15  ;;  %7133 = vrot.lane.b32.xlu0 %v9735_v23, %s8641_s8 }
 0x320   :  { %5262 = vmatpush1.bf16.msra.mxu1 %v5112_v38  ;;  %v5095_v12 = vpop.permute.xlu1 %5094  ;;  %5293 = vmatprep.mubr.bf16.mxu1 %v8632_v3 }
 0x321   :  { %v5114_v29 = vsel %vm938_vm4, %v5093_v11, %v5095_v12  ;;  %v5101_v27 = vpop.permute.xlu0 %5100  ;;  %v5115_v55 = vsel %vm938_vm4, %v5095_v12, %v5097_v40 }
 0x322   :  { %7131 = vrot.lane.b32.xlu1 %v9732_v37, %s8641_s8  ;;  %5302 = vmatprep.subr.bf16.mxu0 %v5115_v55  ;;  %v7930_v55 = vld [vmem:[#allocation3] sm:$0x1] }
 0x323   :  { %8187 = vmatmul.mubr.msk.bf16.vlgmr.msra.gmra.mrb[52].mxu0 %vm153_vm1, %v10049_v15  ;;  %7137 = vrot.lane.b32.xlu0 %v9753_v57, %s8641_s8 }
 0x324   :  { %5303 = vmatpush1.bf16.msra.mxu0 %v5114_v29  ;;  %v5099_v32 = vpop.permute.xlu1 %5098  ;;  %5334 = vmatprep.mubr.bf16.mxu0 %v8632_v3 }
 0x325   :  { %v5116_v58 = vsel %vm938_vm4, %v5097_v40, %v5099_v32  ;;  %v5105_v44 = vpop.permute.xlu0 %5104  ;;  %v5117_v34 = vsel %vm938_vm4, %v5099_v32, %v5101_v27 }
 0x326   :  { %7135 = vrot.lane.b32.xlu1 %v9750_v51, %s8641_s8  ;;  %5343 = vmatprep.subr.bf16.mxu1 %v5117_v34 }
 0x327   :  { %8188 = vmatmul.mubr.msk.bf16.vlgmr.msra.gmra.mrb[84].mxu1 %vm153_vm1, %v10049_v15  ;;  %7141 = vrot.lane.b32.xlu0 %v9764_v28, %s8641_s8 }
 0x328   :  { %5344 = vmatpush1.bf16.msra.mxu1 %v5116_v58  ;;  %v5103_v35 = vpop.permute.xlu1 %5102  ;;  %5375 = vmatprep.mubr.bf16.mxu1 %v8632_v3 }
 0x329   :  { %v5118_v30 = vsel %vm938_vm4, %v5101_v27, %v5103_v35  ;;  %v5552_v42 = vpop.permute.xlu0 %5551  ;;  %v5119_v25 = vsel %vm938_vm4, %v5103_v35, %v5105_v44  ;;  %8349 = vmatprep.subr.bf16.mxu1 %v9940_v21 }
 0x32a   :  { %7139 = vrot.lane.b32.xlu1 %v9762_v8, %s8641_s8  ;;  %5384 = vmatprep.subr.bf16.mxu0 %v5119_v25 }
 0x32b   :  { %8189 = vmatmul.mubr.msk.bf16.vlgmr.msra.gmra.mrb[56].mxu0 %vm153_vm1, %v10049_v15  ;;  %7145 = vrot.lane.b32.xlu0 %v9778_v22, %s8641_s8 }
 0x32c   :  { %5385 = vmatpush1.bf16.msra.mxu0 %v5118_v30  ;;  %v5550_v36 = vpop.permute.xlu1 %5549  ;;  %5416 = vmatprep.mubr.bf16.mxu0 %v8632_v3 }
 0x32d   :  { %v5554_v47 = vpop.permute.xlu0 %5553  ;;  %v5580_v43 = vsel %vm1443_vm5, %v5550_v36, %v5552_v42 }
 0x32e   :  { %7143 = vrot.lane.b32.xlu1 %v9776_v45, %s8641_s8  ;;  %5612 = vmatprep.subr.bf16.mxu0 %v5580_v43  ;;  %v5581_v59 = vsel %vm1443_vm5, %v5552_v42, %v5554_v47  ;;  %v8211_v43 = vld [vmem:[%s10737_s4 + $0x5] sm:$0x1] }
 0x32f   :  { %8190 = vmatmul.mubr.msk.bf16.vlgmr.msra.gmra.mrb[88].mxu1 %vm153_vm1, %v10049_v15  ;;  %7528 = vrot.lane.b32.xlu0 %v9681_v10, %s8642_s17 }
 0x330   :  { %8350 = vmatpush3.bf16.msra.mxu1 %v5105_v44  ;;  %v5548_v49 = vpop.permute.xlu1 %5547  ;;  %8351 = vmatprep.mubr.msk.bf16.mxu1 %vm8639_vm3, %v9940_v21  ;;  %v8202_v44 = vld [vmem:[%s10737_s4 + $0x4] sm:$0x1] }
 0x331   :  { %v5579_v50 = vsel %vm1443_vm5, %v5548_v49, %v5550_v36  ;;  %v5558_v17 = vpop.permute.xlu0 %5557 }
 0x332   :  { %7147 = vrot.lane.b32.xlu1 %v9877_v24, %s8641_s8 }
 0x333   :  { %8191 = vmatmul.mubr.msk.bf16.vlgmr.msra.gmra.mrb[60].mxu0 %vm153_vm1, %v10049_v15  ;;  %7526 = vrot.lane.b32.xlu0 %v9678_v6, %s8642_s17 }
 0x334   :  { %5613 = vmatpush1.bf16.msra.mxu0 %v5579_v50  ;;  %v5556_v53 = vpop.permute.xlu1 %5555  ;;  %5644 = vmatprep.mubr.bf16.mxu0 %v8632_v3 }
 0x335   :  { %v5562_v56 = vpop.permute.xlu0 %5561  ;;  %v5582_v48 = vsel %vm1443_vm5, %v5554_v47, %v5556_v53  ;;  %v5583_v63 = vsel %vm1443_vm5, %v5556_v53, %v5558_v17 }
 0x336   :  { %7530 = vrot.lane.b32.xlu1 %v9697_v18, %s8642_s17  ;;  %5653 = vmatprep.subr.bf16.mxu1 %v5582_v48 }
 0x337   :  { %8352 = vmatmul.mubr.msk.bf16.vlgmr.msra.gmra.mrb[92].mxu1 %vm153_vm1, %v10049_v15  ;;  %7534 = vrot.lane.b32.xlu0 %v9714_v61, %s8642_s17 }
 0x338   :  { %5654 = vmatpush1.bf16.msra.mxu1 %v5581_v59  ;;  %v5560_v4 = vpop.permute.xlu1 %5559  ;;  %5685 = vmatprep.mubr.bf16.mxu1 %v8632_v3 }
 0x339   :  { %v5566_v62 = vpop.permute.xlu0 %5565  ;;  %v5584_v52 = vsel %vm1443_vm5, %v5558_v17, %v5560_v4  ;;  %v5585_v26 = vsel %vm1443_vm5, %v5560_v4, %v5562_v56  ;;  %v6304_v17 = vpack.c.bf16 %v8211_v43, %v8211_v43 }
 0x33a   :  { %7532 = vrot.lane.b32.xlu1 %v9700_v46, %s8642_s17  ;;  %5694 = vmatprep.subr.bf16.mxu0 %v5584_v52 }
 0x33b   :  { %8194 = vmatmul.mubr.msk.bf16.vlgmr.msra.gmra.mrb[64].mxu0 %vm153_vm1, %v10126_v60  ;;  %7538 = vrot.lane.b32.xlu0 %v9732_v37, %s8642_s17 }
 0x33c   :  { %5695 = vmatpush1.bf16.msra.mxu0 %v5583_v63  ;;  %v5564_v0 = vpop.permute.xlu1 %5563  ;;  %5726 = vmatprep.mubr.bf16.mxu0 %v8632_v3 }
 0x33d   :  { %v5570_v2 = vpop.permute.xlu0 %5569  ;;  %v5586_v5 = vsel %vm1443_vm5, %v5562_v56, %v5564_v0  ;;  %v5587_v15 = vsel %vm1443_vm5, %v5564_v0, %v5566_v62 }
 0x33e   :  { %7536 = vrot.lane.b32.xlu1 %v9717_v1, %s8642_s17  ;;  %5735 = vmatprep.subr.bf16.mxu1 %v5586_v5 }
 0x33f   :  { %8195 = vmatmul.mubr.msk.bf16.vlgmr.msra.gmra.mrb[96].mxu1 %vm153_vm1, %v10126_v60  ;;  %7542 = vrot.lane.b32.xlu0 %v9750_v51, %s8642_s17 }
 0x340   :  { %5736 = vmatpush1.bf16.msra.mxu1 %v5585_v26  ;;  %v5568_v7 = vpop.permute.xlu1 %5567  ;;  %5767 = vmatprep.mubr.bf16.mxu1 %v8632_v3 }
 0x341   :  { %v5574_v19 = vpop.permute.xlu0 %5573  ;;  %v5588_v9 = vsel %vm1443_vm5, %v5566_v62, %v5568_v7  ;;  %v5589_v33 = vsel %vm1443_vm5, %v5568_v7, %v5570_v2 }
 0x342   :  { %7540 = vrot.lane.b32.xlu1 %v9735_v23, %s8642_s17  ;;  %5776 = vmatprep.subr.bf16.mxu0 %v5588_v9 }
 0x343   :  { %8196 = vmatmul.mubr.msk.bf16.vlgmr.msra.gmra.mrb[68].mxu0 %vm153_vm1, %v10126_v60  ;;  %7546 = vrot.lane.b32.xlu0 %v9762_v8, %s8642_s17 }
 0x344   :  { %5777 = vmatpush1.bf16.msra.mxu0 %v5587_v15  ;;  %v5572_v39 = vpop.permute.xlu1 %5571  ;;  %5808 = vmatprep.mubr.bf16.mxu0 %v8632_v3 }
 0x345   :  { %v5578_v31 = vpop.permute.xlu0 %5577  ;;  %v5590_v11 = vsel %vm1443_vm5, %v5570_v2, %v5572_v39  ;;  %v5591_v41 = vsel %vm1443_vm5, %v5572_v39, %v5574_v19 }
 0x346   :  { %7544 = vrot.lane.b32.xlu1 %v9753_v57, %s8642_s17  ;;  %5817 = vmatprep.subr.bf16.mxu1 %v5590_v11 }
 0x347   :  { %8197 = vmatmul.mubr.msk.bf16.vlgmr.msra.gmra.mrb[100].mxu1 %vm153_vm1, %v10126_v60  ;;  %7550 = vrot.lane.b32.xlu0 %v9776_v45, %s8642_s17 }
 0x348   :  { %5818 = vmatpush1.bf16.msra.mxu1 %v5589_v33  ;;  %v5576_v16 = vpop.permute.xlu1 %5575  ;;  %5849 = vmatprep.mubr.bf16.mxu1 %v8632_v3 }
 0x349   :  { %v10165_v38 = vpop.permute.xlu0 %6309  ;;  %v5592_v40 = vsel %vm1443_vm5, %v5574_v19, %v5576_v16  ;;  %8355 = vmatprep.subr.bf16.mxu1 %v9940_v21  ;;  %v5593_v27 = vsel %vm1443_vm5, %v5576_v16, %v5578_v31 }
 0x34a   :  { %7548 = vrot.lane.b32.xlu1 %v9764_v28, %s8642_s17  ;;  %5858 = vmatprep.subr.bf16.mxu0 %v5592_v40 }
 0x34b   :  { %8198 = vmatmul.mubr.msk.bf16.vlgmr.msra.gmra.mrb[72].mxu0 %vm153_vm1, %v10126_v60  ;;  %7554 = vrot.lane.b32.xlu0 %v9877_v24, %s8642_s17 }
 0x34c   :  { %5859 = vmatpush1.bf16.msra.mxu0 %v5591_v41  ;;  %v10176_v12 = vpop.permute.xlu1 %6307  ;;  %5890 = vmatprep.mubr.bf16.mxu0 %v8632_v3 }
 0x34d   :  { %5960 = vmatprep.subr.bf16.mxu0 %v9681_v10  ;;  %v10180_v29 = vpop.permute.xlu0 %6311 }
 0x34e   :  { %7552 = vrot.lane.b32.xlu1 %v9778_v22, %s8642_s17  ;;  %v6337_v49 = vsel %vm2262_vm6, %v10165_v38, %v10180_v29 }
 0x34f   :  { %8199 = vmatmul.mubr.msk.bf16.vlgmr.msra.gmra.mrb[104].mxu1 %vm153_vm1, %v10126_v60 }
 0x350   :  { %8356 = vmatpush3.bf16.msra.mxu1 %v5593_v27  ;;  %v6306_v32 = vpop.permute.xlu1 %6305  ;;  %8357 = vmatprep.mubr.msk.bf16.mxu1 %vm8639_vm3, %v9940_v21 }
 0x351   :  { %6001 = vmatprep.subr.bf16.mxu1 %v9700_v46  ;;  %v10190_v58 = vpop.permute.xlu0 %6315  ;;  %v5956_v46 = vpack.c.bf16 %v8202_v44, %v8202_v44  ;;  %v6335_v36 = vsel %vm2262_vm6, %v6306_v32, %v10176_v12 }
 0x352   :  { %7933 = vperm.xlu1 %8627, %v7930_v55  }
 0x353   :  { %8200 = vmatmul.mubr.msk.bf16.vlgmr.msra.gmra.mrb[76].mxu0 %vm153_vm1, %v10126_v60 }
 0x354   :  { %5961 = vmatpush1.bf16.msra.mxu0 %v9678_v6  ;;  %v10195_v10 = vpop.permute.xlu1 %6313  ;;  %5992 = vmatprep.mubr.bf16.mxu0 %v8632_v3 }
 0x355   :  { %6042 = vmatprep.subr.bf16.mxu0 %v9717_v1  ;;  %v10202_v34 = vpop.permute.xlu0 %6319  ;;  %v6338_v42 = vsel %vm2262_vm6, %v10180_v29, %v10195_v10  ;;  %v6339_v56 = vsel %vm2262_vm6, %v10195_v10, %v10190_v58 }
 0x357   :  { %8358 = vmatmul.mubr.msk.bf16.vlgmr.msra.gmra.mrb[108].mxu1 %vm153_vm1, %v10126_v60 }
 0x358   :  { %6002 = vmatpush1.bf16.msra.mxu1 %v9697_v18  ;;  %v10207_v35 = vpop.permute.xlu1 %6317  ;;  %6033 = vmatprep.mubr.bf16.mxu1 %v8632_v3 }
 0x359   :  { %6083 = vmatprep.subr.bf16.mxu1 %v9735_v23  ;;  %v10211_v6 = vpop.permute.xlu0 %6323  ;;  %v6341_v4 = vsel %vm2262_vm6, %v10207_v35, %v10202_v34 }
 0x35b   :  { %8203 = vmatmul.mubr.msk.bf16.vlgmr.msra.gmra.mrb[80].mxu0 %vm153_vm1, %v5956_v46 }
 0x35c   :  { %6043 = vmatpush1.bf16.msra.mxu0 %v9714_v61  ;;  %v10215_v1 = vpop.permute.xlu1 %6321  ;;  %6074 = vmatprep.mubr.bf16.mxu0 %v8632_v3 }
 0x35d   :  { %6124 = vmatprep.subr.bf16.mxu0 %v9753_v57  ;;  %v10219_v30 = vpop.permute.xlu0 %6327  ;;  %v6342_v53 = vsel %vm2262_vm6, %v10202_v34, %v10215_v1  ;;  %v6343_v63 = vsel %vm2262_vm6, %v10215_v1, %v10211_v6 }
 0x35f   :  { %8204 = vmatmul.mubr.msk.bf16.vlgmr.msra.gmra.mrb[112].mxu1 %vm153_vm1, %v5956_v46 }
 0x360   :  { %6084 = vmatpush1.bf16.msra.mxu1 %v9732_v37  ;;  %v10223_v18 = vpop.permute.xlu1 %6325  ;;  %6115 = vmatprep.mubr.bf16.mxu1 %v8632_v3 }
 0x361   :  { %6165 = vmatprep.subr.bf16.mxu1 %v9764_v28  ;;  %v10227_v23 = vpop.permute.xlu0 %6331  ;;  %v6344_v48 = vsel %vm2262_vm6, %v10211_v6, %v10223_v18  ;;  %v6345_v5 = vsel %vm2262_vm6, %v10223_v18, %v10219_v30 }
 0x363   :  { %8205 = vmatmul.mubr.msk.bf16.vlgmr.msra.gmra.mrb[84].mxu0 %vm153_vm1, %v5956_v46 }
 0x364   :  { %6125 = vmatpush1.bf16.msra.mxu0 %v9750_v51  ;;  %v10231_v61 = vpop.permute.xlu1 %6329  ;;  %6156 = vmatprep.mubr.bf16.mxu0 %v8632_v3  ;;  %v6336_v51 = vsel %vm2262_vm6, %v10176_v12, %v10165_v38  ;;  %v8220_v38 = vld [vmem:[%s10737_s4 + $0x6] sm:$0x1] }
 0x365   :  { %6206 = vmatprep.subr.bf16.mxu0 %v9778_v22  ;;  %v10235_v57 = vpop.permute.xlu0 %6714  ;;  %v6346_v62 = vsel %vm2262_vm6, %v10219_v30, %v10231_v61  ;;  %v6347_v19 = vsel %vm2262_vm6, %v10231_v61, %v10227_v23  ;;  %v10370_v12 = vpack.c.bf16 %v8220_v38, %v8220_v38 }
 0x367   :  { %8206 = vmatmul.mubr.msk.bf16.vlgmr.msra.gmra.mrb[116].mxu1 %vm153_vm1, %v5956_v46 }
 0x368   :  { %6166 = vmatpush1.bf16.msra.mxu1 %v9762_v8  ;;  %v10239_v37 = vpop.permute.xlu1 %6333  ;;  %6197 = vmatprep.mubr.bf16.mxu1 %v8632_v3 }
 0x369   :  { %v10242_v28 = vpop.permute.xlu0 %6712  ;;  %8361 = vmatprep.subr.bf16.mxu1 %v9940_v21  ;;  %v6348_v2 = vsel %vm2262_vm6, %v10227_v23, %v10239_v37 }
 0x36a   :  { %v6742_v11 = vsel %vm2701_vm7, %v10242_v28, %v10235_v57 }
 0x36b   :  { %8207 = vmatmul.mubr.msk.bf16.vlgmr.msra.gmra.mrb[88].mxu0 %vm153_vm1, %v5956_v46 }
 0x36c   :  { %6207 = vmatpush1.bf16.msra.mxu0 %v9776_v45  ;;  %v10250_v22 = vpop.permute.xlu1 %6716  ;;  %6238 = vmatprep.mubr.bf16.mxu0 %v8632_v3 }
 0x36d   :  { %6367 = vmatprep.subr.bf16.mxu0 %v6336_v51  ;;  %v10253_v8 = vpop.permute.xlu0 %6720  ;;  %v6743_v9 = vsel %vm2701_vm7, %v10235_v57, %v10250_v22 }
 0x36f   :  { %8208 = vmatmul.mubr.msk.bf16.vlgmr.msra.gmra.mrb[120].mxu1 %vm153_vm1, %v5956_v46 }
 0x370   :  { %8362 = vmatpush3.bf16.msra.mxu1 %v9877_v24  ;;  %v10260_v45 = vpop.permute.xlu1 %6718  ;;  %8363 = vmatprep.mubr.msk.bf16.mxu1 %vm8639_vm3, %v9940_v21  ;;  %v6340_v24 = vsel %vm2262_vm6, %v10190_v58, %v10207_v35 }
 0x371   :  { %6408 = vmatprep.subr.bf16.mxu1 %v6338_v42  ;;  %v10264_v25 = vpop.permute.xlu0 %6724  ;;  %v6745_v31 = vsel %vm2701_vm7, %v10260_v45, %v10253_v8  ;;  %v6744_v41 = vsel %vm2701_vm7, %v10250_v22, %v10260_v45 }
 0x373   :  { %8209 = vmatmul.mubr.msk.bf16.vlgmr.msra.gmra.mrb[92].mxu0 %vm153_vm1, %v5956_v46 }
 0x374   :  { %6368 = vmatpush1.bf16.msra.mxu0 %v6335_v36  ;;  %v10272_v47 = vpop.permute.xlu1 %6722  ;;  %6399 = vmatprep.mubr.bf16.mxu0 %v8632_v3 }
 0x375   :  { %6449 = vmatprep.subr.bf16.mxu0 %v6340_v24  ;;  %v10281_v50 = vpop.permute.xlu0 %6728  ;;  %v6747_v16 = vsel %vm2701_vm7, %v10272_v47, %v10264_v25  ;;  %v6746_v55 = vsel %vm2701_vm7, %v10253_v8, %v10272_v47 }
 0x377   :  { %8364 = vmatmul.mubr.msk.bf16.vlgmr.msra.gmra.mrb[124].mxu1 %vm153_vm1, %v5956_v46 }
 0x378   :  { %6409 = vmatpush1.bf16.msra.mxu1 %v6337_v49  ;;  %v10287_v54 = vpop.permute.xlu1 %6726  ;;  %6440 = vmatprep.mubr.bf16.mxu1 %v8632_v3 }
 0x379   :  { %6490 = vmatprep.subr.bf16.mxu1 %v6342_v53  ;;  %v10300_v60 = vpop.permute.xlu0 %6732  ;;  %v6749_v29 = vsel %vm2701_vm7, %v10287_v54, %v10281_v50  ;;  %v6748_v10 = vsel %vm2701_vm7, %v10264_v25, %v10287_v54 }
 0x37b   :  { %8212 = vmatmul.mubr.msk.bf16.vlgmr.msra.gmra.mrb[96].mxu0 %vm153_vm1, %v6304_v17 }
 0x37c   :  { %6450 = vmatpush1.bf16.msra.mxu0 %v6339_v56  ;;  %v10297_v59 = vpop.permute.xlu1 %6730  ;;  %6481 = vmatprep.mubr.bf16.mxu0 %v8632_v3 }
 0x37d   :  { %6531 = vmatprep.subr.bf16.mxu0 %v6344_v48  ;;  %v10315_v0 = vpop.permute.xlu0 %6736  ;;  %v6751_v58 = vsel %vm2701_vm7, %v10297_v59, %v10300_v60  ;;  %v6750_v35 = vsel %vm2701_vm7, %v10281_v50, %v10297_v59  ;;  %v8229_v50 = vld [vmem:[%s10737_s4 + $0x7] sm:$0x1] }
 0x37e   :  { %v10478_v59 = vpack.c.bf16 %v8229_v50, %v8229_v50 }
 0x37f   :  { %8213 = vmatmul.mubr.msk.bf16.vlgmr.msra.gmra.mrb[128].mxu1 %vm153_vm1, %v6304_v17 }
 0x380   :  { %6491 = vmatpush1.bf16.msra.mxu1 %v6341_v4  ;;  %6522 = vmatprep.mubr.bf16.mxu1 %v8632_v3  ;;  %v10310_v52 = vpop.permute.xlu1 %6734 }
 0x381   :  { %6572 = vmatprep.subr.bf16.mxu1 %v6346_v62  ;;  %v10329_v7 = vpop.permute.xlu0 %6740  ;;  %v6753_v34 = vsel %vm2701_vm7, %v10310_v52, %v10315_v0  ;;  %v6752_v30 = vsel %vm2701_vm7, %v10300_v60, %v10310_v52 }
 0x383   :  { %8214 = vmatmul.mubr.msk.bf16.vlgmr.msra.gmra.mrb[100].mxu0 %vm153_vm1, %v6304_v17 }
 0x384   :  { %6532 = vmatpush1.bf16.msra.mxu0 %v6343_v63  ;;  %6563 = vmatprep.mubr.bf16.mxu0 %v8632_v3  ;;  %v10325_v26 = vpop.permute.xlu1 %6738 }
 0x385   :  { %6613 = vmatprep.subr.bf16.mxu0 %v6348_v2  ;;  %v10342_v39 = vpop.permute.xlu0 %7123  ;;  %v6755_v6 = vsel %vm2701_vm7, %v10325_v26, %v10329_v7  ;;  %v6754_v23 = vsel %vm2701_vm7, %v10315_v0, %v10325_v26 }
 0x387   :  { %8215 = vmatmul.mubr.msk.bf16.vlgmr.msra.gmra.mrb[132].mxu1 %vm153_vm1, %v6304_v17 }
 0x388   :  { %6573 = vmatpush1.bf16.msra.mxu1 %v6345_v5  ;;  %6604 = vmatprep.mubr.bf16.mxu1 %v8632_v3  ;;  %v10340_v15 = vpop.permute.xlu1 %7121 }
 0x389   :  { %8367 = vmatprep.subr.bf16.mxu1 %v9940_v21  ;;  %v10364_v40 = vpop.permute.xlu0 %7125  ;;  %v7150_v57 = vsel %vm3140_vm8, %v10340_v15, %v10342_v39 }
 0x38a   :  { %v7151_v54 = vsel %vm3140_vm8, %v10342_v39, %v10364_v40 }
 0x38b   :  { %8216 = vmatmul.mubr.msk.bf16.vlgmr.msra.gmra.mrb[104].mxu0 %vm153_vm1, %v6304_v17 }
 0x38c   :  { %6614 = vmatpush1.bf16.msra.mxu0 %v6347_v19  ;;  %6645 = vmatprep.mubr.bf16.mxu0 %v8632_v3  ;;  %v10354_v33 = vpop.permute.xlu1 %7119 }
 0x38d   :  { %6774 = vmatprep.subr.bf16.mxu0 %v6743_v9  ;;  %v10381_v32 = vpop.permute.xlu0 %7129  ;;  %v7149_v36 = vsel %vm3140_vm8, %v10354_v33, %v10340_v15 }
 0x38f   :  { %8217 = vmatmul.mubr.msk.bf16.vlgmr.msra.gmra.mrb[136].mxu1 %vm153_vm1, %v6304_v17 }
 0x390   :  { %8368 = vmatpush3.bf16.msra.mxu1 %v10239_v37  ;;  %8369 = vmatprep.mubr.msk.bf16.mxu1 %vm8639_vm3, %v9940_v21  ;;  %v10376_v27 = vpop.permute.xlu1 %7127 }
 0x391   :  { %6815 = vmatprep.subr.bf16.mxu1 %v6745_v31  ;;  %v10400_v46 = vpop.permute.xlu0 %7133  ;;  %v7152_v8 = vsel %vm3140_vm8, %v10364_v40, %v10376_v27  ;;  %v7153_v0 = vsel %vm3140_vm8, %v10376_v27, %v10381_v32 }
 0x393   :  { %8218 = vmatmul.mubr.msk.bf16.vlgmr.msra.gmra.mrb[108].mxu0 %vm153_vm1, %v6304_v17 }
 0x394   :  { %6775 = vmatpush1.bf16.msra.mxu0 %v6742_v11  ;;  %6806 = vmatprep.mubr.bf16.mxu0 %v8632_v3  ;;  %v10392_v44 = vpop.permute.xlu1 %7131 }
 0x395   :  { %6856 = vmatprep.subr.bf16.mxu0 %v6747_v16  ;;  %v10416_v18 = vpop.permute.xlu0 %7137  ;;  %v7154_v43 = vsel %vm3140_vm8, %v10381_v32, %v10392_v44  ;;  %v7155_v15 = vsel %vm3140_vm8, %v10392_v44, %v10400_v46 }
 0x397   :  { %8370 = vmatmul.mubr.msk.bf16.vlgmr.msra.gmra.mrb[140].mxu1 %vm153_vm1, %v6304_v17 }
 0x398   :  { %6816 = vmatpush1.bf16.msra.mxu1 %v6744_v41  ;;  %6847 = vmatprep.mubr.bf16.mxu1 %v8632_v3  ;;  %v10411_v1 = vpop.permute.xlu1 %7135 }
 0x399   :  { %6897 = vmatprep.subr.bf16.mxu1 %v6749_v29  ;;  %v10433_v37 = vpop.permute.xlu0 %7141  ;;  %v7156_v60 = vsel %vm3140_vm8, %v10400_v46, %v10411_v1  ;;  %v7157_v40 = vsel %vm3140_vm8, %v10411_v1, %v10416_v18 }
 0x39b   :  { %8221 = vmatmul.mubr.msk.bf16.vlgmr.msra.gmra.mrb[112].mxu0 %vm153_vm1, %v10370_v12 }
 0x39c   :  { %6857 = vmatpush1.bf16.msra.mxu0 %v6746_v55  ;;  %6888 = vmatprep.mubr.bf16.mxu0 %v8632_v3  ;;  %v10425_v61 = vpop.permute.xlu1 %7139 }
 0x39d   :  { %6938 = vmatprep.subr.bf16.mxu0 %v6751_v58  ;;  %v10454_v24 = vpop.permute.xlu0 %7145  ;;  %v7158_v5 = vsel %vm3140_vm8, %v10416_v18, %v10425_v61 }
 0x39f   :  { %8222 = vmatmul.mubr.msk.bf16.vlgmr.msra.gmra.mrb[144].mxu1 %vm153_vm1, %v10370_v12 }
 0x3a0   :  { %6898 = vmatpush1.bf16.msra.mxu1 %v6748_v10  ;;  %6929 = vmatprep.mubr.bf16.mxu1 %v8632_v3  ;;  %v10447_v45 = vpop.permute.xlu1 %7143  ;;  %v7159_v10 = vsel %vm3140_vm8, %v10425_v61, %v10433_v37 }
 0x3a1   :  { %6979 = vmatprep.subr.bf16.mxu1 %v6753_v34  ;;  %v10484_v62 = vpop.permute.xlu0 %7528  ;;  %v7160_v11 = vsel %vm3140_vm8, %v10433_v37, %v10447_v45  ;;  %v7161_v1 = vsel %vm3140_vm8, %v10447_v45, %v10454_v24 }
 0x3a3   :  { %8223 = vmatmul.mubr.msk.bf16.vlgmr.msra.gmra.mrb[116].mxu0 %vm153_vm1, %v10370_v12 }
 0x3a4   :  { %6939 = vmatpush1.bf16.msra.mxu0 %v6750_v35  ;;  %6970 = vmatprep.mubr.bf16.mxu0 %v8632_v3  ;;  %v10472_v56 = vpop.permute.xlu1 %7147 }
 0x3a5   :  { %7020 = vmatprep.subr.bf16.mxu0 %v6755_v6  ;;  %v7527_v39 = vpop.permute.xlu0 %7526  ;;  %v7162_v29 = vsel %vm3140_vm8, %v10454_v24, %v10472_v56  ;;  %v10564_v24 = vld [vmem:[#allocation2] sm:$0xff] }
 0x3a6   :  { %v7556_v50 = vsel %vm3579_vm9, %v7527_v39, %v10484_v62 }
 0x3a7   :  { %8224 = vmatmul.mubr.msk.bf16.vlgmr.msra.gmra.mrb[148].mxu1 %vm153_vm1, %v10370_v12 }
 0x3a8   :  { %6980 = vmatpush1.bf16.msra.mxu1 %v6752_v30  ;;  %7011 = vmatprep.mubr.bf16.mxu1 %v8632_v3 }
 0x3a9   :  { %8373 = vmatprep.subr.bf16.mxu1 %v9940_v21  ;;  %v10527_v55 = vpop.permute.xlu0 %7534 }
 0x3ab   :  { %8225 = vmatmul.mubr.msk.bf16.vlgmr.msra.gmra.mrb[120].mxu0 %vm153_vm1, %v10370_v12 }
 0x3ac   :  { %7021 = vmatpush1.bf16.msra.mxu0 %v6754_v23  ;;  %7052 = vmatprep.mubr.bf16.mxu0 %v8632_v3 }
 0x3ad   :  { %7181 = vmatprep.subr.bf16.mxu0 %v7150_v57  ;;  %v10435_v28 = vpop.f32.mrb[16].mxu0  ;;  %v10545_v30 = vpop.permute.xlu0 %7538 }
 0x3ae   :  { %v10437_v51 = vpop.f32.mrb[17].mxu0 }
 0x3af   :  { %8226 = vmatmul.mubr.msk.bf16.vlgmr.msra.gmra.mrb[152].mxu1 %vm153_vm1, %v10370_v12  ;;  %v4395_v22 = vpop.f32.mrb[18].mxu0 }
 0x3b0   :  { %8374 = vmatpush3.bf16.msra.mxu1 %v10329_v7  ;;  %v4396_v42 = vpop.f32.mrb[19].mxu0  ;;  %8375 = vmatprep.mubr.msk.bf16.mxu1 %vm8639_vm3, %v9940_v21  ;;  %v10499_v7 = vpop.permute.xlu1 %7530 }
 0x3b1   :  { %7222 = vmatprep.subr.bf16.mxu1 %v7152_v8  ;;  %v7557_v23 = vsel %vm3579_vm9, %v10484_v62, %v10499_v7 }
 0x3b2   :  { %v10449_v25 = vpop.f32.mrb[48].mxu1 }
 0x3b3   :  { %8227 = vmatmul.mubr.msk.bf16.vlgmr.msra.gmra.mrb[124].mxu0 %vm153_vm1, %v10370_v12  ;;  %v10458_v47 = vpop.f32.mrb[49].mxu1 }
 0x3b4   :  { %7182 = vmatpush1.bf16.msra.mxu0 %v7149_v36  ;;  %v4436_v49 = vpop.f32.mrb[50].mxu1  ;;  %7213 = vmatprep.mubr.bf16.mxu0 %v8632_v3  ;;  %v7533_v41 = vpop.permute.xlu1 %7532 }
 0x3b5   :  { %7263 = vmatprep.subr.bf16.mxu0 %v7154_v43  ;;  %v4437_v17 = vpop.f32.mrb[51].mxu1  ;;  %v7559_v45 = vsel %vm3579_vm9, %v7533_v41, %v10527_v55 }
 0x3b6   :  { %v10467_v53 = vpop.f32.mrb[20].mxu0 }
 0x3b7   :  { %8376 = vmatmul.mubr.msk.bf16.vlgmr.msra.gmra.mrb[156].mxu1 %vm153_vm1, %v10370_v12  ;;  %v10476_v48 = vpop.f32.mrb[21].mxu0 }
 0x3b8   :  { %7223 = vmatpush1.bf16.msra.mxu1 %v7151_v54  ;;  %v4477_v4 = vpop.f32.mrb[22].mxu0  ;;  %7254 = vmatprep.mubr.bf16.mxu1 %v8632_v3  ;;  %v7537_v46 = vpop.permute.xlu1 %7536 }
 0x3b9   :  { %7304 = vmatprep.subr.bf16.mxu1 %v7156_v60  ;;  %v4478_v52 = vpop.f32.mrb[23].mxu0  ;;  %v8238_v4 = vld [vmem:[%s10737_s4 + $0x8] sm:$0x1] }
 0x3ba   :  { %v10486_v63 = vpop.f32.mrb[52].mxu1 }
 0x3bb   :  { %8230 = vmatmul.mubr.msk.bf16.vlgmr.msra.gmra.mrb[128].mxu0 %vm153_vm1, %v10478_v59  ;;  %v10493_v2 = vpop.f32.mrb[53].mxu1 }
 0x3bc   :  { %7264 = vmatpush1.bf16.msra.mxu0 %v7153_v0  ;;  %v4518_v26 = vpop.f32.mrb[54].mxu1  ;;  %7295 = vmatprep.mubr.bf16.mxu0 %v8632_v3  ;;  %v7541_v37 = vpop.permute.xlu1 %7540  ;;  %v7558_v0 = vsel %vm3579_vm9, %v10499_v7, %v7533_v41 }
 0x3bd   :  { %7345 = vmatprep.subr.bf16.mxu0 %v7158_v5  ;;  %v4519_v19 = vpop.f32.mrb[55].mxu1 }
 0x3be   :  { %v10501_v9 = vpop.f32.mrb[24].mxu0  ;;  %v10591_v19 = vpack.c.bf16 %v8238_v4, %v8238_v4 }
 0x3bf   :  { %8231 = vmatmul.mubr.msk.bf16.vlgmr.msra.gmra.mrb[160].mxu1 %vm153_vm1, %v10478_v59  ;;  %v10508_v31 = vpop.f32.mrb[25].mxu0 }
 0x3c0   :  { %7305 = vmatpush1.bf16.msra.mxu1 %v7155_v15  ;;  %v4559_v33 = vpop.f32.mrb[26].mxu0  ;;  %7336 = vmatprep.mubr.bf16.mxu1 %v8632_v3 }
 0x3c1   :  { %7386 = vmatprep.subr.bf16.mxu1 %v7160_v11  ;;  %v4560_v16 = vpop.f32.mrb[27].mxu0 }
 0x3c2   :  { %v10514_v38 = vpop.f32.mrb[56].mxu1 }
 0x3c3   :  { %8232 = vmatmul.mubr.msk.bf16.vlgmr.msra.gmra.mrb[132].mxu0 %vm153_vm1, %v10478_v59  ;;  %v10521_v12 = vpop.f32.mrb[57].mxu1 }
 0x3c4   :  { %7346 = vmatpush1.bf16.msra.mxu0 %v7157_v40  ;;  %v4600_v27 = vpop.f32.mrb[58].mxu1  ;;  %7377 = vmatprep.mubr.bf16.mxu0 %v8632_v3 }
 0x3c5   :  { %7427 = vmatprep.subr.bf16.mxu0 %v7162_v29  ;;  %v4601_v32 = vpop.f32.mrb[59].mxu1 }
 0x3c6   :  { %v10529_v58 = vpop.f32.mrb[28].mxu0 }
 0x3c7   :  { %8233 = vmatmul.mubr.msk.bf16.vlgmr.msra.gmra.mrb[164].mxu1 %vm153_vm1, %v10478_v59  ;;  %v10536_v44 = vpop.f32.mrb[29].mxu0 }
 0x3c8   :  { %7387 = vmatpush1.bf16.msra.mxu1 %v7159_v10  ;;  %v4641_v34 = vpop.f32.mrb[30].mxu0  ;;  %7418 = vmatprep.mubr.bf16.mxu1 %v8632_v3 }
 0x3c9   :  { %v4642_v35 = vpop.f32.mrb[31].mxu0  ;;  %8379 = vmatprep.subr.bf16.mxu1 %v9940_v21 }
 0x3ca   :  { %v10540_v6 = vpop.f32.mrb[60].mxu1 }
 0x3cb   :  { %8234 = vmatmul.mubr.msk.bf16.vlgmr.msra.gmra.mrb[136].mxu0 %vm153_vm1, %v10478_v59  ;;  %v8341_v18 = vpop.f32.mrb[61].mxu1 }
 0x3cc   :  { %7428 = vmatpush1.bf16.msra.mxu0 %v7161_v1  ;;  %v4681_v61 = vpop.f32.mrb[62].mxu1  ;;  %7459 = vmatprep.mubr.bf16.mxu0 %v8632_v3 }
 0x3cd   :  { %7588 = vmatprep.subr.bf16.mxu0 %v7557_v23  ;;  %v8342_v21 = vpop.f32.mrb[63].mxu1 }
 0x3ce   :  { %v4780_v57 = vpop.f32.mrb[32].mxu0 }
 0x3cf   :  { %v10554_v22 = vadd.f32 %v4780_v57, %v10435_v28  ;;  %v4782_v8 = vpop.f32.mrb[33].mxu0  ;;  %8235 = vmatmul.mubr.msk.bf16.vlgmr.msra.gmra.mrb[168].mxu1 %vm153_vm1, %v10478_v59  ;;  %v7543_v28 = vpop.permute.xlu0 %7542 }
 0x3d0   :  { %v10559_v42 = vadd.f32 %v4782_v8, %v10437_v51  ;;  %8380 = vmatpush3.bf16.msra.mxu1 %v10472_v56  ;;  %v4784_v36 = vpop.f32.mrb[34].mxu0  ;;  %8381 = vmatprep.mubr.msk.bf16.mxu1 %vm8639_vm3, %v10564_v24  ;;  %v7561_v56 = vsel %vm3579_vm9, %v7537_v46, %v10545_v30  ;;  %v7563_v39 = vsel %vm3579_vm9, %v7541_v37, %v7543_v28 }
 0x3d1   :  { %7629 = vmatprep.subr.bf16.mxu1 %v7559_v45  ;;  %v4785_v43 = vpop.f32.mrb[35].mxu0 }
 0x3d2   :  { %v4821_v49 = vpop.f32.mrb[64].mxu1 }
 0x3d3   :  { %v10571_v51 = vadd.f32 %v4821_v49, %v10449_v25  ;;  %v4823_v17 = vpop.f32.mrb[65].mxu1  ;;  %8236 = vmatmul.mubr.msk.bf16.vlgmr.msra.gmra.mrb[140].mxu0 %vm153_vm1, %v10478_v59  ;;  %v7545_v25 = vpop.permute.xlu1 %7544 }
 0x3d4   :  { %v10576_v54 = vadd.f32 %v4823_v17, %v10458_v47  ;;  %7589 = vmatpush1.bf16.msra.mxu0 %v7556_v50  ;;  %v4825_v60 = vpop.f32.mrb[66].mxu1  ;;  %7620 = vmatprep.mubr.bf16.mxu0 %v8632_v3  ;;  %v7547_v47 = vpop.permute.xlu0 %7546 }
 0x3d5   :  { %7670 = vmatprep.subr.bf16.mxu0 %v7561_v56  ;;  %v4826_v62 = vpop.f32.mrb[67].mxu1  ;;  %v7565_v41 = vsel %vm3579_vm9, %v7545_v25, %v7547_v47 }
 0x3d6   :  { %v4862_v52 = vpop.f32.mrb[36].mxu0 }
 0x3d7   :  { %v10587_v5 = vadd.f32 %v4862_v52, %v10467_v53  ;;  %v4864_v26 = vpop.f32.mrb[37].mxu0  ;;  %8382 = vmatmul.mubr.msk.bf16.vlgmr.msra.gmra.mrb[172].mxu1 %vm153_vm1, %v10478_v59  ;;  %v7560_v53 = vsel %vm3579_vm9, %v10527_v55, %v7537_v46  ;;  %v7549_v16 = vpop.permute.xlu1 %7548 }
 0x3d8   :  { %v10594_v15 = vadd.f32 %v4864_v26, %v10476_v48  ;;  %7630 = vmatpush1.bf16.msra.mxu1 %v7558_v0  ;;  %v4866_v11 = vpop.f32.mrb[38].mxu0  ;;  %7661 = vmatprep.mubr.bf16.mxu1 %v8632_v3  ;;  %v7551_v27 = vpop.permute.xlu0 %7550  ;;  %v7566_v36 = vsel %vm3579_vm9, %v7547_v47, %v7549_v16 }
 0x3d9   :  { %7711 = vmatprep.subr.bf16.mxu1 %v7563_v39  ;;  %v4867_v7 = vpop.f32.mrb[39].mxu0  ;;  %v7567_v46 = vsel %vm3579_vm9, %v7549_v16, %v7551_v27 }
 0x3da   :  { %v4903_v33 = vpop.f32.mrb[68].mxu1 }
 0x3db   :  { %v10601_v59 = vadd.f32 %v4903_v33, %v10486_v63  ;;  %v4905_v40 = vpop.f32.mrb[69].mxu1  ;;  %8239 = vmatmul.mubr.msk.bf16.vlgmr.msra.gmra.mrb[144].mxu0 %vm153_vm1, %v10591_v19  ;;  %v7562_v63 = vsel %vm3579_vm9, %v10545_v30, %v7541_v37  ;;  %v7553_v1 = vpop.permute.xlu1 %7552 }
 0x3dc   :  { %v10606_v48 = vadd.f32 %v4905_v40, %v10493_v2  ;;  %7671 = vmatpush1.bf16.msra.mxu0 %v7560_v53  ;;  %v4907_v29 = vpop.f32.mrb[70].mxu1  ;;  %7702 = vmatprep.mubr.bf16.mxu0 %v8632_v3  ;;  %v7555_v23 = vpop.permute.xlu0 %7554  ;;  %v7568_v17 = vsel %vm3579_vm9, %v7551_v27, %v7553_v1 }
 0x3dd   :  { %7752 = vmatprep.subr.bf16.mxu0 %v7565_v41  ;;  %v4908_v55 = vpop.f32.mrb[71].mxu1  ;;  %v7569_v57 = vsel %vm3579_vm9, %v7553_v1, %v7555_v23 }
 0x3de   :  { %v4944_v32 = vpop.f32.mrb[40].mxu0 }
 0x3df   :  { %v10613_v10 = vadd.f32 %v4944_v32, %v10501_v9  ;;  %v4946_v34 = vpop.f32.mrb[41].mxu0  ;;  %8240 = vmatmul.mubr.msk.bf16.vlgmr.msra.gmra.mrb[176].mxu1 %vm153_vm1, %v10591_v19  ;;  %v7564_v9 = vsel %vm3579_vm9, %v7543_v28, %v7545_v25 }
 0x3e0   :  { %v10618_v2 = vadd.f32 %v4946_v34, %v10508_v31  ;;  %7712 = vmatpush1.bf16.msra.mxu1 %v7562_v63  ;;  %v4948_v35 = vpop.f32.mrb[42].mxu0  ;;  %7743 = vmatprep.mubr.bf16.mxu1 %v8632_v3 }
 0x3e1   :  { %7793 = vmatprep.subr.bf16.mxu1 %v7567_v46  ;;  %v4949_v18 = vpop.f32.mrb[43].mxu0 }
 0x3e2   :  { %v4985_v30 = vpop.f32.mrb[72].mxu1 }
 0x3e3   :  { %v10624_v61 = vadd.f32 %v4985_v30, %v10514_v38  ;;  %v4987_v21 = vpop.f32.mrb[73].mxu1  ;;  %8241 = vmatmul.mubr.msk.bf16.vlgmr.msra.gmra.mrb[148].mxu0 %vm153_vm1, %v10591_v19 }
 0x3e4   :  { %v10629_v31 = vadd.f32 %v4987_v21, %v10521_v12  ;;  %7753 = vmatpush1.bf16.msra.mxu0 %v7564_v9  ;;  %v4989_v37 = vpop.f32.mrb[74].mxu1  ;;  %7784 = vmatprep.mubr.bf16.mxu0 %v8632_v3 }
 0x3e5   :  { %7834 = vmatprep.subr.bf16.mxu0 %v7569_v57  ;;  %v4990_v8 = vpop.f32.mrb[75].mxu1 }
 0x3e6   :  { %v5026_v45 = vpop.f32.mrb[44].mxu0 }
 0x3e7   :  { %v5027_v38 = vadd.f32 %v5026_v45, %v10529_v58  ;;  %v5028_v28 = vpop.f32.mrb[45].mxu0  ;;  %8242 = vmatmul.mubr.msk.bf16.vlgmr.msra.gmra.mrb[180].mxu1 %vm153_vm1, %v10591_v19 }
 0x3e8   :  { %v5029_v12 = vadd.f32 %v5028_v28, %v10536_v44  ;;  %7794 = vmatpush1.bf16.msra.mxu1 %v7566_v36  ;;  %v5030_v43 = vpop.f32.mrb[46].mxu0  ;;  %7825 = vmatprep.mubr.bf16.mxu1 %v8632_v3 }
 0x3e9   :  { %v5031_v49 = vpop.f32.mrb[47].mxu0  ;;  %8385 = vmatprep.subr.bf16.mxu1 %v10564_v24 }
 0x3ea   :  { %v5067_v50 = vpop.f32.mrb[76].mxu1 }
 0x3eb   :  { %v5068_v56 = vadd.f32 %v5067_v50, %v10540_v6  ;;  %8243 = vmatmul.mubr.msk.bf16.vlgmr.msra.gmra.mrb[152].mxu0 %vm153_vm1, %v10591_v19  ;;  %v8347_v58 = vpop.f32.mrb[77].mxu1 }
 0x3ec   :  { %7835 = vmatpush1.bf16.msra.mxu0 %v7568_v17  ;;  %v5070_v60 = vpop.f32.mrb[78].mxu1  ;;  %7866 = vmatprep.mubr.bf16.mxu0 %v8632_v3 }
 0x3ed   :  { %v8348_v44 = vpop.f32.mrb[79].mxu1 }
 0x3ee   :  { %v5172_v4 = vpop.f32.mrb[48].mxu0 }
 0x3ef   :  { %v5465_v25 = vadd.f32 %v5172_v4, %v10554_v22  ;;  %v5174_v62 = vpop.f32.mrb[49].mxu0  ;;  %8244 = vmatmul.mubr.msk.bf16.vlgmr.msra.gmra.mrb[184].mxu1 %vm153_vm1, %v10591_v19 }
 0x3f0   :  { %v5466_v52 = vadd.f32 %v5174_v62, %v10559_v42  ;;  %8386 = vmatpush3.bf16.msra.mxu1 %v7555_v23  ;;  %v5176_v6 = vpop.f32.mrb[50].mxu0  ;;  %8387 = vmatprep.mubr.msk.bf16.mxu1 %vm8639_vm3, %v10564_v24 }
 0x3f1   :  { %v5177_v0 = vpop.f32.mrb[51].mxu0 }
 0x3f2   :  { %v5213_v47 = vpop.f32.mrb[80].mxu1 }
 0x3f3   :  { %v5467_v26 = vadd.f32 %v5213_v47, %v10571_v51  ;;  %v5215_v3 = vpop.f32.mrb[81].mxu1  ;;  %8245 = vmatmul.mubr.msk.bf16.vlgmr.msra.gmra.mrb[156].mxu0 %vm153_vm1, %v10591_v19 }
 0x3f4   :  { %v5468_v22 = vadd.f32 %v5215_v3, %v10576_v54  ;;  %v5217_v39 = vpop.f32.mrb[82].mxu1 }
 0x3f5   :  { %v5218_v11 = vpop.f32.mrb[83].mxu1 }
 0x3f6   :  { %v5254_v7 = vpop.f32.mrb[52].mxu0 }
 0x3f7   :  { %v5469_v42 = vadd.f32 %v5254_v7, %v10587_v5  ;;  %v5256_v33 = vpop.f32.mrb[53].mxu0  ;;  %8388 = vmatmul.mubr.msk.bf16.vlgmr.msra.gmra.mrb[188].mxu1 %vm153_vm1, %v10591_v19 }
 0x3f8   :  { %v5470_v24 = vadd.f32 %v5256_v33, %v10594_v15  ;;  %v5258_v53 = vpop.f32.mrb[54].mxu0 }
 0x3f9   :  { %v5259_v16 = vpop.f32.mrb[55].mxu0 }
 0x3fa   :  { %v5295_v51 = vpop.f32.mrb[84].mxu1 }
 0x3fb   :  { %v5471_v40 = vadd.f32 %v5295_v51, %v10601_v59  ;;  %v5297_v41 = vpop.f32.mrb[85].mxu1 }
 0x3fc   :  { %v5472_v29 = vadd.f32 %v5297_v41, %v10606_v48  ;;  %v5299_v54 = vpop.f32.mrb[86].mxu1 }
 0x3fd   :  { %v5300_v27 = vpop.f32.mrb[87].mxu1 }
 0x3fe   :  { %v5336_v55 = vpop.f32.mrb[56].mxu0 }
 0x3ff   :  { %v5473_v32 = vadd.f32 %v5336_v55, %v10613_v10  ;;  %v5338_v5 = vpop.f32.mrb[57].mxu0 }
 0x400   :  { %v5474_v63 = vadd.f32 %v5338_v5, %v10618_v2  ;;  %v5340_v34 = vpop.f32.mrb[58].mxu0 }
 0x401   :  { %v5341_v19 = vpop.f32.mrb[59].mxu0 }
 0x402   :  { %v5377_v46 = vpop.f32.mrb[88].mxu1 }
 0x403   :  { %v5475_v15 = vadd.f32 %v5377_v46, %v10624_v61  ;;  %v5379_v35 = vpop.f32.mrb[89].mxu1 }
 0x404   :  { %v5476_v1 = vadd.f32 %v5379_v35, %v10629_v31  ;;  %v5381_v59 = vpop.f32.mrb[90].mxu1 }
 0x405   :  { %v5382_v18 = vpop.f32.mrb[91].mxu1 }
 0x406   :  { %v5418_v30 = vpop.f32.mrb[60].mxu0 }
 0x407   :  { %v5477_v48 = vadd.f32 %v5418_v30, %v5027_v38  ;;  %v5420_v9 = vpop.f32.mrb[61].mxu0 }
 0x408   :  { %v5478_v23 = vadd.f32 %v5420_v9, %v5029_v12  ;;  %v5422_v21 = vpop.f32.mrb[62].mxu0 }
 0x409   :  { %v5423_v57 = vpop.f32.mrb[63].mxu0 }
 0x40a   :  { %v5459_v10 = vpop.f32.mrb[92].mxu1 }
 0x40b   :  { %v5479_v37 = vadd.f32 %v5459_v10, %v5068_v56  ;;  %v8353_v8 = vpop.f32.mrb[93].mxu1 }
 0x40c   :  { %v5462_v2 = vpop.f32.mrb[94].mxu1 }
 0x40d   :  { %v8354_v45 = vpop.f32.mrb[95].mxu1 }
 0x40e   :  { %v5646_v36 = vpop.f32.mrb[64].mxu0 }
 0x40f   :  { %v5939_v28 = vadd.f32 %v5646_v36, %v5465_v25  ;;  %v5648_v43 = vpop.f32.mrb[65].mxu0 }
 0x410   :  { %v5940_v61 = vadd.f32 %v5648_v43, %v5466_v52  ;;  %v5650_v49 = vpop.f32.mrb[66].mxu0 }
 0x411   :  { %v5651_v50 = vpop.f32.mrb[67].mxu0 }
 0x412   :  { %v5687_v31 = vpop.f32.mrb[96].mxu1 }
 0x413   :  { %v5941_v17 = vadd.f32 %v5687_v31, %v5467_v26  ;;  %v5689_v58 = vpop.f32.mrb[97].mxu1 }
 0x414   :  { %v5942_v60 = vadd.f32 %v5689_v58, %v5468_v22  ;;  %v5691_v38 = vpop.f32.mrb[98].mxu1 }
 0x415   :  { %v5692_v44 = vpop.f32.mrb[99].mxu1 }
 0x416   :  { %v5728_v12 = vpop.f32.mrb[68].mxu0 }
 0x417   :  { %v5943_v4 = vadd.f32 %v5728_v12, %v5469_v42  ;;  %v5730_v62 = vpop.f32.mrb[69].mxu0 }
 0x418   :  { %v5944_v6 = vadd.f32 %v5730_v62, %v5470_v24  ;;  %v5732_v56 = vpop.f32.mrb[70].mxu0 }
 0x419   :  { %v5733_v0 = vpop.f32.mrb[71].mxu0 }
 0x41a   :  { %v5769_v47 = vpop.f32.mrb[100].mxu1 }
 0x41b   :  { %v5945_v3 = vadd.f32 %v5769_v47, %v5471_v40  ;;  %v5771_v39 = vpop.f32.mrb[101].mxu1 }
 0x41c   :  { %v5946_v25 = vadd.f32 %v5771_v39, %v5472_v29  ;;  %v5773_v11 = vpop.f32.mrb[102].mxu1 }
 0x41d   :  { %v5774_v52 = vpop.f32.mrb[103].mxu1 }
 0x41e   :  { %v5810_v7 = vpop.f32.mrb[72].mxu0 }
 0x41f   :  { %v5947_v33 = vadd.f32 %v5810_v7, %v5473_v32  ;;  %v5812_v53 = vpop.f32.mrb[73].mxu0 }
 0x420   :  { %v5948_v26 = vadd.f32 %v5812_v53, %v5474_v63  ;;  %v5814_v16 = vpop.f32.mrb[74].mxu0 }
 0x421   :  { %v5815_v22 = vpop.f32.mrb[75].mxu0 }
 0x422   :  { %v5851_v51 = vpop.f32.mrb[104].mxu1 }
 0x423   :  { %v5949_v41 = vadd.f32 %v5851_v51, %v5475_v15  ;;  %v5853_v54 = vpop.f32.mrb[105].mxu1 }
 0x424   :  { %v5950_v42 = vadd.f32 %v5853_v54, %v5476_v1  ;;  %v5855_v27 = vpop.f32.mrb[106].mxu1 }
 0x425   :  { %v5856_v24 = vpop.f32.mrb[107].mxu1 }
 0x426   :  { %v5892_v55 = vpop.f32.mrb[76].mxu0 }
 0x427   :  { %v5951_v5 = vadd.f32 %v5892_v55, %v5477_v48  ;;  %v5894_v34 = vpop.f32.mrb[77].mxu0 }
 0x428   :  { %v5952_v40 = vadd.f32 %v5894_v34, %v5478_v23  ;;  %v5896_v19 = vpop.f32.mrb[78].mxu0 }
 0x429   :  { %v5897_v29 = vpop.f32.mrb[79].mxu0 }
 0x42a   :  { %v5933_v46 = vpop.f32.mrb[108].mxu1 }
 0x42b   :  { %v5953_v35 = vadd.f32 %v5933_v46, %v5479_v37  ;;  %v8359_v59 = vpop.f32.mrb[109].mxu1 }
 0x42c   :  { %v5936_v32 = vpop.f32.mrb[110].mxu1 }
 0x42d   :  { %v8360_v18 = vpop.f32.mrb[111].mxu1 }
 0x42e   :  { %v5994_v63 = vpop.f32.mrb[80].mxu0 }
 0x42f   :  { %v6287_v30 = vadd.f32 %v5994_v63, %v5939_v28  ;;  %v5996_v9 = vpop.f32.mrb[81].mxu0 }
 0x430   :  { %v6288_v21 = vadd.f32 %v5996_v9, %v5940_v61  ;;  %v5998_v15 = vpop.f32.mrb[82].mxu0 }
 0x431   :  { %v5999_v57 = vpop.f32.mrb[83].mxu0 }
 0x432   :  { %v6035_v1 = vpop.f32.mrb[112].mxu1 }
 0x433   :  { %v6289_v10 = vadd.f32 %v6035_v1, %v5941_v17  ;;  %v6037_v8 = vpop.f32.mrb[113].mxu1 }
 0x434   :  { %v6290_v2 = vadd.f32 %v6037_v8, %v5942_v60  ;;  %v6039_v48 = vpop.f32.mrb[114].mxu1 }
 0x435   :  { %v6040_v45 = vpop.f32.mrb[115].mxu1 }
 0x436   :  { %v6076_v23 = vpop.f32.mrb[84].mxu0 }
 0x437   :  { %v6291_v36 = vadd.f32 %v6076_v23, %v5943_v4  ;;  %v6078_v43 = vpop.f32.mrb[85].mxu0 }
 0x438   :  { %v6292_v49 = vadd.f32 %v6078_v43, %v5944_v6  ;;  %v6080_v37 = vpop.f32.mrb[86].mxu0 }
 0x439   :  { %v6081_v50 = vpop.f32.mrb[87].mxu0 }
 0x43a   :  { %v6117_v31 = vpop.f32.mrb[116].mxu1 }
 0x43b   :  { %v6293_v58 = vadd.f32 %v6117_v31, %v5945_v3  ;;  %v6119_v38 = vpop.f32.mrb[117].mxu1 }
 0x43c   :  { %v6294_v28 = vadd.f32 %v6119_v38, %v5946_v25  ;;  %v6121_v44 = vpop.f32.mrb[118].mxu1 }
 0x43d   :  { %v6122_v61 = vpop.f32.mrb[119].mxu1 }
 0x43e   :  { %v6158_v12 = vpop.f32.mrb[88].mxu0 }
 0x43f   :  { %v6295_v62 = vadd.f32 %v6158_v12, %v5947_v33  ;;  %v6160_v56 = vpop.f32.mrb[89].mxu0 }
 0x440   :  { %v6296_v17 = vadd.f32 %v6160_v56, %v5948_v26  ;;  %v6162_v0 = vpop.f32.mrb[90].mxu0 }
 0x441   :  { %v6163_v60 = vpop.f32.mrb[91].mxu0 }
 0x442   :  { %v6199_v47 = vpop.f32.mrb[120].mxu1 }
 0x443   :  { %v6297_v39 = vadd.f32 %v6199_v47, %v5949_v41  ;;  %v6201_v11 = vpop.f32.mrb[121].mxu1 }
 0x444   :  { %v6298_v4 = vadd.f32 %v6201_v11, %v5950_v42  ;;  %v6203_v52 = vpop.f32.mrb[122].mxu1 }
 0x445   :  { %v6204_v6 = vpop.f32.mrb[123].mxu1 }
 0x446   :  { %v6240_v7 = vpop.f32.mrb[92].mxu0 }
 0x447   :  { %v6299_v53 = vadd.f32 %v6240_v7, %v5951_v5  ;;  %v6242_v16 = vpop.f32.mrb[93].mxu0 }
 0x448   :  { %v6300_v3 = vadd.f32 %v6242_v16, %v5952_v40  ;;  %v6244_v22 = vpop.f32.mrb[94].mxu0 }
 0x449   :  { %v6245_v25 = vpop.f32.mrb[95].mxu0 }
 0x44a   :  { %v6281_v51 = vpop.f32.mrb[124].mxu1 }
 0x44b   :  { %v6301_v54 = vadd.f32 %v6281_v51, %v5953_v35  ;;  %v8365_v27 = vpop.f32.mrb[125].mxu1 }
 0x44c   :  { %v6284_v33 = vpop.f32.mrb[126].mxu1 }
 0x44d   :  { %v8366_v24 = vpop.f32.mrb[127].mxu1 }
 0x44e   :  { %v6401_v26 = vpop.f32.mrb[96].mxu0 }
 0x44f   :  { %v6694_v55 = vadd.f32 %v6401_v26, %v6287_v30  ;;  %v6403_v34 = vpop.f32.mrb[97].mxu0 }
 0x450   :  { %v6695_v19 = vadd.f32 %v6403_v34, %v6288_v21  ;;  %v6405_v41 = vpop.f32.mrb[98].mxu0 }
 0x451   :  { %v6406_v29 = vpop.f32.mrb[99].mxu0 }
 0x452   :  { %v6442_v42 = vpop.f32.mrb[128].mxu1 }
 0x453   :  { %v6696_v46 = vadd.f32 %v6442_v42, %v6289_v10  ;;  %v6444_v59 = vpop.f32.mrb[129].mxu1 }
 0x454   :  { %v6697_v32 = vadd.f32 %v6444_v59, %v6290_v2  ;;  %v6446_v5 = vpop.f32.mrb[130].mxu1 }
 0x455   :  { %v6447_v18 = vpop.f32.mrb[131].mxu1 }
 0x456   :  { %v6483_v40 = vpop.f32.mrb[100].mxu0 }
 0x457   :  { %v6698_v63 = vadd.f32 %v6483_v40, %v6291_v36  ;;  %v6485_v9 = vpop.f32.mrb[101].mxu0 }
 0x458   :  { %v6699_v15 = vadd.f32 %v6485_v9, %v6292_v49  ;;  %v6487_v35 = vpop.f32.mrb[102].mxu0 }
 0x459   :  { %v6488_v57 = vpop.f32.mrb[103].mxu0 }
 0x45a   :  { %v6524_v1 = vpop.f32.mrb[132].mxu1 }
 0x45b   :  { %v6700_v8 = vadd.f32 %v6524_v1, %v6293_v58  ;;  %v6526_v48 = vpop.f32.mrb[133].mxu1 }
 0x45c   :  { %v6701_v30 = vadd.f32 %v6526_v48, %v6294_v28  ;;  %v6528_v45 = vpop.f32.mrb[134].mxu1 }
 0x45d   :  { %v6529_v21 = vpop.f32.mrb[135].mxu1 }
 0x45e   :  { %v6565_v23 = vpop.f32.mrb[104].mxu0 }
 0x45f   :  { %v6702_v43 = vadd.f32 %v6565_v23, %v6295_v62  ;;  %v6567_v37 = vpop.f32.mrb[105].mxu0 }
 0x460   :  { %v6703_v10 = vadd.f32 %v6567_v37, %v6296_v17  ;;  %v6569_v50 = vpop.f32.mrb[106].mxu0 }
 0x461   :  { %v6570_v2 = vpop.f32.mrb[107].mxu0 }
 0x462   :  { %v6606_v31 = vpop.f32.mrb[136].mxu1 }
 0x463   :  { %v6704_v38 = vadd.f32 %v6606_v31, %v6297_v39  ;;  %v6608_v44 = vpop.f32.mrb[137].mxu1 }
 0x464   :  { %v6705_v36 = vadd.f32 %v6608_v44, %v6298_v4  ;;  %v6610_v61 = vpop.f32.mrb[138].mxu1 }
 0x465   :  { %v6611_v49 = vpop.f32.mrb[139].mxu1 }
 0x466   :  { %v6647_v12 = vpop.f32.mrb[108].mxu0 }
 0x467   :  { %v6706_v56 = vadd.f32 %v6647_v12, %v6299_v53  ;;  %v6649_v0 = vpop.f32.mrb[109].mxu0 }
 0x468   :  { %v6707_v58 = vadd.f32 %v6649_v0, %v6300_v3  ;;  %v6651_v60 = vpop.f32.mrb[110].mxu0 }
 0x469   :  { %v6652_v28 = vpop.f32.mrb[111].mxu0 }
 0x46a   :  { %v6688_v47 = vpop.f32.mrb[140].mxu1 }
 0x46b   :  { %v6708_v11 = vadd.f32 %v6688_v47, %v6301_v54  ;;  %v8371_v52 = vpop.f32.mrb[141].mxu1 }
 0x46c   :  { %v6691_v62 = vpop.f32.mrb[142].mxu1 }
 0x46d   :  { %v8372_v6 = vpop.f32.mrb[143].mxu1 }
 0x46e   :  { %v6808_v17 = vpop.f32.mrb[112].mxu0 }
 0x46f   :  { %v7101_v7 = vadd.f32 %v6808_v17, %v6694_v55  ;;  %v6810_v16 = vpop.f32.mrb[113].mxu0 }
 0x470   :  { %v7102_v22 = vadd.f32 %v6810_v16, %v6695_v19  ;;  %v6812_v39 = vpop.f32.mrb[114].mxu0 }
 0x471   :  { %v6813_v25 = vpop.f32.mrb[115].mxu0 }
 0x472   :  { %v6849_v4 = vpop.f32.mrb[144].mxu1 }
 0x473   :  { %v7103_v51 = vadd.f32 %v6849_v4, %v6696_v46  ;;  %v6851_v27 = vpop.f32.mrb[145].mxu1 }
 0x474   :  { %v7104_v33 = vadd.f32 %v6851_v27, %v6697_v32  ;;  %v6853_v53 = vpop.f32.mrb[146].mxu1 }
 0x475   :  { %v6854_v24 = vpop.f32.mrb[147].mxu1 }
 0x476   :  { %v6890_v3 = vpop.f32.mrb[116].mxu0 }
 0x477   :  { %v7105_v26 = vadd.f32 %v6890_v3, %v6698_v63  ;;  %v6892_v34 = vpop.f32.mrb[117].mxu0 }
 0x478   :  { %v7106_v41 = vadd.f32 %v6892_v34, %v6699_v15  ;;  %v6894_v54 = vpop.f32.mrb[118].mxu0 }
 0x479   :  { %v6895_v29 = vpop.f32.mrb[119].mxu0 }
 0x47a   :  { %v6931_v42 = vpop.f32.mrb[148].mxu1 }
 0x47b   :  { %v7107_v59 = vadd.f32 %v6931_v42, %v6700_v8  ;;  %v6933_v5 = vpop.f32.mrb[149].mxu1 }
 0x47c   :  { %v7108_v55 = vadd.f32 %v6933_v5, %v6701_v30  ;;  %v6935_v18 = vpop.f32.mrb[150].mxu1 }
 0x47d   :  { %v6936_v19 = vpop.f32.mrb[151].mxu1 }
 0x47e   :  { %v6972_v40 = vpop.f32.mrb[120].mxu0 }
 0x47f   :  { %v7109_v9 = vadd.f32 %v6972_v40, %v6702_v43  ;;  %v6974_v35 = vpop.f32.mrb[121].mxu0 }
 0x480   :  { %v7110_v46 = vadd.f32 %v6974_v35, %v6703_v10  ;;  %v6976_v57 = vpop.f32.mrb[122].mxu0 }
 0x481   :  { %v6977_v32 = vpop.f32.mrb[123].mxu0 }
 0x482   :  { %v7013_v1 = vpop.f32.mrb[152].mxu1 }
 0x483   :  { %v7111_v48 = vadd.f32 %v7013_v1, %v6704_v38  ;;  %v7015_v45 = vpop.f32.mrb[153].mxu1 }
 0x484   :  { %v7112_v63 = vadd.f32 %v7015_v45, %v6705_v36  ;;  %v7017_v21 = vpop.f32.mrb[154].mxu1  ;;  %v7934_v45 = vpop.permute.xlu1 %7933 }
 0x485   :  { %v7018_v15 = vpop.f32.mrb[155].mxu1 }
 0x486   :  { %v7054_v23 = vpop.f32.mrb[124].mxu0 }
 0x487   :  { %v7113_v37 = vadd.f32 %v7054_v23, %v6706_v56  ;;  %v7056_v50 = vpop.f32.mrb[125].mxu0 }
 0x488   :  { %v7114_v8 = vadd.f32 %v7056_v50, %v6707_v58  ;;  %v7058_v2 = vpop.f32.mrb[126].mxu0  ;;  %v10684_v50 = vrot.slane %v7934_v45, %v9632_v20 }
 0x489   :  { %v7059_v30 = vpop.f32.mrb[127].mxu0 }
 0x48a   :  { %v7095_v31 = vpop.f32.mrb[156].mxu1 }
 0x48b   :  { %v7115_v44 = vadd.f32 %v7095_v31, %v6708_v11  ;;  %v8377_v61 = vpop.f32.mrb[157].mxu1 }
 0x48c   :  { %v7098_v43 = vpop.f32.mrb[158].mxu1 }
 0x48d   :  { %v8378_v49 = vpop.f32.mrb[159].mxu1 }
 0x48e   :  { %v7215_v10 = vpop.f32.mrb[128].mxu0 }
 0x48f   :  { %v7508_v12 = vadd.f32 %v7215_v10, %v7101_v7  ;;  %v7217_v0 = vpop.f32.mrb[129].mxu0 }
 0x490   :  { %v7509_v60 = vadd.f32 %v7217_v0, %v7102_v22  ;;  %v7219_v38 = vpop.f32.mrb[130].mxu0 }
 0x491   :  { %v7220_v28 = vpop.f32.mrb[131].mxu0 }
 0x492   :  { %v7256_v36 = vpop.f32.mrb[160].mxu1 }
 0x493   :  { %v7510_v47 = vadd.f32 %v7256_v36, %v7103_v51  ;;  %v7258_v52 = vpop.f32.mrb[161].mxu1 }
 0x494   :  { %v7511_v62 = vadd.f32 %v7258_v52, %v7104_v33  ;;  %v7260_v56 = vpop.f32.mrb[162].mxu1 }
 0x495   :  { %v7261_v6 = vpop.f32.mrb[163].mxu1 }
 0x496   :  { %v7297_v58 = vpop.f32.mrb[132].mxu0 }
 0x497   :  { %v7512_v17 = vadd.f32 %v7297_v58, %v7105_v26  ;;  %v7299_v16 = vpop.f32.mrb[133].mxu0 }
 0x498   :  { %v7513_v39 = vadd.f32 %v7299_v16, %v7106_v41  ;;  %v7301_v11 = vpop.f32.mrb[134].mxu0 }
 0x499   :  { %v7302_v25 = vpop.f32.mrb[135].mxu0 }
 0x49a   :  { %v7338_v4 = vpop.f32.mrb[164].mxu1 }
 0x49b   :  { %v10665_v27 = vadd.f32 %v7338_v4, %v7107_v59  ;;  %v7340_v7 = vpop.f32.mrb[165].mxu1 }
 0x49c   :  { %v10667_v53 = vadd.f32 %v7340_v7, %v7108_v55  ;;  %v7342_v22 = vpop.f32.mrb[166].mxu1 }
 0x49d   :  { %v7343_v24 = vpop.f32.mrb[167].mxu1 }
 0x49e   :  { %v7379_v3 = vpop.f32.mrb[136].mxu0 }
 0x49f   :  { %v10669_v51 = vadd.f32 %v7379_v3, %v7109_v9  ;;  %v7381_v33 = vpop.f32.mrb[137].mxu0 }
 0x4a0   :  { %v10671_v34 = vadd.f32 %v7381_v33, %v7110_v46  ;;  %v7383_v54 = vpop.f32.mrb[138].mxu0 }
 0x4a1   :  { %v7384_v26 = vpop.f32.mrb[139].mxu0 }
 0x4a2   :  { %v7420_v29 = vpop.f32.mrb[168].mxu1 }
 0x4a3   :  { %v10673_v41 = vadd.f32 %v7420_v29, %v7111_v48  ;;  %v7422_v42 = vpop.f32.mrb[169].mxu1 }
 0x4a4   :  { %v10675_v5 = vadd.f32 %v7422_v42, %v7112_v63  ;;  %v7424_v59 = vpop.f32.mrb[170].mxu1  ;;  %v8643_v63 = vmov 1966171168  }
 0x4a5   :  { %v7425_v18 = vpop.f32.mrb[171].mxu1  ;;  %v7975_v23 = vunpack.c.l.s4 %v8643_v63 }
 0x4a6   :  { %v7461_v55 = vpop.f32.mrb[140].mxu0 }
 0x4a7   :  { %v10677_v19 = vadd.f32 %v7461_v55, %v7113_v37  ;;  %v7463_v40 = vpop.f32.mrb[141].mxu0  ;;  %v7976_v43 = vunpack.c.0.s8 %v7975_v23 }
 0x4a8   :  { %v10679_v35 = vadd.f32 %v7463_v40, %v7114_v8  ;;  %v7465_v9 = vpop.f32.mrb[142].mxu0 }
 0x4a9   :  { %v7466_v57 = vpop.f32.mrb[143].mxu0 }
 0x4aa   :  { %v7502_v46 = vpop.f32.mrb[172].mxu1 }
 0x4ab   :  { %v10681_v32 = vadd.f32 %v7502_v46, %v7115_v44  ;;  %v8383_v1 = vpop.f32.mrb[173].mxu1 }
 0x4ac   :  { %v7505_v48 = vpop.f32.mrb[174].mxu1 }
 0x4ad   :  { %v8384_v21 = vpop.f32.mrb[175].mxu1 }
 0x4ae   :  { %v7622_v15 = vpop.f32.mrb[144].mxu0 }
 0x4af   :  { %v7915_v37 = vadd.f32 %v7622_v15, %v7508_v12  ;;  %v7624_v2 = vpop.f32.mrb[145].mxu0  ;;  %v10690_v12 = vsub.s32 %v7976_v43, %v9627_v14 }
 0x4b0   :  { %v7916_v30 = vadd.f32 %v7624_v2, %v7509_v60  ;;  %v7626_v8 = vpop.f32.mrb[146].mxu0 }
 0x4b1   :  { %v7940_v31 = vadd.f32 %v10684_v50, %v7915_v37  ;;  %v7627_v61 = vpop.f32.mrb[147].mxu0 }
 0x4b2   :  { %v7941_v44 = vadd.f32 %v10684_v50, %v7916_v30  ;;  %v7663_v49 = vpop.f32.mrb[176].mxu1 }
 0x4b3   :  { %v7917_v10 = vadd.f32 %v7663_v49, %v7510_v47  ;;  %v7665_v0 = vpop.f32.mrb[177].mxu1 }
 0x4b4   :  { %v7970_v38 = vcombine.low %v7940_v31, %v7941_v44  ;;  %v7918_v28 = vadd.f32 %v7665_v0, %v7511_v62  ;;  %v7667_v36 = vpop.f32.mrb[178].mxu1 }
 0x4b5   :  { %v7942_v52 = vadd.f32 %v10684_v50, %v7917_v10  ;;  %v7668_v20 = vpop.f32.mrb[179].mxu1 }
 0x4b6   :  { %v7943_v60 = vadd.f32 %v10684_v50, %v7918_v28  ;;  %v7704_v56 = vpop.f32.mrb[148].mxu0  ;;  %v7980_v62 = vrot.slane %v7970_v38, %v10690_v12 }
 0x4b7   :  { %v7919_v6 = vadd.f32 %v7704_v56, %v7512_v17  ;;  %v7706_v58 = vpop.f32.mrb[149].mxu0 }
 0x4b8   :  { %v7971_v16 = vcombine.low %v7942_v52, %v7943_v60  ;;  %v7920_v11 = vadd.f32 %v7706_v58, %v7513_v39  ;;  %v7708_v25 = vpop.f32.mrb[150].mxu0 }
 0x4b9   :  { %v7944_v47 = vadd.f32 %v10684_v50, %v7919_v6  ;;  %v7709_v4 = vpop.f32.mrb[151].mxu0 }
 0x4ba   :  { %v7987_v7 = vrot.slane %v7971_v16, %v10690_v12  ;;  %v7945_v22 = vadd.f32 %v10684_v50, %v7920_v11  ;;  %v7745_v24 = vpop.f32.mrb[180].mxu1 }
 0x4bb   :  { %v7921_v14 = vadd.f32 %v7745_v24, %v10665_v27  ;;  %v7747_v3 = vpop.f32.mrb[181].mxu1 }
 0x4bc   :  { %v8002_v33 = vcombine.low %v7980_v62, %v7987_v7  ;;  %v7972_v54 = vcombine.low %v7944_v47, %v7945_v22  ;;  %v7922_v17 = vadd.f32 %v7747_v3, %v10667_v53  ;;  %v7749_v26 = vpop.f32.mrb[182].mxu1 }
 0x4bd   :  { %v7946_v39 = vadd.f32 %v10684_v50, %v7921_v14  ;;  %v7750_v29 = vpop.f32.mrb[183].mxu1 }
 0x4be   :  { %v7947_v42 = vadd.f32 %v10684_v50, %v7922_v17  ;;  %v7786_v59 = vpop.f32.mrb[152].mxu0  ;;  %v7994_v1 = vrot.slane %v7972_v54, %v10690_v12  ;;  %v8010_v30 = vrot.slane %v8002_v33, %v10690_v12 }
 0x4bf   :  { %v7923_v18 = vadd.f32 %v7786_v59, %v10669_v51  ;;  %v7788_v55 = vpop.f32.mrb[153].mxu0 }
 0x4c0   :  { %v7973_v40 = vcombine.low %v7946_v39, %v7947_v42  ;;  %v7924_v9 = vadd.f32 %v7788_v55, %v10671_v34  ;;  %v7790_v57 = vpop.f32.mrb[154].mxu0 }
 0x4c1   :  { %v7948_v27 = vadd.f32 %v10684_v50, %v7923_v18  ;;  %v7791_v46 = vpop.f32.mrb[155].mxu0 }
 0x4c2   :  { %v8001_v53 = vrot.slane %v7973_v40, %v10690_v12  ;;  %v7949_v45 = vadd.f32 %v10684_v50, %v7924_v9  ;;  %v7827_v48 = vpop.f32.mrb[184].mxu1 }
 0x4c3   :  { %v7925_v21 = vadd.f32 %v7827_v48, %v10673_v41  ;;  %v7829_v15 = vpop.f32.mrb[185].mxu1 }
 0x4c4   :  { %v8003_v63 = vcombine.low %v7994_v1, %v8001_v53  ;;  %v8019_v51 = vcombine.low %v7948_v27, %v7949_v45  ;;  %v7926_v23 = vadd.f32 %v7829_v15, %v10675_v5  ;;  %v7831_v37 = vpop.f32.mrb[186].mxu1 }
 0x4c5   :  { %v7950_v34 = vadd.f32 %v10684_v50, %v7925_v21  ;;  %v7832_v2 = vpop.f32.mrb[187].mxu1 }
 0x4c6   :  { %v8017_v8 = vrot.slane %v8003_v63, %v10690_v12  ;;  %v7951_v31 = vadd.f32 %v10684_v50, %v7926_v23  ;;  %v7868_v61 = vpop.f32.mrb[156].mxu0  ;;  %v8028_v28 = vrot.slane %v8019_v51, %v10690_v12 }
 0x4c7   :  { %v7927_v44 = vadd.f32 %v7868_v61, %v10677_v19  ;;  %v7870_v43 = vpop.f32.mrb[157].mxu0 }
 0x4c8   :  { %v8018_v41 = vcombine.low %v8010_v30, %v8017_v8  ;;  %v8020_v49 = vcombine.low %v7950_v34, %v7951_v31  ;;  %v7928_v10 = vadd.f32 %v7870_v43, %v10679_v35  ;;  %v7872_v0 = vpop.f32.mrb[158].mxu0 }
 0x4c9   :  { %v7952_v5 = vadd.f32 %v10684_v50, %v7927_v44  ;;  %v7873_v38 = vpop.f32.mrb[159].mxu0 }
 0x4ca   :  { %8069 = vst [vmem:[%s10738_s6] sm:$0xff] %v8018_v41  ;;  %v8035_v36 = vrot.slane %v8020_v49, %v10690_v12  ;;  %v7953_v52 = vadd.f32 %v10684_v50, %v7928_v10  ;;  %v7909_v19 = vpop.f32.mrb[188].mxu1 }
 0x4cb   :  { %v7929_v20 = vadd.f32 %v7909_v19, %v10681_v32  ;;  %v8389_v60 = vpop.f32.mrb[189].mxu1 }
 0x4cc   :  { %v8050_v56 = vcombine.low %v8028_v28, %v8035_v36  ;;  %v8021_v35 = vcombine.low %v7952_v5, %v7953_v52  ;;  %v7912_v6 = vpop.f32.mrb[190].mxu1 }
 0x4cd   :  { %v7954_v58 = vadd.f32 %v10684_v50, %v7929_v20  ;;  %v8390_v16 = vpop.f32.mrb[191].mxu1 }
 0x4ce   :  { %v8042_v11 = vrot.slane %v8021_v35, %v10690_v12  ;;  %v8058_v4 = vrot.slane %v8050_v56, %v10690_v12 }
 0x4cf   :  { %v8049_v25 = vrot.slane %v7954_v58, %v10690_v12 }
 0x4d1   :  { %v8051_v47 = vcombine.low %v8042_v11, %v8049_v25 }
 0x4d3   :  { %v8065_v62 = vrot.slane %v8051_v47, %v10690_v12 }
 0x4d5   :  { %v8066_v7 = vcombine.low %v8058_v4, %v8065_v62 }
 0x4d7   :  { %8074 = vst.msk [vmem:[%s10738_s6 + $0x8] sm:$0x7f] %vm8072_vm11, %v8066_v7 }

</bundles_post_ra>
